<compile_context>
chip_gen: v7x
topology: tpu7x:2x2x1
jax: 0.10.0
libtpu: 0.0.40
codegen_flags: <defaults>
</compile_context>

<pallas_src>
import functools
import math

import jax
import jax.numpy as jnp
from jax.experimental import pallas as pl
from jax.experimental.pallas import tpu as pltpu

CHANNELS = 32            # embed dim (divisible by 4 heads)
SIZE = 8                 # spatial size -> S = 64 tokens
SEQ = SIZE * SIZE
N_HEADS = 4
HEAD_DIM = CHANNELS // N_HEADS
EPS = 1e-5
INV_SQRT2 = 0.7071067811865476
MAX_BLOCK_B = 32                       # batch elements per grid step (cap)
VMEM_LIMIT_BYTES = 48 * 1024 * 1024    # explicit scoped-VMEM budget


def _layernorm(x, w, b):
    # PyTorch LayerNorm: mean / biased variance over last dim, eps=1e-5.
    mean = jnp.mean(x, axis=-1, keepdims=True)
    xc = x - mean
    var = jnp.mean(xc * xc, axis=-1, keepdims=True)
    inv = jax.lax.rsqrt(var + EPS)
    return xc * inv * w + b


def _erf(x):
    # Abramowitz & Stegun 7.1.26 rational approximation (|err| <= 1.5e-7).
    # Uses only exp/mul/add/div/abs/where so it lowers on every generation.
    a1, a2, a3, a4, a5 = (0.254829592, -0.284496736, 1.421413741,
                          -1.453152027, 1.061405429)
    p = 0.3275911
    ax = jnp.abs(x)
    t = 1.0 / (1.0 + p * ax)
    poly = t * (a1 + t * (a2 + t * (a3 + t * (a4 + t * a5))))
    y = 1.0 - poly * jnp.exp(-(ax * ax))
    return jnp.where(x < 0.0, -y, y)


def transformer_kernel(x_ref, hmask_ref,
                       in_w_ref, out_w_ref, fc1_w_ref, fc2_w_ref,
                       in_b_ref, ln1_w_ref, ln1_b_ref, out_b_ref,
                       ln2_w_ref, ln2_b_ref, fc1_b_ref, fc2_b_ref,
                       o_ref, *, fused_layout):
    C, S, H, D = CHANNELS, SEQ, N_HEADS, HEAD_DIM
    Bblk = x_ref.shape[0]
    M = Bblk * S

    # ---- load + (optionally) transpose input to token-major (Bblk, S, C) ----
    if fused_layout:
        x = jnp.swapaxes(x_ref[...], 1, 2)           # (Bblk, C, S) -> (Bblk, S, C)
    else:
        x = x_ref[...]                               # already (Bblk, S, C)
    xf = x.reshape(M, C).astype(jnp.float32)

    # ---- pre-attention LayerNorm (self.ln) ----
    x_ln = _layernorm(xf, ln1_w_ref[...], ln1_b_ref[...])

    # ---- fused QKV projection; bias-add while still 96 lanes wide ----
    qkv = jnp.dot(x_ln, in_w_ref[...], preferred_element_type=jnp.float32)
    qkv = qkv + in_b_ref[...]
    q = qkv[:, 0 * C:1 * C].reshape(Bblk, S, C)
    k = qkv[:, 1 * C:2 * C].reshape(Bblk, S, C)
    v = qkv[:, 2 * C:3 * C].reshape(Bblk, S, C)

    # ---- multi-head attention as stacked masked matmuls + one softmax ----
    # Row block h of the stacked LHS is Q with every channel outside head h
    # zeroed; a full-C contraction then equals the per-head (S, S) score tile,
    # and masking the context keeps only head h's output channels.
    hmask = hmask_ref[...]                           # (H*S, C), 0/1 pattern
    scale = 1.0 / math.sqrt(D)
    q_rep = jnp.concatenate([q] * H, axis=1)         # (Bblk, H*S, C)
    q_st = q_rep * (hmask * scale)
    scores = jnp.einsum("bmc,bkc->bmk", q_st, k,
                        preferred_element_type=jnp.float32)   # (Bblk, H*S, S)
    mx = jnp.max(scores, axis=-1, keepdims=True)
    p = jnp.exp(scores - mx)
    inv = 1.0 / jnp.sum(p, axis=-1, keepdims=True)   # exact reciprocal
    ctx = jnp.einsum("bmk,bkc->bmc", p, v,
                     preferred_element_type=jnp.float32)      # (Bblk, H*S, C)
    ctx = ctx * (hmask * inv)                        # normalize + keep own head
    attn = ctx[:, 0:S, :]
    for h in range(1, H):                            # static, H = 4: merge heads
        attn = attn + ctx[:, h * S:(h + 1) * S, :]

    # ---- attention output projection + residual 1 ----
    attn = attn.reshape(M, C)
    attn = jnp.dot(attn, out_w_ref[...], preferred_element_type=jnp.float32)
    attn_val = attn + out_b_ref[...] + xf

    # ---- FFN: LayerNorm -> Linear -> GELU(exact, erf) -> Linear, residual 2 ----
    h1 = _layernorm(attn_val, ln2_w_ref[...], ln2_b_ref[...])
    h1 = jnp.dot(h1, fc1_w_ref[...],
                 preferred_element_type=jnp.float32) + fc1_b_ref[...]
    h1 = 0.5 * h1 * (1.0 + _erf(h1 * INV_SQRT2))
    h2 = jnp.dot(h1, fc2_w_ref[...],
                 preferred_element_type=jnp.float32) + fc2_b_ref[...]

    out = (h2 + attn_val).reshape(Bblk, S, C)
    if fused_layout:
        o_ref[...] = jnp.swapaxes(out, 1, 2).astype(o_ref.dtype)  # (Bblk, C, S)
    else:
        o_ref[...] = out.astype(o_ref.dtype)


def _head_mask():
    """(H*S, C) mask: row h*S+s, lane c is 1 iff channel c belongs to head h."""
    lane = jnp.arange(CHANNELS)[None, :]
    row = jnp.arange(N_HEADS * SEQ)[:, None]
    return ((lane // HEAD_DIM) == (row // SEQ)).astype(jnp.float32)


def _prepare_params(params):
    """Pre-transpose weights (x @ W form) and reshape vectors to (1, n)."""
    (ln_w, ln_b, in_w, in_b, out_w, out_b,
     ln2_w, ln2_b, fc1_w, fc1_b, fc2_w, fc2_b) = params
    row = lambda a: jnp.asarray(a, jnp.float32).reshape(1, -1)
    return dict(
        in_w_t=jnp.asarray(in_w, jnp.float32).T,     # (C, 3C)
        out_w_t=jnp.asarray(out_w, jnp.float32).T,   # (C, C)
        fc1_w_t=jnp.asarray(fc1_w, jnp.float32).T,   # (C, C)
        fc2_w_t=jnp.asarray(fc2_w, jnp.float32).T,   # (C, C)
        in_b=row(in_b), ln1_w=row(ln_w), ln1_b=row(ln_b), out_b=row(out_b),
        ln2_w=row(ln2_w), ln2_b=row(ln2_b), fc1_b=row(fc1_b), fc2_b=row(fc2_b),
    )


def _choose_block_b(B, cap=MAX_BLOCK_B):
    """Largest divisor of B <= cap; prefer an even grid length so dual-core
    chips (v7x) get balanced work, otherwise keep >= 2 grid blocks."""
    divisors = [d for d in range(1, B + 1) if B % d == 0 and d <= cap]
    even_grid = [d for d in divisors if (B // d) % 2 == 0]
    if even_grid:
        return max(even_grid)
    multi = [d for d in divisors if B // d >= 2]
    if multi:
        return max(multi)
    return max(divisors)


def _pallas_transformer(x3, prepped, hmask, block_b, fused_layout):
    """x3: (B, C, S) if fused_layout else (B, S, C)."""
    B = x3.shape[0]
    C, S = CHANNELS, SEQ
    grid = (B // block_b,)
    data_block = (block_b, C, S) if fused_layout else (block_b, S, C)
    data_spec = pl.BlockSpec(data_block, lambda g: (g, 0, 0))
    const = lambda a: pl.BlockSpec(a.shape, lambda g: (0, 0))

    ordered = (hmask,
               prepped["in_w_t"], prepped["out_w_t"],
               prepped["fc1_w_t"], prepped["fc2_w_t"],
               prepped["in_b"], prepped["ln1_w"], prepped["ln1_b"],
               prepped["out_b"], prepped["ln2_w"], prepped["ln2_b"],
               prepped["fc1_b"], prepped["fc2_b"])

    kernel = functools.partial(transformer_kernel, fused_layout=fused_layout)
    return pl.pallas_call(
        kernel,
        out_shape=jax.ShapeDtypeStruct(x3.shape, x3.dtype),
        grid_spec=pltpu.PrefetchScalarGridSpec(
            num_scalar_prefetch=0,
            grid=grid,
            in_specs=[data_spec] + [const(a) for a in ordered],
            out_specs=data_spec,
        ),
        compiler_params=pltpu.CompilerParams(
            dimension_semantics=("parallel",),
            vmem_limit_bytes=VMEM_LIMIT_BYTES),
    )(x3, *ordered)


def transformer_forward(x, params, block_b=None):
    """x: (B, C, size, size) float32 -> (B, C, size, size)."""
    B, C, Hs, Ws = x.shape
    assert C == CHANNELS and Hs == SIZE and Ws == SIZE
    if block_b is None:
        block_b = _choose_block_b(B)
    assert B % block_b == 0

    prepped = _prepare_params(params)
    hmask = _head_mask()

    x_cs = x.reshape(B, C, SEQ)        # free reshape, no HBM transpose
    try:
        out = _pallas_transformer(x_cs, prepped, hmask, block_b,
                                  fused_layout=True)
        out = jax.block_until_ready(out)
        return out.reshape(B, C, Hs, Ws)
    except Exception:
        # TODO(synk): remove fallback once the in-kernel (C,S)<->(S,C)
        # transpose is confirmed to lower on every target TPU generation.
        x_sc = x_cs.swapaxes(1, 2)     # wrapper-side transpose fallback
        out = _pallas_transformer(x_sc, prepped, hmask, block_b,
                                  fused_layout=False)
        return out.swapaxes(1, 2).reshape(B, C, Hs, Ws)


def make_params(key):
    ks = jax.random.split(key, 8)
    C = CHANNELS
    s = 0.05
    ln_w = jnp.ones((C,), jnp.float32)
    ln_b = jnp.zeros((C,), jnp.float32)
    in_w = s * jax.random.normal(ks[0], (3 * C, C), jnp.float32)
    in_b = s * jax.random.normal(ks[1], (3 * C,), jnp.float32)
    out_w = s * jax.random.normal(ks[2], (C, C), jnp.float32)
    out_b = s * jax.random.normal(ks[3], (C,), jnp.float32)
    ln2_w = 1.0 + s * jax.random.normal(ks[4], (C,), jnp.float32)
    ln2_b = s * jax.random.normal(ks[5], (C,), jnp.float32)
    fc1_w = s * jax.random.normal(ks[6], (C, C), jnp.float32)
    fc1_b = jnp.zeros((C,), jnp.float32)
    fc2_w = s * jax.random.normal(ks[7], (C, C), jnp.float32)
    fc2_b = jnp.zeros((C,), jnp.float32)
    return (ln_w, ln_b, in_w, in_b, out_w, out_b,
            ln2_w, ln2_b, fc1_w, fc1_b, fc2_w, fc2_b)


def reference_forward(x, params):
    """Pure-JAX reference replicating the PyTorch forward."""
    (ln_w, ln_b, in_w, in_b, out_w, out_b,
     ln2_w, ln2_b, fc1_w, fc1_b, fc2_w, fc2_b) = params
    B, C, H, W = x.shape
    S = H * W
    xs = x.reshape(B, C, S).swapaxes(1, 2)           # (B, S, C)

    def ln(v, w, b):
        mean = jnp.mean(v, -1, keepdims=True)
        var = jnp.mean((v - mean) ** 2, -1, keepdims=True)
        return (v - mean) * jax.lax.rsqrt(var + EPS) * w + b

    x_ln = ln(xs, ln_w, ln_b)
    qkv = x_ln @ in_w.T + in_b
    q, k, v = jnp.split(qkv, 3, axis=-1)

    def heads(t):
        return t.reshape(B, S, N_HEADS, HEAD_DIM).transpose(0, 2, 1, 3)

    qh, kh, vh = heads(q), heads(k), heads(v)
    scores = jnp.einsum("bhqd,bhkd->bhqk", qh, kh) / math.sqrt(HEAD_DIM)
    p = jax.nn.softmax(scores, axis=-1)
    ah = jnp.einsum("bhqk,bhkd->bhqd", p, vh)
    attn = ah.transpose(0, 2, 1, 3).reshape(B, S, C) @ out_w.T + out_b
    av = attn + xs
    h1 = ln(av, ln2_w, ln2_b) @ fc1_w.T + fc1_b
    h1 = 0.5 * h1 * (1.0 + jax.lax.erf(h1 * INV_SQRT2))
    h2 = h1 @ fc2_w.T + fc2_b
    out = h2 + av
    return out.swapaxes(1, 2).reshape(B, C, H, W)


if __name__ == "__main__":
    key = jax.random.PRNGKey(0)
    kx, kp = jax.random.split(key)
    B = 4
    x = jax.random.normal(kx, (B, CHANNELS, SIZE, SIZE), jnp.float32)
    params = make_params(kp)

    y = transformer_forward(x, params)
    y = jax.block_until_ready(y)

    y_ref = reference_forward(x, params)
    assert y.shape == (B, CHANNELS, SIZE, SIZE)
    max_err = float(jnp.max(jnp.abs(y - y_ref)))
    assert max_err < 2e-3, f"max_err={max_err}"
    print("KERNEL_OK")
</pallas_src>

<mosaic_0001>
module attributes {stable_mosaic.version = 11 : i64} {
  func.func @transformer_kernel(%arg0: i32, %arg1: memref<2x32x64xf32, #tpu.memory_space<vmem>>, %arg2: memref<256x32xf32, #tpu.memory_space<vmem>>, %arg3: memref<32x96xf32, #tpu.memory_space<vmem>>, %arg4: memref<32x32xf32, #tpu.memory_space<vmem>>, %arg5: memref<32x32xf32, #tpu.memory_space<vmem>>, %arg6: memref<32x32xf32, #tpu.memory_space<vmem>>, %arg7: memref<1x96xf32, #tpu.memory_space<vmem>>, %arg8: memref<1x32xf32, #tpu.memory_space<vmem>>, %arg9: memref<1x32xf32, #tpu.memory_space<vmem>>, %arg10: memref<1x32xf32, #tpu.memory_space<vmem>>, %arg11: memref<1x32xf32, #tpu.memory_space<vmem>>, %arg12: memref<1x32xf32, #tpu.memory_space<vmem>>, %arg13: memref<1x32xf32, #tpu.memory_space<vmem>>, %arg14: memref<1x32xf32, #tpu.memory_space<vmem>>, %arg15: memref<2x32x64xf32, #tpu.memory_space<vmem>>) attributes {dimension_semantics = [#tpu.dimension_semantics<parallel>], iteration_bounds = array<i64: 2>, scalar_prefetch = 0 : i64, scratch_operands = 0 : i64, tpu.core_type = #tpu.core_type<tc>, window_params = [{transform_indices = @transform_0, window_bounds = array<i64: 2, 32, 64>}, {pipeline_mode = #tpu.pipeline_mode<synchronous>, transform_indices = @transform_1, window_bounds = array<i64: 256, 32>}, {pipeline_mode = #tpu.pipeline_mode<synchronous>, transform_indices = @transform_2, window_bounds = array<i64: 32, 96>}, {pipeline_mode = #tpu.pipeline_mode<synchronous>, transform_indices = @transform_3, window_bounds = array<i64: 32, 32>}, {pipeline_mode = #tpu.pipeline_mode<synchronous>, transform_indices = @transform_4, window_bounds = array<i64: 32, 32>}, {pipeline_mode = #tpu.pipeline_mode<synchronous>, transform_indices = @transform_5, window_bounds = array<i64: 32, 32>}, {pipeline_mode = #tpu.pipeline_mode<synchronous>, transform_indices = @transform_6, window_bounds = array<i64: 1, 96>}, {pipeline_mode = #tpu.pipeline_mode<synchronous>, transform_indices = @transform_7, window_bounds = array<i64: 1, 32>}, {pipeline_mode = #tpu.pipeline_mode<synchronous>, transform_indices = @transform_8, window_bounds = array<i64: 1, 32>}, {pipeline_mode = #tpu.pipeline_mode<synchronous>, transform_indices = @transform_9, window_bounds = array<i64: 1, 32>}, {pipeline_mode = #tpu.pipeline_mode<synchronous>, transform_indices = @transform_10, window_bounds = array<i64: 1, 32>}, {pipeline_mode = #tpu.pipeline_mode<synchronous>, transform_indices = @transform_11, window_bounds = array<i64: 1, 32>}, {pipeline_mode = #tpu.pipeline_mode<synchronous>, transform_indices = @transform_12, window_bounds = array<i64: 1, 32>}, {pipeline_mode = #tpu.pipeline_mode<synchronous>, transform_indices = @transform_13, window_bounds = array<i64: 1, 32>}, {transform_indices = @transform_14, window_bounds = array<i64: 2, 32, 64>}]} {
    %c0 = arith.constant 0 : index
    %c0_0 = arith.constant 0 : index
    %c0_1 = arith.constant 0 : index
    %0 = vector.load %arg1[%c0, %c0_0, %c0_1] : memref<2x32x64xf32, #tpu.memory_space<vmem>>, vector<2x32x64xf32>
    %1 = tpu.transpose %0, [0, 2, 1] : vector<2x32x64xf32> -> vector<2x64x32xf32>
    %2 = vector.shape_cast %1 : vector<2x64x32xf32> to vector<128x32xf32>
    %c0_2 = arith.constant 0 : index
    %c0_3 = arith.constant 0 : index
    %3 = vector.load %arg8[%c0_2, %c0_3] : memref<1x32xf32, #tpu.memory_space<vmem>>, vector<1x32xf32>
    %c0_4 = arith.constant 0 : index
    %c0_5 = arith.constant 0 : index
    %4 = vector.load %arg9[%c0_4, %c0_5] : memref<1x32xf32, #tpu.memory_space<vmem>>, vector<1x32xf32>
    %cst = arith.constant dense<0.000000e+00> : vector<128xf32>
    %5 = vector.multi_reduction <add>, %2, %cst [1] : vector<128x32xf32> to vector<128xf32>
    %6 = vector.shape_cast %5 : vector<128xf32> to vector<128x1xf32>
    %cst_6 = arith.constant 3.200000e+01 : f32
    %7 = vector.broadcast %cst_6 : f32 to vector<128x1xf32>
    %8 = arith.divf %6, %7 : vector<128x1xf32>
    %9 = vector.broadcast %8 : vector<128x1xf32> to vector<128x32xf32>
    %10 = arith.subf %2, %9 : vector<128x32xf32>
    %11 = arith.mulf %10, %10 : vector<128x32xf32>
    %cst_7 = arith.constant dense<0.000000e+00> : vector<128xf32>
    %12 = vector.multi_reduction <add>, %11, %cst_7 [1] : vector<128x32xf32> to vector<128xf32>
    %13 = vector.shape_cast %12 : vector<128xf32> to vector<128x1xf32>
    %cst_8 = arith.constant 3.200000e+01 : f32
    %14 = vector.broadcast %cst_8 : f32 to vector<128x1xf32>
    %15 = arith.divf %13, %14 : vector<128x1xf32>
    %cst_9 = arith.constant 9.99999974E-6 : f32
    %16 = vector.broadcast %cst_9 : f32 to vector<128x1xf32>
    %17 = arith.addf %15, %16 : vector<128x1xf32>
    %18 = math.rsqrt %17 : vector<128x1xf32>
    %19 = vector.broadcast %18 : vector<128x1xf32> to vector<128x32xf32>
    %20 = arith.mulf %10, %19 : vector<128x32xf32>
    %21 = vector.broadcast %3 : vector<1x32xf32> to vector<128x32xf32>
    %22 = arith.mulf %20, %21 : vector<128x32xf32>
    %23 = vector.broadcast %4 : vector<1x32xf32> to vector<128x32xf32>
    %24 = arith.addf %22, %23 : vector<128x32xf32>
    %c0_10 = arith.constant 0 : index
    %c0_11 = arith.constant 0 : index
    %25 = vector.load %arg3[%c0_10, %c0_11] : memref<32x96xf32, #tpu.memory_space<vmem>>, vector<32x96xf32>
    %cst_12 = arith.constant dense<0.000000e+00> : vector<128x96xf32>
    %26 = tpu.matmul %24, %25, %cst_12 {dimension_numbers = #tpu.dot_dimension_numbers<[1], [0], [0], [1], [0, 0, 1, 1], [], []>} : vector<128x32xf32>, vector<32x96xf32>, vector<128x96xf32> -> vector<128x96xf32>
    %c0_13 = arith.constant 0 : index
    %c0_14 = arith.constant 0 : index
    %27 = vector.load %arg7[%c0_13, %c0_14] : memref<1x96xf32, #tpu.memory_space<vmem>>, vector<1x96xf32>
    %28 = vector.broadcast %27 : vector<1x96xf32> to vector<128x96xf32>
    %29 = arith.addf %26, %28 : vector<128x96xf32>
    %30 = vector.extract_strided_slice %29 {offsets = [0, 0], sizes = [128, 32], strides = [1, 1]} : vector<128x96xf32> to vector<128x32xf32>
    %31 = vector.shape_cast %30 : vector<128x32xf32> to vector<2x64x32xf32>
    %32 = vector.extract_strided_slice %29 {offsets = [0, 32], sizes = [128, 32], strides = [1, 1]} : vector<128x96xf32> to vector<128x32xf32>
    %33 = vector.shape_cast %32 : vector<128x32xf32> to vector<2x64x32xf32>
    %34 = vector.extract_strided_slice %29 {offsets = [0, 64], sizes = [128, 32], strides = [1, 1]} : vector<128x96xf32> to vector<128x32xf32>
    %35 = vector.shape_cast %34 : vector<128x32xf32> to vector<2x64x32xf32>
    %c0_15 = arith.constant 0 : index
    %c0_16 = arith.constant 0 : index
    %36 = vector.load %arg2[%c0_15, %c0_16] : memref<256x32xf32, #tpu.memory_space<vmem>>, vector<256x32xf32>
    %37 = tpu.concatenate %31, %31, %31, %31 in 1 : vector<2x64x32xf32>, vector<2x64x32xf32>, vector<2x64x32xf32>, vector<2x64x32xf32> -> vector<2x256x32xf32>
    %cst_17 = arith.constant 0.353553385 : f32
    %38 = vector.broadcast %cst_17 : f32 to vector<256x32xf32>
    %39 = arith.mulf %36, %38 : vector<256x32xf32>
    %40 = vector.shape_cast %39 : vector<256x32xf32> to vector<1x256x32xf32>
    %41 = vector.broadcast %40 : vector<1x256x32xf32> to vector<2x256x32xf32>
    %42 = arith.mulf %37, %41 : vector<2x256x32xf32>
    "tpu.trace_start"() <{level = 10 : i32, message = "bmc,bkc->bmk"}> : () -> ()
    %cst_18 = arith.constant dense<0.000000e+00> : vector<2x256x64xf32>
    %43 = tpu.matmul %42, %33, %cst_18 {dimension_numbers = #tpu.dot_dimension_numbers<[2], [2], [1], [1], [0, 0, 0, 1, 1, 1], [0], [0]>} : vector<2x256x32xf32>, vector<2x64x32xf32>, vector<2x256x64xf32> -> vector<2x256x64xf32>
    "tpu.trace_stop"() : () -> ()
    %cst_19 = arith.constant dense<0xFF800000> : vector<2x256xf32>
    %44 = vector.multi_reduction <maximumf>, %43, %cst_19 [2] : vector<2x256x64xf32> to vector<2x256xf32>
    %45 = vector.shape_cast %44 : vector<2x256xf32> to vector<2x256x1xf32>
    %46 = vector.broadcast %45 : vector<2x256x1xf32> to vector<2x256x64xf32>
    %47 = arith.subf %43, %46 : vector<2x256x64xf32>
    %48 = math.exp %47 : vector<2x256x64xf32>
    %cst_20 = arith.constant dense<0.000000e+00> : vector<2x256xf32>
    %49 = vector.multi_reduction <add>, %48, %cst_20 [2] : vector<2x256x64xf32> to vector<2x256xf32>
    %50 = vector.shape_cast %49 : vector<2x256xf32> to vector<2x256x1xf32>
    %cst_21 = arith.constant 1.000000e+00 : f32
    %51 = vector.broadcast %cst_21 : f32 to vector<2x256x1xf32>
    %52 = arith.divf %51, %50 : vector<2x256x1xf32>
    "tpu.trace_start"() <{level = 10 : i32, message = "bmk,bkc->bmc"}> : () -> ()
    %cst_22 = arith.constant dense<0.000000e+00> : vector<2x256x32xf32>
    %53 = tpu.matmul %48, %35, %cst_22 {dimension_numbers = #tpu.dot_dimension_numbers<[2], [1], [1], [2], [0, 0, 0, 1, 1, 2], [0], [0]>} : vector<2x256x64xf32>, vector<2x64x32xf32>, vector<2x256x32xf32> -> vector<2x256x32xf32>
    "tpu.trace_stop"() : () -> ()
    %54 = vector.shape_cast %36 : vector<256x32xf32> to vector<1x256x32xf32>
    %55 = vector.broadcast %54 : vector<1x256x32xf32> to vector<2x256x32xf32>
    %56 = vector.broadcast %52 : vector<2x256x1xf32> to vector<2x256x32xf32>
    %57 = arith.mulf %55, %56 : vector<2x256x32xf32>
    %58 = arith.mulf %53, %57 : vector<2x256x32xf32>
    %59 = vector.extract_strided_slice %58 {offsets = [0, 0, 0], sizes = [2, 64, 32], strides = [1, 1, 1]} : vector<2x256x32xf32> to vector<2x64x32xf32>
    %60 = vector.extract_strided_slice %58 {offsets = [0, 64, 0], sizes = [2, 64, 32], strides = [1, 1, 1]} : vector<2x256x32xf32> to vector<2x64x32xf32>
    %61 = arith.addf %59, %60 : vector<2x64x32xf32>
    %62 = vector.extract_strided_slice %58 {offsets = [0, 128, 0], sizes = [2, 64, 32], strides = [1, 1, 1]} : vector<2x256x32xf32> to vector<2x64x32xf32>
    %63 = arith.addf %61, %62 : vector<2x64x32xf32>
    %64 = vector.extract_strided_slice %58 {offsets = [0, 192, 0], sizes = [2, 64, 32], strides = [1, 1, 1]} : vector<2x256x32xf32> to vector<2x64x32xf32>
    %65 = arith.addf %63, %64 : vector<2x64x32xf32>
    %66 = vector.shape_cast %65 : vector<2x64x32xf32> to vector<128x32xf32>
    %c0_23 = arith.constant 0 : index
    %c0_24 = arith.constant 0 : index
    %67 = vector.load %arg4[%c0_23, %c0_24] : memref<32x32xf32, #tpu.memory_space<vmem>>, vector<32x32xf32>
    %cst_25 = arith.constant dense<0.000000e+00> : vector<128x32xf32>
    %68 = tpu.matmul %66, %67, %cst_25 {dimension_numbers = #tpu.dot_dimension_numbers<[1], [0], [0], [1], [0, 0, 1, 1], [], []>} : vector<128x32xf32>, vector<32x32xf32>, vector<128x32xf32> -> vector<128x32xf32>
    %c0_26 = arith.constant 0 : index
    %c0_27 = arith.constant 0 : index
    %69 = vector.load %arg10[%c0_26, %c0_27] : memref<1x32xf32, #tpu.memory_space<vmem>>, vector<1x32xf32>
    %70 = vector.broadcast %69 : vector<1x32xf32> to vector<128x32xf32>
    %71 = arith.addf %68, %70 : vector<128x32xf32>
    %72 = arith.addf %71, %2 : vector<128x32xf32>
    %c0_28 = arith.constant 0 : index
    %c0_29 = arith.constant 0 : index
    %73 = vector.load %arg11[%c0_28, %c0_29] : memref<1x32xf32, #tpu.memory_space<vmem>>, vector<1x32xf32>
    %c0_30 = arith.constant 0 : index
    %c0_31 = arith.constant 0 : index
    %74 = vector.load %arg12[%c0_30, %c0_31] : memref<1x32xf32, #tpu.memory_space<vmem>>, vector<1x32xf32>
    %cst_32 = arith.constant dense<0.000000e+00> : vector<128xf32>
    %75 = vector.multi_reduction <add>, %72, %cst_32 [1] : vector<128x32xf32> to vector<128xf32>
    %76 = vector.shape_cast %75 : vector<128xf32> to vector<128x1xf32>
    %cst_33 = arith.constant 3.200000e+01 : f32
    %77 = vector.broadcast %cst_33 : f32 to vector<128x1xf32>
    %78 = arith.divf %76, %77 : vector<128x1xf32>
    %79 = vector.broadcast %78 : vector<128x1xf32> to vector<128x32xf32>
    %80 = arith.subf %72, %79 : vector<128x32xf32>
    %81 = arith.mulf %80, %80 : vector<128x32xf32>
    %cst_34 = arith.constant dense<0.000000e+00> : vector<128xf32>
    %82 = vector.multi_reduction <add>, %81, %cst_34 [1] : vector<128x32xf32> to vector<128xf32>
    %83 = vector.shape_cast %82 : vector<128xf32> to vector<128x1xf32>
    %cst_35 = arith.constant 3.200000e+01 : f32
    %84 = vector.broadcast %cst_35 : f32 to vector<128x1xf32>
    %85 = arith.divf %83, %84 : vector<128x1xf32>
    %cst_36 = arith.constant 9.99999974E-6 : f32
    %86 = vector.broadcast %cst_36 : f32 to vector<128x1xf32>
    %87 = arith.addf %85, %86 : vector<128x1xf32>
    %88 = math.rsqrt %87 : vector<128x1xf32>
    %89 = vector.broadcast %88 : vector<128x1xf32> to vector<128x32xf32>
    %90 = arith.mulf %80, %89 : vector<128x32xf32>
    %91 = vector.broadcast %73 : vector<1x32xf32> to vector<128x32xf32>
    %92 = arith.mulf %90, %91 : vector<128x32xf32>
    %93 = vector.broadcast %74 : vector<1x32xf32> to vector<128x32xf32>
    %94 = arith.addf %92, %93 : vector<128x32xf32>
    %c0_37 = arith.constant 0 : index
    %c0_38 = arith.constant 0 : index
    %95 = vector.load %arg5[%c0_37, %c0_38] : memref<32x32xf32, #tpu.memory_space<vmem>>, vector<32x32xf32>
    %cst_39 = arith.constant dense<0.000000e+00> : vector<128x32xf32>
    %96 = tpu.matmul %94, %95, %cst_39 {dimension_numbers = #tpu.dot_dimension_numbers<[1], [0], [0], [1], [0, 0, 1, 1], [], []>} : vector<128x32xf32>, vector<32x32xf32>, vector<128x32xf32> -> vector<128x32xf32>
    %c0_40 = arith.constant 0 : index
    %c0_41 = arith.constant 0 : index
    %97 = vector.load %arg13[%c0_40, %c0_41] : memref<1x32xf32, #tpu.memory_space<vmem>>, vector<1x32xf32>
    %98 = vector.broadcast %97 : vector<1x32xf32> to vector<128x32xf32>
    %99 = arith.addf %96, %98 : vector<128x32xf32>
    %cst_42 = arith.constant 5.000000e-01 : f32
    %100 = vector.broadcast %cst_42 : f32 to vector<128x32xf32>
    %101 = arith.mulf %100, %99 : vector<128x32xf32>
    %cst_43 = arith.constant 0.707106769 : f32
    %102 = vector.broadcast %cst_43 : f32 to vector<128x32xf32>
    %103 = arith.mulf %99, %102 : vector<128x32xf32>
    %104 = math.absf %103 : vector<128x32xf32>
    %cst_44 = arith.constant 0.327591091 : f32
    %105 = vector.broadcast %cst_44 : f32 to vector<128x32xf32>
    %106 = arith.mulf %105, %104 : vector<128x32xf32>
    %cst_45 = arith.constant 1.000000e+00 : f32
    %107 = vector.broadcast %cst_45 : f32 to vector<128x32xf32>
    %108 = arith.addf %107, %106 : vector<128x32xf32>
    %cst_46 = arith.constant 1.000000e+00 : f32
    %109 = vector.broadcast %cst_46 : f32 to vector<128x32xf32>
    %110 = arith.divf %109, %108 : vector<128x32xf32>
    %cst_47 = arith.constant 1.06140542 : f32
    %111 = vector.broadcast %cst_47 : f32 to vector<128x32xf32>
    %112 = arith.mulf %110, %111 : vector<128x32xf32>
    %cst_48 = arith.constant -1.45315206 : f32
    %113 = vector.broadcast %cst_48 : f32 to vector<128x32xf32>
    %114 = arith.addf %113, %112 : vector<128x32xf32>
    %115 = arith.mulf %110, %114 : vector<128x32xf32>
    %cst_49 = arith.constant 1.42141378 : f32
    %116 = vector.broadcast %cst_49 : f32 to vector<128x32xf32>
    %117 = arith.addf %116, %115 : vector<128x32xf32>
    %118 = arith.mulf %110, %117 : vector<128x32xf32>
    %cst_50 = arith.constant -0.284496725 : f32
    %119 = vector.broadcast %cst_50 : f32 to vector<128x32xf32>
    %120 = arith.addf %119, %118 : vector<128x32xf32>
    %121 = arith.mulf %110, %120 : vector<128x32xf32>
    %cst_51 = arith.constant 0.254829586 : f32
    %122 = vector.broadcast %cst_51 : f32 to vector<128x32xf32>
    %123 = arith.addf %122, %121 : vector<128x32xf32>
    %124 = arith.mulf %110, %123 : vector<128x32xf32>
    %125 = arith.mulf %104, %104 : vector<128x32xf32>
    %cst_52 = arith.constant 0.000000e+00 : f32
    %126 = vector.broadcast %cst_52 : f32 to vector<128x32xf32>
    %127 = arith.subf %126, %125 : vector<128x32xf32>
    %128 = math.exp %127 : vector<128x32xf32>
    %129 = arith.mulf %124, %128 : vector<128x32xf32>
    %cst_53 = arith.constant 1.000000e+00 : f32
    %130 = vector.broadcast %cst_53 : f32 to vector<128x32xf32>
    %131 = arith.subf %130, %129 : vector<128x32xf32>
    %cst_54 = arith.constant 0.000000e+00 : f32
    %132 = vector.broadcast %cst_54 : f32 to vector<128x32xf32>
    %133 = arith.cmpf olt, %103, %132 : vector<128x32xf32>
    %cst_55 = arith.constant 0.000000e+00 : f32
    %134 = vector.broadcast %cst_55 : f32 to vector<128x32xf32>
    %135 = arith.subf %134, %131 : vector<128x32xf32>
    %136 = arith.select %133, %135, %131 : vector<128x32xi1>, vector<128x32xf32>
    %cst_56 = arith.constant 1.000000e+00 : f32
    %137 = vector.broadcast %cst_56 : f32 to vector<128x32xf32>
    %138 = arith.addf %137, %136 : vector<128x32xf32>
    %139 = arith.mulf %101, %138 : vector<128x32xf32>
    %c0_57 = arith.constant 0 : index
    %c0_58 = arith.constant 0 : index
    %140 = vector.load %arg6[%c0_57, %c0_58] : memref<32x32xf32, #tpu.memory_space<vmem>>, vector<32x32xf32>
    %cst_59 = arith.constant dense<0.000000e+00> : vector<128x32xf32>
    %141 = tpu.matmul %139, %140, %cst_59 {dimension_numbers = #tpu.dot_dimension_numbers<[1], [0], [0], [1], [0, 0, 1, 1], [], []>} : vector<128x32xf32>, vector<32x32xf32>, vector<128x32xf32> -> vector<128x32xf32>
    %c0_60 = arith.constant 0 : index
    %c0_61 = arith.constant 0 : index
    %142 = vector.load %arg14[%c0_60, %c0_61] : memref<1x32xf32, #tpu.memory_space<vmem>>, vector<1x32xf32>
    %143 = vector.broadcast %142 : vector<1x32xf32> to vector<128x32xf32>
    %144 = arith.addf %141, %143 : vector<128x32xf32>
    %145 = arith.addf %144, %72 : vector<128x32xf32>
    %146 = vector.shape_cast %145 : vector<128x32xf32> to vector<2x64x32xf32>
    %147 = tpu.transpose %146, [0, 2, 1] : vector<2x64x32xf32> -> vector<2x32x64xf32>
    %c0_62 = arith.constant 0 : index
    %c0_63 = arith.constant 0 : index
    %c0_64 = arith.constant 0 : index
    %148 = vector.load %arg15[%c0_62, %c0_63, %c0_64] : memref<2x32x64xf32, #tpu.memory_space<vmem>>, vector<2x32x64xf32>
    tpu.vector_store %arg15[%c0_62, %c0_63, %c0_64], %147 {strides = array<i32>} : memref<2x32x64xf32, #tpu.memory_space<vmem>>, vector<2x32x64xf32>,
    return
  }
  func.func @transform_0(%arg0: i32) -> (i32, i32, i32) {
    %c0_i32 = arith.constant 0 : i32
    %c0_i32_0 = arith.constant 0 : i32
    %c0_i32_1 = arith.constant 0 : i32
    return %arg0, %c0_i32, %c0_i32_0 : i32, i32, i32
  }
  func.func @transform_1(%arg0: i32) -> (i32, i32) {
    %c0_i32 = arith.constant 0 : i32
    %c0_i32_0 = arith.constant 0 : i32
    %c0_i32_1 = arith.constant 0 : i32
    return %c0_i32, %c0_i32_0 : i32, i32
  }
  func.func @transform_2(%arg0: i32) -> (i32, i32) {
    %c0_i32 = arith.constant 0 : i32
    %c0_i32_0 = arith.constant 0 : i32
    %c0_i32_1 = arith.constant 0 : i32
    return %c0_i32, %c0_i32_0 : i32, i32
  }
  func.func @transform_3(%arg0: i32) -> (i32, i32) {
    %c0_i32 = arith.constant 0 : i32
    %c0_i32_0 = arith.constant 0 : i32
    %c0_i32_1 = arith.constant 0 : i32
    return %c0_i32, %c0_i32_0 : i32, i32
  }
  func.func @transform_4(%arg0: i32) -> (i32, i32) {
    %c0_i32 = arith.constant 0 : i32
    %c0_i32_0 = arith.constant 0 : i32
    %c0_i32_1 = arith.constant 0 : i32
    return %c0_i32, %c0_i32_0 : i32, i32
  }
  func.func @transform_5(%arg0: i32) -> (i32, i32) {
    %c0_i32 = arith.constant 0 : i32
    %c0_i32_0 = arith.constant 0 : i32
    %c0_i32_1 = arith.constant 0 : i32
    return %c0_i32, %c0_i32_0 : i32, i32
  }
  func.func @transform_6(%arg0: i32) -> (i32, i32) {
    %c0_i32 = arith.constant 0 : i32
    %c0_i32_0 = arith.constant 0 : i32
    %c0_i32_1 = arith.constant 0 : i32
    return %c0_i32, %c0_i32_0 : i32, i32
  }
  func.func @transform_7(%arg0: i32) -> (i32, i32) {
    %c0_i32 = arith.constant 0 : i32
    %c0_i32_0 = arith.constant 0 : i32
    %c0_i32_1 = arith.constant 0 : i32
    return %c0_i32, %c0_i32_0 : i32, i32
  }
  func.func @transform_8(%arg0: i32) -> (i32, i32) {
    %c0_i32 = arith.constant 0 : i32
    %c0_i32_0 = arith.constant 0 : i32
    %c0_i32_1 = arith.constant 0 : i32
    return %c0_i32, %c0_i32_0 : i32, i32
  }
  func.func @transform_9(%arg0: i32) -> (i32, i32) {
    %c0_i32 = arith.constant 0 : i32
    %c0_i32_0 = arith.constant 0 : i32
    %c0_i32_1 = arith.constant 0 : i32
    return %c0_i32, %c0_i32_0 : i32, i32
  }
  func.func @transform_10(%arg0: i32) -> (i32, i32) {
    %c0_i32 = arith.constant 0 : i32
    %c0_i32_0 = arith.constant 0 : i32
    %c0_i32_1 = arith.constant 0 : i32
    return %c0_i32, %c0_i32_0 : i32, i32
  }
  func.func @transform_11(%arg0: i32) -> (i32, i32) {
    %c0_i32 = arith.constant 0 : i32
    %c0_i32_0 = arith.constant 0 : i32
    %c0_i32_1 = arith.constant 0 : i32
    return %c0_i32, %c0_i32_0 : i32, i32
  }
  func.func @transform_12(%arg0: i32) -> (i32, i32) {
    %c0_i32 = arith.constant 0 : i32
    %c0_i32_0 = arith.constant 0 : i32
    %c0_i32_1 = arith.constant 0 : i32
    return %c0_i32, %c0_i32_0 : i32, i32
  }
  func.func @transform_13(%arg0: i32) -> (i32, i32) {
    %c0_i32 = arith.constant 0 : i32
    %c0_i32_0 = arith.constant 0 : i32
    %c0_i32_1 = arith.constant 0 : i32
    return %c0_i32, %c0_i32_0 : i32, i32
  }
  func.func @transform_14(%arg0: i32) -> (i32, i32, i32) {
    %c0_i32 = arith.constant 0 : i32
    %c0_i32_0 = arith.constant 0 : i32
    %c0_i32_1 = arith.constant 0 : i32
    return %arg0, %c0_i32, %c0_i32_0 : i32, i32, i32
  }
}

module attributes {stable_mosaic.version = 11 : i64} {
  func.func @transformer_kernel(%arg0: i32, %arg1: memref<2x64x32xf32, #tpu.memory_space<vmem>>, %arg2: memref<256x32xf32, #tpu.memory_space<vmem>>, %arg3: memref<32x96xf32, #tpu.memory_space<vmem>>, %arg4: memref<32x32xf32, #tpu.memory_space<vmem>>, %arg5: memref<32x32xf32, #tpu.memory_space<vmem>>, %arg6: memref<32x32xf32, #tpu.memory_space<vmem>>, %arg7: memref<1x96xf32, #tpu.memory_space<vmem>>, %arg8: memref<1x32xf32, #tpu.memory_space<vmem>>, %arg9: memref<1x32xf32, #tpu.memory_space<vmem>>, %arg10: memref<1x32xf32, #tpu.memory_space<vmem>>, %arg11: memref<1x32xf32, #tpu.memory_space<vmem>>, %arg12: memref<1x32xf32, #tpu.memory_space<vmem>>, %arg13: memref<1x32xf32, #tpu.memory_space<vmem>>, %arg14: memref<1x32xf32, #tpu.memory_space<vmem>>, %arg15: memref<2x64x32xf32, #tpu.memory_space<vmem>>) attributes {dimension_semantics = [#tpu.dimension_semantics<parallel>], iteration_bounds = array<i64: 2>, scalar_prefetch = 0 : i64, scratch_operands = 0 : i64, tpu.core_type = #tpu.core_type<tc>, window_params = [{transform_indices = @transform_0, window_bounds = array<i64: 2, 64, 32>}, {pipeline_mode = #tpu.pipeline_mode<synchronous>, transform_indices = @transform_1, window_bounds = array<i64: 256, 32>}, {pipeline_mode = #tpu.pipeline_mode<synchronous>, transform_indices = @transform_2, window_bounds = array<i64: 32, 96>}, {pipeline_mode = #tpu.pipeline_mode<synchronous>, transform_indices = @transform_3, window_bounds = array<i64: 32, 32>}, {pipeline_mode = #tpu.pipeline_mode<synchronous>, transform_indices = @transform_4, window_bounds = array<i64: 32, 32>}, {pipeline_mode = #tpu.pipeline_mode<synchronous>, transform_indices = @transform_5, window_bounds = array<i64: 32, 32>}, {pipeline_mode = #tpu.pipeline_mode<synchronous>, transform_indices = @transform_6, window_bounds = array<i64: 1, 96>}, {pipeline_mode = #tpu.pipeline_mode<synchronous>, transform_indices = @transform_7, window_bounds = array<i64: 1, 32>}, {pipeline_mode = #tpu.pipeline_mode<synchronous>, transform_indices = @transform_8, window_bounds = array<i64: 1, 32>}, {pipeline_mode = #tpu.pipeline_mode<synchronous>, transform_indices = @transform_9, window_bounds = array<i64: 1, 32>}, {pipeline_mode = #tpu.pipeline_mode<synchronous>, transform_indices = @transform_10, window_bounds = array<i64: 1, 32>}, {pipeline_mode = #tpu.pipeline_mode<synchronous>, transform_indices = @transform_11, window_bounds = array<i64: 1, 32>}, {pipeline_mode = #tpu.pipeline_mode<synchronous>, transform_indices = @transform_12, window_bounds = array<i64: 1, 32>}, {pipeline_mode = #tpu.pipeline_mode<synchronous>, transform_indices = @transform_13, window_bounds = array<i64: 1, 32>}, {transform_indices = @transform_14, window_bounds = array<i64: 2, 64, 32>}]} {
    %c0 = arith.constant 0 : index
    %c0_0 = arith.constant 0 : index
    %c0_1 = arith.constant 0 : index
    %0 = vector.load %arg1[%c0, %c0_0, %c0_1] : memref<2x64x32xf32, #tpu.memory_space<vmem>>, vector<2x64x32xf32>
    %1 = vector.shape_cast %0 : vector<2x64x32xf32> to vector<128x32xf32>
    %c0_2 = arith.constant 0 : index
    %c0_3 = arith.constant 0 : index
    %2 = vector.load %arg8[%c0_2, %c0_3] : memref<1x32xf32, #tpu.memory_space<vmem>>, vector<1x32xf32>
    %c0_4 = arith.constant 0 : index
    %c0_5 = arith.constant 0 : index
    %3 = vector.load %arg9[%c0_4, %c0_5] : memref<1x32xf32, #tpu.memory_space<vmem>>, vector<1x32xf32>
    %cst = arith.constant dense<0.000000e+00> : vector<128xf32>
    %4 = vector.multi_reduction <add>, %1, %cst [1] : vector<128x32xf32> to vector<128xf32>
    %5 = vector.shape_cast %4 : vector<128xf32> to vector<128x1xf32>
    %cst_6 = arith.constant 3.200000e+01 : f32
    %6 = vector.broadcast %cst_6 : f32 to vector<128x1xf32>
    %7 = arith.divf %5, %6 : vector<128x1xf32>
    %8 = vector.broadcast %7 : vector<128x1xf32> to vector<128x32xf32>
    %9 = arith.subf %1, %8 : vector<128x32xf32>
    %10 = arith.mulf %9, %9 : vector<128x32xf32>
    %cst_7 = arith.constant dense<0.000000e+00> : vector<128xf32>
    %11 = vector.multi_reduction <add>, %10, %cst_7 [1] : vector<128x32xf32> to vector<128xf32>
    %12 = vector.shape_cast %11 : vector<128xf32> to vector<128x1xf32>
    %cst_8 = arith.constant 3.200000e+01 : f32
    %13 = vector.broadcast %cst_8 : f32 to vector<128x1xf32>
    %14 = arith.divf %12, %13 : vector<128x1xf32>
    %cst_9 = arith.constant 9.99999974E-6 : f32
    %15 = vector.broadcast %cst_9 : f32 to vector<128x1xf32>
    %16 = arith.addf %14, %15 : vector<128x1xf32>
    %17 = math.rsqrt %16 : vector<128x1xf32>
    %18 = vector.broadcast %17 : vector<128x1xf32> to vector<128x32xf32>
    %19 = arith.mulf %9, %18 : vector<128x32xf32>
    %20 = vector.broadcast %2 : vector<1x32xf32> to vector<128x32xf32>
    %21 = arith.mulf %19, %20 : vector<128x32xf32>
    %22 = vector.broadcast %3 : vector<1x32xf32> to vector<128x32xf32>
    %23 = arith.addf %21, %22 : vector<128x32xf32>
    %c0_10 = arith.constant 0 : index
    %c0_11 = arith.constant 0 : index
    %24 = vector.load %arg3[%c0_10, %c0_11] : memref<32x96xf32, #tpu.memory_space<vmem>>, vector<32x96xf32>
    %cst_12 = arith.constant dense<0.000000e+00> : vector<128x96xf32>
    %25 = tpu.matmul %23, %24, %cst_12 {dimension_numbers = #tpu.dot_dimension_numbers<[1], [0], [0], [1], [0, 0, 1, 1], [], []>} : vector<128x32xf32>, vector<32x96xf32>, vector<128x96xf32> -> vector<128x96xf32>
    %c0_13 = arith.constant 0 : index
    %c0_14 = arith.constant 0 : index
    %26 = vector.load %arg7[%c0_13, %c0_14] : memref<1x96xf32, #tpu.memory_space<vmem>>, vector<1x96xf32>
    %27 = vector.broadcast %26 : vector<1x96xf32> to vector<128x96xf32>
    %28 = arith.addf %25, %27 : vector<128x96xf32>
    %29 = vector.extract_strided_slice %28 {offsets = [0, 0], sizes = [128, 32], strides = [1, 1]} : vector<128x96xf32> to vector<128x32xf32>
    %30 = vector.shape_cast %29 : vector<128x32xf32> to vector<2x64x32xf32>
    %31 = vector.extract_strided_slice %28 {offsets = [0, 32], sizes = [128, 32], strides = [1, 1]} : vector<128x96xf32> to vector<128x32xf32>
    %32 = vector.shape_cast %31 : vector<128x32xf32> to vector<2x64x32xf32>
    %33 = vector.extract_strided_slice %28 {offsets = [0, 64], sizes = [128, 32], strides = [1, 1]} : vector<128x96xf32> to vector<128x32xf32>
    %34 = vector.shape_cast %33 : vector<128x32xf32> to vector<2x64x32xf32>
    %c0_15 = arith.constant 0 : index
    %c0_16 = arith.constant 0 : index
    %35 = vector.load %arg2[%c0_15, %c0_16] : memref<256x32xf32, #tpu.memory_space<vmem>>, vector<256x32xf32>
    %36 = tpu.concatenate %30, %30, %30, %30 in 1 : vector<2x64x32xf32>, vector<2x64x32xf32>, vector<2x64x32xf32>, vector<2x64x32xf32> -> vector<2x256x32xf32>
    %cst_17 = arith.constant 0.353553385 : f32
    %37 = vector.broadcast %cst_17 : f32 to vector<256x32xf32>
    %38 = arith.mulf %35, %37 : vector<256x32xf32>
    %39 = vector.shape_cast %38 : vector<256x32xf32> to vector<1x256x32xf32>
    %40 = vector.broadcast %39 : vector<1x256x32xf32> to vector<2x256x32xf32>
    %41 = arith.mulf %36, %40 : vector<2x256x32xf32>
    "tpu.trace_start"() <{level = 10 : i32, message = "bmc,bkc->bmk"}> : () -> ()
    %cst_18 = arith.constant dense<0.000000e+00> : vector<2x256x64xf32>
    %42 = tpu.matmul %41, %32, %cst_18 {dimension_numbers = #tpu.dot_dimension_numbers<[2], [2], [1], [1], [0, 0, 0, 1, 1, 1], [0], [0]>} : vector<2x256x32xf32>, vector<2x64x32xf32>, vector<2x256x64xf32> -> vector<2x256x64xf32>
    "tpu.trace_stop"() : () -> ()
    %cst_19 = arith.constant dense<0xFF800000> : vector<2x256xf32>
    %43 = vector.multi_reduction <maximumf>, %42, %cst_19 [2] : vector<2x256x64xf32> to vector<2x256xf32>
    %44 = vector.shape_cast %43 : vector<2x256xf32> to vector<2x256x1xf32>
    %45 = vector.broadcast %44 : vector<2x256x1xf32> to vector<2x256x64xf32>
    %46 = arith.subf %42, %45 : vector<2x256x64xf32>
    %47 = math.exp %46 : vector<2x256x64xf32>
    %cst_20 = arith.constant dense<0.000000e+00> : vector<2x256xf32>
    %48 = vector.multi_reduction <add>, %47, %cst_20 [2] : vector<2x256x64xf32> to vector<2x256xf32>
    %49 = vector.shape_cast %48 : vector<2x256xf32> to vector<2x256x1xf32>
    %cst_21 = arith.constant 1.000000e+00 : f32
    %50 = vector.broadcast %cst_21 : f32 to vector<2x256x1xf32>
    %51 = arith.divf %50, %49 : vector<2x256x1xf32>
    "tpu.trace_start"() <{level = 10 : i32, message = "bmk,bkc->bmc"}> : () -> ()
    %cst_22 = arith.constant dense<0.000000e+00> : vector<2x256x32xf32>
    %52 = tpu.matmul %47, %34, %cst_22 {dimension_numbers = #tpu.dot_dimension_numbers<[2], [1], [1], [2], [0, 0, 0, 1, 1, 2], [0], [0]>} : vector<2x256x64xf32>, vector<2x64x32xf32>, vector<2x256x32xf32> -> vector<2x256x32xf32>
    "tpu.trace_stop"() : () -> ()
    %53 = vector.shape_cast %35 : vector<256x32xf32> to vector<1x256x32xf32>
    %54 = vector.broadcast %53 : vector<1x256x32xf32> to vector<2x256x32xf32>
    %55 = vector.broadcast %51 : vector<2x256x1xf32> to vector<2x256x32xf32>
    %56 = arith.mulf %54, %55 : vector<2x256x32xf32>
    %57 = arith.mulf %52, %56 : vector<2x256x32xf32>
    %58 = vector.extract_strided_slice %57 {offsets = [0, 0, 0], sizes = [2, 64, 32], strides = [1, 1, 1]} : vector<2x256x32xf32> to vector<2x64x32xf32>
    %59 = vector.extract_strided_slice %57 {offsets = [0, 64, 0], sizes = [2, 64, 32], strides = [1, 1, 1]} : vector<2x256x32xf32> to vector<2x64x32xf32>
    %60 = arith.addf %58, %59 : vector<2x64x32xf32>
    %61 = vector.extract_strided_slice %57 {offsets = [0, 128, 0], sizes = [2, 64, 32], strides = [1, 1, 1]} : vector<2x256x32xf32> to vector<2x64x32xf32>
    %62 = arith.addf %60, %61 : vector<2x64x32xf32>
    %63 = vector.extract_strided_slice %57 {offsets = [0, 192, 0], sizes = [2, 64, 32], strides = [1, 1, 1]} : vector<2x256x32xf32> to vector<2x64x32xf32>
    %64 = arith.addf %62, %63 : vector<2x64x32xf32>
    %65 = vector.shape_cast %64 : vector<2x64x32xf32> to vector<128x32xf32>
    %c0_23 = arith.constant 0 : index
    %c0_24 = arith.constant 0 : index
    %66 = vector.load %arg4[%c0_23, %c0_24] : memref<32x32xf32, #tpu.memory_space<vmem>>, vector<32x32xf32>
    %cst_25 = arith.constant dense<0.000000e+00> : vector<128x32xf32>
    %67 = tpu.matmul %65, %66, %cst_25 {dimension_numbers = #tpu.dot_dimension_numbers<[1], [0], [0], [1], [0, 0, 1, 1], [], []>} : vector<128x32xf32>, vector<32x32xf32>, vector<128x32xf32> -> vector<128x32xf32>
    %c0_26 = arith.constant 0 : index
    %c0_27 = arith.constant 0 : index
    %68 = vector.load %arg10[%c0_26, %c0_27] : memref<1x32xf32, #tpu.memory_space<vmem>>, vector<1x32xf32>
    %69 = vector.broadcast %68 : vector<1x32xf32> to vector<128x32xf32>
    %70 = arith.addf %67, %69 : vector<128x32xf32>
    %71 = arith.addf %70, %1 : vector<128x32xf32>
    %c0_28 = arith.constant 0 : index
    %c0_29 = arith.constant 0 : index
    %72 = vector.load %arg11[%c0_28, %c0_29] : memref<1x32xf32, #tpu.memory_space<vmem>>, vector<1x32xf32>
    %c0_30 = arith.constant 0 : index
    %c0_31 = arith.constant 0 : index
    %73 = vector.load %arg12[%c0_30, %c0_31] : memref<1x32xf32, #tpu.memory_space<vmem>>, vector<1x32xf32>
    %cst_32 = arith.constant dense<0.000000e+00> : vector<128xf32>
    %74 = vector.multi_reduction <add>, %71, %cst_32 [1] : vector<128x32xf32> to vector<128xf32>
    %75 = vector.shape_cast %74 : vector<128xf32> to vector<128x1xf32>
    %cst_33 = arith.constant 3.200000e+01 : f32
    %76 = vector.broadcast %cst_33 : f32 to vector<128x1xf32>
    %77 = arith.divf %75, %76 : vector<128x1xf32>
    %78 = vector.broadcast %77 : vector<128x1xf32> to vector<128x32xf32>
    %79 = arith.subf %71, %78 : vector<128x32xf32>
    %80 = arith.mulf %79, %79 : vector<128x32xf32>
    %cst_34 = arith.constant dense<0.000000e+00> : vector<128xf32>
    %81 = vector.multi_reduction <add>, %80, %cst_34 [1] : vector<128x32xf32> to vector<128xf32>
    %82 = vector.shape_cast %81 : vector<128xf32> to vector<128x1xf32>
    %cst_35 = arith.constant 3.200000e+01 : f32
    %83 = vector.broadcast %cst_35 : f32 to vector<128x1xf32>
    %84 = arith.divf %82, %83 : vector<128x1xf32>
    %cst_36 = arith.constant 9.99999974E-6 : f32
    %85 = vector.broadcast %cst_36 : f32 to vector<128x1xf32>
    %86 = arith.addf %84, %85 : vector<128x1xf32>
    %87 = math.rsqrt %86 : vector<128x1xf32>
    %88 = vector.broadcast %87 : vector<128x1xf32> to vector<128x32xf32>
    %89 = arith.mulf %79, %88 : vector<128x32xf32>
    %90 = vector.broadcast %72 : vector<1x32xf32> to vector<128x32xf32>
    %91 = arith.mulf %89, %90 : vector<128x32xf32>
    %92 = vector.broadcast %73 : vector<1x32xf32> to vector<128x32xf32>
    %93 = arith.addf %91, %92 : vector<128x32xf32>
    %c0_37 = arith.constant 0 : index
    %c0_38 = arith.constant 0 : index
    %94 = vector.load %arg5[%c0_37, %c0_38] : memref<32x32xf32, #tpu.memory_space<vmem>>, vector<32x32xf32>
    %cst_39 = arith.constant dense<0.000000e+00> : vector<128x32xf32>
    %95 = tpu.matmul %93, %94, %cst_39 {dimension_numbers = #tpu.dot_dimension_numbers<[1], [0], [0], [1], [0, 0, 1, 1], [], []>} : vector<128x32xf32>, vector<32x32xf32>, vector<128x32xf32> -> vector<128x32xf32>
    %c0_40 = arith.constant 0 : index
    %c0_41 = arith.constant 0 : index
    %96 = vector.load %arg13[%c0_40, %c0_41] : memref<1x32xf32, #tpu.memory_space<vmem>>, vector<1x32xf32>
    %97 = vector.broadcast %96 : vector<1x32xf32> to vector<128x32xf32>
    %98 = arith.addf %95, %97 : vector<128x32xf32>
    %cst_42 = arith.constant 5.000000e-01 : f32
    %99 = vector.broadcast %cst_42 : f32 to vector<128x32xf32>
    %100 = arith.mulf %99, %98 : vector<128x32xf32>
    %cst_43 = arith.constant 0.707106769 : f32
    %101 = vector.broadcast %cst_43 : f32 to vector<128x32xf32>
    %102 = arith.mulf %98, %101 : vector<128x32xf32>
    %103 = math.absf %102 : vector<128x32xf32>
    %cst_44 = arith.constant 0.327591091 : f32
    %104 = vector.broadcast %cst_44 : f32 to vector<128x32xf32>
    %105 = arith.mulf %104, %103 : vector<128x32xf32>
    %cst_45 = arith.constant 1.000000e+00 : f32
    %106 = vector.broadcast %cst_45 : f32 to vector<128x32xf32>
    %107 = arith.addf %106, %105 : vector<128x32xf32>
    %cst_46 = arith.constant 1.000000e+00 : f32
    %108 = vector.broadcast %cst_46 : f32 to vector<128x32xf32>
    %109 = arith.divf %108, %107 : vector<128x32xf32>
    %cst_47 = arith.constant 1.06140542 : f32
    %110 = vector.broadcast %cst_47 : f32 to vector<128x32xf32>
    %111 = arith.mulf %109, %110 : vector<128x32xf32>
    %cst_48 = arith.constant -1.45315206 : f32
    %112 = vector.broadcast %cst_48 : f32 to vector<128x32xf32>
    %113 = arith.addf %112, %111 : vector<128x32xf32>
    %114 = arith.mulf %109, %113 : vector<128x32xf32>
    %cst_49 = arith.constant 1.42141378 : f32
    %115 = vector.broadcast %cst_49 : f32 to vector<128x32xf32>
    %116 = arith.addf %115, %114 : vector<128x32xf32>
    %117 = arith.mulf %109, %116 : vector<128x32xf32>
    %cst_50 = arith.constant -0.284496725 : f32
    %118 = vector.broadcast %cst_50 : f32 to vector<128x32xf32>
    %119 = arith.addf %118, %117 : vector<128x32xf32>
    %120 = arith.mulf %109, %119 : vector<128x32xf32>
    %cst_51 = arith.constant 0.254829586 : f32
    %121 = vector.broadcast %cst_51 : f32 to vector<128x32xf32>
    %122 = arith.addf %121, %120 : vector<128x32xf32>
    %123 = arith.mulf %109, %122 : vector<128x32xf32>
    %124 = arith.mulf %103, %103 : vector<128x32xf32>
    %cst_52 = arith.constant 0.000000e+00 : f32
    %125 = vector.broadcast %cst_52 : f32 to vector<128x32xf32>
    %126 = arith.subf %125, %124 : vector<128x32xf32>
    %127 = math.exp %126 : vector<128x32xf32>
    %128 = arith.mulf %123, %127 : vector<128x32xf32>
    %cst_53 = arith.constant 1.000000e+00 : f32
    %129 = vector.broadcast %cst_53 : f32 to vector<128x32xf32>
    %130 = arith.subf %129, %128 : vector<128x32xf32>
    %cst_54 = arith.constant 0.000000e+00 : f32
    %131 = vector.broadcast %cst_54 : f32 to vector<128x32xf32>
    %132 = arith.cmpf olt, %102, %131 : vector<128x32xf32>
    %cst_55 = arith.constant 0.000000e+00 : f32
    %133 = vector.broadcast %cst_55 : f32 to vector<128x32xf32>
    %134 = arith.subf %133, %130 : vector<128x32xf32>
    %135 = arith.select %132, %134, %130 : vector<128x32xi1>, vector<128x32xf32>
    %cst_56 = arith.constant 1.000000e+00 : f32
    %136 = vector.broadcast %cst_56 : f32 to vector<128x32xf32>
    %137 = arith.addf %136, %135 : vector<128x32xf32>
    %138 = arith.mulf %100, %137 : vector<128x32xf32>
    %c0_57 = arith.constant 0 : index
    %c0_58 = arith.constant 0 : index
    %139 = vector.load %arg6[%c0_57, %c0_58] : memref<32x32xf32, #tpu.memory_space<vmem>>, vector<32x32xf32>
    %cst_59 = arith.constant dense<0.000000e+00> : vector<128x32xf32>
    %140 = tpu.matmul %138, %139, %cst_59 {dimension_numbers = #tpu.dot_dimension_numbers<[1], [0], [0], [1], [0, 0, 1, 1], [], []>} : vector<128x32xf32>, vector<32x32xf32>, vector<128x32xf32> -> vector<128x32xf32>
    %c0_60 = arith.constant 0 : index
    %c0_61 = arith.constant 0 : index
    %141 = vector.load %arg14[%c0_60, %c0_61] : memref<1x32xf32, #tpu.memory_space<vmem>>, vector<1x32xf32>
    %142 = vector.broadcast %141 : vector<1x32xf32> to vector<128x32xf32>
    %143 = arith.addf %140, %142 : vector<128x32xf32>
    %144 = arith.addf %143, %71 : vector<128x32xf32>
    %145 = vector.shape_cast %144 : vector<128x32xf32> to vector<2x64x32xf32>
    %c0_62 = arith.constant 0 : index
    %c0_63 = arith.constant 0 : index
    %c0_64 = arith.constant 0 : index
    %146 = vector.load %arg15[%c0_62, %c0_63, %c0_64] : memref<2x64x32xf32, #tpu.memory_space<vmem>>, vector<2x64x32xf32>
    tpu.vector_store %arg15[%c0_62, %c0_63, %c0_64], %145 {strides = array<i32>} : memref<2x64x32xf32, #tpu.memory_space<vmem>>, vector<2x64x32xf32>,
    return
  }
  func.func @transform_0(%arg0: i32) -> (i32, i32, i32) {
    %c0_i32 = arith.constant 0 : i32
    %c0_i32_0 = arith.constant 0 : i32
    %c0_i32_1 = arith.constant 0 : i32
    return %arg0, %c0_i32, %c0_i32_0 : i32, i32, i32
  }
  func.func @transform_1(%arg0: i32) -> (i32, i32) {
    %c0_i32 = arith.constant 0 : i32
    %c0_i32_0 = arith.constant 0 : i32
    %c0_i32_1 = arith.constant 0 : i32
    return %c0_i32, %c0_i32_0 : i32, i32
  }
  func.func @transform_2(%arg0: i32) -> (i32, i32) {
    %c0_i32 = arith.constant 0 : i32
    %c0_i32_0 = arith.constant 0 : i32
    %c0_i32_1 = arith.constant 0 : i32
    return %c0_i32, %c0_i32_0 : i32, i32
  }
  func.func @transform_3(%arg0: i32) -> (i32, i32) {
    %c0_i32 = arith.constant 0 : i32
    %c0_i32_0 = arith.constant 0 : i32
    %c0_i32_1 = arith.constant 0 : i32
    return %c0_i32, %c0_i32_0 : i32, i32
  }
  func.func @transform_4(%arg0: i32) -> (i32, i32) {
    %c0_i32 = arith.constant 0 : i32
    %c0_i32_0 = arith.constant 0 : i32
    %c0_i32_1 = arith.constant 0 : i32
    return %c0_i32, %c0_i32_0 : i32, i32
  }
  func.func @transform_5(%arg0: i32) -> (i32, i32) {
    %c0_i32 = arith.constant 0 : i32
    %c0_i32_0 = arith.constant 0 : i32
    %c0_i32_1 = arith.constant 0 : i32
    return %c0_i32, %c0_i32_0 : i32, i32
  }
  func.func @transform_6(%arg0: i32) -> (i32, i32) {
    %c0_i32 = arith.constant 0 : i32
    %c0_i32_0 = arith.constant 0 : i32
    %c0_i32_1 = arith.constant 0 : i32
    return %c0_i32, %c0_i32_0 : i32, i32
  }
  func.func @transform_7(%arg0: i32) -> (i32, i32) {
    %c0_i32 = arith.constant 0 : i32
    %c0_i32_0 = arith.constant 0 : i32
    %c0_i32_1 = arith.constant 0 : i32
    return %c0_i32, %c0_i32_0 : i32, i32
  }
  func.func @transform_8(%arg0: i32) -> (i32, i32) {
    %c0_i32 = arith.constant 0 : i32
    %c0_i32_0 = arith.constant 0 : i32
    %c0_i32_1 = arith.constant 0 : i32
    return %c0_i32, %c0_i32_0 : i32, i32
  }
  func.func @transform_9(%arg0: i32) -> (i32, i32) {
    %c0_i32 = arith.constant 0 : i32
    %c0_i32_0 = arith.constant 0 : i32
    %c0_i32_1 = arith.constant 0 : i32
    return %c0_i32, %c0_i32_0 : i32, i32
  }
  func.func @transform_10(%arg0: i32) -> (i32, i32) {
    %c0_i32 = arith.constant 0 : i32
    %c0_i32_0 = arith.constant 0 : i32
    %c0_i32_1 = arith.constant 0 : i32
    return %c0_i32, %c0_i32_0 : i32, i32
  }
  func.func @transform_11(%arg0: i32) -> (i32, i32) {
    %c0_i32 = arith.constant 0 : i32
    %c0_i32_0 = arith.constant 0 : i32
    %c0_i32_1 = arith.constant 0 : i32
    return %c0_i32, %c0_i32_0 : i32, i32
  }
  func.func @transform_12(%arg0: i32) -> (i32, i32) {
    %c0_i32 = arith.constant 0 : i32
    %c0_i32_0 = arith.constant 0 : i32
    %c0_i32_1 = arith.constant 0 : i32
    return %c0_i32, %c0_i32_0 : i32, i32
  }
  func.func @transform_13(%arg0: i32) -> (i32, i32) {
    %c0_i32 = arith.constant 0 : i32
    %c0_i32_0 = arith.constant 0 : i32
    %c0_i32_1 = arith.constant 0 : i32
    return %c0_i32, %c0_i32_0 : i32, i32
  }
  func.func @transform_14(%arg0: i32) -> (i32, i32, i32) {
    %c0_i32 = arith.constant 0 : i32
    %c0_i32_0 = arith.constant 0 : i32
    %c0_i32_1 = arith.constant 0 : i32
    return %arg0, %c0_i32, %c0_i32_0 : i32, i32, i32
  }
}

</mosaic_0001>

<bundles_post_ra>
// kernel: tpu_custom_call.1
= control target key start
LH: loop header
LB: loop body
LE: loop exit
PB: predicated region body
PF: predicated region fallthrough
CT: control target
= control target key end

     0   :  { %s8939_s0 = inlined_call_operand.vmem [shape: f32[4,32,64], index: 0, kind: input, shape index: {}]   ;;  %s8940_s1 = inlined_call_operand.vmem [shape: f32[256,32], index: 1, kind: input, shape index: {}]   ;;  %s8941_s2 = inlined_call_operand.vmem [shape: f32[32,96], index: 2, kind: input, shape index: {}]   ;;  %s8942_s3 = inlined_call_operand.vmem [shape: f32[32,32], index: 3, kind: input, shape index: {}]   ;;  %s8943_s4 = inlined_call_operand.vmem [shape: f32[32,32], index: 4, kind: input, shape index: {}]   ;;  %s8944_s5 = inlined_call_operand.vmem [shape: f32[32,32], index: 5, kind: input, shape index: {}]   ;;  %s8945_s6 = inlined_call_operand.vmem [shape: f32[1,96], index: 6, kind: input, shape index: {}]   ;;  %s8946_s7 = inlined_call_operand.vmem [shape: f32[1,32], index: 7, kind: input, shape index: {}]   ;;  %s8947_s8 = inlined_call_operand.vmem [shape: f32[1,32], index: 8, kind: input, shape index: {}]   ;;  %s8948_s9 = inlined_call_operand.vmem [shape: f32[1,32], index: 9, kind: input, shape index: {}]   ;;  %s8949_s10 = inlined_call_operand.vmem [shape: f32[1,32], index: 10, kind: input, shape index: {}]   ;;  %s8950_s11 = inlined_call_operand.vmem [shape: f32[1,32], index: 11, kind: input, shape index: {}]   ;;  %s8951_s12 = inlined_call_operand.vmem [shape: f32[1,32], index: 12, kind: input, shape index: {}]   ;;  %s8952_s13 = inlined_call_operand.vmem [shape: f32[1,32], index: 13, kind: input, shape index: {}]   ;;  %s8953_s14 = inlined_call_operand.hbm [shape: f32[4,32,64], index: 14, kind: output, shape index: {}]  }
   0x1   :  { %8988 = sst [smem:[#allocation35_spill]] %s8939_s0 }
   0x2   :  { %8989 = sst [smem:[#allocation36_spill]] %s8940_s1 }
   0x3   :  { %8990 = sst [smem:[#allocation37_spill]] %s8941_s2 }
   0x4   :  { %19 = vsyncpa [#allocation3], 0 }
   0x5   :  { %21 = vsyncpa [#allocation3 + $0x1], 0  ;;  %s6561_s29 = smov 0   ;;  %s6563_s30 = smov 0  }
   0x6   :  { %s6565_s15 = smov 0   ;;  %s6567_s16 = smov 0  }
   0x7 LB: > { %s6582_s17 = sadd.s32 4294967295, %s6479_s16   ;;  %s4904_s18 = sadd.s32 4294967294, %s6479_s16   ;;  %s6479_s16 = sphi %s6567_s16, %s9069_s16   ;;  %s6475_s15 = sphi %s6565_s15, %s9068_s15   ;;  %s6471_s30 = sphi %s6563_s30, %s9067_s30   ;;  %s6467_s29 = sphi %s6561_s29, %s9066_s29  }
   0x8   : > { %s6586_s19 = sadd.s32 1, %s6479_s16   ;;  %s333_s20 = sadd.s32 1, %s6475_s15 }
   0x9   : > { %s330_s21 = ssub.s32 %s6479_s16, %s6586_s19  ;;  %p343_p0 = scmp.ne.s32.totalorder %s6475_s15, %s6471_s30 }
   0xa   : > { %p331_p1 = scmp.eq.s32.totalorder %s330_s21, 0  ;;  %p344_p2 = scmp.eq.s32.totalorder %s6582_s17, 1 }
   0xb   : > { %p349_p3 = scmp.ne.s32.totalorder %s6471_s30, %s6467_s29  ;;  %p350_p4 = scmp.eq.s32.totalorder %s4904_s18, 1 }
   0xc   : > { %s6597_s22 = scalar_select %p331_p1, %s6475_s15, %s333_s20  }
   0xd   : > { %p6599_p5 = por %p344_p2, %p343_p0  ;;  %p6603_p6 = por %p350_p4, %p349_p3 }
   0xe   : > { %p4907_p7 = scmp.ge.s32.totalorder %s6479_s16, 1  ;;  %p417_p8 = scmp.lt.s32.totalorder %s6479_s16, 3 }
  0x10   : > { %p418_p9 = pnand %p4907_p7, %p417_p8 }
  0x12   : > { %421 = sbr.rel (%p418_p9) target bundleno = 2746 (0xaba), region = 76 }
  0x19   : > { %s4909_s25 = sshll.u32 %s6582_s17, 1  ;;  %s8993_s0 = sld [smem:[#allocation35_spill]]  ;;  %vm546_vm0 = vcmask 261120   ;;  %vm1854_vm2 = vcmask 523264  }
  0x1a   : > { %p465_p10 = scmp.lt.s32.totalorder %s4909_s25, 3  ;;  %s9010_s2 = sld [smem:[#allocation37_spill]]  ;;  %vm6927_vm1 = vmpackc.low %vm546_vm0, %vm546_vm0 }
  0x1b   : > { %s9011_s1 = sld [smem:[#allocation36_spill]]  ;;  %s461_s21 = sand.u32 1, %s6471_s30  }
  0x1c   : > { %s9071_s25 = smov (!%p465_p10, %s4909_s25), 3  ;;  %s5136_s27 = sshll.u32 %s6582_s17, 10 }
  0x1d   : > { %s5134_s26 = sshll.u32 %s9071_s25, 5  ;;  %s6481_s25 = smov 96  }
  0x1e   : > { %s8893_s20 = scalar_lea.hbm %s8953_s14, %s5136_s27 }
  0x1f   : > { %s469_s18 = scalar_lea.vmem %s8993_s0, %s5134_s26  ;;  %s6482_s26 = smov 64  }
  0x20   : > { %v472_v0 = vld [vmem:[%s469_s18] sm:$0xff]  ;;  %v473_v2 = vld [vmem:[%s469_s18 + $0x8] sm:$0xff]  ;;  %v474_v4 = vld [vmem:[%s469_s18 + $0x10] sm:$0xff] }
  0x21   : > { %480 = vxpose.xlu0.b32.start [1/4] (short) (narrow) %v472_v0, 64  ;;  %v476_v1 = vld [vmem:[%s469_s18 + $0x20] sm:$0xff]  ;;  %v477_v3 = vld [vmem:[%s469_s18 + $0x28] sm:$0xff]  ;;  %v478_v5 = vld [vmem:[%s469_s18 + $0x30] sm:$0xff] }
  0x22   : > { %512 = vxpose.xlu1.b32.start [1/4] (short) (narrow) %v476_v1, 64  ;;  %v475_v6 = vld [vmem:[%s469_s18 + $0x18] sm:$0xff] }
  0x23   : > { %v479_v7 = vld [vmem:[%s469_s18 + $0x38] sm:$0xff] }
  0x25   : > { %481 = vxpose.xlu0.b32.cont [2/4] (short) (narrow) %v473_v2, 64 }
  0x26   : > { %513 = vxpose.xlu1.b32.cont [2/4] (short) (narrow) %v477_v3, 64 }
  0x29   : > { %482 = vxpose.xlu0.b32.cont [3/4] (short) (narrow) %v474_v4, 64 }
  0x2a   : > { %514 = vxpose.xlu1.b32.cont [3/4] (short) (narrow) %v478_v5, 64 }
  0x2d   : > { %483 = vxpose.xlu0.b32.end [4/4] (short) (narrow) %v475_v6, 64 }
  0x2e   : > { %515 = vxpose.xlu1.b32.end [4/4] (short) (narrow) %v479_v7, 64 }
  0xa1   : > { %v6613_v8 = vpop.trf.xlu0 }
  0xa2   : > { %8994 = vst [vmem:[#allocation5_spill] sm:$0xff] %v6613_v8  ;;  %v547_v9 = vsel %vm546_vm0, %v6613_v8, 0.0  ;;  %v6617_v10 = vpop.trf.xlu1 }
  0xa3   : > { %8995 = vst [vmem:[#allocation6_spill] sm:$0xff] %v6617_v10  ;;  %548 = vadd.xlane.f32.xlu0 %v547_v9  ;;  %v571_v27 = vsel %vm546_vm0, %v6617_v10, 0.0 }
  0xa5   : > { %v6619_v11 = vpop.trf.xlu0 }
  0xa6   : > { %8996 = vst [vmem:[#allocation7_spill] sm:$0xff] %v6619_v11  ;;  %v550_v12 = vsel %vm546_vm0, %v6619_v11, 0.0  ;;  %v6623_v13 = vpop.trf.xlu1 }
  0xa7   : > { %8997 = vst [vmem:[#allocation8_spill] sm:$0xff] %v6623_v13  ;;  %551 = vadd.xlane.f32.xlu1 %v550_v12  ;;  %v574_v32 = vsel %vm546_vm0, %v6623_v13, 0.0 }
  0xa9   : > { %v6625_v14 = vpop.trf.xlu0 }
  0xaa   : > { %8998 = vst [vmem:[#allocation9_spill] sm:$0xff] %v6625_v14  ;;  %v553_v15 = vsel %vm546_vm0, %v6625_v14, 0.0  ;;  %v6629_v16 = vpop.trf.xlu1 }
  0xab   : > { %554 = vadd.xlane.f32.xlu1 %v553_v15  ;;  %8999 = vst [vmem:[#allocation10_spill] sm:$0xff] %v6629_v16  ;;  %v577_v31 = vsel %vm546_vm0, %v6629_v16, 0.0 }
  0xad   : > { %v6631_v17 = vpop.trf.xlu0 }
  0xae   : > { %9000 = vst [vmem:[#allocation11_spill] sm:$0xff] %v6631_v17  ;;  %v556_v18 = vsel %vm546_vm0, %v6631_v17, 0.0  ;;  %v6637_v20 = vpop.trf.xlu1 }
  0xaf   : > { %557 = vadd.xlane.f32.xlu1 %v556_v18  ;;  %9002 = vst [vmem:[#allocation13_spill] sm:$0xff] %v6637_v20  ;;  %v580_v35 = vsel %vm546_vm0, %v6637_v20, 0.0 }
  0xb1   : > { %v6635_v19 = vpop.trf.xlu0 }
  0xb2   : > { %9001 = vst [vmem:[#allocation12_spill] sm:$0xff] %v6635_v19  ;;  %v559_v21 = vsel %vm546_vm0, %v6635_v19, 0.0  ;;  %v6645_v24 = vpop.trf.xlu1 }
  0xb3   : > { %560 = vadd.xlane.f32.xlu0 %v559_v21  ;;  %9004 = vst [vmem:[#allocation15_spill] sm:$0xff] %v6645_v24  ;;  %v583_v34 = vsel %vm546_vm0, %v6645_v24, 0.0 }
  0xb5   : > { %v6641_v22 = vpop.trf.xlu0 }
  0xb6   : > { %9003 = vst [vmem:[#allocation14_spill] sm:$0xff] %v6641_v22  ;;  %v562_v23 = vsel %vm546_vm0, %v6641_v22, 0.0  ;;  %v6655_v29 = vpop.trf.xlu1 }
  0xb7   : > { %563 = vadd.xlane.f32.xlu1 %v562_v23  ;;  %9007 = vst [vmem:[#allocation18_spill] sm:$0xff] %v6655_v29  ;;  %v586_v37 = vsel %vm546_vm0, %v6655_v29, 0.0 }
  0xb9   : > { %v6647_v25 = vpop.trf.xlu0 }
  0xba   : > { %9005 = vst [vmem:[#allocation16_spill] sm:$0xff] %v6647_v25  ;;  %v565_v26 = vsel %vm546_vm0, %v6647_v25, 0.0  ;;  %v6663_v33 = vpop.trf.xlu1 }
  0xbb   : > { %566 = vadd.xlane.f32.xlu0 %v565_v26  ;;  %9008 = vst [vmem:[#allocation19_spill] sm:$0xff] %v6663_v33  ;;  %v589_v36 = vsel %vm546_vm0, %v6663_v33, 0.0 }
  0xbd   : > { %v6653_v28 = vpop.trf.xlu0 }
  0xbe   : > { %9006 = vst [vmem:[#allocation17_spill] sm:$0xff] %v6653_v28  ;;  %v568_v30 = vsel %vm546_vm0, %v6653_v28, 0.0  ;;  %v6673_v38 = vpop.trf.xlu1 }
  0xbf   : > { %572 = vadd.xlane.f32.xlu0 %v571_v27  ;;  %569 = vadd.xlane.f32.xlu1 %v568_v30  ;;  %9009 = vst [vmem:[#allocation20_spill] sm:$0xff] %v6673_v38  ;;  %v592_v39 = vsel %vm546_vm0, %v6673_v38, 0.0 }
  0xc3   : > { %578 = vadd.xlane.f32.xlu0 %v577_v31  ;;  %575 = vadd.xlane.f32.xlu1 %v574_v32 }
  0xc7   : > { %584 = vadd.xlane.f32.xlu0 %v583_v34  ;;  %581 = vadd.xlane.f32.xlu1 %v580_v35 }
  0xcb   : > { %590 = vadd.xlane.f32.xlu0 %v589_v36  ;;  %587 = vadd.xlane.f32.xlu1 %v586_v37 }
  0xcf   : > { %593 = vadd.xlane.f32.xlu1 %v592_v39 }
 0x130   : > { %v549_v40 = vpop.xlane.xlu0 %548 }
 0x131   : > { %v596_v41 = vmul.f32 0.03125, %v549_v40 }
 0x133   : > { %v6678_v42 = vsub.f32 %v6613_v8, %v596_v41 }
 0x134   : > { %v552_v43 = vpop.xlane.xlu1 %551 }
 0x135   : > { %v597_v44 = vmul.f32 0.03125, %v552_v43  ;;  %v628_v45 = vmul.f32 %v6678_v42, %v6678_v42 }
 0x137   : > { %v6683_v46 = vsub.f32 %v6619_v11, %v597_v44  ;;  %v644_v47 = vsel %vm546_vm0, %v628_v45, 0.0 }
 0x138   : > { %v555_v48 = vpop.xlane.xlu1 %554  ;;  %645 = vadd.xlane.f32.xlu0 %v644_v47  ;;  %v800_v47 = vld [vmem:[%s9010_s2] sm:$0xff] }
 0x139   : > { %v598_v49 = vmul.f32 0.03125, %v555_v48  ;;  %v629_v50 = vmul.f32 %v6683_v46, %v6683_v46  ;;  %v801_v48 = vld [vmem:[%s9010_s2 + $0x8] sm:$0xff] }
 0x13b   : > { %v6689_v51 = vsub.f32 %v6625_v14, %v598_v49  ;;  %v647_v52 = vsel %vm546_vm0, %v629_v50, 0.0 }
 0x13c   : > { %v558_v53 = vpop.xlane.xlu1 %557  ;;  %648 = vadd.xlane.f32.xlu1 %v647_v52 }
 0x13d   : > { %v599_v54 = vmul.f32 0.03125, %v558_v53  ;;  %v630_v55 = vmul.f32 %v6689_v51, %v6689_v51 }
 0x13f   : > { %v6695_v56 = vsub.f32 %v6631_v17, %v599_v54  ;;  %v650_v57 = vsel %vm546_vm0, %v630_v55, 0.0  ;;  %v5761_v54 = vpack.c.bf16 %v801_v48, %v800_v47 }
 0x140   : > { %651 = vadd.xlane.f32.xlu0 %v650_v57  ;;  %v561_v58 = vpop.xlane.xlu0 %560 }
 0x141   : > { %v600_v59 = vmul.f32 0.03125, %v561_v58  ;;  %v631_v60 = vmul.f32 %v6695_v56, %v6695_v56  ;;  %5762 = vmatprep.subr.bf16.mxu0 %v5761_v54 }
 0x142   : > { %5764 = vmatpush3.bf16.msra.mxu0 %v5761_v54 }
 0x143   : > { %v6701_v61 = vsub.f32 %v6635_v19, %v600_v59  ;;  %v653_v62 = vsel %vm546_vm0, %v631_v60, 0.0 }
 0x144   : > { %v564_v63 = vpop.xlane.xlu1 %563  ;;  %654 = vadd.xlane.f32.xlu1 %v653_v62 }
 0x145   : > { %v601_v0 = vmul.f32 0.03125, %v564_v63  ;;  %v632_v1 = vmul.f32 %v6701_v61, %v6701_v61  ;;  %v802_v63 = vld [vmem:[%s9010_s2 + $0x10] sm:$0xff] }
 0x147   : > { %v6707_v2 = vsub.f32 %v6641_v22, %v601_v0  ;;  %v656_v3 = vsel %vm546_vm0, %v632_v1, 0.0  ;;  %v803_v0 = vld [vmem:[%s9010_s2 + $0x18] sm:$0xff] }
 0x148   : > { %657 = vadd.xlane.f32.xlu0 %v656_v3  ;;  %v567_v4 = vpop.xlane.xlu0 %566 }
 0x149   : > { %v602_v5 = vmul.f32 0.03125, %v567_v4  ;;  %v633_v6 = vmul.f32 %v6707_v2, %v6707_v2 }
 0x14b   : > { %v6713_v7 = vsub.f32 %v6647_v25, %v602_v5  ;;  %v659_v9 = vsel %vm546_vm0, %v633_v6, 0.0  ;;  %v5765_v6 = vpack.c.bf16 %v803_v0, %v802_v63 }
 0x14c   : > { %660 = vadd.xlane.f32.xlu1 %v659_v9  ;;  %v570_v12 = vpop.xlane.xlu1 %569  ;;  %v573_v15 = vpop.xlane.xlu0 %572 }
 0x14d   : > { %v603_v18 = vmul.f32 0.03125, %v570_v12  ;;  %v604_v21 = vmul.f32 0.03125, %v573_v15  ;;  %v634_v23 = vmul.f32 %v6713_v7, %v6713_v7  ;;  %5766 = vmatprep.subr.bf16.mxu0 %v5765_v6 }
 0x14e   : > { %5768 = vmatpush3.bf16.msra.mxu0 %v5765_v6 }
 0x14f   : > { %v6719_v26 = vsub.f32 %v6653_v28, %v603_v18  ;;  %v6722_v27 = vsub.f32 %v6617_v10, %v604_v21  ;;  %v662_v30 = vsel %vm546_vm0, %v634_v23, 0.0 }
 0x150   : > { %v576_v31 = vpop.xlane.xlu1 %575  ;;  %663 = vadd.xlane.f32.xlu0 %v662_v30  ;;  %v579_v32 = vpop.xlane.xlu0 %578 }
 0x151   : > { %v605_v34 = vmul.f32 0.03125, %v576_v31  ;;  %v606_v35 = vmul.f32 0.03125, %v579_v32  ;;  %v635_v36 = vmul.f32 %v6719_v26, %v6719_v26  ;;  %v636_v37 = vmul.f32 %v6722_v27, %v6722_v27 }
 0x153   : > { %v6730_v39 = vsub.f32 %v6623_v13, %v605_v34  ;;  %v6733_v40 = vsub.f32 %v6629_v16, %v606_v35  ;;  %v665_v41 = vsel %vm546_vm0, %v635_v36, 0.0  ;;  %v668_v43 = vsel %vm546_vm0, %v636_v37, 0.0 }
 0x154   : > { %666 = vadd.xlane.f32.xlu1 %v665_v41  ;;  %v582_v44 = vpop.xlane.xlu1 %581  ;;  %669 = vadd.xlane.f32.xlu0 %v668_v43  ;;  %v585_v45 = vpop.xlane.xlu0 %584 }
 0x155   : > { %v607_v49 = vmul.f32 0.03125, %v582_v44  ;;  %v608_v50 = vmul.f32 0.03125, %v585_v45  ;;  %v637_v52 = vmul.f32 %v6730_v39, %v6730_v39  ;;  %v638_v53 = vmul.f32 %v6733_v40, %v6733_v40 }
 0x157   : > { %v6748_v55 = vsub.f32 %v6637_v20, %v607_v49  ;;  %v6751_v57 = vsub.f32 %v6645_v24, %v608_v50  ;;  %v671_v58 = vsel %vm546_vm0, %v637_v52, 0.0  ;;  %v674_v59 = vsel %vm546_vm0, %v638_v53, 0.0 }
 0x158   : > { %672 = vadd.xlane.f32.xlu1 %v671_v58  ;;  %v588_v60 = vpop.xlane.xlu1 %587  ;;  %675 = vadd.xlane.f32.xlu0 %v674_v59  ;;  %v591_v62 = vpop.xlane.xlu0 %590 }
 0x159   : > { %v609_v1 = vmul.f32 0.03125, %v588_v60  ;;  %v610_v3 = vmul.f32 0.03125, %v591_v62  ;;  %v639_v4 = vmul.f32 %v6748_v55, %v6748_v55  ;;  %v640_v5 = vmul.f32 %v6751_v57, %v6751_v57  ;;  %v6788_v60 = vld [vmem:[%s8946_s7] ss:$0 sm:$0xff] }
 0x15b   : > { %v6766_v9 = vsub.f32 %v6655_v29, %v609_v1  ;;  %v6769_v12 = vsub.f32 %v6663_v33, %v610_v3  ;;  %v677_v15 = vsel %vm546_vm0, %v639_v4, 0.0  ;;  %v680_v18 = vsel %vm546_vm0, %v640_v5, 0.0  ;;  %v6794_v1 = vld [vmem:[%s8947_s8] ss:$0 sm:$0xff] }
 0x15c   : > { %678 = vadd.xlane.f32.xlu1 %v677_v15  ;;  %v594_v21 = vpop.xlane.xlu1 %593  ;;  %681 = vadd.xlane.f32.xlu0 %v680_v18 }
 0x15d   : > { %v611_v23 = vmul.f32 0.03125, %v594_v21  ;;  %v641_v30 = vmul.f32 %v6766_v9, %v6766_v9  ;;  %v642_v31 = vmul.f32 %v6769_v12, %v6769_v12 }
 0x15f   : > { %v6778_v32 = vsub.f32 %v6673_v38, %v611_v23  ;;  %v683_v34 = vsel %vm546_vm0, %v641_v30, 0.0  ;;  %v686_v35 = vsel %vm546_vm0, %v642_v31, 0.0 }
 0x160   : > { %684 = vadd.xlane.f32.xlu1 %v683_v34  ;;  %687 = vadd.xlane.f32.xlu0 %v686_v35 }
 0x161   : > { %v643_v36 = vmul.f32 %v6778_v32, %v6778_v32 }
 0x163   : > { %v689_v37 = vsel %vm546_vm0, %v643_v36, 0.0 }
 0x164   : > { %690 = vadd.xlane.f32.xlu1 %v689_v37 }
 0x1c5   : > { %v646_v41 = vpop.xlane.xlu0 %645 }
 0x1c6   : > { %v692_v43 = vmul.f32 0.03125, %v646_v41 }
 0x1c8   : > { %v708_v44 = vadd.f32 1e-05, %v692_v43 }
 0x1c9   : > { %v649_v45 = vpop.xlane.xlu1 %648 }
 0x1ca   : > { %6001 = vrsqrt.f32 %v708_v44  ;;  %v693_v47 = vmul.f32 0.03125, %v649_v45 }
 0x1cc   : > { %v709_v48 = vadd.f32 1e-05, %v693_v47 }
 0x1cd   : > { %v652_v49 = vpop.xlane.xlu0 %651 }
 0x1ce   : > { %6003 = vrsqrt.f32 %v709_v48  ;;  %v694_v50 = vmul.f32 0.03125, %v652_v49 }
 0x1d0   : > { %v710_v52 = vadd.f32 1e-05, %v694_v50 }
 0x1d1   : > { %v655_v53 = vpop.xlane.xlu1 %654 }
 0x1d2   : > { %6005 = vrsqrt.f32 %v710_v52  ;;  %v695_v54 = vmul.f32 0.03125, %v655_v53 }
 0x1d4   : > { %v6002_v58 = vpop.eup %6001  ;;  %v711_v59 = vadd.f32 1e-05, %v695_v54 }
 0x1d5   : > { %v658_v62 = vpop.xlane.xlu0 %657  ;;  %v740_v63 = vmul.f32 %v6002_v58, %v6678_v42 }
 0x1d6   : > { %6007 = vrsqrt.f32 %v711_v59  ;;  %v696_v0 = vmul.f32 0.03125, %v658_v62 }
 0x1d7   : > { %v762_v3 = vmul.f32 %v6788_v60, %v740_v63 }
 0x1d8   : > { %v6004_v4 = vpop.eup %6003  ;;  %v712_v5 = vadd.f32 1e-05, %v696_v0 }
 0x1d9   : > { %v661_v6 = vpop.xlane.xlu1 %660  ;;  %v784_v15 = vadd.f32 %v6794_v1, %v762_v3  ;;  %v741_v18 = vmul.f32 %v6004_v4, %v6683_v46 }
 0x1da   : > { %6009 = vrsqrt.f32 %v712_v5  ;;  %v697_v21 = vmul.f32 0.03125, %v661_v6 }
 0x1db   : > { %5385 = vmatprep.mubr.msk.f32.mxu0 %vm546_vm0, %v784_v15  ;;  %v763_v42 = vmul.f32 %v6788_v60, %v741_v18 }
 0x1dc   : > { %v6006_v23 = vpop.eup %6005  ;;  %v713_v30 = vadd.f32 1e-05, %v697_v21 }
 0x1dd   : > { %v664_v31 = vpop.xlane.xlu0 %663  ;;  %v785_v34 = vadd.f32 %v6794_v1, %v763_v42  ;;  %v742_v35 = vmul.f32 %v6006_v23, %v6689_v51 }
 0x1de   : > { %6011 = vrsqrt.f32 %v713_v30  ;;  %v698_v36 = vmul.f32 0.03125, %v664_v31 }
 0x1df   : > { %5386 = vmatmul.mubr.msk.f32.vlgmr.msra.gmra.mrb[0].mxu0 %vm546_vm0, %v785_v34  ;;  %v764_v37 = vmul.f32 %v6788_v60, %v742_v35 }
 0x1e0   : > { %v6008_v46 = vpop.eup %6007  ;;  %v714_v41 = vadd.f32 1e-05, %v698_v36 }
 0x1e1   : > { %v667_v43 = vpop.xlane.xlu1 %666  ;;  %v670_v44 = vpop.xlane.xlu0 %669  ;;  %v786_v45 = vadd.f32 %v6794_v1, %v764_v37  ;;  %v743_v47 = vmul.f32 %v6008_v46, %v6695_v56 }
 0x1e2   : > { %6013 = vrsqrt.f32 %v714_v41  ;;  %v699_v48 = vmul.f32 0.03125, %v667_v43  ;;  %v700_v49 = vmul.f32 0.03125, %v670_v44 }
 0x1e3   : > { %5388 = vmatprep.mubr.msk.f32.mxu0 %vm546_vm0, %v786_v45  ;;  %v765_v51 = vmul.f32 %v6788_v60, %v743_v47 }
 0x1e4   : > { %v6010_v50 = vpop.eup %6009  ;;  %v715_v52 = vadd.f32 1e-05, %v699_v48  ;;  %v716_v53 = vadd.f32 1e-05, %v700_v49 }
 0x1e5   : > { %v673_v54 = vpop.xlane.xlu1 %672  ;;  %v676_v58 = vpop.xlane.xlu0 %675  ;;  %v787_v59 = vadd.f32 %v6794_v1, %v765_v51  ;;  %v744_v62 = vmul.f32 %v6010_v50, %v6701_v61 }
 0x1e6   : > { %6015 = vrsqrt.f32 %v715_v52  ;;  %v701_v63 = vmul.f32 0.03125, %v673_v54  ;;  %v702_v0 = vmul.f32 0.03125, %v676_v58 }
 0x1e7   : > { %6017 = vrsqrt.f32 %v716_v53  ;;  %5389 = vmatmul.mubr.msk.f32.gmra.mrb[2].mxu0 %vm546_vm0, %v787_v59  ;;  %v766_v56 = vmul.f32 %v6788_v60, %v744_v62 }
 0x1e8   : > { %v6012_v3 = vpop.eup %6011  ;;  %v717_v4 = vadd.f32 1e-05, %v701_v63  ;;  %v718_v5 = vadd.f32 1e-05, %v702_v0 }
 0x1e9   : > { %v679_v6 = vpop.xlane.xlu1 %678  ;;  %v682_v15 = vpop.xlane.xlu0 %681  ;;  %v788_v18 = vadd.f32 %v6794_v1, %v766_v56  ;;  %v745_v21 = vmul.f32 %v6012_v3, %v6707_v2 }
 0x1ea   : > { %6019 = vrsqrt.f32 %v717_v4  ;;  %v703_v42 = vmul.f32 0.03125, %v679_v6  ;;  %v704_v61 = vmul.f32 0.03125, %v682_v15 }
 0x1eb   : > { %6021 = vrsqrt.f32 %v718_v5  ;;  %5391 = vmatprep.mubr.msk.f32.mxu0 %vm546_vm0, %v788_v18  ;;  %v767_v23 = vmul.f32 %v6788_v60, %v745_v21 }
 0x1ec   : > { %v6014_v30 = vpop.eup %6013  ;;  %v719_v31 = vadd.f32 1e-05, %v703_v42  ;;  %v720_v34 = vadd.f32 1e-05, %v704_v61 }
 0x1ed   : > { %v685_v35 = vpop.xlane.xlu1 %684  ;;  %v688_v36 = vpop.xlane.xlu0 %687  ;;  %v789_v37 = vadd.f32 %v6794_v1, %v767_v23  ;;  %v746_v46 = vmul.f32 %v6014_v30, %v6713_v7 }
 0x1ee   : > { %6023 = vrsqrt.f32 %v719_v31  ;;  %v705_v41 = vmul.f32 0.03125, %v685_v35  ;;  %v706_v2 = vmul.f32 0.03125, %v688_v36 }
 0x1ef   : > { %6025 = vrsqrt.f32 %v720_v34  ;;  %5392 = vmatmul.mubr.msk.f32.gmra.mrb[4].mxu0 %vm546_vm0, %v789_v37  ;;  %v768_v43 = vmul.f32 %v6788_v60, %v746_v46 }
 0x1f0   : > { %v6016_v44 = vpop.eup %6015  ;;  %v721_v45 = vadd.f32 1e-05, %v705_v41  ;;  %v722_v47 = vadd.f32 1e-05, %v706_v2  ;;  %v1004_v41 = vld [vmem:[%s9011_s1] sm:$0xff] }
 0x1f1   : > { %v6018_v48 = vpop.eup %6017  ;;  %v691_v49 = vpop.xlane.xlu1 %690  ;;  %v790_v51 = vadd.f32 %v6794_v1, %v768_v43  ;;  %v747_v50 = vmul.f32 %v6016_v44, %v6719_v26  ;;  %v1036_v43 = vmul.f32 0.35355338, %v1004_v41  ;;  %v1022_v41 = vld [vmem:[%s9011_s1 + $0x90] sm:$0xff] }
 0x1f2   : > { %6027 = vrsqrt.f32 %v721_v45  ;;  %v707_v52 = vmul.f32 0.03125, %v691_v49  ;;  %v748_v7 = vmul.f32 %v6018_v48, %v6722_v27 }
 0x1f3   : > { %6029 = vrsqrt.f32 %v722_v47  ;;  %5394 = vmatprep.mubr.msk.f32.mxu0 %vm546_vm0, %v790_v51  ;;  %v769_v53 = vmul.f32 %v6788_v60, %v747_v50 }
 0x1f4   : > { %v6020_v54 = vpop.eup %6019  ;;  %v723_v58 = vadd.f32 1e-05, %v707_v52  ;;  %v770_v59 = vmul.f32 %v6788_v60, %v748_v7 }
 0x1f5   : > { %v6022_v62 = vpop.eup %6021  ;;  %v791_v63 = vadd.f32 %v6794_v1, %v769_v53  ;;  %v749_v0 = vmul.f32 %v6020_v54, %v6730_v39 }
 0x1f6   : > { %6031 = vrsqrt.f32 %v723_v58  ;;  %v792_v26 = vadd.f32 %v6794_v1, %v770_v59  ;;  %v750_v56 = vmul.f32 %v6022_v62, %v6733_v40 }
 0x1f7   : > { %5395 = vmatmul.mubr.msk.f32.gmra.mrb[6].mxu0 %vm546_vm0, %v791_v63  ;;  %v771_v27 = vmul.f32 %v6788_v60, %v749_v0 }
 0x1f8   : > { %v6024_v3 = vpop.eup %6023  ;;  %5397 = vmatprep.mubr.msk.f32.mxu0 %vm546_vm0, %v792_v26  ;;  %v772_v4 = vmul.f32 %v6788_v60, %v750_v56 }
 0x1f9   : > { %v6026_v5 = vpop.eup %6025  ;;  %v793_v6 = vadd.f32 %v6794_v1, %v771_v27  ;;  %v751_v15 = vmul.f32 %v6024_v3, %v6748_v55 }
 0x1fa   : > { %v794_v39 = vadd.f32 %v6794_v1, %v772_v4  ;;  %v752_v18 = vmul.f32 %v6026_v5, %v6751_v57 }
 0x1fb   : > { %5398 = vmatmul.mubr.msk.f32.gmra.mrb[8].mxu0 %vm546_vm0, %v793_v6  ;;  %v773_v40 = vmul.f32 %v6788_v60, %v751_v15 }
 0x1fc   : > { %v6028_v21 = vpop.eup %6027  ;;  %5400 = vmatprep.mubr.msk.f32.mxu0 %vm546_vm0, %v794_v39  ;;  %v774_v42 = vmul.f32 %v6788_v60, %v752_v18 }
 0x1fd   : > { %v6030_v61 = vpop.eup %6029  ;;  %v795_v23 = vadd.f32 %v6794_v1, %v773_v40  ;;  %v753_v30 = vmul.f32 %v6028_v21, %v6766_v9 }
 0x1fe   : > { %v796_v55 = vadd.f32 %v6794_v1, %v774_v42  ;;  %v754_v31 = vmul.f32 %v6030_v61, %v6769_v12 }
 0x1ff   : > { %5401 = vmatmul.mubr.msk.f32.gmra.mrb[10].mxu0 %vm546_vm0, %v795_v23  ;;  %v775_v57 = vmul.f32 %v6788_v60, %v753_v30 }
 0x200   : > { %v6032_v34 = vpop.eup %6031  ;;  %5403 = vmatprep.mubr.msk.f32.mxu0 %vm546_vm0, %v796_v55  ;;  %v776_v35 = vmul.f32 %v6788_v60, %v754_v31 }
 0x201   : > { %v797_v36 = vadd.f32 %v6794_v1, %v775_v57  ;;  %v755_v37 = vmul.f32 %v6032_v34, %v6778_v32  ;;  %v4914_v32 = vld [vmem:[%s8945_s6] ss:$0 sm:$0xff] }
 0x202   : > { %v798_v46 = vadd.f32 %v6794_v1, %v776_v35 }
 0x203   : > { %5404 = vmatmul.mubr.msk.f32.gmra.mrb[12].mxu0 %vm546_vm0, %v797_v36  ;;  %v777_v9 = vmul.f32 %v6788_v60, %v755_v37 }
 0x204   : > { %5406 = vmatprep.mubr.msk.f32.mxu0 %vm546_vm0, %v798_v46 }
 0x205   : > { %v799_v12 = vadd.f32 %v6794_v1, %v777_v9 }
 0x207   : > { %5407 = vmatmul.mubr.msk.f32.gmra.mrb[14].mxu0 %vm546_vm0, %v799_v12 }
 0x2b2   : > { %v5387_v2 = vpop.f32.mrb[0].mxu0 }
 0x2b3   : > { %v6865_v44 = vadd.f32 %v5387_v2, %v4914_v32  ;;  %v925_v45 = vpop.f32.mrb[1].mxu0 }
 0x2b4   : > { %v6867_v60 = vadd.f32 %v4914_v32, %v925_v45 }
 0x2b6   : > { %v5921_v1 = vpack.i.bf16 %v6865_v44, %v6867_v60  ;;  %v1068_v47 = vmul.f32 %v1036_v43, %v6867_v60 }
 0x2b8   : > { %5922 = vrot.lane.b32.xlu0 %v5921_v1, %s6481_s25  ;;  %5425 = vmatprep.mubr.msk.f32.mxu1 %vm546_vm0, %v1068_v47 }
 0x2ba   : > { %v5390_v48 = vpop.f32.mrb[2].mxu0 }
 0x2bb   : > { %v6874_v49 = vadd.f32 %v5390_v48, %v4914_v32  ;;  %v935_v51 = vpop.f32.mrb[3].mxu0 }
 0x2bc   : > { %v6876_v50 = vadd.f32 %v4914_v32, %v935_v51 }
 0x2be   : > { %v5926_v52 = vpack.i.bf16 %v6874_v49, %v6876_v50 }
 0x2c0   : > { %5927 = vrot.lane.b32.xlu1 %v5926_v52, %s6481_s25 }
 0x2c2   : > { %v5393_v7 = vpop.f32.mrb[4].mxu0 }
 0x2c3   : > { %v6881_v53 = vadd.f32 %v5393_v7, %v4914_v32  ;;  %v945_v54 = vpop.f32.mrb[5].mxu0 }
 0x2c4   : > { %v6883_v58 = vadd.f32 %v4914_v32, %v945_v54 }
 0x2c6   : > { %v5931_v59 = vpack.i.bf16 %v6881_v53, %v6883_v58 }
 0x2c8   : > { %5932 = vrot.lane.b32.xlu1 %v5931_v59, %s6481_s25 }
 0x2ca   : > { %v5396_v62 = vpop.f32.mrb[6].mxu0 }
 0x2cb   : > { %v6888_v63 = vadd.f32 %v5396_v62, %v4914_v32  ;;  %v955_v0 = vpop.f32.mrb[7].mxu0 }
 0x2cc   : > { %v6890_v26 = vadd.f32 %v4914_v32, %v955_v0 }
 0x2ce   : > { %v5399_v56 = vpop.f32.mrb[8].mxu0  ;;  %v5941_v27 = vpack.i.bf16 %v6888_v63, %v6890_v26 }
 0x2cf   : > { %v6894_v3 = vadd.f32 %v5399_v56, %v4914_v32  ;;  %v965_v4 = vpop.f32.mrb[9].mxu0  ;;  %v1005_v56 = vld [vmem:[%s9011_s1 + $0x8] sm:$0xff] }
 0x2d0   : > { %v6896_v5 = vadd.f32 %v4914_v32, %v965_v4  ;;  %5942 = vrot.lane.b32.xlu1 %v5941_v27, %s6481_s25 }
 0x2d2   : > { %v5402_v6 = vpop.f32.mrb[10].mxu0  ;;  %v5936_v15 = vpack.i.bf16 %v6894_v3, %v6896_v5  ;;  %v1100_v39 = vmul.f32 %v1036_v43, %v6896_v5 }
 0x2d3   : > { %v6902_v18 = vadd.f32 %v5402_v6, %v4914_v32  ;;  %v975_v40 = vpop.f32.mrb[11].mxu0  ;;  %v1006_v6 = vld [vmem:[%s9011_s1 + $0x10] sm:$0xff] }
 0x2d4   : > { %v6904_v21 = vadd.f32 %v4914_v32, %v975_v40  ;;  %5937 = vrot.lane.b32.xlu0 %v5936_v15, %s6481_s25  ;;  %5489 = vmatprep.mubr.msk.f32.mxu0 %vm546_vm0, %v1100_v39  ;;  %v6953_v39 = vmul.f32 0.35355338, %v1005_v56 }
 0x2d6   : > { %v5405_v42 = vpop.f32.mrb[12].mxu0  ;;  %v5946_v61 = vpack.i.bf16 %v6902_v18, %v6904_v21 }
 0x2d7   : > { %v6910_v23 = vadd.f32 %v5405_v42, %v4914_v32  ;;  %v985_v30 = vpop.f32.mrb[13].mxu0  ;;  %v6955_v42 = vmul.f32 0.35355338, %v1006_v6 }
 0x2d8   : > { %v6912_v55 = vadd.f32 %v4914_v32, %v985_v30  ;;  %5947 = vrot.lane.b32.xlu0 %v5946_v61, %s6481_s25 }
 0x2da   : > { %v5408_v31 = vpop.f32.mrb[14].mxu0  ;;  %v5951_v57 = vpack.i.bf16 %v6910_v23, %v6912_v55 }
 0x2db   : > { %v6917_v34 = vadd.f32 %v5408_v31, %v4914_v32  ;;  %v995_v35 = vpop.f32.mrb[15].mxu0 }
 0x2dc   : > { %v6919_v36 = vadd.f32 %v4914_v32, %v995_v35  ;;  %5952 = vrot.lane.b32.xlu1 %v5951_v57, %s6481_s25 }
 0x2de   : > { %v5956_v37 = vpack.i.bf16 %v6917_v34, %v6919_v36 }
 0x2e0   : > { %5962 = vrot.lane.b32.xlu1 %v5921_v1, %s6482_s26  ;;  %5957 = vrot.lane.b32.xlu0 %v5956_v37, %s6481_s25  ;;  %s4908_s25 = sshll.u32 %s461_s21, 6 }
 0x2e4   : > { %5972 = vrot.lane.b32.xlu1 %v5931_v59, %s6482_s26  ;;  %5967 = vrot.lane.b32.xlu0 %v5926_v52, %s6482_s26 }
 0x2e8   : > { %5982 = vrot.lane.b32.xlu1 %v5936_v15, %s6482_s26  ;;  %5977 = vrot.lane.b32.xlu0 %v5941_v27, %s6482_s26 }
 0x2ec   : > { %5992 = vrot.lane.b32.xlu1 %v5951_v57, %s6482_s26  ;;  %5987 = vrot.lane.b32.xlu0 %v5946_v61, %s6482_s26  ;;  %v1007_v61 = vld [vmem:[%s9011_s1 + $0x18] sm:$0xff]  ;;  %v1008_v57 = vld [vmem:[%s9011_s1 + $0x20] sm:$0xff] }
 0x2f0   : > { %5997 = vrot.lane.b32.xlu0 %v5956_v37, %s6482_s26  ;;  %v1069_v37 = vmul.f32 %v6953_v39, %v6865_v44  ;;  %s463_s26 = scalar_lea.vmem [#allocation2], %s4908_s25  ;;  %s8898_s25 = scalar_lea.sflag [#allocation3], %s461_s21 }
 0x2f1   : > { %s4842_s28 = sshll.u32 %s463_s26, 4  ;;  %s8895_s28 = int_to_ptr.vmem [resolvable:$true] %s4842_s28 }
 0x2f2   : > { %s6417_s17 = scalar_lea.vmem %s8895_s28, 1024 }
 0x2f3   : > { %p6418_p11 = scmp.ne.s32.totalorder %s8895_s28, %s6417_s17 }
 0x2f5   : > { %p6419_p12 = pnand %p6418_p11, %p6599_p5 }
 0x2f7   : > { %p6420_p13 = pneg %p6419_p12 }
 0x32a   : > { %v5923_v46 = vpop.permute.xlu0 %5922 }
 0x32b   : > { %v5925_v9 = vunpack.i.h.bf16 %v5923_v46  ;;  %v5924_v12 = vunpack.i.l.bf16 %v5923_v46  ;;  %v6969_v46 = vmul.f32 0.35355338, %v1007_v61 }
 0x32d   : > { %v5769_v32 = vpack.c.bf16 %v5925_v9, %v5924_v12  ;;  %v1070_v12 = vmul.f32 %v6955_v42, %v6876_v50 }
 0x32f   : > { %5771 = vmatprep.subr.msk.bf16.mxu1 %vm6927_vm1, %v5769_v32 }
 0x330   : > { %5774 = vmatpush3.bf16.xpose.msk.msra.mxu1 %vm6927_vm1, %v5769_v32  ;;  %v6973_v32 = vmul.f32 0.35355338, %v1008_v57  ;;  %v1013_v57 = vld [vmem:[%s9011_s1 + $0x48] sm:$0xff] }
 0x332   : > { %v5928_v2 = vpop.permute.xlu1 %5927 }
 0x333   : > { %v5930_v43 = vunpack.i.h.bf16 %v5928_v2  ;;  %v5929_v45 = vunpack.i.l.bf16 %v5928_v2  ;;  %v1009_v2 = vld [vmem:[%s9011_s1 + $0x28] sm:$0xff] }
 0x335   : > { %v5775_v1 = vpack.c.bf16 %v5930_v43, %v5929_v45 }
 0x337   : > { %5777 = vmatprep.subr.msk.bf16.mxu1 %vm6927_vm1, %v5775_v1 }
 0x338   : > { %5780 = vmatpush3.bf16.xpose.msk.msra.mxu1 %vm6927_vm1, %v5775_v1  ;;  %v1010_v1 = vld [vmem:[%s9011_s1 + $0x30] sm:$0xff] }
 0x33a   : > { %v5933_v47 = vpop.permute.xlu1 %5932 }
 0x33b   : > { %v5935_v48 = vunpack.i.h.bf16 %v5933_v47  ;;  %v5934_v51 = vunpack.i.l.bf16 %v5933_v47  ;;  %v1071_v47 = vmul.f32 %v6969_v46, %v6874_v49 }
 0x33d   : > { %v5781_v52 = vpack.c.bf16 %v5935_v48, %v5934_v51  ;;  %v6987_v48 = vmul.f32 0.35355338, %v1009_v2  ;;  %v1014_v2 = vld [vmem:[%s9011_s1 + $0x50] sm:$0xff] }
 0x33f   : > { %5783 = vmatprep.subr.msk.bf16.mxu1 %vm6927_vm1, %v5781_v52 }
 0x340   : > { %5786 = vmatpush3.bf16.xpose.msk.msra.mxu1 %vm6927_vm1, %v5781_v52 }
 0x342   : > { %v5943_v7 = vpop.permute.xlu1 %5942 }
 0x343   : > { %v5945_v54 = vunpack.i.h.bf16 %v5943_v7  ;;  %v5944_v59 = vunpack.i.l.bf16 %v5943_v7  ;;  %v1072_v7 = vmul.f32 %v6973_v32, %v6883_v58 }
 0x345   : > { %v5787_v62 = vpack.c.bf16 %v5945_v54, %v5944_v59  ;;  %v6991_v54 = vmul.f32 0.35355338, %v1010_v1  ;;  %v1011_v59 = vld [vmem:[%s9011_s1 + $0x38] sm:$0xff] }
 0x346   : > { %v5938_v0 = vpop.permute.xlu0 %5937 }
 0x347   : > { %v5940_v27 = vunpack.i.h.bf16 %v5938_v0  ;;  %v5939_v4 = vunpack.i.l.bf16 %v5938_v0  ;;  %5789 = vmatprep.subr.msk.bf16.mxu1 %vm6927_vm1, %v5787_v62 }
 0x348   : > { %5792 = vmatpush3.bf16.xpose.msk.msra.mxu1 %vm6927_vm1, %v5787_v62 }
 0x349   : > { %v5793_v15 = vpack.c.bf16 %v5940_v27, %v5939_v4  ;;  %v1012_v27 = vld [vmem:[%s9011_s1 + $0x40] sm:$0xff]  ;;  %v1073_v4 = vmul.f32 %v6987_v48, %v6881_v53 }
 0x34a   : > { %v5948_v40 = vpop.permute.xlu0 %5947 }
 0x34b   : > { %v5950_v30 = vunpack.i.h.bf16 %v5948_v40  ;;  %v5949_v31 = vunpack.i.l.bf16 %v5948_v40  ;;  %5795 = vmatprep.subr.msk.bf16.mxu0 %vm6927_vm1, %v5793_v15 }
 0x34c   : > { %5798 = vmatpush3.bf16.xpose.msk.msra.mxu0 %vm6927_vm1, %v5793_v15  ;;  %v7007_v15 = vmul.f32 0.35355338, %v1011_v59  ;;  %v7027_v59 = vmul.f32 0.35355338, %v1014_v2  ;;  %v1018_v2 = vld [vmem:[%s9011_s1 + $0x70] sm:$0xff] }
 0x34d   : > { %v5799_v35 = vpack.c.bf16 %v5950_v30, %v5949_v31  ;;  %v1074_v30 = vmul.f32 %v6991_v54, %v6890_v26  ;;  %v7011_v31 = vmul.f32 0.35355338, %v1012_v27  ;;  %v1016_v27 = vld [vmem:[%s9011_s1 + $0x60] sm:$0xff] }
 0x34e   : > { %v5953_v9 = vpop.permute.xlu1 %5952  ;;  %v1075_v1 = vmul.f32 %v7007_v15, %v6888_v63 }
 0x34f   : > { %v5955_v43 = vunpack.i.h.bf16 %v5953_v9  ;;  %v5954_v45 = vunpack.i.l.bf16 %v5953_v9  ;;  %5426 = vmatmul.mubr.msk.f32.vlgmr.msra.gmra.mrb[0].mxu1 %vm546_vm0, %v1069_v37  ;;  %5801 = vmatprep.subr.msk.bf16.mxu0 %vm6927_vm1, %v5799_v35 }
 0x350   : > { %5428 = vmatprep.mubr.msk.f32.mxu1 %vm546_vm0, %v1070_v12 }
 0x351   : > { %v5805_v62 = vpack.c.bf16 %v5955_v43, %v5954_v45 }
 0x352   : > { %v5963_v51 = vpop.permute.xlu1 %5962  ;;  %v5958_v52 = vpop.permute.xlu0 %5957 }
 0x353   : > { %v5965_v0 = vunpack.i.h.bf16 %v5963_v51  ;;  %v5964_v56 = vunpack.i.l.bf16 %v5963_v51  ;;  %5429 = vmatmul.mubr.msk.f32.gmra.mrb[2].mxu1 %vm546_vm0, %v1071_v47  ;;  %v5959_v37 = vunpack.i.l.bf16 %v5958_v52  ;;  %v7023_v51 = vmul.f32 0.35355338, %v1013_v57 }
 0x354   : > { %5431 = vmatprep.mubr.msk.f32.mxu1 %vm546_vm0, %v1072_v7  ;;  %5804 = vmatpush3.bf16.xpose.msk.msra.mxu0 %vm6927_vm1, %v5799_v35  ;;  %v5960_v35 = vunpack.i.h.bf16 %v5958_v52  ;;  %v1076_v7 = vmul.f32 %v7011_v31, %v6867_v60 }
 0x355   : > { %5807 = vmatprep.subr.msk.bf16.mxu0 %vm6927_vm1, %v5805_v62  ;;  %v5817_v6 = vpack.c.bf16 %v5965_v0, %v5964_v56  ;;  %v1015_v0 = vld [vmem:[%s9011_s1 + $0x58] sm:$0xff] }
 0x356   : > { %v5973_v40 = vpop.permute.xlu1 %5972  ;;  %v5968_v61 = vpop.permute.xlu0 %5967  ;;  %v5811_v56 = vpack.c.bf16 %v5960_v35, %v5959_v37  ;;  %v7043_v57 = vmul.f32 0.35355338, %v1015_v0  ;;  %v1078_v35 = vmul.f32 %v7027_v59, %v6876_v50  ;;  %v7047_v37 = vmul.f32 0.35355338, %v1016_v27  ;;  %v1020_v27 = vld [vmem:[%s9011_s1 + $0x80] sm:$0xff] }
 0x357   : > { %v5970_v9 = vunpack.i.h.bf16 %v5968_v61  ;;  %v5969_v12 = vunpack.i.l.bf16 %v5968_v61  ;;  %5432 = vmatmul.mubr.msk.f32.gmra.mrb[4].mxu1 %vm546_vm0, %v1073_v4  ;;  %5818 = vmatprep.subr.bf16.mxu1 %v5817_v6  ;;  %v5975_v43 = vunpack.i.h.bf16 %v5973_v40  ;;  %v5974_v45 = vunpack.i.l.bf16 %v5973_v40 }
 0x358   : > { %5434 = vmatprep.mubr.msk.f32.mxu1 %vm546_vm0, %v1074_v30  ;;  %5820 = vmatpush3.bf16.msra.mxu1 %v5817_v6  ;;  %v1077_v30 = vmul.f32 %v7023_v51, %v6865_v44 }
 0x359   : > { %v5821_v47 = vpack.c.bf16 %v5970_v9, %v5969_v12  ;;  %v5825_v61 = vpack.c.bf16 %v5975_v43, %v5974_v45  ;;  %v1079_v45 = vmul.f32 %v7043_v57, %v6874_v49 }
 0x35a   : > { %v5978_v52 = vpop.permute.xlu0 %5977  ;;  %v5983_v4 = vpop.permute.xlu1 %5982 }
 0x35b   : > { %5435 = vmatmul.mubr.msk.f32.gmra.mrb[6].mxu1 %vm546_vm0, %v1075_v1  ;;  %5822 = vmatprep.subr.bf16.mxu1 %v5821_v47  ;;  %v5980_v6 = vunpack.i.h.bf16 %v5978_v52  ;;  %v5979_v40 = vunpack.i.l.bf16 %v5978_v52  ;;  %v5985_v9 = vunpack.i.h.bf16 %v5983_v4  ;;  %v5984_v12 = vunpack.i.l.bf16 %v5983_v4 }
 0x35c   : > { %5437 = vmatprep.mubr.msk.f32.mxu1 %vm546_vm0, %v1076_v7  ;;  %5810 = vmatpush3.bf16.xpose.msk.msra.mxu0 %vm6927_vm1, %v5805_v62  ;;  %v1017_v62 = vld [vmem:[%s9011_s1 + $0x68] sm:$0xff]  ;;  %v7063_v52 = vmul.f32 0.35355338, %v1018_v2  ;;  %v1019_v7 = vld [vmem:[%s9011_s1 + $0x78] sm:$0xff] }
 0x35d   : > { %5824 = vmatpush3.bf16.msra.mxu1 %v5821_v47  ;;  %5813 = vmatprep.subr.msk.bf16.mxu0 %vm6927_vm1, %v5811_v56  ;;  %v5829_v43 = vpack.c.bf16 %v5980_v6, %v5979_v40  ;;  %v7059_v1 = vmul.f32 0.35355338, %v1017_v62  ;;  %v1080_v47 = vmul.f32 %v7047_v37, %v6883_v58  ;;  %v5833_v0 = vpack.c.bf16 %v5985_v9, %v5984_v12 }
 0x35e   : > { %5826 = vmatprep.subr.bf16.mxu1 %v5825_v61  ;;  %v5988_v4 = vpop.permute.xlu0 %5987  ;;  %v7077_v40 = vmul.f32 0.35355338, %v1019_v7  ;;  %v1101_v9 = vmul.f32 %v6953_v39, %v6894_v3  ;;  %v5993_v12 = vpop.permute.xlu1 %5992  ;;  %v7101_v7 = vmul.f32 0.35355338, %v1022_v41  ;;  %v1024_v39 = vld [vmem:[%s9011_s1 + $0xa0] sm:$0xff]  ;;  %v1103_v41 = vmul.f32 %v6969_v46, %v6902_v18  ;;  %v1026_v46 = vld [vmem:[%s9011_s1 + $0xb0] sm:$0xff] }
 0x35f   : > { %5438 = vmatmul.mubr.msk.f32.gmra.mrb[8].mxu1 %vm546_vm0, %v1077_v30  ;;  %v1081_v6 = vmul.f32 %v7059_v1, %v6881_v53  ;;  %v7081_v30 = vmul.f32 0.35355338, %v1020_v27  ;;  %v5989_v62 = vunpack.i.l.bf16 %v5988_v4  ;;  %v1023_v27 = vld [vmem:[%s9011_s1 + $0x98] sm:$0xff] }
 0x360   : > { %5440 = vmatprep.mubr.msk.f32.mxu1 %vm546_vm0, %v1078_v35  ;;  %v1021_v35 = vld [vmem:[%s9011_s1 + $0x88] sm:$0xff]  ;;  %v1083_v2 = vmul.f32 %v7077_v40, %v6888_v63 }
 0x361   : > { %5828 = vmatpush3.bf16.msra.mxu1 %v5825_v61  ;;  %v1082_v61 = vmul.f32 %v7063_v52, %v6890_v26 }
 0x362   : > { %5830 = vmatprep.subr.bf16.mxu1 %v5829_v43 }
 0x363   : > { %5441 = vmatmul.mubr.msk.f32.gmra.mrb[10].mxu1 %vm546_vm0, %v1079_v45  ;;  %v1084_v45 = vmul.f32 %v7081_v30, %v6867_v60 }
 0x364   : > { %5443 = vmatprep.mubr.msk.f32.mxu1 %vm546_vm0, %v1080_v47  ;;  %5816 = vmatpush3.bf16.xpose.msk.msra.mxu0 %vm6927_vm1, %v5811_v56  ;;  %v5990_v56 = vunpack.i.h.bf16 %v5988_v4  ;;  %v1102_v47 = vmul.f32 %v6955_v42, %v6904_v21  ;;  %v5995_v4 = vunpack.i.h.bf16 %v5993_v12 }
 0x365   : > { %5832 = vmatpush3.bf16.msra.mxu1 %v5829_v43  ;;  %5834 = vmatprep.subr.bf16.mxu0 %v5833_v0  ;;  %v7095_v43 = vmul.f32 0.35355338, %v1021_v35 }
 0x366   : > { %v5837_v42 = vpack.c.bf16 %v5990_v56, %v5989_v62 }
 0x367   : > { %5444 = vmatmul.mubr.msk.f32.gmra.mrb[12].mxu1 %vm546_vm0, %v1081_v6  ;;  %v5994_v6 = vunpack.i.l.bf16 %v5993_v12  ;;  %v1085_v35 = vmul.f32 %v7095_v43, %v6865_v44  ;;  %v1104_v12 = vmul.f32 %v6973_v32, %v6912_v55 }
 0x368   : > { %5446 = vmatprep.mubr.msk.f32.mxu1 %vm546_vm0, %v1082_v61  ;;  %v5998_v61 = vpop.permute.xlu0 %5997 }
 0x369   : > { %v6000_v56 = vunpack.i.h.bf16 %v5998_v61  ;;  %v5999_v62 = vunpack.i.l.bf16 %v5998_v61  ;;  %v5841_v32 = vpack.c.bf16 %v5995_v4, %v5994_v6  ;;  %v1106_v61 = vmul.f32 %v6991_v54, %v6919_v36  ;;  %v1027_v4 = vld [vmem:[%s9011_s1 + $0xb8] sm:$0xff] }
 0x36b   : > { %5447 = vmatmul.mubr.msk.f32.gmra.mrb[14].mxu1 %vm546_vm0, %v1083_v2  ;;  %5490 = vmatmul.mubr.msk.f32.vlgmr.msra.gmra.mrb[16].mxu0 %vm546_vm0, %v1101_v9  ;;  %v7117_v9 = vmul.f32 0.35355338, %v1023_v27  ;;  %v1086_v2 = vmul.f32 %v7101_v7, %v6876_v50  ;;  %v1105_v27 = vmul.f32 %v6987_v48, %v6910_v23  ;;  %v1028_v48 = vld [vmem:[%s9011_s1 + $0xc0] sm:$0xff]  ;;  %v5845_v6 = vpack.c.bf16 %v6000_v56, %v5999_v62  ;;  %v1029_v56 = vld [vmem:[%s9011_s1 + $0xc8] sm:$0xff] }
 0x36c   : > { %5449 = vmatprep.mubr.msk.f32.mxu1 %vm546_vm0, %v1084_v45  ;;  %5492 = vmatprep.mubr.msk.f32.mxu0 %vm546_vm0, %v1102_v47  ;;  %v7123_v45 = vmul.f32 0.35355338, %v1024_v39  ;;  %v1109_v62 = vmul.f32 %v7023_v51, %v6894_v3  ;;  %v1032_v51 = vld [vmem:[%s9011_s1 + $0xe0] sm:$0xff] }
 0x36d   : > { %5836 = vmatpush3.bf16.msra.mxu0 %v5833_v0  ;;  %v1025_v0 = vld [vmem:[%s9011_s1 + $0xa8] sm:$0xff]  ;;  %v1087_v47 = vmul.f32 %v7117_v9, %v6874_v49 }
 0x36e   : > { %5838 = vmatprep.subr.bf16.mxu0 %v5837_v42  ;;  %v7139_v39 = vmul.f32 0.35355338, %v1025_v0  ;;  %v1108_v0 = vmul.f32 %v7011_v31, %v6896_v5 }
 0x36f   : > { %5450 = vmatmul.mubr.msk.f32.gmra.mrb[16].mxu1 %vm546_vm0, %v1085_v35  ;;  %5493 = vmatmul.mubr.msk.f32.gmra.mrb[18].mxu0 %vm546_vm0, %v1103_v41  ;;  %v1088_v35 = vmul.f32 %v7123_v45, %v6883_v58  ;;  %v7145_v41 = vmul.f32 0.35355338, %v1026_v46  ;;  %v7167_v46 = vmul.f32 0.35355338, %v1028_v48 }
 0x370   : > { %5452 = vmatprep.mubr.msk.f32.mxu1 %vm546_vm0, %v1086_v2  ;;  %5495 = vmatprep.mubr.msk.f32.mxu0 %vm546_vm0, %v1104_v12  ;;  %v1089_v54 = vmul.f32 %v7139_v39, %v6881_v53  ;;  %v7161_v2 = vmul.f32 0.35355338, %v1027_v4 }
 0x371   : > { %5840 = vmatpush3.bf16.msra.mxu0 %v5837_v42  ;;  %v1107_v42 = vmul.f32 %v7007_v15, %v6917_v34  ;;  %v1090_v12 = vmul.f32 %v7145_v41, %v6890_v26  ;;  %v1030_v15 = vld [vmem:[%s9011_s1 + $0xd0] sm:$0xff] }
 0x372   : > { %5842 = vmatprep.subr.bf16.mxu0 %v5841_v32  ;;  %v1091_v31 = vmul.f32 %v7161_v2, %v6888_v63 }
 0x373   : > { %5453 = vmatmul.mubr.msk.f32.gmra.mrb[18].mxu1 %vm546_vm0, %v1087_v47  ;;  %5496 = vmatmul.mubr.msk.f32.gmra.mrb[20].mxu0 %vm546_vm0, %v1105_v27  ;;  %v1092_v47 = vmul.f32 %v7167_v46, %v6867_v60  ;;  %v1110_v27 = vmul.f32 %v7027_v59, %v6904_v21  ;;  %v1111_v59 = vmul.f32 %v7043_v57, %v6902_v18 }
 0x374   : > { %5455 = vmatprep.mubr.msk.f32.mxu1 %vm546_vm0, %v1088_v35  ;;  %5498 = vmatprep.mubr.msk.f32.mxu0 %vm546_vm0, %v1106_v61  ;;  %v1062_v35 = vmul.f32 0.35355338, %v1030_v15  ;;  %v1031_v61 = vld [vmem:[%s9011_s1 + $0xd8] sm:$0xff]  ;;  %v1113_v57 = vmul.f32 %v7059_v1, %v6910_v23 }
 0x375   : > { %5844 = vmatpush3.bf16.msra.mxu0 %v5841_v32  ;;  %v1061_v32 = vmul.f32 0.35355338, %v1029_v56  ;;  %v1063_v4 = vmul.f32 0.35355338, %v1031_v61  ;;  %v1035_v15 = vld [vmem:[%s9011_s1 + $0xf8] sm:$0xff] }
 0x376   : > { %5846 = vmatprep.subr.bf16.mxu0 %v5845_v6  ;;  %v1094_v48 = vmul.f32 %v1062_v35, %v6876_v50  ;;  %v1067_v1 = vmul.f32 0.35355338, %v1035_v15 }
 0x377   : > { %5456 = vmatmul.mubr.msk.f32.gmra.mrb[20].mxu1 %vm546_vm0, %v1089_v54  ;;  %5499 = vmatmul.mubr.msk.f32.gmra.mrb[22].mxu0 %vm546_vm0, %v1107_v42  ;;  %v1093_v60 = vmul.f32 %v1061_v32, %v6865_v44  ;;  %v1064_v54 = vmul.f32 0.35355338, %v1032_v51  ;;  %v1033_v42 = vld [vmem:[%s9011_s1 + $0xe8] sm:$0xff]  ;;  %v1034_v44 = vld [vmem:[%s9011_s1 + $0xf0] sm:$0xff]  ;;  %v1095_v50 = vmul.f32 %v1063_v4, %v6874_v49 }
 0x378   : > { %5458 = vmatprep.mubr.msk.f32.mxu1 %vm546_vm0, %v1090_v12  ;;  %5501 = vmatprep.mubr.msk.f32.mxu0 %vm546_vm0, %v1108_v0  ;;  %v1114_v0 = vmul.f32 %v7063_v52, %v6919_v36  ;;  %v1066_v56 = vmul.f32 0.35355338, %v1034_v44 }
 0x379   : > { %5848 = vmatpush3.bf16.msra.mxu0 %v5845_v6  ;;  %v1112_v6 = vmul.f32 %v7047_v37, %v6912_v55  ;;  %v1065_v37 = vmul.f32 0.35355338, %v1033_v42  ;;  %v1096_v12 = vmul.f32 %v1064_v54, %v6883_v58  ;;  %v1115_v58 = vmul.f32 %v7077_v40, %v6917_v34 }
 0x37a   : > { %v1098_v52 = vmul.f32 %v1066_v56, %v6890_v26  ;;  %v1118_v40 = vmul.f32 %v7101_v7, %v6904_v21  ;;  %v1119_v26 = vmul.f32 %v7117_v9, %v6902_v18  ;;  %v1123_v7 = vmul.f32 %v7161_v2, %v6917_v34 }
 0x37b   : > { %5459 = vmatmul.mubr.msk.f32.gmra.mrb[22].mxu1 %vm546_vm0, %v1091_v31  ;;  %5502 = vmatmul.mubr.msk.f32.gmra.mrb[24].mxu0 %vm546_vm0, %v1109_v62  ;;  %v1097_v49 = vmul.f32 %v1065_v37, %v6881_v53  ;;  %v1116_v31 = vmul.f32 %v7081_v30, %v6896_v5  ;;  %v1099_v62 = vmul.f32 %v1067_v1, %v6888_v63 }
 0x37c   : > { %5461 = vmatprep.mubr.msk.f32.mxu1 %vm546_vm0, %v1092_v47  ;;  %5504 = vmatprep.mubr.msk.f32.mxu0 %vm546_vm0, %v1110_v27  ;;  %v1117_v53 = vmul.f32 %v7095_v43, %v6894_v3  ;;  %v1120_v30 = vmul.f32 %v7123_v45, %v6912_v55  ;;  %v1121_v63 = vmul.f32 %v7139_v39, %v6910_v23 }
 0x37d   : > { %v1122_v43 = vmul.f32 %v7145_v41, %v6919_v36  ;;  %v1124_v9 = vmul.f32 %v7167_v46, %v6896_v5  ;;  %v1125_v45 = vmul.f32 %v1061_v32, %v6894_v3  ;;  %v1126_v39 = vmul.f32 %v1062_v35, %v6904_v21 }
 0x37e   : > { %v1127_v41 = vmul.f32 %v1063_v4, %v6902_v18  ;;  %v1128_v47 = vmul.f32 %v1064_v54, %v6912_v55  ;;  %v1129_v5 = vmul.f32 %v1065_v37, %v6910_v23  ;;  %v1130_v2 = vmul.f32 %v1066_v56, %v6919_v36 }
 0x37f   : > { %5462 = vmatmul.mubr.msk.f32.gmra.mrb[24].mxu1 %vm546_vm0, %v1093_v60  ;;  %5505 = vmatmul.mubr.msk.f32.gmra.mrb[26].mxu0 %vm546_vm0, %v1111_v59  ;;  %v1131_v3 = vmul.f32 %v1067_v1, %v6917_v34 }
 0x380   : > { %5464 = vmatprep.mubr.msk.f32.mxu1 %vm546_vm0, %v1094_v48  ;;  %5507 = vmatprep.mubr.msk.f32.mxu0 %vm546_vm0, %v1112_v6 }
 0x383   : > { %5465 = vmatmul.mubr.msk.f32.gmra.mrb[26].mxu1 %vm546_vm0, %v1095_v50  ;;  %5508 = vmatmul.mubr.msk.f32.gmra.mrb[28].mxu0 %vm546_vm0, %v1113_v57 }
 0x384   : > { %5467 = vmatprep.mubr.msk.f32.mxu1 %vm546_vm0, %v1096_v12  ;;  %5510 = vmatprep.mubr.msk.f32.mxu0 %vm546_vm0, %v1114_v0 }
 0x387   : > { %5468 = vmatmul.mubr.msk.f32.gmra.mrb[28].mxu1 %vm546_vm0, %v1097_v49  ;;  %5511 = vmatmul.mubr.msk.f32.gmra.mrb[30].mxu0 %vm546_vm0, %v1115_v58 }
 0x388   : > { %5470 = vmatprep.mubr.msk.f32.mxu1 %vm546_vm0, %v1098_v52  ;;  %5513 = vmatprep.mubr.msk.f32.mxu0 %vm546_vm0, %v1116_v31 }
 0x38b   : > { %5471 = vmatmul.mubr.msk.f32.gmra.mrb[30].mxu1 %vm546_vm0, %v1099_v62  ;;  %5514 = vmatmul.mubr.msk.f32.gmra.mrb[32].mxu0 %vm546_vm0, %v1117_v53 }
 0x38c   : > { %5516 = vmatprep.mubr.msk.f32.mxu0 %vm546_vm0, %v1118_v40 }
 0x38f   : > { %5517 = vmatmul.mubr.msk.f32.gmra.mrb[34].mxu0 %vm546_vm0, %v1119_v26 }
 0x390   : > { %5519 = vmatprep.mubr.msk.f32.mxu0 %vm546_vm0, %v1120_v30 }
 0x393   : > { %5520 = vmatmul.mubr.msk.f32.gmra.mrb[36].mxu0 %vm546_vm0, %v1121_v63 }
 0x394   : > { %5522 = vmatprep.mubr.msk.f32.mxu0 %vm546_vm0, %v1122_v43 }
 0x397   : > { %5523 = vmatmul.mubr.msk.f32.gmra.mrb[38].mxu0 %vm546_vm0, %v1123_v7 }
 0x398   : > { %5525 = vmatprep.mubr.msk.f32.mxu0 %vm546_vm0, %v1124_v9 }
 0x39b   : > { %5526 = vmatmul.mubr.msk.f32.gmra.mrb[40].mxu0 %vm546_vm0, %v1125_v45 }
 0x39c   : > { %5528 = vmatprep.mubr.msk.f32.mxu0 %vm546_vm0, %v1126_v39 }
 0x39f   : > { %5529 = vmatmul.mubr.msk.f32.gmra.mrb[42].mxu0 %vm546_vm0, %v1127_v41 }
 0x3a0   : > { %5531 = vmatprep.mubr.msk.f32.mxu0 %vm546_vm0, %v1128_v47 }
 0x3a3   : > { %5532 = vmatmul.mubr.msk.f32.gmra.mrb[44].mxu0 %vm546_vm0, %v1129_v5 }
 0x3a4   : > { %5534 = vmatprep.mubr.msk.f32.mxu0 %vm546_vm0, %v1130_v2 }
 0x3a7   : > { %5535 = vmatmul.mubr.msk.f32.gmra.mrb[46].mxu0 %vm546_vm0, %v1131_v3 }
 0x422   : > { %v7276_v18 = vpop.f32.mrb[0].mxu1 }
 0x423   : > { %v7278_v21 = vpop.f32.mrb[1].mxu1  ;;  %v1858_v55 = vsel %vm1854_vm2, %v7276_v18, -inf }
 0x424   : > { %1859 = vmax.xlane.f32.xlu0 %v1858_v55  ;;  %v1855_v23 = vsel %vm1854_vm2, %v7278_v21, -inf }
 0x425   : > { %1856 = vmax.xlane.f32.xlu1 %v1855_v23 }
 0x426   : > { %v7284_v36 = vpop.f32.mrb[2].mxu1 }
 0x427   : > { %v7286_v46 = vpop.f32.mrb[3].mxu1  ;;  %v1864_v34 = vsel %vm1854_vm2, %v7284_v36, -inf }
 0x428   : > { %v1861_v32 = vsel %vm1854_vm2, %v7286_v46, -inf }
 0x429   : > { %1865 = vmax.xlane.f32.xlu1 %v1864_v34  ;;  %1862 = vmax.xlane.f32.xlu0 %v1861_v32 }
 0x42a   : > { %v7292_v27 = vpop.f32.mrb[4].mxu1 }
 0x42b   : > { %v7294_v35 = vpop.f32.mrb[5].mxu1  ;;  %v1870_v61 = vsel %vm1854_vm2, %v7292_v27, -inf }
 0x42c   : > { %v1867_v51 = vsel %vm1854_vm2, %v7294_v35, -inf }
 0x42d   : > { %1871 = vmax.xlane.f32.xlu1 %v1870_v61  ;;  %1868 = vmax.xlane.f32.xlu0 %v1867_v51 }
 0x42e   : > { %v7300_v60 = vpop.f32.mrb[6].mxu1 }
 0x42f   : > { %v7302_v59 = vpop.f32.mrb[7].mxu1  ;;  %v1876_v4 = vsel %vm1854_vm2, %v7300_v60, -inf }
 0x430   : > { %v1873_v42 = vsel %vm1854_vm2, %v7302_v59, -inf }
 0x431   : > { %1877 = vmax.xlane.f32.xlu0 %v1876_v4 }
 0x432   : > { %v7306_v48 = vpop.f32.mrb[8].mxu1 }
 0x433   : > { %v7308_v6 = vpop.f32.mrb[9].mxu1  ;;  %v1882_v54 = vsel %vm1854_vm2, %v7306_v48, -inf }
 0x434   : > { %1883 = vmax.xlane.f32.xlu1 %v1882_v54  ;;  %v1879_v57 = vsel %vm1854_vm2, %v7308_v6, -inf }
 0x435   : > { %1874 = vmax.xlane.f32.xlu0 %v1873_v42 }
 0x436   : > { %v7314_v44 = vpop.f32.mrb[10].mxu1 }
 0x437   : > { %v7316_v50 = vpop.f32.mrb[11].mxu1  ;;  %v1888_v56 = vsel %vm1854_vm2, %v7314_v44, -inf }
 0x438   : > { %v1885_v37 = vsel %vm1854_vm2, %v7316_v50, -inf }
 0x439   : > { %1880 = vmax.xlane.f32.xlu0 %v1879_v57  ;;  %1886 = vmax.xlane.f32.xlu1 %v1885_v37 }
 0x43a   : > { %v7322_v12 = vpop.f32.mrb[12].mxu1 }
 0x43b   : > { %v7324_v0 = vpop.f32.mrb[13].mxu1  ;;  %v1894_v52 = vsel %vm1854_vm2, %v7322_v12, -inf }
 0x43c   : > { %v1891_v30 = vsel %vm1854_vm2, %v7324_v0, -inf }
 0x43d   : > { %1889 = vmax.xlane.f32.xlu0 %v1888_v56 }
 0x43e   : > { %v7328_v15 = vpop.f32.mrb[14].mxu1  ;;  %v7330_v49 = vpop.f32.mrb[16].mxu0 }
 0x43f   : > { %v7332_v58 = vpop.f32.mrb[15].mxu1  ;;  %v7334_v1 = vpop.f32.mrb[17].mxu0  ;;  %v1954_v41 = vsel %vm1854_vm2, %v7330_v49, -inf  ;;  %v1900_v55 = vsel %vm1854_vm2, %v7328_v15, -inf }
 0x440   : > { %v1897_v31 = vsel %vm1854_vm2, %v7332_v58, -inf  ;;  %v1951_v4 = vsel %vm1854_vm2, %v7334_v1, -inf }
 0x441   : > { %1895 = vmax.xlane.f32.xlu0 %v1894_v52  ;;  %1898 = vmax.xlane.f32.xlu1 %v1897_v31 }
 0x442   : > { %v7340_v62 = vpop.f32.mrb[16].mxu1  ;;  %v7342_v53 = vpop.f32.mrb[18].mxu0 }
 0x443   : > { %v7344_v40 = vpop.f32.mrb[17].mxu1  ;;  %v7346_v26 = vpop.f32.mrb[19].mxu0  ;;  %v1960_v52 = vsel %vm1854_vm2, %v7342_v53, -inf }
 0x444   : > { %v1957_v63 = vsel %vm1854_vm2, %v7346_v26, -inf  ;;  %v1903_v33 = vsel %vm1854_vm2, %v7344_v40, -inf }
 0x445   : > { %1892 = vmax.xlane.f32.xlu0 %v1891_v30  ;;  %1958 = vmax.xlane.f32.xlu1 %v1957_v63 }
 0x446   : > { %v7352_v43 = vpop.f32.mrb[18].mxu1  ;;  %v7354_v7 = vpop.f32.mrb[20].mxu0 }
 0x447   : > { %v7356_v9 = vpop.f32.mrb[19].mxu1  ;;  %v7358_v45 = vpop.f32.mrb[21].mxu0  ;;  %v1966_v39 = vsel %vm1854_vm2, %v7354_v7, -inf  ;;  %v1912_v16 = vsel %vm1854_vm2, %v7352_v43, -inf }
 0x448   : > { %v1963_v23 = vsel %vm1854_vm2, %v7358_v45, -inf  ;;  %v1909_v54 = vsel %vm1854_vm2, %v7356_v9, -inf }
 0x449   : > { %1955 = vmax.xlane.f32.xlu0 %v1954_v41  ;;  %1967 = vmax.xlane.f32.xlu1 %v1966_v39 }
 0x44a   : > { %v7364_v47 = vpop.f32.mrb[20].mxu1  ;;  %v7366_v5 = vpop.f32.mrb[22].mxu0 }
 0x44b   : > { %v7368_v2 = vpop.f32.mrb[21].mxu1  ;;  %v7370_v3 = vpop.f32.mrb[23].mxu0 }
 0x44c   : > { %v1969_v31 = vsel %vm1854_vm2, %v7370_v3, -inf }
 0x44d   : > { %1901 = vmax.xlane.f32.xlu0 %v1900_v55  ;;  %1964 = vmax.xlane.f32.xlu1 %v1963_v23  ;;  %v1906_v55 = vsel %vm1854_vm2, %v7340_v62, -inf }
 0x44e   : > { %v7376_v34 = vpop.f32.mrb[22].mxu1  ;;  %v7378_v32 = vpop.f32.mrb[24].mxu0 }
 0x44f   : > { %v7380_v61 = vpop.f32.mrb[23].mxu1  ;;  %v7382_v51 = vpop.f32.mrb[25].mxu0  ;;  %v1978_v23 = vsel %vm1854_vm2, %v7378_v32, -inf  ;;  %v1924_v38 = vsel %vm1854_vm2, %v7376_v34, -inf }
 0x450   : > { %v1975_v20 = vsel %vm1854_vm2, %v7382_v51, -inf  ;;  %v1921_v13 = vsel %vm1854_vm2, %v7380_v61, -inf }
 0x451   : > { %1952 = vmax.xlane.f32.xlu0 %v1951_v4  ;;  %1910 = vmax.xlane.f32.xlu1 %v1909_v54 }
 0x452   : > { %v7388_v42 = vpop.f32.mrb[24].mxu1  ;;  %v7390_v57 = vpop.f32.mrb[26].mxu0 }
 0x453   : > { %9014 = vst [vmem:[#allocation21_spill] sm:$0xff] %v7390_v57  ;;  %v7392_v37 = vpop.f32.mrb[25].mxu1  ;;  %v7394_v56 = vpop.f32.mrb[27].mxu0 }
 0x454   : > { %9015 = vst [vmem:[#allocation22_spill] sm:$0xff] %v7392_v37 }
 0x455   : > { %1961 = vmax.xlane.f32.xlu0 %v1960_v52  ;;  %1970 = vmax.xlane.f32.xlu1 %v1969_v31 }
 0x456   : > { %v7400_v30 = vpop.f32.mrb[26].mxu1  ;;  %v7402_v63 = vpop.f32.mrb[28].mxu0 }
 0x457   : > { %9016 = vst [vmem:[#allocation23_spill] sm:$0xff] %v7402_v63  ;;  %v7404_v39 = vpop.f32.mrb[27].mxu1  ;;  %v7406_v41 = vpop.f32.mrb[29].mxu0 }
 0x458   : > { %9017 = vst [vmem:[#allocation24_spill] sm:$0xff] %v7406_v41 }
 0x459   : > { %1907 = vmax.xlane.f32.xlu0 %v1906_v55  ;;  %1979 = vmax.xlane.f32.xlu1 %v1978_v23 }
 0x45a   : > { %v7412_v4 = vpop.f32.mrb[28].mxu1  ;;  %v7414_v54 = vpop.f32.mrb[30].mxu0 }
 0x45b   : > { %9018 = vst [vmem:[#allocation25_spill] sm:$0xff] %v7414_v54  ;;  %v7416_v52 = vpop.f32.mrb[29].mxu1  ;;  %v7418_v31 = vpop.f32.mrb[31].mxu0 }
 0x45c   : > { %9019 = vst [vmem:[#allocation26_spill] sm:$0xff] %v7418_v31 }
 0x45d   : > { %1904 = vmax.xlane.f32.xlu0 %v1903_v33  ;;  %1925 = vmax.xlane.f32.xlu1 %v1924_v38  ;;  %v1972_v38 = vsel %vm1854_vm2, %v7366_v5, -inf }
 0x45e   : > { %v7424_v24 = vpop.f32.mrb[30].mxu1  ;;  %v7426_v55 = vpop.f32.mrb[32].mxu0 }
 0x45f   : > { %v7428_v23 = vpop.f32.mrb[31].mxu1  ;;  %v7430_v29 = vpop.f32.mrb[33].mxu0 }
 0x461   : > { %1913 = vmax.xlane.f32.xlu0 %v1912_v16  ;;  %1976 = vmax.xlane.f32.xlu1 %v1975_v20  ;;  %v1918_v16 = vsel %vm1854_vm2, %v7364_v47, -inf  ;;  %v1981_v20 = vsel %vm1854_vm2, %v7394_v56, -inf }
 0x462   : > { %v7436_v10 = vpop.f32.mrb[34].mxu0 }
 0x463   : > { %v7438_v33 = vpop.f32.mrb[35].mxu0 }
 0x465   : > { %1973 = vmax.xlane.f32.xlu0 %v1972_v38  ;;  %1922 = vmax.xlane.f32.xlu1 %v1921_v13  ;;  %v1915_v38 = vsel %vm1854_vm2, %v7368_v2, -inf  ;;  %v1990_v13 = vsel %vm1854_vm2, %v7402_v63, -inf }
 0x466   : > { %v7444_v25 = vpop.f32.mrb[36].mxu0 }
 0x467   : > { %v7446_v28 = vpop.f32.mrb[37].mxu0 }
 0x469   : > { %1919 = vmax.xlane.f32.xlu0 %v1918_v16  ;;  %1982 = vmax.xlane.f32.xlu1 %v1981_v20  ;;  %v1984_v16 = vsel %vm1854_vm2, %v7390_v57, -inf  ;;  %v1987_v20 = vsel %vm1854_vm2, %v7406_v41, -inf }
 0x46a   : > { %v7452_v19 = vpop.f32.mrb[38].mxu0 }
 0x46b   : > { %9020 = vst [vmem:[#allocation27_spill] sm:$0xff] %v7452_v19  ;;  %v7454_v22 = vpop.f32.mrb[39].mxu0 }
 0x46d   : > { %1916 = vmax.xlane.f32.xlu0 %v1915_v38  ;;  %1991 = vmax.xlane.f32.xlu1 %v1990_v13  ;;  %v1996_v38 = vsel %vm1854_vm2, %v7414_v54, -inf  ;;  %v1930_v13 = vsel %vm1854_vm2, %v7388_v42, -inf }
 0x46e   : > { %v7460_v14 = vpop.f32.mrb[40].mxu0 }
 0x46f   : > { %9021 = vst [vmem:[#allocation28_spill] sm:$0xff] %v7460_v14  ;;  %v7462_v17 = vpop.f32.mrb[41].mxu0 }
 0x471   : > { %1985 = vmax.xlane.f32.xlu0 %v1984_v16  ;;  %1988 = vmax.xlane.f32.xlu1 %v1987_v20  ;;  %v1993_v16 = vsel %vm1854_vm2, %v7418_v31, -inf  ;;  %v1927_v20 = vsel %vm1854_vm2, %v7392_v37, -inf  ;;  %v1999_v31 = vsel %vm1854_vm2, %v7430_v29, -inf  ;;  %v1933_v37 = vsel %vm1854_vm2, %v7404_v39, -inf }
 0x472   : > { %v7468_v8 = vpop.f32.mrb[42].mxu0 }
 0x473   : > { %9022 = vst [vmem:[#allocation29_spill] sm:$0xff] %v7468_v8  ;;  %v7470_v11 = vpop.f32.mrb[43].mxu0 }
 0x474   : > { %9023 = vst [vmem:[#allocation30_spill] sm:$0xff] %v7470_v11 }
 0x475   : > { %1997 = vmax.xlane.f32.xlu1 %v1996_v38  ;;  %1931 = vmax.xlane.f32.xlu0 %v1930_v13  ;;  %v2002_v38 = vsel %vm1854_vm2, %v7426_v55, -inf  ;;  %v1936_v13 = vsel %vm1854_vm2, %v7400_v30, -inf }
 0x476   : > { %v7476_v63 = vpop.f32.mrb[44].mxu0 }
 0x477   : > { %9024 = vst [vmem:[#allocation31_spill] sm:$0xff] %v7476_v63  ;;  %v7478_v57 = vpop.f32.mrb[45].mxu0 }
 0x478   : > { %9025 = vst [vmem:[#allocation32_spill] sm:$0xff] %v7478_v57 }
 0x479   : > { %1994 = vmax.xlane.f32.xlu1 %v1993_v16  ;;  %1928 = vmax.xlane.f32.xlu0 %v1927_v20  ;;  %v2008_v16 = vsel %vm1854_vm2, %v7436_v10, -inf  ;;  %v1942_v20 = vsel %vm1854_vm2, %v7412_v4, -inf }
 0x47a   : > { %v7484_v41 = vpop.f32.mrb[46].mxu0 }
 0x47b   : > { %9026 = vst [vmem:[#allocation33_spill] sm:$0xff] %v7484_v41  ;;  %v7486_v54 = vpop.f32.mrb[47].mxu0 }
 0x47c   : > { %9027 = vst [vmem:[#allocation34_spill] sm:$0xff] %v7486_v54 }
 0x47d   : > { %2003 = vmax.xlane.f32.xlu1 %v2002_v38  ;;  %1937 = vmax.xlane.f32.xlu0 %v1936_v13  ;;  %v2005_v38 = vsel %vm1854_vm2, %v7438_v33, -inf  ;;  %v1939_v13 = vsel %vm1854_vm2, %v7416_v52, -inf }
 0x481   : > { %2000 = vmax.xlane.f32.xlu1 %v1999_v31  ;;  %1934 = vmax.xlane.f32.xlu0 %v1933_v37  ;;  %v2014_v31 = vsel %vm1854_vm2, %v7444_v25, -inf  ;;  %v1948_v37 = vsel %vm1854_vm2, %v7424_v24, -inf }
 0x485   : > { %2009 = vmax.xlane.f32.xlu1 %v2008_v16  ;;  %1943 = vmax.xlane.f32.xlu0 %v1942_v20  ;;  %v2011_v16 = vsel %vm1854_vm2, %v7446_v28, -inf  ;;  %v1945_v20 = vsel %vm1854_vm2, %v7428_v23, -inf }
 0x489   : > { %2006 = vmax.xlane.f32.xlu1 %v2005_v38  ;;  %1940 = vmax.xlane.f32.xlu0 %v1939_v13  ;;  %v2017_v38 = vsel %vm1854_vm2, %v7454_v22, -inf  ;;  %v2023_v13 = vsel %vm1854_vm2, %v7462_v17, -inf }
 0x48d   : > { %2015 = vmax.xlane.f32.xlu1 %v2014_v31  ;;  %1949 = vmax.xlane.f32.xlu0 %v1948_v37  ;;  %v2020_v31 = vsel %vm1854_vm2, %v7452_v19, -inf  ;;  %v2029_v37 = vsel %vm1854_vm2, %v7470_v11, -inf }
 0x491   : > { %2012 = vmax.xlane.f32.xlu1 %v2011_v16  ;;  %1946 = vmax.xlane.f32.xlu0 %v1945_v20  ;;  %v2026_v16 = vsel %vm1854_vm2, %v7460_v14, -inf  ;;  %v2035_v20 = vsel %vm1854_vm2, %v7478_v57, -inf }
 0x495   : > { %2018 = vmax.xlane.f32.xlu1 %v2017_v38  ;;  %2024 = vmax.xlane.f32.xlu0 %v2023_v13  ;;  %v2032_v38 = vsel %vm1854_vm2, %v7468_v8, -inf  ;;  %v2041_v13 = vsel %vm1854_vm2, %v7486_v54, -inf }
 0x499   : > { %2021 = vmax.xlane.f32.xlu1 %v2020_v31  ;;  %2030 = vmax.xlane.f32.xlu0 %v2029_v37  ;;  %v2038_v31 = vsel %vm1854_vm2, %v7476_v63, -inf  ;;  %v2044_v37 = vsel %vm1854_vm2, %v7484_v41, -inf }
 0x49d   : > { %2027 = vmax.xlane.f32.xlu1 %v2026_v16  ;;  %2036 = vmax.xlane.f32.xlu0 %v2035_v20 }
 0x4a1   : > { %2033 = vmax.xlane.f32.xlu1 %v2032_v38  ;;  %2042 = vmax.xlane.f32.xlu0 %v2041_v13 }
 0x4a5   : > { %2039 = vmax.xlane.f32.xlu1 %v2038_v31 }
 0x4a9   : > { %2045 = vmax.xlane.f32.xlu1 %v2044_v37 }
 0x4b1   : > { %v1860_v14 = vpop.xlane.xlu0 %1859 }
 0x4b2   : > { %v2048_v16 = vsub.f32 %v7276_v18, %v1860_v14  ;;  %v1857_v20 = vpop.xlane.xlu1 %1856 }
 0x4b3   : > { %v2047_v57 = vsub.f32 %v7278_v21, %v1857_v20 }
 0x4b4   : > { %v2113_v8 = vmul.f32 1.442695, %v2048_v16 }
 0x4b5   : > { %v2111_v11 = vmul.f32 1.442695, %v2047_v57 }
 0x4b6   : > { %6033 = vpow2.f32 %v2113_v8  ;;  %v1866_v54 = vpop.xlane.xlu1 %1865  ;;  %v1863_v38 = vpop.xlane.xlu0 %1862 }
 0x4b7   : > { %6035 = vpow2.f32 %v2111_v11  ;;  %v2050_v13 = vsub.f32 %v7284_v36, %v1866_v54  ;;  %v2049_v31 = vsub.f32 %v7286_v46, %v1863_v38 }
 0x4b9   : > { %v2117_v63 = vmul.f32 1.442695, %v2050_v13  ;;  %v2115_v19 = vmul.f32 1.442695, %v2049_v31 }
 0x4ba   : > { %v1872_v41 = vpop.xlane.xlu1 %1871  ;;  %v1869_v37 = vpop.xlane.xlu0 %1868 }
 0x4bb   : > { %6037 = vpow2.f32 %v2117_v63  ;;  %v2052_v14 = vsub.f32 %v7292_v27, %v1872_v41  ;;  %v2051_v18 = vsub.f32 %v7294_v35, %v1869_v37 }
 0x4bc   : > { %6039 = vpow2.f32 %v2115_v19 }
 0x4bd   : > { %v2121_v21 = vmul.f32 1.442695, %v2052_v14  ;;  %v2119_v57 = vmul.f32 1.442695, %v2051_v18 }
 0x4be   : > { %v1878_v8 = vpop.xlane.xlu0 %1877 }
 0x4bf   : > { %6041 = vpow2.f32 %v2121_v21  ;;  %v2054_v11 = vsub.f32 %v7300_v60, %v1878_v8 }
 0x4c0   : > { %v6034_v16 = vpop.eup %6033  ;;  %6043 = vpow2.f32 %v2119_v57 }
 0x4c1   : > { %v6036_v36 = vpop.eup %6035  ;;  %v2125_v46 = vmul.f32 1.442695, %v2054_v11  ;;  %v1884_v54 = vpop.xlane.xlu1 %1883  ;;  %v2242_v20 = vsel %vm1854_vm2, %v6034_v16, 0.0 }
 0x4c2   : > { %v2056_v63 = vsub.f32 %v7306_v48, %v1884_v54  ;;  %5553 = vmatprep.mubr.msk.f32.mxu1 %vm1854_vm2, %v6036_v36  ;;  %v1875_v27 = vpop.xlane.xlu0 %1874  ;;  %2243 = vadd.xlane.f32.xlu0 %v2242_v20  ;;  %v2239_v38 = vsel %vm1854_vm2, %v6036_v36, 0.0 }
 0x4c3   : > { %6045 = vpow2.f32 %v2125_v46  ;;  %v2053_v19 = vsub.f32 %v7302_v59, %v1875_v27  ;;  %5554 = vmatmul.mubr.msk.f32.vlgmr.msra.gmra.mrb[32].mxu1 %vm1854_vm2, %v6034_v16 }
 0x4c4   : > { %v2129_v35 = vmul.f32 1.442695, %v2056_v63 }
 0x4c5   : > { %v6038_v60 = vpop.eup %6037  ;;  %v2123_v41 = vmul.f32 1.442695, %v2053_v19 }
 0x4c6   : > { %v6040_v13 = vpop.eup %6039  ;;  %6047 = vpow2.f32 %v2129_v35  ;;  %v1881_v31 = vpop.xlane.xlu0 %1880  ;;  %2240 = vadd.xlane.f32.xlu0 %v2239_v38  ;;  %v2248_v48 = vsel %vm1854_vm2, %v6038_v60, 0.0 }
 0x4c7   : > { %v1887_v37 = vpop.xlane.xlu1 %1886  ;;  %6049 = vpow2.f32 %v2123_v41  ;;  %5556 = vmatprep.mubr.msk.f32.mxu1 %vm1854_vm2, %v6040_v13  ;;  %v2055_v14 = vsub.f32 %v7308_v6, %v1881_v31  ;;  %2249 = vadd.xlane.f32.xlu1 %v2248_v48  ;;  %v2245_v8 = vsel %vm1854_vm2, %v6040_v13, 0.0 }
 0x4c8   : > { %v2057_v59 = vsub.f32 %v7316_v50, %v1887_v37  ;;  %5557 = vmatmul.mubr.msk.f32.gmra.mrb[34].mxu1 %vm1854_vm2, %v6038_v60 }
 0x4c9   : > { %v6042_v18 = vpop.eup %6041  ;;  %v2127_v21 = vmul.f32 1.442695, %v2055_v14 }
 0x4ca   : > { %v2131_v57 = vmul.f32 1.442695, %v2057_v59  ;;  %v6044_v11 = vpop.eup %6043  ;;  %v1890_v16 = vpop.xlane.xlu0 %1889  ;;  %2246 = vadd.xlane.f32.xlu0 %v2245_v8  ;;  %v2254_v36 = vsel %vm1854_vm2, %v6042_v18, 0.0 }
 0x4cb   : > { %6051 = vpow2.f32 %v2127_v21  ;;  %5559 = vmatprep.mubr.msk.f32.mxu1 %vm1854_vm2, %v6044_v11  ;;  %v2058_v6 = vsub.f32 %v7314_v44, %v1890_v16  ;;  %2255 = vadd.xlane.f32.xlu1 %v2254_v36  ;;  %v2251_v54 = vsel %vm1854_vm2, %v6044_v11, 0.0 }
 0x4cc   : > { %5560 = vmatmul.mubr.msk.f32.gmra.mrb[36].mxu1 %vm1854_vm2, %v6042_v18  ;;  %6053 = vpow2.f32 %v2131_v57 }
 0x4cd   : > { %v6046_v50 = vpop.eup %6045  ;;  %v2133_v46 = vmul.f32 1.442695, %v2058_v6 }
 0x4ce   : > { %v1896_v20 = vpop.xlane.xlu0 %1895  ;;  %v1899_v63 = vpop.xlane.xlu1 %1898  ;;  %2252 = vadd.xlane.f32.xlu0 %v2251_v54  ;;  %v2260_v27 = vsel %vm1854_vm2, %v6046_v50, 0.0 }
 0x4cf   : > { %6055 = vpow2.f32 %v2133_v46  ;;  %v2060_v19 = vsub.f32 %v7322_v12, %v1896_v20  ;;  %2261 = vadd.xlane.f32.xlu1 %v2260_v27  ;;  %v2061_v41 = vsub.f32 %v7332_v58, %v1899_v63 }
 0x4d0   : > { %v6048_v35 = vpop.eup %6047 }
 0x4d1   : > { %v6050_v60 = vpop.eup %6049  ;;  %v2137_v44 = vmul.f32 1.442695, %v2060_v19  ;;  %v2266_v38 = vsel %vm1854_vm2, %v6048_v35, 0.0  ;;  %v2139_v14 = vmul.f32 1.442695, %v2061_v41 }
 0x4d2   : > { %5562 = vmatprep.mubr.msk.f32.mxu1 %vm1854_vm2, %v6050_v60  ;;  %v1893_v13 = vpop.xlane.xlu0 %1892  ;;  %v1959_v31 = vpop.xlane.xlu1 %1958  ;;  %v2257_v37 = vsel %vm1854_vm2, %v6050_v60, 0.0 }
 0x4d3   : > { %6057 = vpow2.f32 %v2137_v44  ;;  %v2059_v48 = vsub.f32 %v7324_v0, %v1893_v13  ;;  %5563 = vmatmul.mubr.msk.f32.gmra.mrb[38].mxu1 %vm1854_vm2, %v6046_v50  ;;  %2267 = vadd.xlane.f32.xlu1 %v2266_v38  ;;  %v2081_v54 = vsub.f32 %v7346_v26, %v1959_v31 }
 0x4d4   : > { %2258 = vadd.xlane.f32.xlu0 %v2257_v37 }
 0x4d5   : > { %v6052_v12 = vpop.eup %6051  ;;  %v2135_v59 = vmul.f32 1.442695, %v2059_v48  ;;  %v2179_v44 = vmul.f32 1.442695, %v2081_v54 }
 0x4d6   : > { %5565 = vmatprep.mubr.msk.f32.mxu1 %vm1854_vm2, %v6052_v12  ;;  %v1956_v58 = vpop.xlane.xlu0 %1955  ;;  %v1968_v18 = vpop.xlane.xlu1 %1967  ;;  %v2263_v21 = vsel %vm1854_vm2, %v6052_v12, 0.0 }
 0x4d7   : > { %v6054_v57 = vpop.eup %6053  ;;  %6059 = vpow2.f32 %v2135_v59  ;;  %5566 = vmatmul.mubr.msk.f32.gmra.mrb[40].mxu1 %vm1854_vm2, %v6048_v35  ;;  %2264 = vadd.xlane.f32.xlu1 %v2263_v21  ;;  %v2080_v8 = vsub.f32 %v7330_v49, %v1956_v58 }
 0x4d8   : > { %5568 = vmatprep.mubr.msk.f32.mxu1 %vm1854_vm2, %v6054_v57  ;;  %6061 = vpow2.f32 %v2139_v14  ;;  %v2269_v36 = vsel %vm1854_vm2, %v6054_v57, 0.0 }
 0x4d9   : > { %v6056_v0 = vpop.eup %6055  ;;  %v2177_v63 = vmul.f32 1.442695, %v2080_v8 }
 0x4da   : > { %v1902_v11 = vpop.xlane.xlu0 %1901  ;;  %v1965_v16 = vpop.xlane.xlu1 %1964  ;;  %v2272_v6 = vsel %vm1854_vm2, %v6056_v0, 0.0 }
 0x4db   : > { %v2062_v50 = vsub.f32 %v7328_v15, %v1902_v11  ;;  %5569 = vmatmul.mubr.msk.f32.gmra.mrb[42].mxu1 %vm1854_vm2, %v6056_v0  ;;  %2270 = vadd.xlane.f32.xlu1 %v2269_v36  ;;  %v2083_v15 = vsub.f32 %v7358_v45, %v1965_v16 }
 0x4dc   : > { %2273 = vadd.xlane.f32.xlu0 %v2272_v6 }
 0x4dd   : > { %v6058_v46 = vpop.eup %6057  ;;  %v2141_v20 = vmul.f32 1.442695, %v2062_v50  ;;  %v2183_v45 = vmul.f32 1.442695, %v2083_v15 }
 0x4de   : > { %v1953_v27 = vpop.xlane.xlu0 %1952  ;;  %v1911_v19 = vpop.xlane.xlu1 %1910  ;;  %v2278_v49 = vsel %vm1854_vm2, %v6058_v46, 0.0 }
 0x4df   : > { %6063 = vpow2.f32 %v2141_v20  ;;  %v2079_v35 = vsub.f32 %v7334_v1, %v1953_v27  ;;  %v2084_v1 = vsub.f32 %v7354_v7, %v1968_v18  ;;  %v2065_v7 = vsub.f32 %v7356_v9, %v1911_v19 }
 0x4e0   : > { %2279 = vadd.xlane.f32.xlu0 %v2278_v49  ;;  %6065 = vpow2.f32 %v2177_v63 }
 0x4e1   : > { %v6060_v60 = vpop.eup %6059  ;;  %v2175_v41 = vmul.f32 1.442695, %v2079_v35  ;;  %v2147_v6 = vmul.f32 1.442695, %v2065_v7 }
 0x4e2   : > { %5571 = vmatprep.mubr.msk.f32.mxu1 %vm1854_vm2, %v6060_v60  ;;  %v1962_v38 = vpop.xlane.xlu0 %1961  ;;  %v1971_v26 = vpop.xlane.xlu1 %1970  ;;  %v2275_v13 = vsel %vm1854_vm2, %v6060_v60, 0.0 }
 0x4e3   : > { %v6062_v31 = vpop.eup %6061  ;;  %6067 = vpow2.f32 %v2175_v41  ;;  %v2082_v37 = vsub.f32 %v7342_v53, %v1962_v38  ;;  %5572 = vmatmul.mubr.msk.f32.gmra.mrb[44].mxu1 %vm1854_vm2, %v6058_v46  ;;  %2276 = vadd.xlane.f32.xlu1 %v2275_v13  ;;  %v2085_v12 = vsub.f32 %v7370_v3, %v1971_v26  ;;  %v2185_v53 = vmul.f32 1.442695, %v2084_v1 }
 0x4e4   : > { %5574 = vmatprep.mubr.msk.f32.mxu1 %vm1854_vm2, %v6062_v31  ;;  %6069 = vpow2.f32 %v2179_v44  ;;  %v2281_v58 = vsel %vm1854_vm2, %v6062_v31, 0.0 }
 0x4e5   : > { %v2181_v48 = vmul.f32 1.442695, %v2082_v37  ;;  %v2187_v18 = vmul.f32 1.442695, %v2085_v12 }
 0x4e6   : > { %v1908_v14 = vpop.xlane.xlu0 %1907  ;;  %v1980_v59 = vpop.xlane.xlu1 %1979 }
 0x4e7   : > { %6071 = vpow2.f32 %v2181_v48  ;;  %v2064_v21 = vsub.f32 %v7340_v62, %v1908_v14  ;;  %2282 = vadd.xlane.f32.xlu1 %v2281_v58  ;;  %v2088_v35 = vsub.f32 %v7378_v32, %v1980_v59 }
 0x4e8   : > { %6073 = vpow2.f32 %v2183_v45 }
 0x4e9   : > { %v6064_v57 = vpop.eup %6063  ;;  %v2145_v0 = vmul.f32 1.442695, %v2064_v21  ;;  %v2193_v13 = vmul.f32 1.442695, %v2088_v35 }
 0x4ea   : > { %5575 = vmatmul.mubr.msk.f32.gmra.mrb[46].mxu1 %vm1854_vm2, %v6064_v57  ;;  %v1905_v8 = vpop.xlane.xlu0 %1904  ;;  %v7588_v11 = vpop.xlane.xlu1 %1925  ;;  %v2284_v3 = vsel %vm1854_vm2, %v6064_v57, 0.0 }
 0x4eb   : > { %6075 = vpow2.f32 %v2145_v0  ;;  %v2063_v16 = vsub.f32 %v7344_v40, %v1905_v8  ;;  %2285 = vadd.xlane.f32.xlu0 %v2284_v3  ;;  %v6066_v62 = vpop.eup %6065  ;;  %v2070_v48 = vsub.f32 %v7376_v34, %v7588_v11 }
 0x4ec   : > { %6077 = vpow2.f32 %v2185_v53  ;;  %v2338_v40 = vsel %vm1854_vm2, %v6066_v62, 0.0 }
 0x4ed   : > { %v6068_v36 = vpop.eup %6067  ;;  %6079 = vpow2.f32 %v2187_v18  ;;  %v2143_v50 = vmul.f32 1.442695, %v2063_v16  ;;  %v2157_v7 = vmul.f32 1.442695, %v2070_v48 }
 0x4ee   : > { %5617 = vmatprep.mubr.msk.f32.mxu0 %vm1854_vm2, %v6068_v36  ;;  %v1914_v9 = vpop.xlane.xlu0 %1913  ;;  %v1977_v46 = vpop.xlane.xlu1 %1976  ;;  %v2335_v54 = vsel %vm1854_vm2, %v6068_v36, 0.0  ;;  %v9029_v36 = vld [vmem:[#allocation21_spill] sm:$0xff] }
 0x4ef   : > { %v6070_v20 = vpop.eup %6069  ;;  %6081 = vpow2.f32 %v2143_v50  ;;  %v2066_v63 = vsub.f32 %v7352_v43, %v1914_v9  ;;  %5618 = vmatmul.mubr.msk.f32.vlgmr.msra.gmra.mrb[48].mxu0 %vm1854_vm2, %v6066_v62  ;;  %2336 = vadd.xlane.f32.xlu1 %v2335_v54  ;;  %v2087_v27 = vsub.f32 %v7382_v51, %v1977_v46  ;;  %v9028_v62 = vld [vmem:[#allocation23_spill] sm:$0xff]  ;;  %v9030_v50 = vld [vmem:[#allocation24_spill] sm:$0xff] }
 0x4f0   : > { %2339 = vadd.xlane.f32.xlu0 %v2338_v40  ;;  %5620 = vmatprep.mubr.msk.f32.mxu0 %vm1854_vm2, %v6070_v20  ;;  %6083 = vpow2.f32 %v2147_v6  ;;  %v2341_v16 = vsel %vm1854_vm2, %v6070_v20, 0.0 }
 0x4f1   : > { %v6072_v19 = vpop.eup %6071  ;;  %v2149_v49 = vmul.f32 1.442695, %v2066_v63  ;;  %v2191_v41 = vmul.f32 1.442695, %v2087_v27 }
 0x4f2   : > { %v1974_v60 = vpop.xlane.xlu0 %1973  ;;  %v1923_v44 = vpop.xlane.xlu1 %1922  ;;  %v2344_v21 = vsel %vm1854_vm2, %v6072_v19, 0.0 }
 0x4f3   : > { %v7600_v15 = vpop.eup %6073  ;;  %6085 = vpow2.f32 %v2149_v49  ;;  %v2086_v43 = vsub.f32 %v7366_v5, %v1974_v60  ;;  %5621 = vmatmul.mubr.msk.f32.gmra.mrb[50].mxu0 %vm1854_vm2, %v6072_v19  ;;  %v2069_v14 = vsub.f32 %v7380_v61, %v1923_v44  ;;  %v9031_v60 = vld [vmem:[#allocation25_spill] sm:$0xff] }
 0x4f4   : > { %5623 = vmatprep.mubr.msk.f32.mxu0 %vm1854_vm2, %v7600_v15 }
 0x4f5   : > { %v6076_v51 = vpop.eup %6075  ;;  %v2189_v38 = vmul.f32 1.442695, %v2086_v43  ;;  %v2155_v18 = vmul.f32 1.442695, %v2069_v14 }
 0x4f6   : > { %v6078_v26 = vpop.eup %6077  ;;  %v1920_v31 = vpop.xlane.xlu0 %1919  ;;  %v2290_v32 = vsel %vm1854_vm2, %v6076_v51, 0.0 }
 0x4f7   : > { %v1983_v37 = vpop.xlane.xlu1 %1982  ;;  %v7607_v1 = vpop.eup %6079  ;;  %6087 = vpow2.f32 %v2189_v38  ;;  %v2068_v45 = vsub.f32 %v7364_v47, %v1920_v31  ;;  %5624 = vmatmul.mubr.msk.f32.gmra.mrb[52].mxu0 %vm1854_vm2, %v6078_v26  ;;  %2291 = vadd.xlane.f32.xlu1 %v2290_v32  ;;  %v2350_v19 = vsel %vm1854_vm2, %v6078_v26, 0.0 }
 0x4f8   : > { %v2089_v5 = vsub.f32 %v7394_v56, %v1983_v37  ;;  %6089 = vpow2.f32 %v2191_v41  ;;  %5626 = vmatprep.mubr.msk.f32.mxu0 %vm1854_vm2, %v7607_v1 }
 0x4f9   : > { %v6082_v12 = vpop.eup %6081  ;;  %v2153_v59 = vmul.f32 1.442695, %v2068_v45  ;;  %6091 = vpow2.f32 %v2193_v13 }
 0x4fa   : > { %v2195_v58 = vmul.f32 1.442695, %v2089_v5  ;;  %5577 = vmatprep.mubr.msk.f32.mxu1 %vm1854_vm2, %v6082_v12  ;;  %v1917_v47 = vpop.xlane.xlu0 %1916  ;;  %v2287_v53 = vsel %vm1854_vm2, %v6082_v12, 0.0  ;;  %v6084_v57 = vpop.eup %6083  ;;  %v9033_v5 = vld [vmem:[#allocation22_spill] sm:$0xff]  ;;  %v2347_v12 = vsel %vm1854_vm2, %v7600_v15, 0.0 }
 0x4fb   : > { %v1992_v56 = vpop.xlane.xlu1 %1991  ;;  %6093 = vpow2.f32 %v2153_v59  ;;  %v2067_v34 = vsub.f32 %v7368_v2, %v1917_v47  ;;  %5578 = vmatmul.mubr.msk.f32.gmra.mrb[48].mxu1 %vm1854_vm2, %v6076_v51  ;;  %2345 = vadd.xlane.f32.xlu1 %v2344_v21  ;;  %v2293_v49 = vsel %vm1854_vm2, %v6084_v57, 0.0 }
 0x4fc   : > { %6095 = vpow2.f32 %v2195_v58  ;;  %2288 = vadd.xlane.f32.xlu0 %v2287_v53  ;;  %5580 = vmatprep.mubr.msk.f32.mxu1 %vm1854_vm2, %v6084_v57  ;;  %v2092_v2 = vsub.f32 %v9028_v62, %v1992_v56  ;;  %v2353_v62 = vsel %vm1854_vm2, %v7607_v1, 0.0 }
 0x4fd   : > { %v6086_v61 = vpop.eup %6085  ;;  %v2151_v0 = vmul.f32 1.442695, %v2067_v34 }
 0x4fe   : > { %v1986_v8 = vpop.xlane.xlu0 %1985  ;;  %v2296_v3 = vsel %vm1854_vm2, %v6086_v61, 0.0  ;;  %v2201_v35 = vmul.f32 1.442695, %v2092_v2 }
 0x4ff   : > { %v1989_v11 = vpop.xlane.xlu1 %1988  ;;  %6097 = vpow2.f32 %v2151_v0  ;;  %v2090_v6 = vsub.f32 %v9029_v36, %v1986_v8  ;;  %5581 = vmatmul.mubr.msk.f32.gmra.mrb[50].mxu1 %vm1854_vm2, %v6086_v61  ;;  %2297 = vadd.xlane.f32.xlu1 %v2296_v3 }
 0x500   : > { %v2091_v9 = vsub.f32 %v9030_v50, %v1989_v11  ;;  %6099 = vpow2.f32 %v2157_v7  ;;  %2342 = vadd.xlane.f32.xlu0 %v2341_v16 }
 0x501   : > { %v6088_v46 = vpop.eup %6087  ;;  %6101 = vpow2.f32 %v2155_v18  ;;  %v2197_v54 = vmul.f32 1.442695, %v2090_v6 }
 0x502   : > { %v2199_v63 = vmul.f32 1.442695, %v2091_v9  ;;  %v7629_v40 = vpop.eup %6089  ;;  %5627 = vmatmul.mubr.msk.f32.gmra.mrb[54].mxu0 %vm1854_vm2, %v6088_v46  ;;  %v1932_v27 = vpop.xlane.xlu0 %1931  ;;  %v2356_v53 = vsel %vm1854_vm2, %v6088_v46, 0.0 }
 0x503   : > { %v1998_v20 = vpop.xlane.xlu1 %1997  ;;  %6103 = vpow2.f32 %v2197_v54  ;;  %v2072_v43 = vsub.f32 %v7388_v42, %v1932_v27  ;;  %5629 = vmatprep.mubr.msk.f32.mxu0 %vm1854_vm2, %v7629_v40  ;;  %2351 = vadd.xlane.f32.xlu1 %v2350_v19  ;;  %v6092_v41 = vpop.eup %6091  ;;  %v9032_v42 = vld [vmem:[#allocation26_spill] sm:$0xff] }
 0x504   : > { %v2094_v44 = vsub.f32 %v9031_v60, %v1998_v20  ;;  %6105 = vpow2.f32 %v2199_v63  ;;  %2294 = vadd.xlane.f32.xlu0 %v2293_v49  ;;  %v2362_v50 = vsel %vm1854_vm2, %v6092_v41, 0.0 }
 0x505   : > { %v6094_v51 = vpop.eup %6093  ;;  %v2161_v26 = vmul.f32 1.442695, %v2072_v43  ;;  %6107 = vpow2.f32 %v2201_v35  ;;  %v2359_v43 = vsel %vm1854_vm2, %v7629_v40, 0.0 }
 0x506   : > { %v2205_v38 = vmul.f32 1.442695, %v2094_v44  ;;  %v7638_v13 = vpop.eup %6095  ;;  %5630 = vmatmul.mubr.msk.f32.gmra.mrb[56].mxu0 %vm1854_vm2, %v6092_v41  ;;  %v1929_v37 = vpop.xlane.xlu0 %1928  ;;  %v2302_v32 = vsel %vm1854_vm2, %v6094_v51, 0.0 }
 0x507   : > { %v1995_v31 = vpop.xlane.xlu1 %1994  ;;  %v2071_v48 = vsub.f32 %v9033_v5, %v1929_v37  ;;  %2303 = vadd.xlane.f32.xlu1 %v2302_v32  ;;  %5632 = vmatprep.mubr.msk.f32.mxu0 %vm1854_vm2, %v7638_v13  ;;  %v2365_v37 = vsel %vm1854_vm2, %v7638_v13, 0.0 }
 0x508   : > { %v2093_v45 = vsub.f32 %v9032_v42, %v1995_v31  ;;  %2348 = vadd.xlane.f32.xlu0 %v2347_v12  ;;  %6109 = vpow2.f32 %v2205_v38 }
 0x509   : > { %v6098_v14 = vpop.eup %6097  ;;  %v2159_v58 = vmul.f32 1.442695, %v2071_v48  ;;  %6111 = vpow2.f32 %v2161_v26 }
 0x50a   : > { %v2203_v59 = vmul.f32 1.442695, %v2093_v45  ;;  %v6100_v47 = vpop.eup %6099  ;;  %5583 = vmatprep.mubr.msk.f32.mxu1 %vm1854_vm2, %v6098_v14  ;;  %v1938_v21 = vpop.xlane.xlu0 %1937  ;;  %v2299_v57 = vsel %vm1854_vm2, %v6098_v14, 0.0 }
 0x50b   : > { %v2004_v56 = vpop.xlane.xlu1 %2003  ;;  %v6102_v34 = vpop.eup %6101  ;;  %v2074_v15 = vsub.f32 %v7400_v30, %v1938_v21  ;;  %5584 = vmatmul.mubr.msk.f32.gmra.mrb[52].mxu1 %vm1854_vm2, %v6094_v51  ;;  %2357 = vadd.xlane.f32.xlu1 %v2356_v53  ;;  %v2308_v30 = vsel %vm1854_vm2, %v6100_v47, 0.0 }
 0x50c   : > { %6113 = vpow2.f32 %v2203_v59  ;;  %v2096_v7 = vsub.f32 %v7426_v55, %v2004_v56  ;;  %2300 = vadd.xlane.f32.xlu0 %v2299_v57  ;;  %5586 = vmatprep.mubr.msk.f32.mxu1 %vm1854_vm2, %v6102_v34  ;;  %v2305_v54 = vsel %vm1854_vm2, %v6102_v34, 0.0 }
 0x50d   : > { %6115 = vpow2.f32 %v2159_v58  ;;  %v7655_v61 = vpop.eup %6103  ;;  %v2165_v8 = vmul.f32 1.442695, %v2074_v15 }
 0x50e   : > { %v2209_v18 = vmul.f32 1.442695, %v2096_v7  ;;  %v7657_v0 = vpop.eup %6105  ;;  %5633 = vmatmul.mubr.msk.f32.gmra.mrb[58].mxu0 %vm1854_vm2, %v7655_v61  ;;  %v1935_v55 = vpop.xlane.xlu0 %1934  ;;  %v2368_v40 = vsel %vm1854_vm2, %v7655_v61, 0.0 }
 0x50f   : > { %v2001_v11 = vpop.xlane.xlu1 %2000  ;;  %v2073_v16 = vsub.f32 %v7404_v39, %v1935_v55  ;;  %2309 = vadd.xlane.f32.xlu1 %v2308_v30  ;;  %5587 = vmatmul.mubr.msk.f32.gmra.mrb[54].mxu1 %vm1854_vm2, %v6100_v47  ;;  %v7669_v2 = vpop.eup %6107  ;;  %v2371_v53 = vsel %vm1854_vm2, %v7657_v0, 0.0  ;;  %v9035_v30 = vld [vmem:[#allocation30_spill] sm:$0xff] }
 0x510   : > { %v2095_v3 = vsub.f32 %v7430_v29, %v2001_v11  ;;  %5635 = vmatprep.mubr.msk.f32.mxu0 %vm1854_vm2, %v7657_v0  ;;  %2354 = vadd.xlane.f32.xlu0 %v2353_v62  ;;  %6117 = vpow2.f32 %v2209_v18  ;;  %v2374_v7 = vsel %vm1854_vm2, %v7669_v2, 0.0  ;;  %v9034_v0 = vld [vmem:[#allocation27_spill] sm:$0xff] }
 0x511   : > { %v2163_v6 = vmul.f32 1.442695, %v2073_v16  ;;  %6119 = vpow2.f32 %v2165_v8 }
 0x512   : > { %v2207_v36 = vmul.f32 1.442695, %v2095_v3  ;;  %5636 = vmatmul.mubr.msk.f32.gmra.mrb[60].mxu0 %vm1854_vm2, %v7669_v2  ;;  %v1944_v39 = vpop.xlane.xlu0 %1943  ;;  %v7674_v9 = vpop.eup %6109 }
 0x513   : > { %v2010_v29 = vpop.xlane.xlu1 %2009  ;;  %v2076_v46 = vsub.f32 %v7412_v4, %v1944_v39  ;;  %2363 = vadd.xlane.f32.xlu1 %v2362_v50  ;;  %v6112_v63 = vpop.eup %6111 }
 0x514   : > { %6121 = vpow2.f32 %v2207_v36  ;;  %v2098_v1 = vsub.f32 %v7436_v10, %v2010_v29  ;;  %2306 = vadd.xlane.f32.xlu0 %v2305_v54  ;;  %v2314_v44 = vsel %vm1854_vm2, %v6112_v63, 0.0  ;;  %v9036_v29 = vld [vmem:[#allocation28_spill] sm:$0xff] }
 0x515   : > { %6123 = vpow2.f32 %v2163_v6  ;;  %v2169_v49 = vmul.f32 1.442695, %v2076_v46  ;;  %v9037_v54 = vld [vmem:[#allocation32_spill] sm:$0xff] }
 0x516   : > { %v7679_v20 = vpop.eup %6113  ;;  %v2213_v27 = vmul.f32 1.442695, %v2098_v1  ;;  %v1941_v60 = vpop.xlane.xlu0 %1940 }
 0x517   : > { %v6116_v19 = vpop.eup %6115  ;;  %5638 = vmatprep.mubr.msk.f32.mxu0 %vm1854_vm2, %v7679_v20  ;;  %v2007_v35 = vpop.xlane.xlu1 %2006  ;;  %v2075_v4 = vsub.f32 %v7416_v52, %v1941_v60  ;;  %2315 = vadd.xlane.f32.xlu1 %v2314_v44  ;;  %v2377_v50 = vsel %vm1854_vm2, %v7679_v20, 0.0 }
 0x518   : > { %v2097_v10 = vsub.f32 %v7438_v33, %v2007_v35  ;;  %5589 = vmatprep.mubr.msk.f32.mxu1 %vm1854_vm2, %v6116_v19  ;;  %5639 = vmatmul.mubr.msk.f32.gmra.mrb[62].mxu0 %vm1854_vm2, %v7674_v9  ;;  %6125 = vpow2.f32 %v2213_v27  ;;  %v2311_v59 = vsel %vm1854_vm2, %v6116_v19, 0.0  ;;  %v2380_v27 = vsel %vm1854_vm2, %v7674_v9, 0.0  ;;  %v9039_v9 = vld [vmem:[#allocation34_spill] sm:$0xff] }
 0x519   : > { %5590 = vmatmul.mubr.msk.f32.gmra.mrb[56].mxu1 %vm1854_vm2, %v6112_v63  ;;  %v2167_v51 = vmul.f32 1.442695, %v2075_v4  ;;  %2360 = vadd.xlane.f32.xlu0 %v2359_v43  ;;  %6127 = vpow2.f32 %v2169_v49  ;;  %v9038_v4 = vld [vmem:[#allocation29_spill] sm:$0xff] }
 0x51a   : > { %v2211_v41 = vmul.f32 1.442695, %v2097_v10  ;;  %v1950_v38 = vpop.xlane.xlu0 %1949  ;;  %v7692_v26 = vpop.eup %6117 }
 0x51b   : > { %v2016_v33 = vpop.xlane.xlu1 %2015  ;;  %v2078_v31 = vsub.f32 %v7424_v24, %v1950_v38  ;;  %v6120_v32 = vpop.eup %6119  ;;  %2366 = vadd.xlane.f32.xlu1 %v2365_v37 }
 0x51c   : > { %6129 = vpow2.f32 %v2211_v41  ;;  %v2100_v52 = vsub.f32 %v7444_v25, %v2016_v33  ;;  %v2320_v14 = vsel %vm1854_vm2, %v6120_v32, 0.0 }
 0x51d   : > { %6131 = vpow2.f32 %v2167_v51  ;;  %2369 = vadd.xlane.f32.xlu0 %v2368_v40  ;;  %v2173_v48 = vmul.f32 1.442695, %v2078_v31  ;;  %v9040_v31 = vld [vmem:[#allocation31_spill] sm:$0xff] }
 0x51e   : > { %v7700_v42 = vpop.eup %6121  ;;  %v2217_v45 = vmul.f32 1.442695, %v2100_v52  ;;  %v1947_v24 = vpop.xlane.xlu0 %1946 }
 0x51f   : > { %v6124_v5 = vpop.eup %6123  ;;  %5641 = vmatprep.mubr.msk.f32.mxu0 %vm1854_vm2, %v7700_v42  ;;  %v2013_v25 = vpop.xlane.xlu1 %2012  ;;  %v2077_v13 = vsub.f32 %v7428_v23, %v1947_v24  ;;  %2321 = vadd.xlane.f32.xlu1 %v2320_v14 }
 0x520   : > { %v2099_v12 = vsub.f32 %v7446_v28, %v2013_v25  ;;  %5592 = vmatprep.mubr.msk.f32.mxu1 %vm1854_vm2, %v6124_v5  ;;  %5642 = vmatmul.mubr.msk.f32.gmra.mrb[64].mxu0 %vm1854_vm2, %v7692_v26  ;;  %6133 = vpow2.f32 %v2217_v45  ;;  %v2317_v16 = vsel %vm1854_vm2, %v6124_v5, 0.0 }
 0x521   : > { %5593 = vmatmul.mubr.msk.f32.gmra.mrb[58].mxu1 %vm1854_vm2, %v6120_v32  ;;  %v2171_v47 = vmul.f32 1.442695, %v2077_v13  ;;  %2312 = vadd.xlane.f32.xlu0 %v2311_v59  ;;  %6135 = vpow2.f32 %v2173_v48  ;;  %v2386_v32 = vsel %vm1854_vm2, %v7692_v26, 0.0  ;;  %v2383_v26 = vsel %vm1854_vm2, %v7700_v42, 0.0 }
 0x522   : > { %v2215_v58 = vmul.f32 1.442695, %v2099_v12  ;;  %v2025_v56 = vpop.xlane.xlu0 %2024  ;;  %v7712_v21 = vpop.eup %6125  ;;  %v9041_v12 = vld [vmem:[#allocation33_spill] sm:$0xff] }
 0x523   : > { %v2019_v28 = vpop.xlane.xlu1 %2018  ;;  %v6128_v57 = vpop.eup %6127  ;;  %v2103_v34 = vsub.f32 %v7462_v17, %v2025_v56  ;;  %2372 = vadd.xlane.f32.xlu1 %v2371_v53  ;;  %v2392_v14 = vsel %vm1854_vm2, %v7712_v21, 0.0 }
 0x524   : > { %6137 = vpow2.f32 %v2215_v58  ;;  %v2101_v23 = vsub.f32 %v7454_v22, %v2019_v28  ;;  %v2326_v17 = vsel %vm1854_vm2, %v6128_v57, 0.0 }
 0x525   : > { %6139 = vpow2.f32 %v2171_v47  ;;  %2375 = vadd.xlane.f32.xlu0 %v2374_v7  ;;  %v2223_v55 = vmul.f32 1.442695, %v2103_v34 }
 0x526   : > { %v7720_v15 = vpop.eup %6129  ;;  %v2219_v61 = vmul.f32 1.442695, %v2101_v23  ;;  %v2031_v8 = vpop.xlane.xlu0 %2030 }
 0x527   : > { %v6132_v18 = vpop.eup %6131  ;;  %5644 = vmatprep.mubr.msk.f32.mxu0 %vm1854_vm2, %v7720_v15  ;;  %v2022_v22 = vpop.xlane.xlu1 %2021  ;;  %v2105_v3 = vsub.f32 %v9035_v30, %v2031_v8  ;;  %2327 = vadd.xlane.f32.xlu1 %v2326_v17  ;;  %v2389_v56 = vsel %vm1854_vm2, %v7720_v15, 0.0 }
 0x528   : > { %6141 = vpow2.f32 %v2219_v61  ;;  %v2102_v11 = vsub.f32 %v9034_v0, %v2022_v22  ;;  %5595 = vmatprep.mubr.msk.f32.mxu1 %vm1854_vm2, %v6132_v18  ;;  %5645 = vmatmul.mubr.msk.f32.gmra.mrb[66].mxu0 %vm1854_vm2, %v7712_v21  ;;  %v2323_v51 = vsel %vm1854_vm2, %v6132_v18, 0.0  ;;  %v3425_v61 = vld [vmem:[%s8942_s3] sm:$0xff]  ;;  %v3426_v18 = vld [vmem:[%s8942_s3 + $0x8] sm:$0xff] }
 0x529   : > { %5596 = vmatmul.mubr.msk.f32.gmra.mrb[60].mxu1 %vm1854_vm2, %v6128_v57  ;;  %2318 = vadd.xlane.f32.xlu0 %v2317_v16  ;;  %v2227_v46 = vmul.f32 1.442695, %v2105_v3  ;;  %v5849_v8 = vpack.c.bf16 %v3426_v18, %v3425_v61 }
 0x52a   : > { %v2221_v62 = vmul.f32 1.442695, %v2102_v11  ;;  %v2037_v36 = vpop.xlane.xlu0 %2036  ;;  %v6134_v6 = vpop.eup %6133 }
 0x52b   : > { %v2028_v2 = vpop.xlane.xlu1 %2027  ;;  %v6136_v1 = vpop.eup %6135  ;;  %v2107_v63 = vsub.f32 %v9037_v54, %v2037_v36  ;;  %2378 = vadd.xlane.f32.xlu1 %v2377_v50  ;;  %v2398_v28 = vsel %vm1854_vm2, %v6134_v6, 0.0  ;;  %5850 = vmatprep.subr.bf16.mxu0 %v5849_v8 }
 0x52c   : > { %6143 = vpow2.f32 %v2221_v62  ;;  %v2104_v39 = vsub.f32 %v9036_v29, %v2028_v2  ;;  %v2332_v44 = vsel %vm1854_vm2, %v6136_v1, 0.0  ;;  %5873 = vmatprep.subr.bf16.mxu1 %v5849_v8  ;;  %5852 = vmatpush3.bf16.msra.mxu0 %v5849_v8 }
 0x52d   : > { %6145 = vpow2.f32 %v2223_v55  ;;  %2381 = vadd.xlane.f32.xlu0 %v2380_v27  ;;  %v2231_v43 = vmul.f32 1.442695, %v2107_v63  ;;  %5875 = vmatpush3.bf16.msra.mxu1 %v5849_v8 }
 0x52e   : > { %v6138_v19 = vpop.eup %6137  ;;  %v2225_v49 = vmul.f32 1.442695, %v2104_v39  ;;  %v2043_v10 = vpop.xlane.xlu0 %2042 }
 0x52f   : > { %v6140_v35 = vpop.eup %6139  ;;  %5647 = vmatprep.mubr.msk.f32.mxu0 %vm1854_vm2, %v6138_v19  ;;  %v2034_v60 = vpop.xlane.xlu1 %2033  ;;  %v2109_v41 = vsub.f32 %v9039_v9, %v2043_v10  ;;  %2333 = vadd.xlane.f32.xlu1 %v2332_v44  ;;  %v2395_v53 = vsel %vm1854_vm2, %v6138_v19, 0.0 }
 0x530   : > { %6147 = vpow2.f32 %v2225_v49  ;;  %v2106_v20 = vsub.f32 %v9038_v4, %v2034_v60  ;;  %5598 = vmatprep.mubr.msk.f32.mxu1 %vm1854_vm2, %v6140_v35  ;;  %5648 = vmatmul.mubr.msk.f32.gmra.mrb[68].mxu0 %vm1854_vm2, %v6134_v6  ;;  %v2329_v45 = vsel %vm1854_vm2, %v6140_v35, 0.0 }
 0x531   : > { %6149 = vpow2.f32 %v2227_v46  ;;  %5599 = vmatmul.mubr.msk.f32.gmra.mrb[62].mxu1 %vm1854_vm2, %v6136_v1  ;;  %2324 = vadd.xlane.f32.xlu0 %v2323_v51  ;;  %v2235_v40 = vmul.f32 1.442695, %v2109_v41  ;;  %v3427_v1 = vld [vmem:[%s8942_s3 + $0x10] sm:$0xff]  ;;  %v3428_v46 = vld [vmem:[%s8942_s3 + $0x18] sm:$0xff] }
 0x532   : > { %v6142_v33 = vpop.eup %6141  ;;  %v2229_v38 = vmul.f32 1.442695, %v2106_v20  ;;  %v5853_v54 = vpack.c.bf16 %v3428_v46, %v3427_v1  ;;  %v7879_v1 = vld [vmem:[%s9011_s1 + $0x48] sm:$0xff] }
 0x533   : > { %5650 = vmatprep.mubr.msk.f32.mxu0 %vm1854_vm2, %v6142_v33  ;;  %v2040_v52 = vpop.xlane.xlu1 %2039  ;;  %2387 = vadd.xlane.f32.xlu1 %v2386_v32  ;;  %v2401_v15 = vsel %vm1854_vm2, %v6142_v33, 0.0 }
 0x534   : > { %6151 = vpow2.f32 %v2229_v38  ;;  %v2108_v37 = vsub.f32 %v9040_v31, %v2040_v52  ;;  %5854 = vmatprep.subr.bf16.mxu0 %v5853_v54  ;;  %5874 = vmatprep.subr.bf16.mxu1 %v5853_v54 }
 0x535   : > { %6153 = vpow2.f32 %v2231_v43  ;;  %2330 = vadd.xlane.f32.xlu0 %v2329_v45  ;;  %5856 = vmatpush3.bf16.msra.mxu0 %v5853_v54 }
 0x536   : > { %v6144_v5 = vpop.eup %6143  ;;  %v2233_v48 = vmul.f32 1.442695, %v2108_v37  ;;  %5876 = vmatpush3.bf16.msra.mxu1 %v5853_v54 }
 0x537   : > { %v6146_v25 = vpop.eup %6145  ;;  %5651 = vmatmul.mubr.msk.f32.gmra.mrb[70].mxu0 %vm1854_vm2, %v6144_v5  ;;  %v2046_v24 = vpop.xlane.xlu1 %2045  ;;  %2393 = vadd.xlane.f32.xlu1 %v2392_v14  ;;  %v2404_v42 = vsel %vm1854_vm2, %v6144_v5, 0.0 }
 0x538   : > { %6155 = vpow2.f32 %v2233_v48  ;;  %v2110_v13 = vsub.f32 %v9041_v12, %v2046_v24  ;;  %5653 = vmatprep.mubr.msk.f32.mxu0 %vm1854_vm2, %v6146_v25  ;;  %v2407_v11 = vsel %vm1854_vm2, %v6146_v25, 0.0  ;;  %v7828_v25 = vld [vmem:[%s9011_s1] sm:$0xff] }
 0x539   : > { %6157 = vpow2.f32 %v2235_v40  ;;  %2384 = vadd.xlane.f32.xlu0 %v2383_v26  ;;  %v7820_v40 = vld [vmem:[%s9011_s1 + $0x8] sm:$0xff] }
 0x53a   : > { %v6148_v59 = vpop.eup %6147  ;;  %v2237_v58 = vmul.f32 1.442695, %v2110_v13 }
 0x53b   : > { %v6150_v47 = vpop.eup %6149  ;;  %5654 = vmatmul.mubr.msk.f32.gmra.mrb[72].mxu0 %vm1854_vm2, %v6148_v59  ;;  %2399 = vadd.xlane.f32.xlu1 %v2398_v28  ;;  %v2410_v7 = vsel %vm1854_vm2, %v6148_v59, 0.0 }
 0x53c   : > { %6159 = vpow2.f32 %v2237_v58  ;;  %5656 = vmatprep.mubr.msk.f32.mxu0 %vm1854_vm2, %v6150_v47  ;;  %v2413_v55 = vsel %vm1854_vm2, %v6150_v47, 0.0  ;;  %v7836_v58 = vld [vmem:[%s9011_s1 + $0x18] sm:$0xff] }
 0x53d   : > { %2390 = vadd.xlane.f32.xlu0 %v2389_v56 }
 0x53e   : > { %v6152_v21 = vpop.eup %6151 }
 0x53f   : > { %v6154_v23 = vpop.eup %6153  ;;  %5657 = vmatmul.mubr.msk.f32.gmra.mrb[74].mxu0 %vm1854_vm2, %v6152_v21  ;;  %2405 = vadd.xlane.f32.xlu1 %v2404_v42  ;;  %v2416_v0 = vsel %vm1854_vm2, %v6152_v21, 0.0 }
 0x540   : > { %5659 = vmatprep.mubr.msk.f32.mxu0 %vm1854_vm2, %v6154_v23  ;;  %v2419_v3 = vsel %vm1854_vm2, %v6154_v23, 0.0 }
 0x541   : > { %2396 = vadd.xlane.f32.xlu0 %v2395_v53 }
 0x542   : > { %v6156_v57 = vpop.eup %6155 }
 0x543   : > { %v6158_v34 = vpop.eup %6157  ;;  %5660 = vmatmul.mubr.msk.f32.gmra.mrb[76].mxu0 %vm1854_vm2, %v6156_v57  ;;  %2411 = vadd.xlane.f32.xlu1 %v2410_v7  ;;  %v2422_v17 = vsel %vm1854_vm2, %v6156_v57, 0.0  ;;  %v7844_v57 = vld [vmem:[%s9011_s1 + $0x28] sm:$0xff] }
 0x544   : > { %5662 = vmatprep.mubr.msk.f32.mxu0 %vm1854_vm2, %v6158_v34  ;;  %v2425_v16 = vsel %vm1854_vm2, %v6158_v34, 0.0 }
 0x545   : > { %2402 = vadd.xlane.f32.xlu0 %v2401_v15  ;;  %v7850_v15 = vld [vmem:[%s9011_s1 + $0x20] sm:$0xff] }
 0x546   : > { %v6160_v22 = vpop.eup %6159 }
 0x547   : > { %5663 = vmatmul.mubr.msk.f32.gmra.mrb[78].mxu0 %vm1854_vm2, %v6160_v22  ;;  %2417 = vadd.xlane.f32.xlu1 %v2416_v0  ;;  %v2428_v30 = vsel %vm1854_vm2, %v6160_v22, 0.0 }
 0x549   : > { %2408 = vadd.xlane.f32.xlu0 %v2407_v11 }
 0x54b   : > { %2423 = vadd.xlane.f32.xlu1 %v2422_v17 }
 0x54d   : > { %2414 = vadd.xlane.f32.xlu0 %v2413_v55 }
 0x54f   : > { %2429 = vadd.xlane.f32.xlu1 %v2428_v30  ;;  %v2244_v2 = vpop.xlane.xlu0 %2243 }
 0x550   : > { %6161 = vrcp.f32 %v2244_v2 }
 0x551   : > { %2420 = vadd.xlane.f32.xlu0 %v2419_v3 }
 0x553   : > { %v2241_v6 = vpop.xlane.xlu0 %2240 }
 0x554   : > { %v2250_v62 = vpop.xlane.xlu1 %2249  ;;  %6163 = vrcp.f32 %v2241_v6 }
 0x555   : > { %2426 = vadd.xlane.f32.xlu0 %v2425_v16  ;;  %6165 = vrcp.f32 %v2250_v62  ;;  %v7868_v16 = vld [vmem:[%s9011_s1 + $0x30] sm:$0xff] }
 0x557   : > { %v2247_v39 = vpop.xlane.xlu0 %2246 }
 0x558   : > { %v2256_v36 = vpop.xlane.xlu1 %2255 }
 0x559   : > { %6167 = vrcp.f32 %v2256_v36 }
 0x55a   : > { %v6162_v31 = vpop.eup %6161 }
 0x55b   : > { %v2253_v63 = vpop.xlane.xlu0 %2252  ;;  %v3250_v45 = vmul.f32 %v7820_v40, %v6162_v31 }
 0x55c   : > { %v7785_v29 = vpop.xlane.xlu1 %2261  ;;  %6169 = vrcp.f32 %v2253_v63 }
 0x55e   : > { %v6164_v37 = vpop.eup %6163 }
 0x55f   : > { %v3249_v24 = vmul.f32 %v7828_v25, %v6164_v37  ;;  %v6166_v12 = vpop.eup %6165 }
 0x560   : > { %v2268_v50 = vpop.xlane.xlu1 %2267  ;;  %v3252_v47 = vmul.f32 %v7836_v58, %v6166_v12 }
 0x561   : > { %v2259_v19 = vpop.xlane.xlu0 %2258 }
 0x562   : > { %6171 = vrcp.f32 %v2259_v19 }
 0x563   : > { %v6168_v28 = vpop.eup %6167  ;;  %6173 = vrcp.f32 %v2268_v50 }
 0x564   : > { %v2265_v27 = vpop.xlane.xlu1 %2264  ;;  %v3254_v34 = vmul.f32 %v7844_v57, %v6168_v28  ;;  %v7912_v28 = vld [vmem:[%s9011_s1 + $0x50] sm:$0xff] }
 0x565   : > { %6175 = vrcp.f32 %v2265_v27  ;;  %v7885_v27 = vld [vmem:[%s9011_s1 + $0x40] sm:$0xff] }
 0x566   : > { %v6170_v21 = vpop.eup %6169  ;;  %6177 = vrcp.f32 %v2247_v39 }
 0x567   : > { %v3253_v61 = vmul.f32 %v7850_v15, %v6170_v21 }
 0x568   : > { %v2271_v49 = vpop.xlane.xlu1 %2270 }
 0x569   : > { %v2274_v35 = vpop.xlane.xlu0 %2273 }
 0x56a   : > { %6179 = vrcp.f32 %v2274_v35 }
 0x56b   : > { %6181 = vrcp.f32 %v2271_v49 }
 0x56c   : > { %v6172_v17 = vpop.eup %6171 }
 0x56d   : > { %v2280_v10 = vpop.xlane.xlu0 %2279  ;;  %v6174_v55 = vpop.eup %6173  ;;  %v3255_v62 = vmul.f32 %v7868_v16, %v6172_v17 }
 0x56e   : > { %6183 = vrcp.f32 %v2280_v10  ;;  %v3258_v46 = vmul.f32 %v7879_v1, %v6174_v55 }
 0x56f   : > { %v6176_v2 = vpop.eup %6175 }
 0x570   : > { %v7793_v60 = vpop.xlane.xlu1 %2276  ;;  %v6178_v50 = vpop.eup %6177  ;;  %v3257_v19 = vmul.f32 %v7885_v27, %v6176_v2 }
 0x571   : > { %6185 = vrcp.f32 %v7793_v60 }
 0x572   : > { %6187 = vrcp.f32 %v7785_v29 }
 0x574   : > { %v7795_v4 = vpop.xlane.xlu1 %2282  ;;  %v6180_v54 = vpop.eup %6179 }
 0x575   : > { %v6182_v49 = vpop.eup %6181 }
 0x578   : > { %v7797_v20 = vpop.xlane.xlu0 %2285 }
 0x579   : > { %6189 = vrcp.f32 %v7797_v20 }
 0x57a   : > { %6191 = vrcp.f32 %v7795_v4  ;;  %v7930_v4 = vld [vmem:[%s9011_s1 + $0x68] sm:$0xff] }
 0x57c   : > { %v7799_v44 = vpop.xlane.xlu1 %2336 }
 0x57d   : > { %v7803_v9 = vpop.xlane.xlu0 %2339 }
 0x57e   : > { %6193 = vrcp.f32 %v7803_v9 }
 0x57f   : > { %6195 = vrcp.f32 %v7799_v44 }
 0x584   : > { %v7801_v43 = vpop.xlane.xlu1 %2291 }
 0x588   : > { %v7805_v41 = vpop.xlane.xlu1 %2345 }
 0x589   : > { %v7807_v51 = vpop.xlane.xlu0 %2288  ;;  %6197 = vrcp.f32 %v7805_v41  ;;  %v7955_v41 = vld [vmem:[%s9011_s1 + $0x38] sm:$0xff] }
 0x58c   : > { %v7811_v38 = vpop.xlane.xlu1 %2297 }
 0x58d   : > { %v7809_v33 = vpop.xlane.xlu0 %2342 }
 0x58e   : > { %6199 = vrcp.f32 %v7809_v33  ;;  %v7961_v33 = vld [vmem:[%s9011_s1 + $0x78] sm:$0xff] }
 0x590   : > { %v7815_v32 = vpop.xlane.xlu1 %2351 }
 0x591   : > { %v7813_v52 = vpop.xlane.xlu0 %2294  ;;  %6201 = vrcp.f32 %v7815_v32  ;;  %v7968_v32 = vld [vmem:[%s9011_s1 + $0x70] sm:$0xff] }
 0x594   : > { %v7831_v59 = vpop.xlane.xlu1 %2303 }
 0x595   : > { %v7823_v5 = vpop.xlane.xlu0 %2348 }
 0x596   : > { %v5555_v48 = vpop.f32.mrb[32].mxu1  ;;  %6203 = vrcp.f32 %v7823_v5 }
 0x597   : > { %v3314_v13 = vmul.f32 %v5555_v48, %v3250_v45  ;;  %v2745_v14 = vpop.f32.mrb[33].mxu1  ;;  %v7895_v45 = vld [vmem:[%s9011_s1 + $0x58] sm:$0xff]  ;;  %6205 = vrcp.f32 %v7801_v43 }
 0x598   : > { %v3313_v26 = vmul.f32 %v3249_v24, %v2745_v14  ;;  %v7853_v18 = vpop.xlane.xlu1 %2357  ;;  %v3260_v48 = vmul.f32 %v7895_v45, %v6180_v54  ;;  %v7902_v24 = vld [vmem:[%s9011_s1 + $0x10] sm:$0xff]  ;;  %6207 = vrcp.f32 %v7807_v51 }
 0x599   : > { %v7839_v23 = vpop.xlane.xlu0 %2300  ;;  %v3251_v12 = vmul.f32 %v7902_v24, %v6178_v50  ;;  %6209 = vrcp.f32 %v7811_v38 }
 0x59a   : > { %6211 = vrcp.f32 %v7813_v52 }
 0x59b   : > { %v5558_v56 = vpop.f32.mrb[34].mxu1  ;;  %6213 = vrcp.f32 %v7853_v18 }
 0x59c   : > { %v3316_v42 = vmul.f32 %v5558_v56, %v3252_v47  ;;  %v2755_v53 = vpop.f32.mrb[35].mxu1  ;;  %v7861_v30 = vpop.xlane.xlu1 %2309  ;;  %v3259_v56 = vmul.f32 %v7912_v28, %v6182_v49 }
 0x59d   : > { %v7859_v11 = vpop.xlane.xlu0 %2354 }
 0x59f   : > { %v5561_v7 = vpop.f32.mrb[36].mxu1 }
 0x5a0   : > { %v7855_v22 = vmul.f32 %v5561_v7, %v3254_v34  ;;  %v2765_v8 = vpop.f32.mrb[37].mxu1  ;;  %v7888_v60 = vpop.xlane.xlu1 %2363  ;;  %v3315_v34 = vmul.f32 %v3251_v12, %v2755_v53  ;;  %v7936_v53 = vld [vmem:[%s9011_s1 + $0x60] sm:$0xff] }
 0x5a1   : > { %v7857_v0 = vmul.f32 %v3253_v61, %v2765_v8  ;;  %v7871_v6 = vpop.xlane.xlu0 %2306 }
 0x5a4   : > { %v7919_v8 = vpop.xlane.xlu1 %2315 }
 0x5a6   : > { %v7863_v3 = vpop.f32.mrb[38].mxu1  ;;  %v7905_v14 = vpop.xlane.xlu0 %2360 }
 0x5a7   : > { %v2775_v36 = vpop.f32.mrb[39].mxu1 }
 0x5a8   : > { %v7873_v39 = vmul.f32 %v3255_v62, %v2775_v36  ;;  %v7940_v44 = vpop.xlane.xlu1 %2366 }
 0x5aa   : > { %v5567_v63 = vpop.f32.mrb[40].mxu1  ;;  %v7924_v62 = vpop.xlane.xlu0 %2369 }
 0x5ab   : > { %v3322_v35 = vmul.f32 %v5567_v63, %v3258_v46  ;;  %v2785_v10 = vpop.f32.mrb[41].mxu1 }
 0x5ac   : > { %v3321_v31 = vmul.f32 %v3257_v19, %v2785_v10 }
 0x5ad   : > { %v7890_v37 = vadd.f32 %v3322_v35, %v3314_v13 }
 0x5ae   : > { %v7907_v13 = vadd.f32 %v3321_v31, %v3313_v26  ;;  %v5570_v47 = vpop.f32.mrb[42].mxu1  ;;  %v6184_v26 = vpop.eup %6183  ;;  %6215 = vrcp.f32 %v7859_v11 }
 0x5af   : > { %v3324_v29 = vmul.f32 %v5570_v47, %v3260_v48  ;;  %v2795_v21 = vpop.f32.mrb[43].mxu1  ;;  %v6186_v55 = vpop.eup %6185  ;;  %v3262_v20 = vmul.f32 %v7930_v4, %v6184_v26  ;;  %6217 = vrcp.f32 %v7888_v60  ;;  %v8022_v60 = vld [vmem:[%s9011_s1 + $0x80] sm:$0xff] }
 0x5b0   : > { %v3323_v7 = vmul.f32 %v3259_v56, %v2795_v21  ;;  %v3261_v2 = vmul.f32 %v7936_v53, %v6186_v55  ;;  %v6188_v50 = vpop.eup %6187  ;;  %v7946_v49 = vpop.xlane.xlu0 %2312  ;;  %6219 = vrcp.f32 %v7905_v14 }
 0x5b1   : > { %v7917_v61 = vadd.f32 %v3324_v29, %v3316_v42  ;;  %v6190_v54 = vpop.eup %6189  ;;  %v3256_v10 = vmul.f32 %v7955_v41, %v6188_v50  ;;  %v7972_v47 = vpop.xlane.xlu1 %2321  ;;  %6221 = vrcp.f32 %v7831_v59 }
 0x5b2   : > { %v7921_v17 = vadd.f32 %v3323_v7, %v3315_v34  ;;  %v6192_v19 = vpop.eup %6191  ;;  %6223 = vrcp.f32 %v7839_v23  ;;  %v8045_v23 = vld [vmem:[%s9011_s1 + $0x90] sm:$0xff] }
 0x5b3   : > { %v3263_v31 = vmul.f32 %v7968_v32, %v6192_v19  ;;  %v6194_v48 = vpop.eup %6193  ;;  %v3320_v12 = vmul.f32 %v7863_v3, %v3256_v10  ;;  %6225 = vrcp.f32 %v7861_v30 }
 0x5b4   : > { %v6196_v21 = vpop.eup %6195  ;;  %v7975_v5 = vpop.xlane.xlu0 %2375  ;;  %v3282_v55 = vmul.f32 %v7820_v40, %v6194_v48  ;;  %6227 = vrcp.f32 %v7924_v62 }
 0x5b5   : > { %v6198_v3 = vpop.eup %6197  ;;  %v7988_v43 = vpop.xlane.xlu1 %2372  ;;  %6229 = vrcp.f32 %v7871_v6 }
 0x5b6   : > { %v5573_v42 = vpop.f32.mrb[44].mxu1  ;;  %v3284_v51 = vmul.f32 %v7836_v58, %v6198_v3 }
 0x5b7   : > { %v3326_v9 = vmul.f32 %v5573_v42, %v3262_v20  ;;  %v2805_v36 = vpop.f32.mrb[45].mxu1  ;;  %v3281_v42 = vmul.f32 %v7828_v25, %v6196_v21 }
 0x5b8   : > { %v3325_v46 = vmul.f32 %v3261_v2, %v2805_v36  ;;  %v6200_v2 = vpop.eup %6199  ;;  %v7994_v40 = vpop.xlane.xlu0 %2318  ;;  %6231 = vrcp.f32 %v7940_v44 }
 0x5b9   : > { %v7944_v63 = vadd.f32 %v3326_v9, %v7855_v22  ;;  %v3264_v22 = vmul.f32 %v7961_v33, %v6190_v54  ;;  %v3283_v25 = vmul.f32 %v7902_v24, %v6200_v2  ;;  %v8004_v58 = vpop.xlane.xlu1 %2327 }
 0x5ba   : > { %v7949_v35 = vadd.f32 %v3325_v46, %v7857_v0 }
 0x5bd   : > { %v5576_v0 = vpop.f32.mrb[46].mxu1  ;;  %v2379_v3 = vpop.xlane.xlu1 %2378 }
 0x5be   : > { %v3328_v56 = vmul.f32 %v5576_v0, %v3264_v22  ;;  %v2815_v29 = vpop.f32.mrb[47].mxu1 }
 0x5bf   : > { %v3327_v34 = vmul.f32 %v3263_v31, %v2815_v29 }
 0x5c0   : > { %v7977_v7 = vadd.f32 %v3328_v56, %v3320_v12  ;;  %v2382_v12 = vpop.xlane.xlu0 %2381 }
 0x5c1   : > { %v7981_v26 = vadd.f32 %v3327_v34, %v7873_v39  ;;  %v6202_v39 = vpop.eup %6201  ;;  %6233 = vrcp.f32 %v7975_v5  ;;  %v8057_v62 = vpop.xlane.xlu1 %2333 }
 0x5c2   : > { %v5619_v20 = vpop.f32.mrb[48].mxu0  ;;  %v6204_v54 = vpop.eup %6203  ;;  %v3286_v52 = vmul.f32 %v7844_v57, %v6202_v39  ;;  %v8016_v57 = vld [vmem:[%s9011_s1 + $0x88] sm:$0xff]  ;;  %6235 = vrcp.f32 %v7988_v43 }
 0x5c3   : > { %v7985_v9 = vmul.f32 %v5619_v20, %v3282_v55  ;;  %v3090_v36 = vpop.f32.mrb[49].mxu0  ;;  %v6206_v22 = vpop.eup %6205  ;;  %v3285_v31 = vmul.f32 %v7850_v15, %v6204_v54  ;;  %6237 = vrcp.f32 %v7919_v8 }
 0x5c4   : > { %v7990_v50 = vmul.f32 %v3281_v42, %v3090_v36  ;;  %v6208_v48 = vpop.eup %6207  ;;  %v3266_v56 = vmul.f32 %v8016_v57, %v6206_v22  ;;  %v8033_v36 = vld [vmem:[%s9011_s1 + $0x98] sm:$0xff]  ;;  %6239 = vrcp.f32 %v2382_v12 }
 0x5c5   : > { %v6210_v29 = vpop.eup %6209  ;;  %v3265_v21 = vmul.f32 %v8022_v60, %v6208_v48  ;;  %6241 = vrcp.f32 %v2379_v3 }
 0x5c6   : > { %v5622_v46 = vpop.f32.mrb[50].mxu0  ;;  %v6212_v14 = vpop.eup %6211  ;;  %6243 = vrcp.f32 %v7946_v49 }
 0x5c7   : > { %v7998_v19 = vmul.f32 %v5622_v46, %v3284_v51  ;;  %v3100_v38 = vpop.f32.mrb[51].mxu0  ;;  %v6214_v42 = vpop.eup %6213  ;;  %v3268_v51 = vmul.f32 %v8033_v36, %v6210_v29  ;;  %6245 = vrcp.f32 %v7972_v47 }
 0x5c8   : > { %v8001_v10 = vmul.f32 %v3283_v25, %v3100_v38  ;;  %v6216_v39 = vpop.eup %6215  ;;  %v8037_v46 = vpop.xlane.xlu0 %2324 }
 0x5c9   : > { %v6218_v22 = vpop.eup %6217 }
 0x5ca   : > { %v5625_v0 = vpop.f32.mrb[52].mxu0  ;;  %v6220_v48 = vpop.eup %6219  ;;  %v3290_v44 = vmul.f32 %v7879_v1, %v6218_v22 }
 0x5cb   : > { %v8008_v24 = vmul.f32 %v5625_v0, %v3286_v52  ;;  %v3110_v18 = vpop.f32.mrb[53].mxu0  ;;  %v3288_v52 = vmul.f32 %v7955_v41, %v6214_v42  ;;  %v3289_v29 = vmul.f32 %v7885_v27, %v6220_v48  ;;  %v6222_v5 = vpop.eup %6221  ;;  %v8081_v27 = vld [vmem:[%s9011_s1 + $0xa8] sm:$0xff] }
 0x5cc   : > { %v8011_v11 = vmul.f32 %v3285_v31, %v3110_v18  ;;  %v3287_v31 = vmul.f32 %v7868_v16, %v6216_v39  ;;  %v3270_v42 = vmul.f32 %v8081_v27, %v6222_v5 }
 0x5ce   : > { %v5579_v15 = vpop.f32.mrb[48].mxu1 }
 0x5cf   : > { %v3330_v34 = vmul.f32 %v5579_v15, %v3266_v56  ;;  %v2825_v55 = vpop.f32.mrb[49].mxu1 }
 0x5d0   : > { %v3329_v20 = vmul.f32 %v3265_v21, %v2825_v55  ;;  %v2388_v55 = vpop.xlane.xlu1 %2387 }
 0x5d1   : > { %v8028_v2 = vadd.f32 %v7890_v37, %v3330_v34  ;;  %v3267_v37 = vmul.f32 %v8045_v23, %v6212_v14  ;;  %v6224_v14 = vpop.eup %6223  ;;  %6247 = vrcp.f32 %v2388_v55 }
 0x5d2   : > { %v8040_v59 = vadd.f32 %v7907_v13, %v3329_v20  ;;  %v5582_v25 = vpop.f32.mrb[50].mxu1  ;;  %v6226_v34 = vpop.eup %6225 }
 0x5d3   : > { %v3332_v54 = vmul.f32 %v5582_v25, %v3268_v51  ;;  %v2835_v38 = vpop.f32.mrb[51].mxu1  ;;  %v6228_v43 = vpop.eup %6227 }
 0x5d4   : > { %v3331_v30 = vmul.f32 %v3267_v37, %v2835_v38  ;;  %v6230_v8 = vpop.eup %6229  ;;  %v3292_v38 = vmul.f32 %v7895_v45, %v6228_v43 }
 0x5d5   : > { %v8053_v13 = vadd.f32 %v7917_v61, %v3332_v54  ;;  %v5628_v0 = vpop.f32.mrb[54].mxu0  ;;  %v8067_v61 = vpop.xlane.xlu0 %2330 }
 0x5d6   : > { %v8060_v18 = vadd.f32 %v7921_v17, %v3331_v30  ;;  %v8062_v6 = vmul.f32 %v5628_v0, %v3288_v52  ;;  %v3120_v41 = vpop.f32.mrb[55].mxu0  ;;  %v6232_v3 = vpop.eup %6231  ;;  %v8098_v52 = vld [vmem:[%s9011_s1 + $0xb8] sm:$0xff] }
 0x5d7   : > { %v8064_v56 = vmul.f32 %v3287_v31, %v3120_v41  ;;  %v6234_v37 = vpop.eup %6233  ;;  %v3272_v22 = vmul.f32 %v8098_v52, %v6226_v34  ;;  %v2394_v31 = vpop.xlane.xlu1 %2393  ;;  %v3291_v45 = vmul.f32 %v7912_v28, %v6232_v3 }
 0x5d8   : > { %v6236_v0 = vpop.eup %6235 }
 0x5d9   : > { %v5631_v16 = vpop.f32.mrb[56].mxu0  ;;  %v2385_v12 = vpop.xlane.xlu0 %2384  ;;  %v3293_v47 = vmul.f32 %v7936_v53, %v6236_v0 }
 0x5da   : > { %v3354_v15 = vmul.f32 %v5631_v16, %v3290_v44  ;;  %v3130_v21 = vpop.f32.mrb[57].mxu0  ;;  %v6238_v34 = vpop.eup %6237  ;;  %6249 = vrcp.f32 %v2385_v12 }
 0x5db   : > { %v3353_v17 = vmul.f32 %v3289_v29, %v3130_v21  ;;  %v3294_v21 = vmul.f32 %v7930_v4, %v6234_v37  ;;  %6251 = vrcp.f32 %v7994_v40 }
 0x5dc   : > { %v8073_v20 = vadd.f32 %v3354_v15, %v7985_v9  ;;  %v8088_v9 = vld [vmem:[%s9011_s1 + $0xa0] sm:$0xff]  ;;  %6253 = vrcp.f32 %v8004_v58 }
 0x5dd   : > { %v8076_v1 = vadd.f32 %v3353_v17, %v7990_v50  ;;  %v3269_v50 = vmul.f32 %v8088_v9, %v6224_v14  ;;  %6255 = vrcp.f32 %v2394_v31 }
 0x5de   : > { %v5585_v51 = vpop.f32.mrb[52].mxu1 }
 0x5df   : > { %v3334_v39 = vmul.f32 %v5585_v51, %v3270_v42  ;;  %v2845_v25 = vpop.f32.mrb[53].mxu1 }
 0x5e0   : > { %v3333_v54 = vmul.f32 %v3269_v50, %v2845_v25 }
 0x5e1   : > { %v8093_v30 = vadd.f32 %v7944_v63, %v3334_v39  ;;  %v5634_v49 = vpop.f32.mrb[58].mxu0  ;;  %v8108_v63 = vld [vmem:[%s9011_s1 + $0xb0] sm:$0xff]  ;;  %v2400_v39 = vpop.xlane.xlu1 %2399 }
 0x5e2   : > { %v8102_v48 = vadd.f32 %v7949_v35, %v3333_v54  ;;  %v3356_v41 = vmul.f32 %v5634_v49, %v3292_v38  ;;  %v5588_v44 = vpop.f32.mrb[54].mxu1  ;;  %v3271_v16 = vmul.f32 %v8108_v63, %v6230_v8  ;;  %v3140_v5 = vpop.f32.mrb[59].mxu0 }
 0x5e3   : > { %v3336_v29 = vmul.f32 %v5588_v44, %v3272_v22  ;;  %v2855_v15 = vpop.f32.mrb[55].mxu1  ;;  %v2391_v35 = vpop.xlane.xlu0 %2390  ;;  %v3355_v28 = vmul.f32 %v3291_v45, %v3140_v5 }
 0x5e4   : > { %v8114_v14 = vadd.f32 %v3356_v41, %v7998_v19  ;;  %v3335_v17 = vmul.f32 %v3271_v16, %v2855_v15  ;;  %v6240_v8 = vpop.eup %6239  ;;  %6257 = vrcp.f32 %v2391_v35 }
 0x5e5   : > { %v8117_v43 = vadd.f32 %v7977_v7, %v3336_v29  ;;  %v5637_v42 = vpop.f32.mrb[60].mxu0  ;;  %v8122_v4 = vadd.f32 %v3355_v28, %v8001_v10  ;;  %v6242_v50 = vpop.eup %6241  ;;  %v3296_v40 = vmul.f32 %v7961_v33, %v6240_v8  ;;  %6259 = vrcp.f32 %v8037_v46  ;;  %v8163_v46 = vld [vmem:[%s9011_s1 + $0xd8] sm:$0xff] }
 0x5e6   : > { %v8125_v55 = vadd.f32 %v7981_v26, %v3335_v17  ;;  %v3358_v19 = vmul.f32 %v5637_v42, %v3294_v21  ;;  %v3150_v51 = vpop.f32.mrb[61].mxu0  ;;  %v6244_v12 = vpop.eup %6243  ;;  %v8137_v26 = vld [vmem:[%s9011_s1 + $0xc8] sm:$0xff]  ;;  %v3295_v54 = vmul.f32 %v7968_v32, %v6242_v50  ;;  %6261 = vrcp.f32 %v8057_v62 }
 0x5e7   : > { %v3357_v3 = vmul.f32 %v3293_v47, %v3150_v51  ;;  %v2397_v25 = vpop.xlane.xlu0 %2396  ;;  %v3274_v10 = vmul.f32 %v8137_v26, %v6238_v34  ;;  %v6246_v44 = vpop.eup %6245  ;;  %6263 = vrcp.f32 %v2400_v39 }
 0x5e8   : > { %v8128_v7 = vadd.f32 %v3358_v19, %v8008_v24  ;;  %v6248_v45 = vpop.eup %6247  ;;  %v2406_v16 = vpop.xlane.xlu1 %2405  ;;  %6265 = vrcp.f32 %v2397_v25 }
 0x5e9   : > { %v8131_v53 = vadd.f32 %v3357_v3, %v8011_v11  ;;  %v8145_v11 = vld [vmem:[%s9011_s1 + $0xc0] sm:$0xff]  ;;  %v6250_v15 = vpop.eup %6249  ;;  %6267 = vrcp.f32 %v8067_v61  ;;  %v8189_v61 = vld [vmem:[%s9011_s1 + $0xe8] sm:$0xff] }
 0x5ea   : > { %v3273_v33 = vmul.f32 %v8145_v11, %v6244_v12  ;;  %v6252_v21 = vpop.eup %6251  ;;  %v3297_v35 = vmul.f32 %v8022_v60, %v6250_v15  ;;  %6269 = vrcp.f32 %v2406_v16 }
 0x5eb   : > { %v5640_v37 = vpop.f32.mrb[62].mxu0  ;;  %v2403_v28 = vpop.xlane.xlu0 %2402 }
 0x5ec   : > { %v5591_v24 = vpop.f32.mrb[56].mxu1  ;;  %v3360_v38 = vmul.f32 %v5640_v37, %v3296_v40  ;;  %v3160_v49 = vpop.f32.mrb[63].mxu0  ;;  %6271 = vrcp.f32 %v2403_v28 }
 0x5ed   : > { %v3338_v22 = vmul.f32 %v5591_v24, %v3274_v10  ;;  %v2865_v0 = vpop.f32.mrb[57].mxu1  ;;  %v3359_v41 = vmul.f32 %v3295_v54, %v3160_v49  ;;  %v2412_v47 = vpop.xlane.xlu1 %2411 }
 0x5ee   : > { %v8149_v32 = vadd.f32 %v3360_v38, %v8062_v6  ;;  %v3337_v58 = vmul.f32 %v3273_v33, %v2865_v0  ;;  %v3298_v6 = vmul.f32 %v8016_v57, %v6248_v45  ;;  %v8171_v57 = vld [vmem:[%s9011_s1 + $0xd0] sm:$0xff]  ;;  %v6254_v50 = vpop.eup %6253  ;;  %6273 = vrcp.f32 %v2412_v47 }
 0x5ef   : > { %v3410_v29 = vadd.f32 %v8028_v2, %v3338_v22  ;;  %v8154_v5 = vadd.f32 %v3359_v41, %v8064_v56  ;;  %v3276_v2 = vmul.f32 %v8163_v46, %v6246_v44  ;;  %v3275_v34 = vmul.f32 %v8171_v57, %v6252_v21  ;;  %v6256_v3 = vpop.eup %6255  ;;  %v2409_v12 = vpop.xlane.xlu0 %2408 }
 0x5f0   : > { %v3409_v31 = vadd.f32 %v8040_v59, %v3337_v58  ;;  %v6258_v39 = vpop.eup %6257  ;;  %v3300_v25 = vmul.f32 %v8033_v36, %v6256_v3  ;;  %v8196_v36 = vld [vmem:[%s9011_s1 + $0xe0] sm:$0xff]  ;;  %6275 = vrcp.f32 %v2409_v12 }
 0x5f1   : > { %v6260_v54 = vpop.eup %6259  ;;  %v3299_v24 = vmul.f32 %v8045_v23, %v6258_v39 }
 0x5f2   : > { %5673 = vmatprep.mubr.msk.f32.mxu0 %vm546_vm0, %v3409_v31  ;;  %v3277_v33 = vmul.f32 %v8196_v36, %v6260_v54  ;;  %v6262_v58 = vpop.eup %6261 }
 0x5f3   : > { %5674 = vmatmul.mubr.msk.f32.vlgmr.msra.gmra.mrb[80].mxu0 %vm546_vm0, %v3410_v29  ;;  %v5643_v56 = vpop.f32.mrb[64].mxu0  ;;  %v2415_v22 = vpop.xlane.xlu0 %2414 }
 0x5f4   : > { %v5594_v59 = vpop.f32.mrb[58].mxu1  ;;  %v3362_v17 = vmul.f32 %v5643_v56, %v3298_v6  ;;  %v3170_v42 = vpop.f32.mrb[65].mxu0 }
 0x5f5   : > { %v3340_v8 = vmul.f32 %v5594_v59, %v3276_v2  ;;  %v2875_v19 = vpop.f32.mrb[59].mxu1  ;;  %v3361_v51 = vmul.f32 %v3297_v35, %v3170_v42  ;;  %v6264_v16 = vpop.eup %6263 }
 0x5f6   : > { %v8175_v60 = vadd.f32 %v8073_v20, %v3362_v17  ;;  %v3339_v62 = vmul.f32 %v3275_v34, %v2875_v19  ;;  %v2418_v20 = vpop.xlane.xlu1 %2417  ;;  %v6266_v31 = vpop.eup %6265  ;;  %v3302_v2 = vmul.f32 %v8081_v27, %v6264_v16  ;;  %v8220_v27 = vld [vmem:[%s9011_s1 + $0xf0] sm:$0xff] }
 0x5f7   : > { %v3412_v40 = vadd.f32 %v8053_v13, %v3340_v8  ;;  %v8180_v10 = vadd.f32 %v8076_v1, %v3361_v51  ;;  %v3278_v13 = vmul.f32 %v8189_v61, %v6254_v50  ;;  %v6268_v28 = vpop.eup %6267  ;;  %6277 = vrcp.f32 %v2418_v20 }
 0x5f8   : > { %v3411_v37 = vadd.f32 %v8060_v18, %v3339_v62  ;;  %v3279_v17 = vmul.f32 %v8220_v27, %v6268_v28  ;;  %6279 = vrcp.f32 %v2415_v22  ;;  %v6270_v19 = vpop.eup %6269 }
 0x5f9   : > { %v3304_v39 = vmul.f32 %v8098_v52, %v6270_v19  ;;  %v9043_v19 = vld [vmem:[#allocation5_spill] sm:$0xff] }
 0x5fa   : > { %5676 = vmatprep.mubr.msk.f32.mxu0 %vm546_vm0, %v3411_v37  ;;  %v2424_v6 = vpop.xlane.xlu1 %2423 }
 0x5fb   : > { %5677 = vmatmul.mubr.msk.f32.gmra.mrb[82].mxu0 %vm546_vm0, %v3412_v40  ;;  %v5646_v1 = vpop.f32.mrb[66].mxu0  ;;  %6281 = vrcp.f32 %v2424_v6 }
 0x5fc   : > { %v5597_v18 = vpop.f32.mrb[60].mxu1  ;;  %v3364_v38 = vmul.f32 %v5646_v1, %v3300_v25  ;;  %v3180_v49 = vpop.f32.mrb[67].mxu0 }
 0x5fd   : > { %v3342_v0 = vmul.f32 %v5597_v18, %v3278_v13  ;;  %v2885_v41 = vpop.f32.mrb[61].mxu1  ;;  %v3363_v44 = vmul.f32 %v3299_v24, %v3180_v49 }
 0x5fe   : > { %v8200_v45 = vadd.f32 %v8114_v14, %v3364_v38  ;;  %v3341_v23 = vmul.f32 %v3277_v33, %v2885_v41  ;;  %v2421_v14 = vpop.xlane.xlu0 %2420  ;;  %v2430_v40 = vpop.xlane.xlu1 %2429 }
 0x5ff   : > { %v3414_v29 = vadd.f32 %v8093_v30, %v3342_v0  ;;  %v8204_v15 = vadd.f32 %v8122_v4, %v3363_v44  ;;  %v8213_v30 = vld [vmem:[%s9011_s1 + $0xf8] sm:$0xff]  ;;  %6283 = vrcp.f32 %v2421_v14  ;;  %s6483_s1 = smov [#allocation2]  }
 0x600   : > { %v3413_v21 = vadd.f32 %v8102_v48, %v3341_v23  ;;  %v3280_v4 = vmul.f32 %v8213_v30, %v6262_v58  ;;  %v3301_v48 = vmul.f32 %v8088_v9, %v6266_v31  ;;  %v6272_v9 = vpop.eup %6271  ;;  %6285 = vrcp.f32 %v2430_v40  ;;  %s6421_s2 = sshll.u32 %s6483_s1, 4  ;;  %s6422_s2 = int_to_ptr.vmem [resolvable:$false] %s6421_s2 }
 0x601   : > { %v6274_v37 = vpop.eup %6273  ;;  %s6423_s27 = scalar_lea.vmem %s6422_s2, 2048  ;;  %p6424_p0 = scmp.lt.s32.totalorder %s8895_s28, %s6422_s2 }
 0x602   : > { %5679 = vmatprep.mubr.msk.f32.mxu0 %vm546_vm0, %v3413_v21  ;;  %v2427_v54 = vpop.xlane.xlu0 %2426  ;;  %v6276_v20 = vpop.eup %6275  ;;  %v3306_v1 = vmul.f32 %v8137_v26, %v6274_v37  ;;  %p6425_p1 = scmp.lt.s32.totalorder %s6423_s27, %s6417_s17 }
 0x603   : > { %5680 = vmatmul.mubr.msk.f32.gmra.mrb[84].mxu0 %vm546_vm0, %v3414_v29  ;;  %v5649_v56 = vpop.f32.mrb[68].mxu0  ;;  %6287 = vrcp.f32 %v2427_v54  ;;  %v6278_v52 = vpop.eup %6277  ;;  %v3305_v38 = vmul.f32 %v8145_v11, %v6276_v20  ;;  %v9045_v54 = vld [vmem:[#allocation9_spill] sm:$0xff] }
 0x604   : > { %v5600_v35 = vpop.f32.mrb[62].mxu1  ;;  %v3366_v59 = vmul.f32 %v5649_v56, %v3302_v2  ;;  %v3190_v34 = vpop.f32.mrb[69].mxu0  ;;  %v3308_v41 = vmul.f32 %v8163_v46, %v6278_v52  ;;  %p6426_p2 = por %p6425_p1, %p6424_p0 }
 0x605   : > { %v3344_v42 = vmul.f32 %v5600_v35, %v3280_v4  ;;  %v2895_v47 = vpop.f32.mrb[63].mxu1  ;;  %v3365_v8 = vmul.f32 %v3301_v48, %v3190_v34  ;;  %v6280_v33 = vpop.eup %6279 }
 0x606   : > { %v3406_v51 = vadd.f32 %v8128_v7, %v3366_v59  ;;  %v3343_v50 = vmul.f32 %v3279_v17, %v2895_v47  ;;  %v3303_v7 = vmul.f32 %v8108_v63, %v6272_v9  ;;  %v6282_v44 = vpop.eup %6281  ;;  %v3307_v26 = vmul.f32 %v8171_v57, %v6280_v33  ;;  %v9042_v47 = vld [vmem:[#allocation7_spill] sm:$0xff]  ;;  %p6427_p3 = pnand %p6426_p2, %p6420_p13 }
 0x607   : > { %v3416_v62 = vadd.f32 %v8117_v43, %v3344_v42  ;;  %v3405_v3 = vadd.f32 %v8131_v53, %v3365_v8 }
 0x608   : > { %v3415_v12 = vadd.f32 %v8125_v55, %v3343_v50 }
 0x609   : > { %v6284_v23 = vpop.eup %6283 }
 0x60a   : > { %5682 = vmatprep.mubr.msk.f32.mxu1 %vm546_vm0, %v3415_v12  ;;  %v5652_v25 = vpop.f32.mrb[70].mxu0  ;;  %v6286_v31 = vpop.eup %6285 }
 0x60b   : > { %v3368_v13 = vmul.f32 %v5652_v25, %v3304_v39  ;;  %5683 = vmatmul.mubr.msk.f32.vlgmr.msra.gmra.mrb[64].mxu1 %vm546_vm0, %v3416_v62  ;;  %v3200_v43 = vpop.f32.mrb[71].mxu0  ;;  %v9044_v39 = vld [vmem:[#allocation11_spill] sm:$0xff] }
 0x60c   : > { %v3367_v53 = vmul.f32 %v3303_v7, %v3200_v43 }
 0x60d   : > { %v3408_v55 = vadd.f32 %v8149_v32, %v3368_v13  ;;  %v6288_v28 = vpop.eup %6287 }
 0x60e   : > { %v3407_v24 = vadd.f32 %v8154_v5, %v3367_v53  ;;  %v5655_v18 = vpop.f32.mrb[72].mxu0 }
 0x60f   : > { %v3370_v63 = vmul.f32 %v5655_v18, %v3306_v1  ;;  %v3210_v49 = vpop.f32.mrb[73].mxu0  ;;  %v9046_v1 = vld [vmem:[#allocation14_spill] sm:$0xff] }
 0x610   : > { %v3369_v22 = vmul.f32 %v3305_v38, %v3210_v49 }
 0x611   : > { %v3418_v0 = vadd.f32 %v8175_v60, %v3370_v63  ;;  %v3310_v60 = vmul.f32 %v8189_v61, %v6282_v44  ;;  %v3311_v61 = vmul.f32 %v8220_v27, %v6288_v28 }
 0x612   : > { %v3417_v58 = vadd.f32 %v8180_v10, %v3369_v22  ;;  %v5658_v32 = vpop.f32.mrb[74].mxu0  ;;  %v3309_v10 = vmul.f32 %v8196_v36, %v6284_v23 }
 0x613   : > { %v3372_v16 = vmul.f32 %v5658_v32, %v3308_v41  ;;  %v3220_v5 = vpop.f32.mrb[75].mxu0  ;;  %v9048_v41 = vld [vmem:[#allocation17_spill] sm:$0xff] }
 0x614   : > { %v3371_v29 = vmul.f32 %v3307_v26, %v3220_v5  ;;  %5685 = vmatprep.mubr.msk.f32.mxu1 %vm546_vm0, %v3417_v58  ;;  %v9049_v58 = vld [vmem:[#allocation16_spill] sm:$0xff] }
 0x615   : > { %v3420_v11 = vadd.f32 %v8200_v45, %v3372_v16  ;;  %5686 = vmatmul.mubr.msk.f32.gmra.mrb[66].mxu1 %vm546_vm0, %v3418_v0  ;;  %v3312_v45 = vmul.f32 %v8213_v30, %v6286_v31  ;;  %v8256_v30 = vld [vmem:[%s8948_s9] ss:$0 sm:$0xff] }
 0x616   : > { %v3419_v46 = vadd.f32 %v8204_v15, %v3371_v29  ;;  %v5661_v21 = vpop.f32.mrb[76].mxu0 }
 0x617   : > { %v3374_v57 = vmul.f32 %v5661_v21, %v3310_v60  ;;  %v3230_v6 = vpop.f32.mrb[77].mxu0  ;;  %v9050_v60 = vld [vmem:[#allocation8_spill] sm:$0xff] }
 0x618   : > { %v3373_v2 = vmul.f32 %v3309_v10, %v3230_v6  ;;  %5688 = vmatprep.mubr.msk.f32.mxu1 %vm546_vm0, %v3419_v46  ;;  %v9051_v46 = vld [vmem:[#allocation6_spill] sm:$0xff] }
 0x619   : > { %v3422_v14 = vadd.f32 %v3406_v51, %v3374_v57  ;;  %5689 = vmatmul.mubr.msk.f32.gmra.mrb[68].mxu1 %vm546_vm0, %v3420_v11 }
 0x61a   : > { %v3421_v4 = vadd.f32 %v3405_v3, %v3373_v2  ;;  %v5664_v56 = vpop.f32.mrb[78].mxu0 }
 0x61b   : > { %v3376_v48 = vmul.f32 %v5664_v56, %v3312_v45  ;;  %v3240_v15 = vpop.f32.mrb[79].mxu0  ;;  %v9052_v45 = vld [vmem:[#allocation13_spill] sm:$0xff]  ;;  %v9053_v56 = vld [vmem:[#allocation10_spill] sm:$0xff] }
 0x61c   : > { %v3375_v35 = vmul.f32 %v3311_v61, %v3240_v15  ;;  %5691 = vmatprep.mubr.msk.f32.mxu1 %vm546_vm0, %v3421_v4 }
 0x61d   : > { %v3424_v36 = vadd.f32 %v3408_v55, %v3376_v48  ;;  %5692 = vmatmul.mubr.msk.f32.gmra.mrb[70].mxu1 %vm546_vm0, %v3422_v14 }
 0x61e   : > { %v3423_v59 = vadd.f32 %v3407_v24, %v3375_v35  ;;  %v9047_v24 = vld [vmem:[#allocation12_spill] sm:$0xff] }
 0x620   : > { %5694 = vmatprep.mubr.msk.f32.mxu1 %vm546_vm0, %v3423_v59 }
 0x621   : > { %5695 = vmatmul.mubr.msk.f32.gmra.mrb[72].mxu1 %vm546_vm0, %v3424_v36 }
 0x6c6   : > { %v5675_v17 = vpop.f32.mrb[80].mxu0 }
 0x6c7   : > { %v3556_v27 = vadd.f32 %v5675_v17, %v8256_v30  ;;  %v3550_v34 = vpop.f32.mrb[81].mxu0 }
 0x6c8   : > { %v3551_v42 = vadd.f32 %v8256_v30, %v3550_v34 }
 0x6c9   : > { %v8261_v8 = vadd.f32 %v3556_v27, %v9042_v47  ;;  %v9054_v27 = vld [vmem:[#allocation18_spill] sm:$0xff] }
 0x6ca   : > { %v8264_v51 = vadd.f32 %v3551_v42, %v9043_v19  ;;  %v9056_v42 = vld [vmem:[#allocation15_spill] sm:$0xff] }
 0x6cb   : > { %v3650_v50 = vsel %vm546_vm0, %v8261_v8, 0.0 }
 0x6cc   : > { %3651 = vadd.xlane.f32.xlu1 %v3650_v50  ;;  %v3647_v9 = vsel %vm546_vm0, %v8264_v51, 0.0 }
 0x6cd   : > { %3648 = vadd.xlane.f32.xlu0 %v3647_v9 }
 0x6ce   : > { %v5678_v62 = vpop.f32.mrb[82].mxu0 }
 0x6cf   : > { %v3566_v3 = vadd.f32 %v5678_v62, %v8256_v30  ;;  %v3560_v12 = vpop.f32.mrb[83].mxu0 }
 0x6d0   : > { %v3561_v40 = vadd.f32 %v8256_v30, %v3560_v12 }
 0x6d1   : > { %v8273_v37 = vadd.f32 %v3566_v3, %v9044_v39 }
 0x6d2   : > { %v8276_v25 = vadd.f32 %v3561_v40, %v9045_v54  ;;  %v9058_v40 = vld [vmem:[#allocation20_spill] sm:$0xff]  ;;  %v9060_v54 = vld [vmem:[#allocation19_spill] sm:$0xff] }
 0x6d3   : > { %v3656_v7 = vsel %vm546_vm0, %v8273_v37, 0.0 }
 0x6d4   : > { %3657 = vadd.xlane.f32.xlu1 %v3656_v7  ;;  %v3653_v20 = vsel %vm546_vm0, %v8276_v25, 0.0 }
 0x6d5   : > { %3654 = vadd.xlane.f32.xlu0 %v3653_v20 }
 0x6d6   : > { %v5681_v13 = vpop.f32.mrb[84].mxu0 }
 0x6d7   : > { %v3576_v43 = vadd.f32 %v5681_v13, %v8256_v30  ;;  %v3570_v53 = vpop.f32.mrb[85].mxu0 }
 0x6d8   : > { %v3571_v55 = vadd.f32 %v8256_v30, %v3570_v53 }
 0x6d9   : > { %v8285_v52 = vadd.f32 %v3576_v43, %v9046_v1 }
 0x6da   : > { %v8288_v18 = vadd.f32 %v3571_v55, %v9047_v24 }
 0x6db   : > { %v3662_v38 = vsel %vm546_vm0, %v8285_v52, 0.0 }
 0x6dc   : > { %3663 = vadd.xlane.f32.xlu1 %v3662_v38  ;;  %v3659_v33 = vsel %vm546_vm0, %v8288_v18, 0.0 }
 0x6dd   : > { %3660 = vadd.xlane.f32.xlu0 %v3659_v33 }
 0x6de   : > { %v5684_v63 = vpop.f32.mrb[64].mxu1 }
 0x6df   : > { %v3586_v49 = vadd.f32 %v5684_v63, %v8256_v30  ;;  %v3580_v22 = vpop.f32.mrb[65].mxu1 }
 0x6e0   : > { %v3581_v0 = vadd.f32 %v8256_v30, %v3580_v22 }
 0x6e1   : > { %v8297_v44 = vadd.f32 %v3586_v49, %v9048_v41 }
 0x6e2   : > { %v8300_v32 = vadd.f32 %v3581_v0, %v9049_v58 }
 0x6e3   : > { %v3668_v26 = vsel %vm546_vm0, %v8297_v44, 0.0 }
 0x6e4   : > { %3669 = vadd.xlane.f32.xlu1 %v3668_v26  ;;  %v3665_v23 = vsel %vm546_vm0, %v8300_v32, 0.0 }
 0x6e5   : > { %3666 = vadd.xlane.f32.xlu0 %v3665_v23 }
 0x6e8   : > { %v5687_v16 = vpop.f32.mrb[66].mxu1 }
 0x6e9   : > { %v3596_v5 = vadd.f32 %v5687_v16, %v8256_v30  ;;  %v3590_v29 = vpop.f32.mrb[67].mxu1 }
 0x6ea   : > { %v3591_v11 = vadd.f32 %v8256_v30, %v3590_v29 }
 0x6eb   : > { %v8309_v31 = vadd.f32 %v3596_v5, %v9050_v60 }
 0x6ec   : > { %v8312_v21 = vadd.f32 %v3591_v11, %v9051_v46  ;;  %v5690_v10 = vpop.f32.mrb[68].mxu1 }
 0x6ed   : > { %v3606_v28 = vadd.f32 %v5690_v10, %v8256_v30  ;;  %v3600_v57 = vpop.f32.mrb[69].mxu1  ;;  %v3674_v6 = vsel %vm546_vm0, %v8309_v31, 0.0 }
 0x6ee   : > { %v3601_v2 = vadd.f32 %v8256_v30, %v3600_v57  ;;  %3675 = vadd.xlane.f32.xlu1 %v3674_v6  ;;  %v3671_v14 = vsel %vm546_vm0, %v8312_v21, 0.0 }
 0x6ef   : > { %v8321_v4 = vadd.f32 %v3606_v28, %v9052_v45  ;;  %3672 = vadd.xlane.f32.xlu0 %v3671_v14 }
 0x6f0   : > { %v8324_v61 = vadd.f32 %v3601_v2, %v9053_v56  ;;  %v5693_v48 = vpop.f32.mrb[70].mxu1 }
 0x6f1   : > { %v3616_v15 = vadd.f32 %v5693_v48, %v8256_v30  ;;  %v3610_v35 = vpop.f32.mrb[71].mxu1  ;;  %v3680_v36 = vsel %vm546_vm0, %v8321_v4, 0.0 }
 0x6f2   : > { %v3611_v59 = vadd.f32 %v8256_v30, %v3610_v35  ;;  %3681 = vadd.xlane.f32.xlu1 %v3680_v36  ;;  %v3677_v17 = vsel %vm546_vm0, %v8324_v61, 0.0 }
 0x6f3   : > { %v8333_v34 = vadd.f32 %v3616_v15, %v9054_v27  ;;  %3678 = vadd.xlane.f32.xlu0 %v3677_v17 }
 0x6f4   : > { %v8336_v47 = vadd.f32 %v3611_v59, %v9056_v42  ;;  %v5696_v19 = vpop.f32.mrb[72].mxu1 }
 0x6f5   : > { %9055 = vst [vmem:[#allocation23_spill] sm:$0xff] %v8333_v34  ;;  %v3626_v50 = vadd.f32 %v5696_v19, %v8256_v30  ;;  %v3620_v9 = vpop.f32.mrb[73].mxu1  ;;  %v3686_v62 = vsel %vm546_vm0, %v8333_v34, 0.0 }
 0x6f6   : > { %9057 = vst [vmem:[#allocation21_spill] sm:$0xff] %v8336_v47  ;;  %v3621_v3 = vadd.f32 %v8256_v30, %v3620_v9  ;;  %3687 = vadd.xlane.f32.xlu1 %v3686_v62  ;;  %v3683_v12 = vsel %vm546_vm0, %v8336_v47, 0.0 }
 0x6f7   : > { %v8345_v39 = vadd.f32 %v3626_v50, %v9058_v40  ;;  %3684 = vadd.xlane.f32.xlu0 %v3683_v12  ;;  %v3899_v12 = vld [vmem:[%s8943_s4] sm:$0xff]  ;;  %v3900_v40 = vld [vmem:[%s8943_s4 + $0x8] sm:$0xff] }
 0x6f8   : > { %v8348_v7 = vadd.f32 %v3621_v3, %v9060_v54 }
 0x6f9   : > { %9059 = vst [vmem:[#allocation24_spill] sm:$0xff] %v8345_v39  ;;  %v3692_v20 = vsel %vm546_vm0, %v8345_v39, 0.0 }
 0x6fa   : > { %9061 = vst [vmem:[#allocation25_spill] sm:$0xff] %v8348_v7  ;;  %3693 = vadd.xlane.f32.xlu1 %v3692_v20  ;;  %v3689_v13 = vsel %vm546_vm0, %v8348_v7, 0.0  ;;  %v5857_v20 = vpack.c.bf16 %v3900_v40, %v3899_v12 }
 0x6fb   : > { %3690 = vadd.xlane.f32.xlu0 %v3689_v13 }
 0x6fc   : > { %5858 = vmatprep.subr.bf16.mxu0 %v5857_v20 }
 0x6fd   : > { %5860 = vmatpush3.bf16.msra.mxu0 %v5857_v20 }
 0x759   : > { %v3652_v30 = vpop.xlane.xlu1 %3651 }
 0x75a   : > { %v3696_v43 = vmul.f32 0.03125, %v3652_v30  ;;  %v3649_v53 = vpop.xlane.xlu0 %3648 }
 0x75b   : > { %v3695_v55 = vmul.f32 0.03125, %v3649_v53 }
 0x75c   : > { %v8355_v1 = vsub.f32 %v8261_v8, %v3696_v43 }
 0x75d   : > { %v8358_v24 = vsub.f32 %v8264_v51, %v3695_v55 }
 0x75e   : > { %v3728_v38 = vmul.f32 %v8355_v1, %v8355_v1 }
 0x75f   : > { %v3727_v33 = vmul.f32 %v8358_v24, %v8358_v24 }
 0x760   : > { %v3746_v63 = vsel %vm546_vm0, %v3728_v38, 0.0 }
 0x761   : > { %v3658_v49 = vpop.xlane.xlu1 %3657  ;;  %3747 = vadd.xlane.f32.xlu1 %v3746_v63  ;;  %v3743_v22 = vsel %vm546_vm0, %v3727_v33, 0.0  ;;  %v3901_v33 = vld [vmem:[%s8943_s4 + $0x10] sm:$0xff]  ;;  %v3902_v63 = vld [vmem:[%s8943_s4 + $0x18] sm:$0xff] }
 0x762   : > { %v3698_v0 = vmul.f32 0.03125, %v3658_v49  ;;  %3744 = vadd.xlane.f32.xlu0 %v3743_v22  ;;  %v3655_v41 = vpop.xlane.xlu0 %3654 }
 0x763   : > { %v3697_v58 = vmul.f32 0.03125, %v3655_v41 }
 0x764   : > { %v8367_v26 = vsub.f32 %v8273_v37, %v3698_v0  ;;  %v5861_v0 = vpack.c.bf16 %v3902_v63, %v3901_v33 }
 0x765   : > { %v8370_v23 = vsub.f32 %v8276_v25, %v3697_v58 }
 0x766   : > { %v3730_v16 = vmul.f32 %v8367_v26, %v8367_v26  ;;  %5862 = vmatprep.subr.bf16.mxu0 %v5861_v0 }
 0x767   : > { %v3729_v5 = vmul.f32 %v8370_v23, %v8370_v23  ;;  %5864 = vmatpush3.bf16.msra.mxu0 %v5861_v0 }
 0x768   : > { %v3752_v29 = vsel %vm546_vm0, %v3730_v16, 0.0 }
 0x769   : > { %v3664_v11 = vpop.xlane.xlu1 %3663  ;;  %3753 = vadd.xlane.f32.xlu1 %v3752_v29  ;;  %v3749_v60 = vsel %vm546_vm0, %v3729_v5, 0.0 }
 0x76a   : > { %v3700_v46 = vmul.f32 0.03125, %v3664_v11  ;;  %3750 = vadd.xlane.f32.xlu0 %v3749_v60  ;;  %v3661_v10 = vpop.xlane.xlu0 %3660 }
 0x76b   : > { %v3699_v28 = vmul.f32 0.03125, %v3661_v10 }
 0x76c   : > { %v8379_v57 = vsub.f32 %v8285_v52, %v3700_v46 }
 0x76d   : > { %v8382_v6 = vsub.f32 %v8288_v18, %v3699_v28 }
 0x76e   : > { %v3732_v2 = vmul.f32 %v8379_v57, %v8379_v57 }
 0x76f   : > { %v3731_v14 = vmul.f32 %v8382_v6, %v8382_v6 }
 0x770   : > { %v3758_v45 = vsel %vm546_vm0, %v3732_v2, 0.0 }
 0x771   : > { %v3670_v56 = vpop.xlane.xlu1 %3669  ;;  %3759 = vadd.xlane.f32.xlu1 %v3758_v45  ;;  %v3755_v48 = vsel %vm546_vm0, %v3731_v14, 0.0 }
 0x772   : > { %v3702_v15 = vmul.f32 0.03125, %v3670_v56  ;;  %3756 = vadd.xlane.f32.xlu0 %v3755_v48  ;;  %v3667_v35 = vpop.xlane.xlu0 %3666 }
 0x773   : > { %v3701_v36 = vmul.f32 0.03125, %v3667_v35 }
 0x774   : > { %v8391_v59 = vsub.f32 %v8297_v44, %v3702_v15 }
 0x775   : > { %v8394_v17 = vsub.f32 %v8300_v32, %v3701_v36 }
 0x776   : > { %v3734_v27 = vmul.f32 %v8391_v59, %v8391_v59 }
 0x777   : > { %v3733_v42 = vmul.f32 %v8394_v17, %v8394_v17 }
 0x778   : > { %v3764_v19 = vsel %vm546_vm0, %v3734_v27, 0.0 }
 0x779   : > { %3765 = vadd.xlane.f32.xlu1 %v3764_v19  ;;  %v3761_v50 = vsel %vm546_vm0, %v3733_v42, 0.0 }
 0x77a   : > { %3762 = vadd.xlane.f32.xlu0 %v3761_v50 }
 0x77b   : > { %v3676_v9 = vpop.xlane.xlu1 %3675 }
 0x77c   : > { %v3704_v62 = vmul.f32 0.03125, %v3676_v9  ;;  %v3673_v3 = vpop.xlane.xlu0 %3672 }
 0x77d   : > { %v3703_v54 = vmul.f32 0.03125, %v3673_v3 }
 0x77e   : > { %v8409_v13 = vsub.f32 %v8309_v31, %v3704_v62 }
 0x77f   : > { %v8412_v30 = vsub.f32 %v8312_v21, %v3703_v54  ;;  %v3682_v43 = vpop.xlane.xlu1 %3681 }
 0x780   : > { %v3706_v53 = vmul.f32 0.03125, %v3682_v43  ;;  %v3679_v55 = vpop.xlane.xlu0 %3678  ;;  %v3736_v38 = vmul.f32 %v8409_v13, %v8409_v13 }
 0x781   : > { %v3705_v49 = vmul.f32 0.03125, %v3679_v55  ;;  %v3735_v22 = vmul.f32 %v8412_v30, %v8412_v30 }
 0x782   : > { %v8425_v41 = vsub.f32 %v8321_v4, %v3706_v53  ;;  %v3770_v58 = vsel %vm546_vm0, %v3736_v38, 0.0 }
 0x783   : > { %v8429_v16 = vsub.f32 %v8324_v61, %v3705_v49  ;;  %v3688_v5 = vpop.xlane.xlu1 %3687  ;;  %3771 = vadd.xlane.f32.xlu1 %v3770_v58  ;;  %v3767_v29 = vsel %vm546_vm0, %v3735_v22, 0.0 }
 0x784   : > { %v3708_v11 = vmul.f32 0.03125, %v3688_v5  ;;  %3768 = vadd.xlane.f32.xlu0 %v3767_v29  ;;  %v3685_v60 = vpop.xlane.xlu0 %3684  ;;  %v3738_v46 = vmul.f32 %v8425_v41, %v8425_v41 }
 0x785   : > { %v3707_v10 = vmul.f32 0.03125, %v3685_v60  ;;  %v3737_v28 = vmul.f32 %v8429_v16, %v8429_v16 }
 0x786   : > { %v8437_v2 = vsub.f32 %v8333_v34, %v3708_v11  ;;  %v3776_v14 = vsel %vm546_vm0, %v3738_v46, 0.0  ;;  %v8465_v11 = vld [vmem:[%s8949_s10] ss:$0 sm:$0xff] }
 0x787   : > { %v8441_v45 = vsub.f32 %v8336_v47, %v3707_v10  ;;  %3777 = vadd.xlane.f32.xlu1 %v3776_v14  ;;  %v3694_v56 = vpop.xlane.xlu1 %3693  ;;  %v3773_v48 = vsel %vm546_vm0, %v3737_v28, 0.0 }
 0x788   : > { %v3710_v15 = vmul.f32 0.03125, %v3694_v56  ;;  %3774 = vadd.xlane.f32.xlu0 %v3773_v48  ;;  %v3691_v35 = vpop.xlane.xlu0 %3690  ;;  %v3740_v36 = vmul.f32 %v8437_v2, %v8437_v2  ;;  %v8472_v48 = vld [vmem:[%s8950_s11] ss:$0 sm:$0xff] }
 0x789   : > { %v3709_v27 = vmul.f32 0.03125, %v3691_v35  ;;  %v3739_v42 = vmul.f32 %v8441_v45, %v8441_v45 }
 0x78a   : > { %v8449_v19 = vsub.f32 %v8345_v39, %v3710_v15  ;;  %v3782_v50 = vsel %vm546_vm0, %v3740_v36, 0.0 }
 0x78b   : > { %v8453_v9 = vsub.f32 %v8348_v7, %v3709_v27  ;;  %3783 = vadd.xlane.f32.xlu1 %v3782_v50  ;;  %v3779_v62 = vsel %vm546_vm0, %v3739_v42, 0.0 }
 0x78c   : > { %3780 = vadd.xlane.f32.xlu0 %v3779_v62  ;;  %v3742_v3 = vmul.f32 %v8449_v19, %v8449_v19 }
 0x78d   : > { %v3741_v12 = vmul.f32 %v8453_v9, %v8453_v9 }
 0x78e   : > { %v3788_v40 = vsel %vm546_vm0, %v3742_v3, 0.0 }
 0x78f   : > { %3789 = vadd.xlane.f32.xlu1 %v3788_v40  ;;  %v3785_v54 = vsel %vm546_vm0, %v3741_v12, 0.0 }
 0x790   : > { %3786 = vadd.xlane.f32.xlu0 %v3785_v54 }
 0x7ee   : > { %v3748_v20 = vpop.xlane.xlu1 %3747 }
 0x7ef   : > { %v3792_v43 = vmul.f32 0.03125, %v3748_v20  ;;  %v3745_v53 = vpop.xlane.xlu0 %3744 }
 0x7f0   : > { %v3791_v55 = vmul.f32 0.03125, %v3745_v53 }
 0x7f1   : > { %v3808_v38 = vadd.f32 1e-05, %v3792_v43 }
 0x7f2   : > { %v3807_v33 = vadd.f32 1e-05, %v3791_v55 }
 0x7f3   : > { %6289 = vrsqrt.f32 %v3808_v38 }
 0x7f4   : > { %6291 = vrsqrt.f32 %v3807_v33 }
 0x7f6   : > { %v3754_v63 = vpop.xlane.xlu1 %3753 }
 0x7f7   : > { %v3794_v49 = vmul.f32 0.03125, %v3754_v63  ;;  %v3751_v22 = vpop.xlane.xlu0 %3750 }
 0x7f8   : > { %v3793_v0 = vmul.f32 0.03125, %v3751_v22 }
 0x7f9   : > { %v3810_v58 = vadd.f32 1e-05, %v3794_v49 }
 0x7fa   : > { %v3809_v5 = vadd.f32 1e-05, %v3793_v0 }
 0x7fb   : > { %6293 = vrsqrt.f32 %v3810_v58 }
 0x7fc   : > { %6295 = vrsqrt.f32 %v3809_v5 }
 0x7fd   : > { %v6290_v29 = vpop.eup %6289 }
 0x7fe   : > { %v6292_v60 = vpop.eup %6291  ;;  %v3840_v46 = vmul.f32 %v6290_v29, %v8355_v1  ;;  %v3760_v10 = vpop.xlane.xlu1 %3759 }
 0x7ff   : > { %v3796_v28 = vmul.f32 0.03125, %v3760_v10  ;;  %v3757_v14 = vpop.xlane.xlu0 %3756  ;;  %v3839_v56 = vmul.f32 %v6292_v60, %v8358_v24 }
 0x800   : > { %v3862_v15 = vmul.f32 %v8465_v11, %v3840_v46  ;;  %v3795_v35 = vmul.f32 0.03125, %v3757_v14 }
 0x801   : > { %v3812_v36 = vadd.f32 1e-05, %v3796_v28  ;;  %v3861_v27 = vmul.f32 %v8465_v11, %v3839_v56 }
 0x802   : > { %v3811_v42 = vadd.f32 1e-05, %v3795_v35  ;;  %v3884_v50 = vadd.f32 %v8472_v48, %v3862_v15 }
 0x803   : > { %6297 = vrsqrt.f32 %v3812_v36  ;;  %v3883_v1 = vadd.f32 %v8472_v48, %v3861_v27 }
 0x804   : > { %6299 = vrsqrt.f32 %v3811_v42 }
 0x805   : > { %v6294_v62 = vpop.eup %6293  ;;  %5705 = vmatprep.mubr.msk.f32.mxu0 %vm546_vm0, %v3883_v1 }
 0x806   : > { %v6296_v24 = vpop.eup %6295  ;;  %v3766_v3 = vpop.xlane.xlu1 %3765  ;;  %5706 = vmatmul.mubr.msk.f32.vlgmr.msra.gmra.mrb[86].mxu0 %vm546_vm0, %v3884_v50  ;;  %v3842_v12 = vmul.f32 %v6294_v62, %v8367_v26 }
 0x807   : > { %v3798_v40 = vmul.f32 0.03125, %v3766_v3  ;;  %v3763_v54 = vpop.xlane.xlu0 %3762  ;;  %v3841_v20 = vmul.f32 %v6296_v24, %v8370_v23 }
 0x808   : > { %v3797_v43 = vmul.f32 0.03125, %v3763_v54  ;;  %v3864_v53 = vmul.f32 %v8465_v11, %v3842_v12 }
 0x809   : > { %v3814_v55 = vadd.f32 1e-05, %v3798_v40  ;;  %v3863_v38 = vmul.f32 %v8465_v11, %v3841_v20 }
 0x80a   : > { %v3813_v33 = vadd.f32 1e-05, %v3797_v43  ;;  %v3886_v49 = vadd.f32 %v8472_v48, %v3864_v53 }
 0x80b   : > { %6301 = vrsqrt.f32 %v3814_v55  ;;  %v3885_v63 = vadd.f32 %v8472_v48, %v3863_v38 }
 0x80c   : > { %6303 = vrsqrt.f32 %v3813_v33 }
 0x80d   : > { %v6298_v22 = vpop.eup %6297  ;;  %5708 = vmatprep.mubr.msk.f32.mxu0 %vm546_vm0, %v3885_v63 }
 0x80e   : > { %v6300_v26 = vpop.eup %6299  ;;  %5709 = vmatmul.mubr.msk.f32.gmra.mrb[88].mxu0 %vm546_vm0, %v3886_v49  ;;  %v3844_v23 = vmul.f32 %v6298_v22, %v8379_v57 }
 0x80f   : > { %v3843_v0 = vmul.f32 %v6300_v26, %v8382_v6 }
 0x810   : > { %v3772_v58 = vpop.xlane.xlu1 %3771  ;;  %v3866_v5 = vmul.f32 %v8465_v11, %v3844_v23 }
 0x811   : > { %v3800_v29 = vmul.f32 0.03125, %v3772_v58  ;;  %v3769_v60 = vpop.xlane.xlu0 %3768  ;;  %v3865_v46 = vmul.f32 %v8465_v11, %v3843_v0 }
 0x812   : > { %v3799_v10 = vmul.f32 0.03125, %v3769_v60  ;;  %v3888_v35 = vadd.f32 %v8472_v48, %v3866_v5 }
 0x813   : > { %v3816_v28 = vadd.f32 1e-05, %v3800_v29  ;;  %v3887_v14 = vadd.f32 %v8472_v48, %v3865_v46 }
 0x814   : > { %v3815_v56 = vadd.f32 1e-05, %v3799_v10  ;;  %v3778_v15 = vpop.xlane.xlu1 %3777 }
 0x815   : > { %v6302_v36 = vpop.eup %6301  ;;  %6305 = vrsqrt.f32 %v3816_v28  ;;  %v3802_v57 = vmul.f32 0.03125, %v3778_v15  ;;  %5711 = vmatprep.mubr.msk.f32.mxu0 %vm546_vm0, %v3887_v14  ;;  %v3775_v6 = vpop.xlane.xlu0 %3774 }
 0x816   : > { %v6304_v27 = vpop.eup %6303  ;;  %6307 = vrsqrt.f32 %v3815_v56  ;;  %5712 = vmatmul.mubr.msk.f32.gmra.mrb[90].mxu0 %vm546_vm0, %v3888_v35  ;;  %v3801_v42 = vmul.f32 0.03125, %v3775_v6  ;;  %v3846_v1 = vmul.f32 %v6302_v36, %v8391_v59 }
 0x817   : > { %v3818_v50 = vadd.f32 1e-05, %v3802_v57  ;;  %v3845_v62 = vmul.f32 %v6304_v27, %v8394_v17 }
 0x818   : > { %v3817_v24 = vadd.f32 1e-05, %v3801_v42  ;;  %v3784_v3 = vpop.xlane.xlu1 %3783  ;;  %v3868_v12 = vmul.f32 %v8465_v11, %v3846_v1 }
 0x819   : > { %6309 = vrsqrt.f32 %v3818_v50  ;;  %v3804_v40 = vmul.f32 0.03125, %v3784_v3  ;;  %v3781_v54 = vpop.xlane.xlu0 %3780  ;;  %v3867_v20 = vmul.f32 %v8465_v11, %v3845_v62 }
 0x81a   : > { %6311 = vrsqrt.f32 %v3817_v24  ;;  %v3803_v43 = vmul.f32 0.03125, %v3781_v54  ;;  %v3890_v59 = vadd.f32 %v8472_v48, %v3868_v12 }
 0x81b   : > { %v3820_v53 = vadd.f32 1e-05, %v3804_v40  ;;  %v3889_v55 = vadd.f32 %v8472_v48, %v3867_v20 }
 0x81c   : > { %v3819_v38 = vadd.f32 1e-05, %v3803_v43  ;;  %v3790_v33 = vpop.xlane.xlu1 %3789 }
 0x81d   : > { %6313 = vrsqrt.f32 %v3820_v53  ;;  %v3806_v17 = vmul.f32 0.03125, %v3790_v33  ;;  %5714 = vmatprep.mubr.msk.f32.mxu0 %vm546_vm0, %v3889_v55  ;;  %v3787_v63 = vpop.xlane.xlu0 %3786  ;;  %v8551_v53 = vld [vmem:[%s8951_s12] ss:$0 sm:$0xff] }
 0x81e   : > { %6315 = vrsqrt.f32 %v3819_v38  ;;  %5715 = vmatmul.mubr.msk.f32.gmra.mrb[92].mxu0 %vm546_vm0, %v3890_v59  ;;  %v3805_v49 = vmul.f32 0.03125, %v3787_v63 }
 0x81f   : > { %v6306_v22 = vpop.eup %6305  ;;  %v3822_v26 = vadd.f32 1e-05, %v3806_v17 }
 0x820   : > { %v6308_v23 = vpop.eup %6307  ;;  %v3821_v0 = vadd.f32 1e-05, %v3805_v49  ;;  %v3848_v58 = vmul.f32 %v6306_v22, %v8409_v13 }
 0x821   : > { %6317 = vrsqrt.f32 %v3822_v26  ;;  %v3847_v5 = vmul.f32 %v6308_v23, %v8412_v30 }
 0x822   : > { %6319 = vrsqrt.f32 %v3821_v0  ;;  %v3870_v29 = vmul.f32 %v8465_v11, %v3848_v58 }
 0x823   : > { %v6310_v60 = vpop.eup %6309  ;;  %v3869_v46 = vmul.f32 %v8465_v11, %v3847_v5 }
 0x824   : > { %v6312_v10 = vpop.eup %6311  ;;  %v3850_v28 = vmul.f32 %v6310_v60, %v8425_v41  ;;  %v3892_v15 = vadd.f32 %v8472_v48, %v3870_v29 }
 0x825   : > { %v3891_v14 = vadd.f32 %v8472_v48, %v3869_v46  ;;  %v3849_v56 = vmul.f32 %v6312_v10, %v8429_v16 }
 0x826   : > { %v3872_v13 = vmul.f32 %v8465_v11, %v3850_v28 }
 0x827   : > { %v6314_v35 = vpop.eup %6313  ;;  %5717 = vmatprep.mubr.msk.f32.mxu0 %vm546_vm0, %v3891_v14  ;;  %v3871_v30 = vmul.f32 %v8465_v11, %v3849_v56 }
 0x828   : > { %v6316_v36 = vpop.eup %6315  ;;  %5718 = vmatmul.mubr.msk.f32.gmra.mrb[94].mxu0 %vm546_vm0, %v3892_v15  ;;  %v3852_v57 = vmul.f32 %v6314_v35, %v8437_v2  ;;  %v3894_v16 = vadd.f32 %v8472_v48, %v3872_v13 }
 0x829   : > { %v3893_v41 = vadd.f32 %v8472_v48, %v3871_v30  ;;  %v3851_v6 = vmul.f32 %v6316_v36, %v8441_v45 }
 0x82a   : > { %v3874_v27 = vmul.f32 %v8465_v11, %v3852_v57 }
 0x82b   : > { %v6318_v42 = vpop.eup %6317  ;;  %5720 = vmatprep.mubr.msk.f32.mxu0 %vm546_vm0, %v3893_v41  ;;  %v3873_v1 = vmul.f32 %v8465_v11, %v3851_v6 }
 0x82c   : > { %v6320_v50 = vpop.eup %6319  ;;  %5721 = vmatmul.mubr.msk.f32.gmra.mrb[96].mxu0 %vm546_vm0, %v3894_v16  ;;  %v3854_v62 = vmul.f32 %v6318_v42, %v8449_v19  ;;  %v3896_v45 = vadd.f32 %v8472_v48, %v3874_v27  ;;  %v4535_v19 = vld [vmem:[%s8944_s5] sm:$0xff] }
 0x82d   : > { %v3895_v2 = vadd.f32 %v8472_v48, %v3873_v1  ;;  %v3853_v24 = vmul.f32 %v6320_v50, %v8453_v9  ;;  %v4536_v9 = vld [vmem:[%s8944_s5 + $0x8] sm:$0xff] }
 0x82e   : > { %v3876_v3 = vmul.f32 %v8465_v11, %v3854_v62  ;;  %v5865_v20 = vpack.c.bf16 %v4536_v9, %v4535_v19 }
 0x82f   : > { %5723 = vmatprep.mubr.msk.f32.mxu0 %vm546_vm0, %v3895_v2  ;;  %v3875_v12 = vmul.f32 %v8465_v11, %v3853_v24  ;;  %v4537_v11 = vld [vmem:[%s8944_s5 + $0x10] sm:$0xff] }
 0x830   : > { %5724 = vmatmul.mubr.msk.f32.gmra.mrb[98].mxu0 %vm546_vm0, %v3896_v45  ;;  %v3898_v54 = vadd.f32 %v8472_v48, %v3876_v3  ;;  %5866 = vmatprep.subr.bf16.mxu1 %v5865_v20 }
 0x831   : > { %v3897_v40 = vadd.f32 %v8472_v48, %v3875_v12  ;;  %5868 = vmatpush3.bf16.msra.mxu1 %v5865_v20  ;;  %v4538_v48 = vld [vmem:[%s8944_s5 + $0x18] sm:$0xff] }
 0x832   : > { %v5869_v43 = vpack.c.bf16 %v4538_v48, %v4537_v11 }
 0x833   : > { %5726 = vmatprep.mubr.msk.f32.mxu0 %vm546_vm0, %v3897_v40 }
 0x834   : > { %5727 = vmatmul.mubr.msk.f32.gmra.mrb[100].mxu0 %vm546_vm0, %v3898_v54  ;;  %5870 = vmatprep.subr.bf16.mxu1 %v5869_v43 }
 0x835   : > { %5872 = vmatpush3.bf16.msra.mxu1 %v5869_v43 }
 0x8d9   : > { %v5707_v55 = vpop.f32.mrb[86].mxu0 }
 0x8da   : > { %v8554_v38 = vadd.f32 %v5707_v55, %v8551_v53  ;;  %v4024_v33 = vpop.f32.mrb[87].mxu0 }
 0x8db   : > { %v8557_v59 = vadd.f32 %v8551_v53, %v4024_v33 }
 0x8dc   : > { %v8560_v17 = vmul.f32 0.70710677, %v8554_v38 }
 0x8dd   : > { %v8563_v63 = vmul.f32 0.70710677, %v8557_v59 }
 0x8de   : > { %v4136_v49 = vand.u32 2147483647, %v8560_v17  ;;  %vm4456_vm3 = vcmp.lt.f32.partialorder %v8560_v17, 0.0 }
 0x8df   : > { %v4135_v22 = vand.u32 2147483647, %v8563_v63  ;;  %vm4455_vm4 = vcmp.lt.f32.partialorder %v8563_v63, 0.0 }
 0x8e0   : > { %v4152_v26 = vmul.f32 0.3275911, %v4136_v49  ;;  %v4360_v10 = vmul.f32 %v4136_v49, %v4136_v49 }
 0x8e1   : > { %v4151_v23 = vmul.f32 0.3275911, %v4135_v22  ;;  %v5710_v0 = vpop.f32.mrb[88].mxu0  ;;  %v4359_v14 = vmul.f32 %v4135_v22, %v4135_v22 }
 0x8e2   : > { %v4168_v58 = vadd.f32 1.0, %v4152_v26  ;;  %v8568_v5 = vadd.f32 %v5710_v0, %v8551_v53  ;;  %v4034_v29 = vpop.f32.mrb[89].mxu0  ;;  %v4376_v35 = vsub.f32 0.0, %v4360_v10 }
 0x8e3   : > { %v4167_v60 = vadd.f32 1.0, %v4151_v23  ;;  %v4035_v46 = vadd.f32 %v8551_v53, %v4034_v29  ;;  %v4375_v57 = vsub.f32 0.0, %v4359_v14 }
 0x8e4   : > { %6321 = vrcp.f32 %v4168_v58  ;;  %v8572_v28 = vmul.f32 0.70710677, %v8568_v5  ;;  %v4393_v24 = vmul.f32 1.442695, %v4376_v35 }
 0x8e5   : > { %6323 = vrcp.f32 %v4167_v60  ;;  %v8574_v56 = vmul.f32 0.70710677, %v4035_v46  ;;  %v4391_v3 = vmul.f32 1.442695, %v4375_v57 }
 0x8e6   : > { %v4138_v15 = vand.u32 2147483647, %v8572_v28  ;;  %vm4458_vm5 = vcmp.lt.f32.partialorder %v8572_v28, 0.0 }
 0x8e7   : > { %v4137_v13 = vand.u32 2147483647, %v8574_v56  ;;  %vm4457_vm6 = vcmp.lt.f32.partialorder %v8574_v56, 0.0 }
 0x8e8   : > { %v4154_v30 = vmul.f32 0.3275911, %v4138_v15  ;;  %v4362_v36 = vmul.f32 %v4138_v15, %v4138_v15  ;;  %v8606_v15 = vmul.f32 0.5, %v8554_v38 }
 0x8e9   : > { %v4153_v41 = vmul.f32 0.3275911, %v4137_v13  ;;  %v5713_v6 = vpop.f32.mrb[90].mxu0  ;;  %v4361_v27 = vmul.f32 %v4137_v13, %v4137_v13 }
 0x8ea   : > { %v4170_v16 = vadd.f32 1.0, %v4154_v30  ;;  %v8579_v42 = vadd.f32 %v5713_v6, %v8551_v53  ;;  %v4044_v1 = vpop.f32.mrb[91].mxu0  ;;  %v4378_v50 = vsub.f32 0.0, %v4362_v36  ;;  %v8610_v36 = vmul.f32 0.5, %v8557_v59 }
 0x8eb   : > { %v4169_v62 = vadd.f32 1.0, %v4153_v41  ;;  %v8582_v2 = vadd.f32 %v8551_v53, %v4044_v1  ;;  %v4377_v54 = vsub.f32 0.0, %v4361_v27 }
 0x8ec   : > { %6325 = vrcp.f32 %v4170_v16  ;;  %v8585_v45 = vmul.f32 0.70710677, %v8579_v42  ;;  %v4397_v11 = vmul.f32 1.442695, %v4378_v50  ;;  %v8617_v16 = vmul.f32 0.5, %v4035_v46 }
 0x8ed   : > { %6327 = vrcp.f32 %v4169_v62  ;;  %v8588_v12 = vmul.f32 0.70710677, %v8582_v2  ;;  %v4395_v23 = vmul.f32 1.442695, %v4377_v54 }
 0x8ee   : > { %v8590_v40 = vpop.eup %6321  ;;  %v4140_v19 = vand.u32 2147483647, %v8585_v45  ;;  %6329 = vpow2.f32 %v4393_v24  ;;  %vm4460_vm7 = vcmp.lt.f32.partialorder %v8585_v45, 0.0 }
 0x8ef   : > { %v8593_v9 = vpop.eup %6323  ;;  %v4216_v20 = vmul.f32 1.0614054, %v8590_v40  ;;  %v4139_v48 = vand.u32 2147483647, %v8588_v12  ;;  %6331 = vpow2.f32 %v4391_v3  ;;  %vm4459_vm8 = vcmp.lt.f32.partialorder %v8588_v12, 0.0 }
 0x8f0   : > { %v4215_v43 = vmul.f32 1.0614054, %v8593_v9  ;;  %v4156_v55 = vmul.f32 0.3275911, %v4140_v19  ;;  %6333 = vpow2.f32 %v4397_v11  ;;  %v4364_v35 = vmul.f32 %v4140_v19, %v4140_v19 }
 0x8f1   : > { %v4232_v33 = vadd.f32 -1.4531521, %v4216_v20  ;;  %v4155_v49 = vmul.f32 0.3275911, %v4139_v48  ;;  %v5716_v22 = vpop.f32.mrb[92].mxu0  ;;  %v4363_v50 = vmul.f32 %v4139_v48, %v4139_v48 }
 0x8f2   : > { %v4231_v26 = vadd.f32 -1.4531521, %v4215_v43  ;;  %v4172_v0 = vadd.f32 1.0, %v4156_v55  ;;  %v8599_v58 = vadd.f32 %v5716_v22, %v8551_v53  ;;  %v4054_v29 = vpop.f32.mrb[93].mxu0  ;;  %v4380_v54 = vsub.f32 0.0, %v4364_v35 }
 0x8f3   : > { %v4248_v60 = vmul.f32 %v8590_v40, %v4232_v33  ;;  %v4171_v10 = vadd.f32 1.0, %v4155_v49  ;;  %v8603_v14 = vadd.f32 %v8551_v53, %v4054_v29  ;;  %v4379_v29 = vsub.f32 0.0, %v4363_v50 }
 0x8f4   : > { %v4247_v13 = vmul.f32 %v8593_v9, %v4231_v26  ;;  %6335 = vrcp.f32 %v4172_v0  ;;  %v8613_v57 = vmul.f32 0.70710677, %v8599_v58 }
 0x8f5   : > { %v4264_v30 = vadd.f32 1.4214138, %v4248_v60  ;;  %6337 = vrcp.f32 %v4171_v10  ;;  %v8620_v38 = vmul.f32 0.70710677, %v8603_v14 }
 0x8f6   : > { %v8615_v41 = vpop.eup %6325  ;;  %v4263_v6 = vadd.f32 1.4214138, %v4247_v13  ;;  %6339 = vpow2.f32 %v4395_v23  ;;  %v4142_v62 = vand.u32 2147483647, %v8613_v57  ;;  %vm4462_vm9 = vcmp.lt.f32.partialorder %v8613_v57, 0.0 }
 0x8f7   : > { %v8622_v27 = vpop.eup %6327  ;;  %v4280_v1 = vmul.f32 %v8590_v40, %v4264_v30  ;;  %v4218_v59 = vmul.f32 1.0614054, %v8615_v41  ;;  %v4141_v46 = vand.u32 2147483647, %v8620_v38  ;;  %v4401_v30 = vmul.f32 1.442695, %v4380_v54 }
 0x8f8   : > { %v4279_v24 = vmul.f32 %v8593_v9, %v4263_v6  ;;  %v4217_v3 = vmul.f32 1.0614054, %v8622_v27  ;;  %v4158_v11 = vmul.f32 0.3275911, %v4142_v62  ;;  %v4366_v43 = vmul.f32 %v4142_v62, %v4142_v62  ;;  %v6330_v55 = vpop.eup %6329 }
 0x8f9   : > { %v4296_v19 = vadd.f32 -0.28449672, %v4280_v1  ;;  %v4234_v20 = vadd.f32 -1.4531521, %v4218_v59  ;;  %v4157_v22 = vmul.f32 0.3275911, %v4141_v46  ;;  %v4365_v26 = vmul.f32 %v4141_v46, %v4141_v46  ;;  %v6332_v23 = vpop.eup %6331 }
 0x8fa   : > { %v4295_v33 = vadd.f32 -0.28449672, %v4279_v24  ;;  %v4233_v49 = vadd.f32 -1.4531521, %v4217_v3  ;;  %v4174_v60 = vadd.f32 1.0, %v4158_v11  ;;  %v8636_v59 = vpop.eup %6333  ;;  %v4382_v3 = vsub.f32 0.0, %v4366_v43 }
 0x8fb   : > { %v4312_v48 = vmul.f32 %v8590_v40, %v4296_v19  ;;  %v4250_v0 = vmul.f32 %v8615_v41, %v4234_v20  ;;  %v5719_v10 = vpop.f32.mrb[94].mxu0  ;;  %v4173_v6 = vadd.f32 1.0, %v4157_v22  ;;  %v4381_v20 = vsub.f32 0.0, %v4365_v26 }
 0x8fc   : > { %v4311_v13 = vmul.f32 %v8593_v9, %v4295_v33  ;;  %v4249_v35 = vmul.f32 %v8622_v27, %v4233_v49  ;;  %v8634_v1 = vpop.f32.mrb[95].mxu0  ;;  %6341 = vrcp.f32 %v4174_v60  ;;  %v4399_v22 = vmul.f32 1.442695, %v4379_v29 }
 0x8fd   : > { %v4328_v62 = vadd.f32 0.2548296, %v4312_v48  ;;  %v4266_v24 = vadd.f32 1.4214138, %v4250_v0  ;;  %6343 = vrcp.f32 %v4173_v6  ;;  %v4403_v29 = vmul.f32 1.442695, %v4381_v20 }
 0x8fe   : > { %v8638_v46 = vpop.eup %6335  ;;  %v4327_v50 = vadd.f32 0.2548296, %v4311_v13  ;;  %v4265_v19 = vadd.f32 1.4214138, %v4249_v35  ;;  %6345 = vpow2.f32 %v4401_v30  ;;  %vm4461_vm10 = vcmp.lt.f32.partialorder %v8620_v38, 0.0 }
 0x8ff   : > { %v8641_v11 = vpop.eup %6337  ;;  %v4344_v54 = vmul.f32 %v8590_v40, %v4328_v62  ;;  %v4282_v33 = vmul.f32 %v8615_v41, %v4266_v24  ;;  %v4220_v49 = vmul.f32 1.0614054, %v8638_v46  ;;  %v8647_v43 = vpop.f32.mrb[96].mxu0  ;;  %v4405_v62 = vmul.f32 1.442695, %v4382_v3 }
 0x900   : > { %v6340_v48 = vpop.eup %6339  ;;  %v4343_v0 = vmul.f32 %v8593_v9, %v4327_v50  ;;  %v4281_v60 = vmul.f32 %v8622_v27, %v4265_v19  ;;  %v4219_v26 = vmul.f32 1.0614054, %v8641_v11  ;;  %v8652_v13 = vpop.f32.mrb[97].mxu0  ;;  %v8657_v50 = vadd.f32 %v5719_v10, %v8551_v53 }
 0x901   : > { %v4424_v40 = vmul.f32 %v6330_v55, %v4344_v54  ;;  %v4298_v35 = vadd.f32 -0.28449672, %v4282_v33  ;;  %v4236_v6 = vadd.f32 -1.4531521, %v4220_v49  ;;  %6347 = vpow2.f32 %v4399_v22 }
 0x902   : > { %v4423_v24 = vmul.f32 %v6332_v23, %v4343_v0  ;;  %v4297_v39 = vadd.f32 -0.28449672, %v4281_v60  ;;  %v4235_v7 = vadd.f32 -1.4531521, %v4219_v26  ;;  %6349 = vpow2.f32 %v4405_v62 }
 0x903   : > { %v4440_v34 = vsub.f32 1.0, %v4424_v40  ;;  %v4314_v47 = vmul.f32 %v8615_v41, %v4298_v35  ;;  %v4252_v9 = vmul.f32 %v8638_v46, %v4236_v6  ;;  %v8659_v30 = vpop.f32.mrb[98].mxu0  ;;  %6351 = vpow2.f32 %v4403_v29 }
 0x904   : > { %v4439_v19 = vsub.f32 1.0, %v4423_v24  ;;  %v4313_v55 = vmul.f32 %v8622_v27, %v4297_v39  ;;  %v4251_v54 = vmul.f32 %v8641_v11, %v4235_v7  ;;  %v8663_v23 = vpop.f32.mrb[99].mxu0 }
 0x905   : > { %v4472_v3 = vsub.f32 0.0, %v4440_v34  ;;  %v4330_v20 = vadd.f32 0.2548296, %v4314_v47  ;;  %v4268_v33 = vadd.f32 1.4214138, %v4252_v9 }
 0x906   : > { %v4471_v49 = vsub.f32 0.0, %v4439_v19  ;;  %v4329_v0 = vadd.f32 0.2548296, %v4313_v55  ;;  %v4267_v10 = vadd.f32 1.4214138, %v4251_v54  ;;  %v8666_v60 = vpop.eup %6341 }
 0x907   : > { %v4488_v39 = vsel %vm4456_vm3, %v4472_v3, %v4440_v34  ;;  %v4346_v7 = vmul.f32 %v8615_v41, %v4330_v20  ;;  %v4284_v22 = vmul.f32 %v8638_v46, %v4268_v33  ;;  %v8674_v47 = vmul.f32 0.70710677, %v8657_v50  ;;  %v8676_v26 = vpop.f32.mrb[100].mxu0  ;;  %v8678_v40 = vpop.eup %6343 }
 0x908   : > { %v4504_v35 = vadd.f32 1.0, %v4488_v39  ;;  %v4487_v6 = vsel %vm4455_vm4, %v4471_v49, %v4439_v19  ;;  %v4345_v17 = vmul.f32 %v8622_v27, %v4329_v0  ;;  %v4283_v34 = vmul.f32 %v8641_v11, %v4267_v10  ;;  %v8684_v41 = vpop.f32.mrb[101].mxu0  ;;  %v6346_v55 = vpop.eup %6345 }
 0x909   : > { %v4503_v62 = vadd.f32 1.0, %v4487_v6  ;;  %v4426_v24 = vmul.f32 %v8636_v59, %v4346_v7  ;;  %v4300_v29 = vadd.f32 -0.28449672, %v4284_v22  ;;  %v4222_v9 = vmul.f32 1.0614054, %v8666_v60 }
 0x90a   : > { %v4520_v54 = vmul.f32 %v4504_v35, %v8606_v15  ;;  %v4425_v3 = vmul.f32 %v6340_v48, %v4345_v17  ;;  %v4299_v20 = vadd.f32 -0.28449672, %v4283_v34  ;;  %v4221_v63 = vmul.f32 1.0614054, %v8678_v40 }
 0x90b   : > { %v4519_v19 = vmul.f32 %v4503_v62, %v8610_v36  ;;  %v4442_v27 = vsub.f32 1.0, %v4426_v24  ;;  %v4316_v33 = vmul.f32 %v8638_v46, %v4300_v29  ;;  %v4238_v49 = vadd.f32 -1.4531521, %v4222_v9  ;;  %v6348_v36 = vpop.eup %6347 }
 0x90c   : > { %v4441_v0 = vsub.f32 1.0, %v4425_v3  ;;  %v4315_v10 = vmul.f32 %v8641_v11, %v4299_v20  ;;  %v4237_v59 = vadd.f32 -1.4531521, %v4221_v63  ;;  %v4144_v39 = vand.u32 2147483647, %v8674_v47  ;;  %v6350_v62 = vpop.eup %6349 }
 0x90d   : > { %v4474_v7 = vsub.f32 0.0, %v4442_v27  ;;  %v4332_v22 = vadd.f32 0.2548296, %v4316_v33  ;;  %v4254_v15 = vmul.f32 %v8666_v60, %v4238_v49  ;;  %v8697_v48 = vadd.f32 %v8551_v53, %v8634_v1  ;;  %5737 = vmatprep.mubr.msk.f32.mxu1 %vm546_vm0, %v4519_v19  ;;  %v6352_v3 = vpop.eup %6351 }
 0x90e   : > { %v4473_v35 = vsub.f32 0.0, %v4441_v0  ;;  %v4331_v6 = vadd.f32 0.2548296, %v4315_v10  ;;  %v4253_v17 = vmul.f32 %v8678_v40, %v4237_v59  ;;  %v4160_v34 = vmul.f32 0.3275911, %v4144_v39  ;;  %5738 = vmatmul.mubr.msk.f32.vlgmr.msra.gmra.mrb[74].mxu1 %vm546_vm0, %v4520_v54 }
 0x90f   : > { %v4490_v24 = vsel %vm4458_vm5, %v4474_v7, %v4442_v27  ;;  %v4348_v29 = vmul.f32 %v8638_v46, %v4332_v22  ;;  %v4270_v9 = vadd.f32 1.4214138, %v4254_v15  ;;  %v8707_v1 = vadd.f32 %v8647_v43, %v8551_v53 }
 0x910   : > { %v4506_v20 = vadd.f32 1.0, %v4490_v24  ;;  %v4489_v63 = vsel %vm4457_vm6, %v4473_v35, %v4441_v0  ;;  %v4347_v19 = vmul.f32 %v8641_v11, %v4331_v6  ;;  %v4269_v33 = vadd.f32 1.4214138, %v4253_v17 }
 0x911   : > { %v4505_v54 = vadd.f32 1.0, %v4489_v63  ;;  %v4428_v49 = vmul.f32 %v6346_v55, %v4348_v29  ;;  %v4286_v28 = vmul.f32 %v8666_v60, %v4270_v9  ;;  %v4176_v27 = vadd.f32 1.0, %v4160_v34 }
 0x912   : > { %v4106_v46 = vmul.f32 0.5, %v8568_v5  ;;  %v4427_v10 = vmul.f32 %v6348_v36, %v4347_v19  ;;  %v4285_v59 = vmul.f32 %v8678_v40, %v4269_v33  ;;  %v8718_v55 = vmul.f32 0.70710677, %v8697_v48 }
 0x913   : > { %v4521_v43 = vmul.f32 %v4505_v54, %v8617_v16  ;;  %v4444_v7 = vsub.f32 1.0, %v4428_v49  ;;  %v4302_v22 = vadd.f32 -0.28449672, %v4286_v28  ;;  %6353 = vrcp.f32 %v4176_v27 }
 0x914   : > { %v4522_v56 = vmul.f32 %v4506_v20, %v4106_v46  ;;  %v4443_v0 = vsub.f32 1.0, %v4427_v10  ;;  %v4301_v15 = vadd.f32 -0.28449672, %v4285_v59  ;;  %v8721_v6 = vmul.f32 0.70710677, %v8707_v1 }
 0x915   : > { %v4476_v11 = vsub.f32 0.0, %v4444_v7  ;;  %v4318_v35 = vmul.f32 %v8666_v60, %v4302_v22  ;;  %5740 = vmatprep.mubr.msk.f32.mxu1 %vm546_vm0, %v4521_v43  ;;  %v4107_v5 = vmul.f32 0.5, %v8582_v2  ;;  %v4143_v24 = vand.u32 2147483647, %v8718_v55 }
 0x916   : > { %v4475_v16 = vsub.f32 0.0, %v4443_v0  ;;  %v4317_v36 = vmul.f32 %v8678_v40, %v4301_v15  ;;  %5741 = vmatmul.mubr.msk.f32.gmra.mrb[76].mxu1 %vm546_vm0, %v4522_v56  ;;  %v4146_v63 = vand.u32 2147483647, %v8721_v6  ;;  %v4368_v2 = vmul.f32 %v4144_v39, %v4144_v39 }
 0x917   : > { %v4492_v17 = vsel %vm4460_vm7, %v4476_v11, %v4444_v7  ;;  %v4334_v34 = vadd.f32 0.2548296, %v4318_v35  ;;  %v4159_v33 = vmul.f32 0.3275911, %v4143_v24  ;;  %v4108_v54 = vmul.f32 0.5, %v8579_v42 }
 0x918   : > { %v4508_v29 = vadd.f32 1.0, %v4492_v17  ;;  %v4491_v9 = vsel %vm4459_vm8, %v4475_v16, %v4443_v0  ;;  %v4333_v20 = vadd.f32 0.2548296, %v4317_v36  ;;  %v4162_v28 = vmul.f32 0.3275911, %v4146_v63 }
 0x919   : > { %v4507_v19 = vadd.f32 1.0, %v4491_v9  ;;  %v4350_v45 = vmul.f32 %v8666_v60, %v4334_v34  ;;  %v4175_v46 = vadd.f32 1.0, %v4159_v33  ;;  %v8736_v10 = vadd.f32 %v8551_v53, %v8652_v13 }
 0x91a   : > { %v4349_v49 = vmul.f32 %v8678_v40, %v4333_v20  ;;  %v4524_v59 = vmul.f32 %v4508_v29, %v4108_v54  ;;  %v4178_v7 = vadd.f32 1.0, %v4162_v28  ;;  %v4384_v39 = vsub.f32 0.0, %v4368_v2 }
 0x91b   : > { %v4523_v27 = vmul.f32 %v4507_v19, %v4107_v5  ;;  %v4430_v12 = vmul.f32 %v6350_v62, %v4350_v45  ;;  %6355 = vrcp.f32 %v4175_v46  ;;  %v4109_v13 = vmul.f32 0.5, %v8603_v14 }
 0x91c   : > { %v4429_v43 = vmul.f32 %v6352_v3, %v4349_v49  ;;  %6357 = vrcp.f32 %v4178_v7  ;;  %v8745_v56 = vmul.f32 0.70710677, %v8736_v10  ;;  %v8749_v3 = vadd.f32 %v8659_v30, %v8551_v53 }
 0x91d   : > { %v8738_v22 = vpop.eup %6353  ;;  %v4446_v60 = vsub.f32 1.0, %v4430_v12  ;;  %5743 = vmatprep.mubr.msk.f32.mxu1 %vm546_vm0, %v4523_v27  ;;  %v4409_v35 = vmul.f32 1.442695, %v4384_v39  ;;  %v8756_v14 = vadd.f32 %v8551_v53, %v8663_v23  ;;  %v4367_v34 = vmul.f32 %v4143_v24, %v4143_v24 }
 0x91e   : > { %v4445_v42 = vsub.f32 1.0, %v4429_v43  ;;  %v4224_v40 = vmul.f32 1.0614054, %v8738_v22  ;;  %5744 = vmatmul.mubr.msk.f32.gmra.mrb[78].mxu1 %vm546_vm0, %v4524_v59  ;;  %v4145_v5 = vand.u32 2147483647, %v8745_v56  ;;  %v4370_v38 = vmul.f32 %v4146_v63, %v4146_v63 }
 0x91f   : > { %v4478_v62 = vsub.f32 0.0, %v4446_v60  ;;  %v8760_v30 = vmul.f32 0.70710677, %v8749_v3  ;;  %v4110_v9 = vmul.f32 0.5, %v8599_v58  ;;  %v8765_v23 = vmul.f32 0.70710677, %v8756_v14 }
 0x920   : > { %v4477_v0 = vsub.f32 0.0, %v4445_v42  ;;  %v4240_v15 = vadd.f32 -1.4531521, %v4224_v40  ;;  %v4161_v29 = vmul.f32 0.3275911, %v4145_v5  ;;  %6359 = vpow2.f32 %v4409_v35 }
 0x921   : > { %v4494_v11 = vsel %vm4462_vm9, %v4478_v62, %v4446_v60  ;;  %v4148_v19 = vand.u32 2147483647, %v8760_v30  ;;  %v4383_v24 = vsub.f32 0.0, %v4367_v34  ;;  %v4386_v63 = vsub.f32 0.0, %v4370_v38 }
 0x922   : > { %v4510_v16 = vadd.f32 1.0, %v4494_v11  ;;  %v4493_v36 = vsel %vm4461_vm10, %v4477_v0, %v4445_v42  ;;  %v4256_v17 = vmul.f32 %v8738_v22, %v4240_v15  ;;  %v4177_v2 = vadd.f32 1.0, %v4161_v29 }
 0x923   : > { %v4509_v57 = vadd.f32 1.0, %v4493_v36  ;;  %v4164_v49 = vmul.f32 0.3275911, %v4148_v19  ;;  %v4147_v58 = vand.u32 2147483647, %v8765_v23  ;;  %v8777_v43 = vadd.f32 %v8676_v26, %v8551_v53 }
 0x924   : > { %v4272_v20 = vadd.f32 1.4214138, %v4256_v17  ;;  %v4526_v33 = vmul.f32 %v4510_v16, %v4110_v9  ;;  %6361 = vrcp.f32 %v4177_v2  ;;  %v4407_v40 = vmul.f32 1.442695, %v4383_v24 }
 0x925   : > { %v4525_v45 = vmul.f32 %v4509_v57, %v4109_v13  ;;  %v8768_v28 = vpop.eup %6355  ;;  %v4180_v59 = vadd.f32 1.0, %v4164_v49  ;;  %v4163_v60 = vmul.f32 0.3275911, %v4147_v58  ;;  %v4369_v13 = vmul.f32 %v4145_v5, %v4145_v5 }
 0x926   : > { %v4288_v54 = vmul.f32 %v8738_v22, %v4272_v20  ;;  %v8772_v27 = vpop.eup %6357  ;;  %v4223_v46 = vmul.f32 1.0614054, %v8768_v28  ;;  %v4413_v35 = vmul.f32 1.442695, %v4386_v63  ;;  %v8784_v26 = vmul.f32 0.70710677, %v8777_v43 }
 0x927   : > { %5746 = vmatprep.mubr.msk.f32.mxu1 %vm546_vm0, %v4525_v45  ;;  %v4226_v7 = vmul.f32 1.0614054, %v8772_v27  ;;  %6363 = vrcp.f32 %v4180_v59  ;;  %v4179_v0 = vadd.f32 1.0, %v4163_v60  ;;  %v8789_v36 = vadd.f32 %v8551_v53, %v8684_v41 }
 0x928   : > { %v4304_v12 = vadd.f32 -0.28449672, %v4288_v54  ;;  %5747 = vmatmul.mubr.msk.f32.gmra.mrb[80].mxu1 %vm546_vm0, %v4526_v33  ;;  %v4239_v42 = vadd.f32 -1.4531521, %v4223_v46  ;;  %v4372_v34 = vmul.f32 %v4148_v19, %v4148_v19  ;;  %v4150_v5 = vand.u32 2147483647, %v8784_v26 }
 0x929   : > { %v4242_v62 = vadd.f32 -1.4531521, %v4226_v7  ;;  %6365 = vrcp.f32 %v4179_v0  ;;  %v4385_v29 = vsub.f32 0.0, %v4369_v13  ;;  %v8794_v9 = vmul.f32 0.70710677, %v8789_v36 }
 0x92a   : > { %v4320_v39 = vmul.f32 %v8738_v22, %v4304_v12  ;;  %v4255_v11 = vmul.f32 %v8768_v28, %v4239_v42  ;;  %6367 = vpow2.f32 %v4407_v40  ;;  %v6360_v20 = vpop.eup %6359  ;;  %v4166_v2 = vmul.f32 0.3275911, %v4150_v5 }
 0x92b   : > { %v4258_v16 = vmul.f32 %v8772_v27, %v4242_v62  ;;  %6369 = vpow2.f32 %v4413_v35  ;;  %v4388_v49 = vsub.f32 0.0, %v4372_v34  ;;  %v4411_v12 = vmul.f32 1.442695, %v4385_v29 }
 0x92c   : > { %v4336_v15 = vadd.f32 0.2548296, %v4320_v39  ;;  %v4271_v57 = vadd.f32 1.4214138, %v4255_v11  ;;  %v4182_v24 = vadd.f32 1.0, %v4166_v2  ;;  %v4371_v46 = vmul.f32 %v4147_v58, %v4147_v58 }
 0x92d   : > { %v4274_v38 = vadd.f32 1.4214138, %v4258_v16  ;;  %v4112_v0 = vmul.f32 0.5, %v8657_v50  ;;  %v4417_v35 = vmul.f32 1.442695, %v4388_v49  ;;  %vm4464_vm11 = vcmp.lt.f32.partialorder %v8674_v47, 0.0 }
 0x92e   : > { %v4352_v17 = vmul.f32 %v8738_v22, %v4336_v15  ;;  %v4287_v45 = vmul.f32 %v8768_v28, %v4271_v57  ;;  %v8797_v33 = vpop.eup %6361  ;;  %v4149_v22 = vand.u32 2147483647, %v8794_v9  ;;  %6371 = vrcp.f32 %v4182_v24 }
 0x92f   : > { %v4290_v41 = vmul.f32 %v8772_v27, %v4274_v38  ;;  %v4225_v54 = vmul.f32 1.0614054, %v8797_v33  ;;  %6373 = vpow2.f32 %v4411_v12  ;;  %v4387_v57 = vsub.f32 0.0, %v4371_v46 }
 0x930   : > { %v4432_v53 = vmul.f32 %v6360_v20, %v4352_v17  ;;  %v4303_v19 = vadd.f32 -0.28449672, %v4287_v45  ;;  %v4165_v59 = vmul.f32 0.3275911, %v4149_v22  ;;  %vm4463_vm12 = vcmp.lt.f32.partialorder %v8718_v55, 0.0 }
 0x931   : > { %v4306_v63 = vadd.f32 -0.28449672, %v4290_v41  ;;  %v8802_v7 = vpop.eup %6363  ;;  %v4241_v39 = vadd.f32 -1.4531521, %v4225_v54  ;;  %v4415_v12 = vmul.f32 1.442695, %v4387_v57 }
 0x932   : > { %v4319_v60 = vmul.f32 %v8768_v28, %v4303_v19  ;;  %v4448_v42 = vsub.f32 1.0, %v4432_v53  ;;  %v4228_v62 = vmul.f32 1.0614054, %v8802_v7  ;;  %v4181_v13 = vadd.f32 1.0, %v4165_v59 }
 0x933   : > { %v4322_v40 = vmul.f32 %v8772_v27, %v4306_v63  ;;  %v4257_v11 = vmul.f32 %v8797_v33, %v4241_v39  ;;  %v8809_v58 = vpop.eup %6365  ;;  %v4374_v53 = vmul.f32 %v4150_v5, %v4150_v5  ;;  %v4111_v19 = vmul.f32 0.5, %v8697_v48 }
 0x934   : > { %v4335_v15 = vadd.f32 0.2548296, %v4319_v60  ;;  %v4244_v17 = vadd.f32 -1.4531521, %v4228_v62  ;;  %v4227_v29 = vmul.f32 1.0614054, %v8809_v58  ;;  %6375 = vrcp.f32 %v4181_v13  ;;  %v6368_v20 = vpop.eup %6367 }
 0x935   : > { %v4338_v16 = vadd.f32 0.2548296, %v4322_v40  ;;  %v4273_v38 = vadd.f32 1.4214138, %v4257_v11  ;;  %v4480_v45 = vsub.f32 0.0, %v4448_v42  ;;  %v6370_v41 = vpop.eup %6369  ;;  %6377 = vpow2.f32 %v4417_v35 }
 0x936   : > { %v4351_v34 = vmul.f32 %v8768_v28, %v4335_v15  ;;  %v4260_v2 = vmul.f32 %v8802_v7, %v4244_v17  ;;  %v4243_v24 = vadd.f32 -1.4531521, %v4227_v29  ;;  %v4390_v39 = vsub.f32 0.0, %v4374_v53 }
 0x937   : > { %v4354_v50 = vmul.f32 %v8772_v27, %v4338_v16  ;;  %v4289_v49 = vmul.f32 %v8797_v33, %v4273_v38  ;;  %v4496_v60 = vsel %vm4464_vm11, %v4480_v45, %v4448_v42  ;;  %v4373_v40 = vmul.f32 %v4149_v22, %v4149_v22 }
 0x938   : > { %v4431_v54 = vmul.f32 %v6368_v20, %v4351_v34  ;;  %v4276_v63 = vadd.f32 1.4214138, %v4260_v2  ;;  %v4259_v27 = vmul.f32 %v8809_v58, %v4243_v24  ;;  %v8820_v48 = vpop.eup %6371  ;;  %6379 = vpow2.f32 %v4415_v12 }
 0x939   : > { %v4434_v28 = vmul.f32 %v6370_v41, %v4354_v50  ;;  %v4305_v59 = vadd.f32 -0.28449672, %v4289_v49  ;;  %v4230_v35 = vmul.f32 1.0614054, %v8820_v48  ;;  %v4512_v16 = vadd.f32 1.0, %v4496_v60  ;;  %v6374_v34 = vpop.eup %6373 }
 0x93a   : > { %v4447_v46 = vsub.f32 1.0, %v4431_v54  ;;  %v4292_v5 = vmul.f32 %v8802_v7, %v4276_v63  ;;  %v4275_v47 = vadd.f32 1.4214138, %v4259_v27  ;;  %v4421_v20 = vmul.f32 1.442695, %v4390_v39 }
 0x93b   : > { %v4450_v13 = vsub.f32 1.0, %v4434_v28  ;;  %v4321_v15 = vmul.f32 %v8797_v33, %v4305_v59  ;;  %v4246_v29 = vadd.f32 -1.4531521, %v4230_v35  ;;  %v4389_v53 = vsub.f32 0.0, %v4373_v40 }
 0x93c   : > { %v4479_v62 = vsub.f32 0.0, %v4447_v46  ;;  %v4308_v11 = vadd.f32 -0.28449672, %v4292_v5  ;;  %v4291_v57 = vmul.f32 %v8809_v58, %v4275_v47  ;;  %v4528_v28 = vmul.f32 %v4512_v16, %v4112_v0 }
 0x93d   : > { %v4337_v42 = vadd.f32 0.2548296, %v4321_v15  ;;  %v4482_v50 = vsub.f32 0.0, %v4450_v13  ;;  %v4262_v49 = vmul.f32 %v8820_v48, %v4246_v29  ;;  %vm4466_vm13 = vcmp.lt.f32.partialorder %v8721_v6, 0.0 }
 0x93e   : > { %v4495_v17 = vsel %vm4463_vm12, %v4479_v62, %v4447_v46  ;;  %v4324_v38 = vmul.f32 %v8802_v7, %v4308_v11  ;;  %v8827_v45 = vpop.eup %6375  ;;  %v4307_v2 = vadd.f32 -0.28449672, %v4291_v57  ;;  %6381 = vpow2.f32 %v4421_v20 }
 0x93f   : > { %v4511_v22 = vadd.f32 1.0, %v4495_v17  ;;  %v4353_v55 = vmul.f32 %v8797_v33, %v4337_v42  ;;  %v4229_v24 = vmul.f32 1.0614054, %v8827_v45  ;;  %v4278_v59 = vadd.f32 1.4214138, %v4262_v49  ;;  %v6378_v33 = vpop.eup %6377 }
 0x940   : > { %v4340_v54 = vadd.f32 0.2548296, %v4324_v38  ;;  %v4323_v12 = vmul.f32 %v8809_v58, %v4307_v2  ;;  %v4419_v5 = vmul.f32 1.442695, %v4389_v53  ;;  %v4498_v39 = vsel %vm4466_vm13, %v4482_v50, %v4450_v13 }
 0x941   : > { %v4527_v41 = vmul.f32 %v4511_v22, %v4111_v19  ;;  %v4433_v63 = vmul.f32 %v6374_v34, %v4353_v55  ;;  %v4245_v27 = vadd.f32 -1.4531521, %v4229_v24  ;;  %v4294_v40 = vmul.f32 %v8820_v48, %v4278_v59 }
 0x942   : > { %v4356_v46 = vmul.f32 %v8802_v7, %v4340_v54  ;;  %v4339_v19 = vadd.f32 0.2548296, %v4323_v12  ;;  %v4113_v6 = vmul.f32 0.5, %v8736_v10  ;;  %v6380_v47 = vpop.eup %6379  ;;  %vm4465_vm14 = vcmp.lt.f32.partialorder %v8745_v56, 0.0 }
 0x943   : > { %5749 = vmatprep.mubr.msk.f32.mxu1 %vm546_vm0, %v4527_v41  ;;  %v4449_v60 = vsub.f32 1.0, %v4433_v63  ;;  %v4261_v62 = vmul.f32 %v8827_v45, %v4245_v27  ;;  %v4310_v35 = vadd.f32 -0.28449672, %v4294_v40  ;;  %v4514_v17 = vadd.f32 1.0, %v4498_v39 }
 0x944   : > { %5750 = vmatmul.mubr.msk.f32.gmra.mrb[82].mxu1 %vm546_vm0, %v4528_v28  ;;  %v4436_v0 = vmul.f32 %v6378_v33, %v4356_v46  ;;  %v4355_v15 = vmul.f32 %v8809_v58, %v4339_v19  ;;  %6383 = vpow2.f32 %v4419_v5  ;;  %v4114_v10 = vmul.f32 0.5, %v8707_v1 }
 0x945   : > { %v4481_v7 = vsub.f32 0.0, %v4449_v60  ;;  %v4277_v16 = vadd.f32 1.4214138, %v4261_v62  ;;  %v4326_v22 = vmul.f32 %v8820_v48, %v4310_v35  ;;  %vm4468_vm15 = vcmp.lt.f32.partialorder %v8760_v30, 0.0 }
 0x946   : > { %v4452_v11 = vsub.f32 1.0, %v4436_v0  ;;  %v4435_v57 = vmul.f32 %v6380_v47, %v4355_v15  ;;  %v4530_v55 = vmul.f32 %v4514_v17, %v4114_v10  ;;  %vm4467_vm1 = vcmp.lt.f32.partialorder %v8765_v23, 0.0 }
 0x947   : > { %v4497_v42 = vsel %vm4465_vm14, %v4481_v7, %v4449_v60  ;;  %v4293_v38 = vmul.f32 %v8827_v45, %v4277_v16  ;;  %v4342_v20 = vadd.f32 0.2548296, %v4326_v22  ;;  %v4115_v30 = vmul.f32 0.5, %v8756_v14 }
 0x948   : > { %v4513_v13 = vadd.f32 1.0, %v4497_v42  ;;  %v4484_v34 = vsub.f32 0.0, %v4452_v11  ;;  %v4451_v58 = vsub.f32 1.0, %v4435_v57  ;;  %v6382_v54 = vpop.eup %6381  ;;  %v4116_v12 = vmul.f32 0.5, %v8749_v3 }
 0x949   : > { %v4309_v50 = vadd.f32 -0.28449672, %v4293_v38  ;;  %v4358_v53 = vmul.f32 %v8820_v48, %v4342_v20  ;;  %vm4470_vm3 = vcmp.lt.f32.partialorder %v8784_v26, 0.0  ;;  %vm4469_vm4 = vcmp.lt.f32.partialorder %v8794_v9, 0.0  ;;  %v5111_v26 = vld [vmem:[%s8952_s13] ss:$0 sm:$0xff] }
 0x94a   : > { %v4529_v29 = vmul.f32 %v4513_v13, %v4113_v6  ;;  %v4500_v56 = vsel %vm4468_vm15, %v4484_v34, %v4452_v11  ;;  %v4483_v2 = vsub.f32 0.0, %v4451_v58  ;;  %v4117_v0 = vmul.f32 0.5, %v8789_v36 }
 0x94b   : > { %v4325_v41 = vmul.f32 %v8827_v45, %v4309_v50  ;;  %v4516_v49 = vadd.f32 1.0, %v4500_v56  ;;  %v4438_v28 = vmul.f32 %v6382_v54, %v4358_v53  ;;  %v4118_v40 = vmul.f32 0.5, %v8777_v43 }
 0x94c   : > { %5752 = vmatprep.mubr.msk.f32.mxu1 %vm546_vm0, %v4529_v29  ;;  %v4499_v1 = vsel %vm4467_vm1, %v4483_v2, %v4451_v58 }
 0x94d   : > { %5753 = vmatmul.mubr.msk.f32.gmra.mrb[84].mxu1 %vm546_vm0, %v4530_v55  ;;  %v4515_v24 = vadd.f32 1.0, %v4499_v1  ;;  %v4341_v63 = vadd.f32 0.2548296, %v4325_v41  ;;  %v4454_v23 = vsub.f32 1.0, %v4438_v28  ;;  %v4532_v27 = vmul.f32 %v4516_v49, %v4116_v12 }
 0x94e   : > { %v6384_v59 = vpop.eup %6383 }
 0x94f   : > { %v4531_v46 = vmul.f32 %v4515_v24, %v4115_v30  ;;  %v4357_v48 = vmul.f32 %v8827_v45, %v4341_v63  ;;  %v4486_v33 = vsub.f32 0.0, %v4454_v23 }
 0x951   : > { %v4437_v60 = vmul.f32 %v6384_v59, %v4357_v48  ;;  %5755 = vmatprep.mubr.msk.f32.mxu1 %vm546_vm0, %v4531_v46  ;;  %v4502_v19 = vsel %vm4470_vm3, %v4486_v33, %v4454_v23  ;;  %v9065_v33 = vld [vmem:[#allocation24_spill] sm:$0xff] }
 0x952   : > { %5756 = vmatmul.mubr.msk.f32.gmra.mrb[86].mxu1 %vm546_vm0, %v4532_v27  ;;  %v4518_v3 = vadd.f32 1.0, %v4502_v19 }
 0x953   : > { %v4453_v14 = vsub.f32 1.0, %v4437_v60 }
 0x954   : > { %v4534_v6 = vmul.f32 %v4518_v3, %v4118_v40 }
 0x955   : > { %v4485_v5 = vsub.f32 0.0, %v4453_v14 }
 0x957   : > { %v4501_v39 = vsel %vm4469_vm4, %v4485_v5, %v4453_v14 }
 0x958   : > { %v4517_v45 = vadd.f32 1.0, %v4501_v39 }
 0x95a   : > { %v4533_v62 = vmul.f32 %v4517_v45, %v4117_v0 }
 0x95c   : > { %5758 = vmatprep.mubr.msk.f32.mxu1 %vm546_vm0, %v4533_v62 }
 0x95d   : > { %5759 = vmatmul.mubr.msk.f32.gmra.mrb[88].mxu1 %vm546_vm0, %v4534_v6 }
 0x9e1   : > { %v5739_v7 = vpop.f32.mrb[74].mxu1 }
 0x9e2   : > { %v4660_v15 = vpop.f32.mrb[75].mxu1  ;;  %v4666_v47 = vadd.f32 %v5739_v7, %v5111_v26 }
 0x9e3   : > { %v4661_v9 = vadd.f32 %v5111_v26, %v4660_v15 }
 0x9e4   : > { %v4740_v36 = vadd.f32 %v4666_v47, %v8261_v8 }
 0x9e5   : > { %v4739_v11 = vadd.f32 %v4661_v9, %v8264_v51 }
 0x9e7   : > { %4755 = vxpose.xlu0.b32.start [1/8] (short) (narrow) %v4739_v11, 32 }
 0x9e9   : > { %v5742_v43 = vpop.f32.mrb[76].mxu1 }
 0x9ea   : > { %v4670_v35 = vpop.f32.mrb[77].mxu1  ;;  %v4676_v17 = vadd.f32 %v5742_v43, %v5111_v26 }
 0x9eb   : > { %v4671_v16 = vadd.f32 %v5111_v26, %v4670_v35  ;;  %4756 = vxpose.xlu0.b32.cont [2/8] (short) (narrow) %v4740_v36, 32 }
 0x9ec   : > { %v4742_v57 = vadd.f32 %v4676_v17, %v8273_v37 }
 0x9ed   : > { %v4741_v42 = vadd.f32 %v4671_v16, %v8276_v25 }
 0x9ef   : > { %4757 = vxpose.xlu0.b32.cont [3/8] (short) (narrow) %v4741_v42, 32 }
 0x9f1   : > { %v5745_v13 = vpop.f32.mrb[78].mxu1 }
 0x9f2   : > { %v4680_v34 = vpop.f32.mrb[79].mxu1  ;;  %v4686_v38 = vadd.f32 %v5745_v13, %v5111_v26 }
 0x9f3   : > { %v4681_v22 = vadd.f32 %v5111_v26, %v4680_v34  ;;  %4758 = vxpose.xlu0.b32.cont [4/8] (short) (narrow) %v4742_v57, 32 }
 0x9f4   : > { %v4744_v8 = vadd.f32 %v4686_v38, %v8285_v52 }
 0x9f5   : > { %v4743_v51 = vadd.f32 %v4681_v22, %v8288_v18 }
 0x9f7   : > { %4759 = vxpose.xlu0.b32.cont [5/8] (short) (narrow) %v4743_v51, 32 }
 0x9fb   : > { %v5748_v10 = vpop.f32.mrb[80].mxu1  ;;  %4760 = vxpose.xlu0.b32.cont [6/8] (short) (narrow) %v4744_v8, 32 }
 0x9fc   : > { %v4690_v58 = vpop.f32.mrb[81].mxu1  ;;  %v4696_v56 = vadd.f32 %v5748_v10, %v5111_v26 }
 0x9fd   : > { %v4691_v29 = vadd.f32 %v5111_v26, %v4690_v58 }
 0x9fe   : > { %v4746_v37 = vadd.f32 %v4696_v56, %v8297_v44 }
 0x9ff   : > { %v4745_v25 = vadd.f32 %v4691_v29, %v8300_v32 }
 0xa01   : > { %4761 = vxpose.xlu0.b32.cont [7/8] (short) (narrow) %v4745_v25, 32 }
 0xa05   : > { %4762 = vxpose.xlu0.b32.end [8/8] (short) (narrow) %v4746_v37, 32 }
 0xa17   : > { %v5751_v20 = vpop.f32.mrb[82].mxu1 }
 0xa18   : > { %v4700_v50 = vpop.f32.mrb[83].mxu1  ;;  %v4706_v2 = vadd.f32 %v5751_v20, %v5111_v26 }
 0xa19   : > { %v4701_v55 = vadd.f32 %v5111_v26, %v4700_v50 }
 0xa1a   : > { %v4748_v52 = vadd.f32 %v4706_v2, %v8309_v31  ;;  %v9063_v31 = vld [vmem:[#allocation23_spill] sm:$0xff] }
 0xa1b   : > { %v4747_v18 = vadd.f32 %v4701_v55, %v8312_v21  ;;  %v9062_v21 = vld [vmem:[#allocation21_spill] sm:$0xff] }
 0xa1d   : > { %4787 = vxpose.xlu1.b32.start [1/8] (short) (narrow) %v4747_v18, 32 }
 0xa20   : > { %v5754_v53 = vpop.f32.mrb[84].mxu1 }
 0xa21   : > { %4788 = vxpose.xlu1.b32.cont [2/8] (short) (narrow) %v4748_v52, 32  ;;  %v4710_v41 = vpop.f32.mrb[85].mxu1  ;;  %v4716_v49 = vadd.f32 %v5754_v53, %v5111_v26 }
 0xa22   : > { %v4711_v54 = vadd.f32 %v5111_v26, %v4710_v41 }
 0xa23   : > { %v4750_v30 = vadd.f32 %v4716_v49, %v8321_v4 }
 0xa24   : > { %v4749_v32 = vadd.f32 %v4711_v54, %v8324_v61  ;;  %v9064_v61 = vld [vmem:[#allocation25_spill] sm:$0xff] }
 0xa25   : > { %v5757_v1 = vpop.f32.mrb[86].mxu1 }
 0xa26   : > { %4789 = vxpose.xlu1.b32.cont [3/8] (short) (narrow) %v4749_v32, 32  ;;  %v4720_v44 = vpop.f32.mrb[87].mxu1  ;;  %v4726_v28 = vadd.f32 %v5757_v1, %v5111_v26 }
 0xa27   : > { %v4721_v24 = vadd.f32 %v5111_v26, %v4720_v44 }
 0xa28   : > { %v4752_v12 = vadd.f32 %v4726_v28, %v9063_v31 }
 0xa29   : > { %v4751_v63 = vadd.f32 %v4721_v24, %v9062_v21 }
 0xa2a   : > { %4790 = vxpose.xlu1.b32.cont [4/8] (short) (narrow) %v4750_v30, 32 }
 0xa2e   : > { %4791 = vxpose.xlu1.b32.cont [5/8] (short) (narrow) %v4751_v63, 32 }
 0xa30   : > { %v5760_v46 = vpop.f32.mrb[88].mxu1 }
 0xa31   : > { %v4730_v23 = vpop.f32.mrb[89].mxu1  ;;  %v4736_v59 = vadd.f32 %v5760_v46, %v5111_v26 }
 0xa32   : > { %4792 = vxpose.xlu1.b32.cont [6/8] (short) (narrow) %v4752_v12, 32  ;;  %v4731_v48 = vadd.f32 %v5111_v26, %v4730_v23 }
 0xa33   : > { %v4754_v60 = vadd.f32 %v4736_v59, %v9065_v33 }
 0xa34   : > { %v4753_v27 = vadd.f32 %v4731_v48, %v9064_v61 }
 0xa36   : > { %4793 = vxpose.xlu1.b32.cont [7/8] (short) (narrow) %v4753_v27, 32 }
 0xa3a   : > { %4794 = vxpose.xlu1.b32.end [8/8] (short) (narrow) %v4754_v60, 32 }
 0xa69   : > { %v4771_v4 = vpop.trf.xlu0 }
 0xa6a   : > { %4819 = vst.msk [vmem:[%s463_s26] sm:$0xff] %vm1854_vm2, %v4771_v4 }
 0xa6d   : > { %v4772_v14 = vpop.trf.xlu0 }
 0xa6e   : > { %4820 = vst.msk [vmem:[%s463_s26 + $0x8] sm:$0xff] %vm1854_vm2, %v4772_v14 }
 0xa71   : > { %v4773_v19 = vpop.trf.xlu0 }
 0xa72   : > { %4821 = vst.msk [vmem:[%s463_s26 + $0x10] sm:$0xff] %vm1854_vm2, %v4773_v19 }
 0xa75   : > { %v4774_v5 = vpop.trf.xlu0 }
 0xa76   : > { %4822 = vst.msk [vmem:[%s463_s26 + $0x18] sm:$0xff] %vm1854_vm2, %v4774_v5 }
 0xa9e   : > { %v4803_v3 = vpop.trf.xlu1 }
 0xa9f   : > { %4823 = vst.msk [vmem:[%s463_s26 + $0x20] sm:$0xff] %vm1854_vm2, %v4803_v3 }
 0xaa2   : > { %v4804_v39 = vpop.trf.xlu1 }
 0xaa3   : > { %4824 = vst.msk [vmem:[%s463_s26 + $0x28] sm:$0xff] %vm1854_vm2, %v4804_v39 }
 0xaa6   : > { %v4805_v0 = vpop.trf.xlu1 }
 0xaa7   : > { %4825 = vst.msk [vmem:[%s463_s26 + $0x30] sm:$0xff] %vm1854_vm2, %v4805_v0 }
 0xaaa   : > { %v4806_v45 = vpop.trf.xlu1 }
 0xaab   : > { %4826 = vst.msk [vmem:[%s463_s26 + $0x38] sm:$0xff] %vm1854_vm2, %v4806_v45 }
 0xaac   : > { %6430 = shalt.err (!%p6427_p3)
}
 0xaad   : > { %s6431_s21 = scalar_lea.hbm %s8893_s20, 1024  ;;  %s6435_s1 = scalar_lea.hbm %s8953_s14, 2048 }
 0xaae   : > { %p6432_p4 = scmp.ne.s32.totalorder %s8893_s20, %s6431_s21  ;;  %p6436_p9 = scmp.lt.u32.totalorder %s8893_s20, %s8953_s14 }
 0xaaf   : > { %p6437_p10 = scmp.lt.u32.totalorder %s6435_s1, %s6431_s21  ;;  %p6439_p12 = scmp.lt.u32.totalorder %s6431_s21, %s8893_s20 }
 0xab0   : > { %p6433_p7 = pnand %p6432_p4, %p6599_p5 }
 0xab1   : > { %p6438_p11 = por %p6437_p10, %p6436_p9 }
 0xab2   : > { %p6434_p8 = pneg %p6433_p7 }
 0xab3   : > { %p6440_p13 = por %p6439_p12, %p6438_p11 }
 0xab5   : > { %p6441_p0 = pnand %p6440_p13, %p6434_p8 }
 0xab7   : > { %6444 = shalt.err (!%p6441_p0)
}
 0xab8   : > { %s6484_s17 = smov 128   ;;  %s6485_s27 = smov 8  }
 0xab9   : > { %5877 = dma.vmem_to_hbm [thread:$0]  (%p6599_p5), %s8895_s28, 1024, %s8893_s20, %s8898_s25, %s6484_s17, %s6484_s17, %s6485_s27  }
 0xaba PF: > { %p5883_p1 = scmp.ge.s32.totalorder %s6479_s16, 2  ;;  %s4857_s26 = sand.u32 1, %s6467_s29  }
 0xabb   : > { %s4858_s21 = scalar_lea.sflag [#allocation3], %s4857_s26 }
 0xabc   : > { %p5880_p2 = pnand %p5883_p1, %p6603_p6 }
 0xabe   : > { %6462 = dma.done.wait (!%p5880_p2), %s4858_s21, 1024  }
 0xabf   : > { %6464 = vsyncadd (!%p5880_p2), %s4858_s21, 4294966272  ;;  %p24_p3 = scmp.ge.s32.totalorder %s6586_s19, 4   ;;  %s9066_s29 = smov %s6471_s30 }
 0xac0   : > { %s9067_s30 = smov %s6475_s15  ;;  %s9068_s15 = smov %s6597_s22 }
 0xac1   : > { %s9069_s16 = smov %s6586_s19  ;;  %26 = sbr.rel (!%p24_p3) target bundleno = 7 (0x7), region = 111 }
 0xac8   :  { %4863 = vsyncpa [#allocation3], 1 }
 0xac9   :  { %4865 = vsyncpa [#allocation3 + $0x1], 1 }

// kernel: tpu_custom_call.1
= control target key start
LH: loop header
LB: loop body
LE: loop exit
PB: predicated region body
PF: predicated region fallthrough
CT: control target
= control target key end

     0   :  { %s6355_s29 = smov 0   ;;  %s8665_s0 = inlined_call_operand.vmem [shape: f32[4,64,32], index: 0, kind: input, shape index: {}]   ;;  %s8666_s1 = inlined_call_operand.vmem [shape: f32[256,32], index: 1, kind: input, shape index: {}]   ;;  %s8667_s2 = inlined_call_operand.vmem [shape: f32[32,96], index: 2, kind: input, shape index: {}]   ;;  %s8668_s3 = inlined_call_operand.vmem [shape: f32[32,32], index: 3, kind: input, shape index: {}]   ;;  %s8669_s4 = inlined_call_operand.vmem [shape: f32[32,32], index: 4, kind: input, shape index: {}]   ;;  %s8670_s5 = inlined_call_operand.vmem [shape: f32[32,32], index: 5, kind: input, shape index: {}]   ;;  %s8671_s6 = inlined_call_operand.vmem [shape: f32[1,96], index: 6, kind: input, shape index: {}]   ;;  %s8672_s7 = inlined_call_operand.vmem [shape: f32[1,32], index: 7, kind: input, shape index: {}]   ;;  %s8673_s8 = inlined_call_operand.vmem [shape: f32[1,32], index: 8, kind: input, shape index: {}]   ;;  %s8674_s9 = inlined_call_operand.vmem [shape: f32[1,32], index: 9, kind: input, shape index: {}]   ;;  %s8675_s10 = inlined_call_operand.vmem [shape: f32[1,32], index: 10, kind: input, shape index: {}]   ;;  %s8676_s11 = inlined_call_operand.vmem [shape: f32[1,32], index: 11, kind: input, shape index: {}]   ;;  %s8677_s12 = inlined_call_operand.vmem [shape: f32[1,32], index: 12, kind: input, shape index: {}]   ;;  %s8678_s13 = inlined_call_operand.vmem [shape: f32[1,32], index: 13, kind: input, shape index: {}]   ;;  %s8679_s14 = inlined_call_operand.vmem [shape: f32[4,64,32], index: 14, kind: output, shape index: {}]  }
   0x1 LB: > { %s4777_s30 = sadd.s32 4294967295, %s6276_s29   ;;  %p4781_p0 = scmp.ge.s32.totalorder %s6276_s29, 1  ;;  %s6276_s29 = sphi %s6355_s29, %s24_s29  }
   0x2   : > { %p414_p1 = scmp.lt.s32.totalorder %s6276_s29, 3 }
   0x4   : > { %p415_p2 = pnand %p4781_p0, %p414_p1 }
   0x6   : > { %418 = sbr.rel (%p415_p2) target bundleno = 2477 (0x9ad), region = 76 }
   0xd   : > { %s4782_s15 = sshll.u32 %s4777_s30, 1  ;;  %vm494_vm0 = vcmask 261120   ;;  %s6278_s24 = smov 96   ;;  %vm1802_vm2 = vcmask 523264  }
   0xe   : > { %p463_p3 = scmp.lt.s32.totalorder %s4782_s15, 3  ;;  %s6279_s25 = smov 64   ;;  %vm6679_vm1 = vmpackc.low %vm494_vm0, %vm494_vm0 }
  0x10   : > { %s8740_s15 = smov (!%p463_p3, %s4782_s15), 3 }
  0x11   : > { %s5006_s16 = sshll.u32 %s8740_s15, 6 }
  0x12   : > { %s6371_s19 = scalar_lea.vmem %s8665_s0, %s5006_s16 }
  0x13   : > { %v476_v0 = vld [vmem:[%s6371_s19] sm:$0xff]  ;;  %v478_v1 = vld [vmem:[%s6371_s19 + $0x10] sm:$0xff]  ;;  %v477_v2 = vld [vmem:[%s6371_s19 + $0x8] sm:$0xff] }
  0x14   : > { %v495_v3 = vsel %vm494_vm0, %v476_v0, 0.0  ;;  %v501_v4 = vsel %vm494_vm0, %v478_v1, 0.0  ;;  %v479_v5 = vld [vmem:[%s6371_s19 + $0x18] sm:$0xff]  ;;  %v498_v6 = vsel %vm494_vm0, %v477_v2, 0.0  ;;  %v480_v8 = vld [vmem:[%s6371_s19 + $0x20] sm:$0xff]  ;;  %v481_v9 = vld [vmem:[%s6371_s19 + $0x28] sm:$0xff] }
  0x15   : > { %496 = vadd.xlane.f32.xlu0 %v495_v3  ;;  %502 = vadd.xlane.f32.xlu1 %v501_v4  ;;  %v504_v7 = vsel %vm494_vm0, %v479_v5, 0.0  ;;  %v507_v10 = vsel %vm494_vm0, %v480_v8, 0.0  ;;  %v510_v11 = vsel %vm494_vm0, %v481_v9, 0.0  ;;  %v6386_v12 = vld [vmem:[%s6371_s19 + $0x30] sm:$0xff]  ;;  %v6389_v13 = vld [vmem:[%s6371_s19 + $0x38] sm:$0xff]  ;;  %v6396_v16 = vld [vmem:[%s6371_s19 + $0x40] sm:$0xff] }
  0x16   : > { %v513_v14 = vsel %vm494_vm0, %v6386_v12, 0.0  ;;  %v516_v15 = vsel %vm494_vm0, %v6389_v13, 0.0  ;;  %v6399_v17 = vld [vmem:[%s6371_s19 + $0x48] sm:$0xff]  ;;  %v519_v18 = vsel %vm494_vm0, %v6396_v16, 0.0  ;;  %v6406_v20 = vld [vmem:[%s6371_s19 + $0x50] sm:$0xff]  ;;  %v6409_v21 = vld [vmem:[%s6371_s19 + $0x58] sm:$0xff] }
  0x17   : > { %v522_v19 = vsel %vm494_vm0, %v6399_v17, 0.0  ;;  %v525_v22 = vsel %vm494_vm0, %v6406_v20, 0.0  ;;  %v528_v23 = vsel %vm494_vm0, %v6409_v21, 0.0  ;;  %v6416_v24 = vld [vmem:[%s6371_s19 + $0x60] sm:$0xff]  ;;  %v6419_v25 = vld [vmem:[%s6371_s19 + $0x68] sm:$0xff]  ;;  %v6426_v28 = vld [vmem:[%s6371_s19 + $0x70] sm:$0xff] }
  0x18   : > { %v531_v26 = vsel %vm494_vm0, %v6416_v24, 0.0  ;;  %v534_v27 = vsel %vm494_vm0, %v6419_v25, 0.0  ;;  %v6429_v29 = vld [vmem:[%s6371_s19 + $0x78] sm:$0xff]  ;;  %v537_v30 = vsel %vm494_vm0, %v6426_v28, 0.0 }
  0x19   : > { %499 = vadd.xlane.f32.xlu0 %v498_v6  ;;  %505 = vadd.xlane.f32.xlu1 %v504_v7  ;;  %v540_v31 = vsel %vm494_vm0, %v6429_v29, 0.0 }
  0x1d   : > { %508 = vadd.xlane.f32.xlu0 %v507_v10  ;;  %511 = vadd.xlane.f32.xlu1 %v510_v11 }
  0x21   : > { %514 = vadd.xlane.f32.xlu0 %v513_v14  ;;  %517 = vadd.xlane.f32.xlu1 %v516_v15 }
  0x25   : > { %520 = vadd.xlane.f32.xlu0 %v519_v18  ;;  %523 = vadd.xlane.f32.xlu1 %v522_v19 }
  0x29   : > { %526 = vadd.xlane.f32.xlu0 %v525_v22  ;;  %529 = vadd.xlane.f32.xlu1 %v528_v23 }
  0x2d   : > { %532 = vadd.xlane.f32.xlu0 %v531_v26  ;;  %535 = vadd.xlane.f32.xlu1 %v534_v27 }
  0x31   : > { %538 = vadd.xlane.f32.xlu0 %v537_v30  ;;  %541 = vadd.xlane.f32.xlu1 %v540_v31 }
  0xa2   : > { %v497_v32 = vpop.xlane.xlu0 %496  ;;  %v503_v33 = vpop.xlane.xlu1 %502 }
  0xa3   : > { %v544_v34 = vmul.f32 0.03125, %v497_v32  ;;  %v546_v35 = vmul.f32 0.03125, %v503_v33 }
  0xa5   : > { %v6435_v36 = vsub.f32 %v476_v0, %v544_v34  ;;  %v6437_v37 = vsub.f32 %v478_v1, %v546_v35 }
  0xa6   : > { %v500_v38 = vpop.xlane.xlu0 %499  ;;  %v506_v39 = vpop.xlane.xlu1 %505 }
  0xa7   : > { %v545_v40 = vmul.f32 0.03125, %v500_v38  ;;  %v547_v41 = vmul.f32 0.03125, %v506_v39  ;;  %v576_v42 = vmul.f32 %v6435_v36, %v6435_v36  ;;  %v578_v43 = vmul.f32 %v6437_v37, %v6437_v37 }
  0xa9   : > { %v6443_v44 = vsub.f32 %v477_v2, %v545_v40  ;;  %v6445_v45 = vsub.f32 %v479_v5, %v547_v41  ;;  %v592_v46 = vsel %vm494_vm0, %v576_v42, 0.0  ;;  %v598_v49 = vsel %vm494_vm0, %v578_v43, 0.0 }
  0xaa   : > { %593 = vadd.xlane.f32.xlu0 %v592_v46  ;;  %v509_v47 = vpop.xlane.xlu0 %508  ;;  %v512_v48 = vpop.xlane.xlu1 %511 }
  0xab   : > { %v548_v50 = vmul.f32 0.03125, %v509_v47  ;;  %v549_v51 = vmul.f32 0.03125, %v512_v48  ;;  %v577_v52 = vmul.f32 %v6443_v44, %v6443_v44  ;;  %v579_v53 = vmul.f32 %v6445_v45, %v6445_v45 }
  0xad   : > { %v6453_v54 = vsub.f32 %v480_v8, %v548_v50  ;;  %v6455_v55 = vsub.f32 %v481_v9, %v549_v51  ;;  %v595_v56 = vsel %vm494_vm0, %v577_v52, 0.0  ;;  %v601_v59 = vsel %vm494_vm0, %v579_v53, 0.0  ;;  %v749_v53 = vld [vmem:[%s8667_s2 + $0x8] sm:$0xff] }
  0xae   : > { %599 = vadd.xlane.f32.xlu0 %v598_v49  ;;  %596 = vadd.xlane.f32.xlu1 %v595_v56  ;;  %v515_v57 = vpop.xlane.xlu0 %514  ;;  %v518_v58 = vpop.xlane.xlu1 %517 }
  0xaf   : > { %v550_v60 = vmul.f32 0.03125, %v515_v57  ;;  %v551_v61 = vmul.f32 0.03125, %v518_v58  ;;  %v580_v62 = vmul.f32 %v6453_v54, %v6453_v54  ;;  %v581_v63 = vmul.f32 %v6455_v55, %v6455_v55  ;;  %v750_v57 = vld [vmem:[%s8667_s2 + $0x10] sm:$0xff]  ;;  %v751_v58 = vld [vmem:[%s8667_s2 + $0x18] sm:$0xff] }
  0xb1   : > { %v6464_v0 = vsub.f32 %v6386_v12, %v550_v60  ;;  %v6467_v1 = vsub.f32 %v6389_v13, %v551_v61  ;;  %v604_v2 = vsel %vm494_vm0, %v580_v62, 0.0  ;;  %v607_v5 = vsel %vm494_vm0, %v581_v63, 0.0 }
  0xb2   : > { %602 = vadd.xlane.f32.xlu1 %v601_v59  ;;  %605 = vadd.xlane.f32.xlu0 %v604_v2  ;;  %v521_v3 = vpop.xlane.xlu0 %520  ;;  %v524_v4 = vpop.xlane.xlu1 %523  ;;  %v5636_v59 = vpack.c.bf16 %v751_v58, %v750_v57 }
  0xb3   : > { %v552_v6 = vmul.f32 0.03125, %v521_v3  ;;  %v553_v7 = vmul.f32 0.03125, %v524_v4  ;;  %v582_v8 = vmul.f32 %v6464_v0, %v6464_v0  ;;  %v583_v9 = vmul.f32 %v6467_v1, %v6467_v1 }
  0xb5   : > { %v6476_v10 = vsub.f32 %v6396_v16, %v552_v6  ;;  %v6479_v11 = vsub.f32 %v6399_v17, %v553_v7  ;;  %v610_v12 = vsel %vm494_vm0, %v582_v8, 0.0  ;;  %v613_v15 = vsel %vm494_vm0, %v583_v9, 0.0 }
  0xb6   : > { %608 = vadd.xlane.f32.xlu1 %v607_v5  ;;  %611 = vadd.xlane.f32.xlu0 %v610_v12  ;;  %v527_v13 = vpop.xlane.xlu0 %526  ;;  %v530_v14 = vpop.xlane.xlu1 %529 }
  0xb7   : > { %v554_v18 = vmul.f32 0.03125, %v527_v13  ;;  %v555_v19 = vmul.f32 0.03125, %v530_v14  ;;  %v584_v22 = vmul.f32 %v6476_v10, %v6476_v10  ;;  %v585_v16 = vmul.f32 %v6479_v11, %v6479_v11 }
  0xb9   : > { %v6488_v23 = vsub.f32 %v6406_v20, %v554_v18  ;;  %v6491_v17 = vsub.f32 %v6409_v21, %v555_v19  ;;  %v616_v26 = vsel %vm494_vm0, %v584_v22, 0.0  ;;  %v619_v31 = vsel %vm494_vm0, %v585_v16, 0.0 }
  0xba   : > { %614 = vadd.xlane.f32.xlu1 %v613_v15  ;;  %617 = vadd.xlane.f32.xlu0 %v616_v26  ;;  %v533_v27 = vpop.xlane.xlu0 %532  ;;  %v536_v30 = vpop.xlane.xlu1 %535 }
  0xbb   : > { %v556_v32 = vmul.f32 0.03125, %v533_v27  ;;  %v557_v33 = vmul.f32 0.03125, %v536_v30  ;;  %v586_v34 = vmul.f32 %v6488_v23, %v6488_v23  ;;  %v587_v20 = vmul.f32 %v6491_v17, %v6491_v17  ;;  %v6540_v30 = vld [vmem:[%s8672_s7] ss:$0 sm:$0xff] }
  0xbd   : > { %v6500_v35 = vsub.f32 %v6416_v24, %v556_v32  ;;  %v6503_v21 = vsub.f32 %v6419_v25, %v557_v33  ;;  %v622_v38 = vsel %vm494_vm0, %v586_v34, 0.0  ;;  %v625_v41 = vsel %vm494_vm0, %v587_v20, 0.0 }
  0xbe   : > { %620 = vadd.xlane.f32.xlu1 %v619_v31  ;;  %623 = vadd.xlane.f32.xlu0 %v622_v38  ;;  %v539_v39 = vpop.xlane.xlu0 %538  ;;  %v542_v40 = vpop.xlane.xlu1 %541  ;;  %v6546_v38 = vld [vmem:[%s8673_s8] ss:$0 sm:$0xff] }
  0xbf   : > { %v558_v42 = vmul.f32 0.03125, %v539_v39  ;;  %v559_v43 = vmul.f32 0.03125, %v542_v40  ;;  %v588_v46 = vmul.f32 %v6500_v35, %v6500_v35  ;;  %v589_v24 = vmul.f32 %v6503_v21, %v6503_v21 }
  0xc1   : > { %v6512_v47 = vsub.f32 %v6426_v28, %v558_v42  ;;  %v6515_v25 = vsub.f32 %v6429_v29, %v559_v43  ;;  %v628_v48 = vsel %vm494_vm0, %v588_v46, 0.0  ;;  %v631_v49 = vsel %vm494_vm0, %v589_v24, 0.0  ;;  %v748_v29 = vld [vmem:[%s8667_s2] sm:$0xff] }
  0xc2   : > { %626 = vadd.xlane.f32.xlu1 %v625_v41  ;;  %629 = vadd.xlane.f32.xlu0 %v628_v48  ;;  %v5632_v56 = vpack.c.bf16 %v749_v53, %v748_v29 }
  0xc3   : > { %v590_v50 = vmul.f32 %v6512_v47, %v6512_v47  ;;  %v591_v51 = vmul.f32 %v6515_v25, %v6515_v25 }
  0xc4   : > { %5633 = vmatprep.subr.bf16.mxu0 %v5632_v56 }
  0xc5   : > { %v634_v52 = vsel %vm494_vm0, %v590_v50, 0.0  ;;  %v637_v28 = vsel %vm494_vm0, %v591_v51, 0.0  ;;  %5635 = vmatpush3.bf16.msra.mxu0 %v5632_v56 }
  0xc6   : > { %632 = vadd.xlane.f32.xlu1 %v631_v49  ;;  %635 = vadd.xlane.f32.xlu0 %v634_v52 }
  0xc7   : > { %5637 = vmatprep.subr.bf16.mxu0 %v5636_v59 }
  0xc9   : > { %5639 = vmatpush3.bf16.msra.mxu0 %v5636_v59 }
  0xca   : > { %638 = vadd.xlane.f32.xlu1 %v637_v28 }
 0x137   : > { %v594_v60 = vpop.xlane.xlu0 %593 }
 0x138   : > { %v640_v61 = vmul.f32 0.03125, %v594_v60 }
 0x13a   : > { %v656_v62 = vadd.f32 1e-05, %v640_v61 }
 0x13b   : > { %v597_v63 = vpop.xlane.xlu1 %596  ;;  %v600_v2 = vpop.xlane.xlu0 %599 }
 0x13c   : > { %5838 = vrsqrt.f32 %v656_v62  ;;  %v641_v3 = vmul.f32 0.03125, %v597_v63  ;;  %v642_v4 = vmul.f32 0.03125, %v600_v2 }
 0x13e   : > { %v657_v5 = vadd.f32 1e-05, %v641_v3  ;;  %v658_v6 = vadd.f32 1e-05, %v642_v4 }
 0x13f   : > { %v603_v7 = vpop.xlane.xlu1 %602  ;;  %v606_v8 = vpop.xlane.xlu0 %605 }
 0x140   : > { %5840 = vrsqrt.f32 %v657_v5  ;;  %v643_v9 = vmul.f32 0.03125, %v603_v7  ;;  %v644_v12 = vmul.f32 0.03125, %v606_v8 }
 0x141   : > { %5842 = vrsqrt.f32 %v658_v6 }
 0x142   : > { %v659_v13 = vadd.f32 1e-05, %v643_v9  ;;  %v660_v14 = vadd.f32 1e-05, %v644_v12 }
 0x143   : > { %v609_v15 = vpop.xlane.xlu1 %608  ;;  %v612_v18 = vpop.xlane.xlu0 %611 }
 0x144   : > { %5844 = vrsqrt.f32 %v659_v13  ;;  %v645_v19 = vmul.f32 0.03125, %v609_v15  ;;  %v646_v22 = vmul.f32 0.03125, %v612_v18 }
 0x145   : > { %5846 = vrsqrt.f32 %v660_v14 }
 0x146   : > { %v5839_v16 = vpop.eup %5838  ;;  %v661_v26 = vadd.f32 1e-05, %v645_v19  ;;  %v662_v27 = vadd.f32 1e-05, %v646_v22 }
 0x147   : > { %v615_v31 = vpop.xlane.xlu1 %614  ;;  %v618_v32 = vpop.xlane.xlu0 %617  ;;  %v688_v33 = vmul.f32 %v5839_v16, %v6435_v36 }
 0x148   : > { %5848 = vrsqrt.f32 %v661_v26  ;;  %v647_v34 = vmul.f32 0.03125, %v615_v31  ;;  %v648_v20 = vmul.f32 0.03125, %v618_v32 }
 0x149   : > { %5850 = vrsqrt.f32 %v662_v27  ;;  %v710_v39 = vmul.f32 %v6540_v30, %v688_v33 }
 0x14a   : > { %v5841_v40 = vpop.eup %5840  ;;  %v663_v41 = vadd.f32 1e-05, %v647_v34  ;;  %v664_v42 = vadd.f32 1e-05, %v648_v20 }
 0x14b   : > { %v5843_v43 = vpop.eup %5842  ;;  %v621_v46 = vpop.xlane.xlu1 %620  ;;  %v732_v48 = vadd.f32 %v6546_v38, %v710_v39  ;;  %v689_v36 = vmul.f32 %v5841_v40, %v6443_v44 }
 0x14c   : > { %v624_v24 = vpop.xlane.xlu0 %623  ;;  %5852 = vrsqrt.f32 %v663_v41  ;;  %v649_v49 = vmul.f32 0.03125, %v621_v46  ;;  %v690_v51 = vmul.f32 %v5843_v43, %v6437_v37 }
 0x14d   : > { %v650_v50 = vmul.f32 0.03125, %v624_v24  ;;  %5854 = vrsqrt.f32 %v664_v42  ;;  %5256 = vmatprep.mubr.msk.f32.mxu0 %vm494_vm0, %v732_v48  ;;  %v711_v52 = vmul.f32 %v6540_v30, %v689_v36 }
 0x14e   : > { %v5845_v28 = vpop.eup %5844  ;;  %v665_v29 = vadd.f32 1e-05, %v649_v49  ;;  %v712_v56 = vmul.f32 %v6540_v30, %v690_v51 }
 0x14f   : > { %v666_v53 = vadd.f32 1e-05, %v650_v50  ;;  %v5847_v57 = vpop.eup %5846  ;;  %v627_v58 = vpop.xlane.xlu1 %626  ;;  %v733_v44 = vadd.f32 %v6546_v38, %v711_v52  ;;  %v691_v60 = vmul.f32 %v5845_v28, %v6445_v45 }
 0x150   : > { %v630_v59 = vpop.xlane.xlu0 %629  ;;  %5856 = vrsqrt.f32 %v665_v29  ;;  %v651_v61 = vmul.f32 0.03125, %v627_v58  ;;  %v734_v62 = vadd.f32 %v6546_v38, %v712_v56  ;;  %v692_v2 = vmul.f32 %v5847_v57, %v6453_v54 }
 0x151   : > { %v652_v37 = vmul.f32 0.03125, %v630_v59  ;;  %5858 = vrsqrt.f32 %v666_v53  ;;  %5257 = vmatmul.mubr.msk.f32.vlgmr.msra.gmra.mrb[0].mxu0 %vm494_vm0, %v733_v44  ;;  %v713_v63 = vmul.f32 %v6540_v30, %v691_v60 }
 0x152   : > { %v5849_v3 = vpop.eup %5848  ;;  %v667_v4 = vadd.f32 1e-05, %v651_v61  ;;  %5259 = vmatprep.mubr.msk.f32.mxu0 %vm494_vm0, %v734_v62  ;;  %v714_v9 = vmul.f32 %v6540_v30, %v692_v2  ;;  %v952_v62 = vld [vmem:[%s8666_s1] sm:$0xff] }
 0x153   : > { %v668_v5 = vadd.f32 1e-05, %v652_v37  ;;  %v5851_v6 = vpop.eup %5850  ;;  %v633_v7 = vpop.xlane.xlu1 %632  ;;  %v735_v8 = vadd.f32 %v6546_v38, %v713_v63  ;;  %v693_v12 = vmul.f32 %v5849_v3, %v6455_v55  ;;  %v984_v2 = vmul.f32 0.35355338, %v952_v62 }
 0x154   : > { %v636_v45 = vpop.xlane.xlu0 %635  ;;  %5860 = vrsqrt.f32 %v667_v4  ;;  %v653_v13 = vmul.f32 0.03125, %v633_v7  ;;  %v694_v15 = vmul.f32 %v5851_v6, %v6464_v0  ;;  %v736_v54 = vadd.f32 %v6546_v38, %v714_v9 }
 0x155   : > { %v654_v14 = vmul.f32 0.03125, %v636_v45  ;;  %5862 = vrsqrt.f32 %v668_v5  ;;  %5260 = vmatmul.mubr.msk.f32.gmra.mrb[2].mxu0 %vm494_vm0, %v735_v8  ;;  %v715_v18 = vmul.f32 %v6540_v30, %v693_v12 }
 0x156   : > { %v5853_v19 = vpop.eup %5852  ;;  %v669_v22 = vadd.f32 1e-05, %v653_v13  ;;  %v716_v26 = vmul.f32 %v6540_v30, %v694_v15  ;;  %5262 = vmatprep.mubr.msk.f32.mxu0 %vm494_vm0, %v736_v54 }
 0x157   : > { %v670_v16 = vadd.f32 1e-05, %v654_v14  ;;  %v5855_v27 = vpop.eup %5854  ;;  %v639_v55 = vpop.xlane.xlu1 %638  ;;  %v737_v31 = vadd.f32 %v6546_v38, %v715_v18  ;;  %v695_v0 = vmul.f32 %v5853_v19, %v6467_v1 }
 0x158   : > { %5864 = vrsqrt.f32 %v669_v22  ;;  %v655_v32 = vmul.f32 0.03125, %v639_v55  ;;  %v738_v33 = vadd.f32 %v6546_v38, %v716_v26  ;;  %v696_v34 = vmul.f32 %v5855_v27, %v6476_v10 }
 0x159   : > { %5866 = vrsqrt.f32 %v670_v16  ;;  %5263 = vmatmul.mubr.msk.f32.gmra.mrb[4].mxu0 %vm494_vm0, %v737_v31  ;;  %v717_v20 = vmul.f32 %v6540_v30, %v695_v0 }
 0x15a   : > { %v5857_v39 = vpop.eup %5856  ;;  %v671_v40 = vadd.f32 1e-05, %v655_v32  ;;  %5265 = vmatprep.mubr.msk.f32.mxu0 %vm494_vm0, %v738_v33  ;;  %v718_v41 = vmul.f32 %v6540_v30, %v696_v34 }
 0x15b   : > { %v5859_v42 = vpop.eup %5858  ;;  %v739_v1 = vadd.f32 %v6546_v38, %v717_v20  ;;  %v697_v43 = vmul.f32 %v5857_v39, %v6479_v11 }
 0x15c   : > { %5868 = vrsqrt.f32 %v671_v40  ;;  %v740_v46 = vadd.f32 %v6546_v38, %v718_v41  ;;  %v698_v10 = vmul.f32 %v5859_v42, %v6488_v23 }
 0x15d   : > { %5266 = vmatmul.mubr.msk.f32.gmra.mrb[6].mxu0 %vm494_vm0, %v739_v1  ;;  %v719_v24 = vmul.f32 %v6540_v30, %v697_v43 }
 0x15e   : > { %v5861_v48 = vpop.eup %5860  ;;  %5268 = vmatprep.mubr.msk.f32.mxu0 %vm494_vm0, %v740_v46  ;;  %v720_v36 = vmul.f32 %v6540_v30, %v698_v10 }
 0x15f   : > { %v5863_v49 = vpop.eup %5862  ;;  %v741_v50 = vadd.f32 %v6546_v38, %v719_v24  ;;  %v699_v51 = vmul.f32 %v5861_v48, %v6491_v17 }
 0x160   : > { %v742_v11 = vadd.f32 %v6546_v38, %v720_v36  ;;  %v700_v52 = vmul.f32 %v5863_v49, %v6500_v35 }
 0x161   : > { %5269 = vmatmul.mubr.msk.f32.gmra.mrb[8].mxu0 %vm494_vm0, %v741_v50  ;;  %v721_v23 = vmul.f32 %v6540_v30, %v699_v51 }
 0x162   : > { %v5865_v28 = vpop.eup %5864  ;;  %5271 = vmatprep.mubr.msk.f32.mxu0 %vm494_vm0, %v742_v11  ;;  %v722_v29 = vmul.f32 %v6540_v30, %v700_v52 }
 0x163   : > { %v5867_v53 = vpop.eup %5866  ;;  %v743_v56 = vadd.f32 %v6546_v38, %v721_v23  ;;  %v701_v57 = vmul.f32 %v5865_v28, %v6503_v21  ;;  %v963_v23 = vld [vmem:[%s8666_s1 + $0x58] sm:$0xff] }
 0x164   : > { %v744_v17 = vadd.f32 %v6546_v38, %v722_v29  ;;  %v702_v58 = vmul.f32 %v5867_v53, %v6512_v47 }
 0x165   : > { %5272 = vmatmul.mubr.msk.f32.gmra.mrb[10].mxu0 %vm494_vm0, %v743_v56  ;;  %v723_v35 = vmul.f32 %v6540_v30, %v701_v57 }
 0x166   : > { %v5869_v59 = vpop.eup %5868  ;;  %5274 = vmatprep.mubr.msk.f32.mxu0 %vm494_vm0, %v744_v17  ;;  %v724_v44 = vmul.f32 %v6540_v30, %v702_v58 }
 0x167   : > { %v745_v60 = vadd.f32 %v6546_v38, %v723_v35  ;;  %v703_v61 = vmul.f32 %v5869_v59, %v6515_v25  ;;  %v4790_v25 = vld [vmem:[%s8671_s6] ss:$0 sm:$0xff] }
 0x168   : > { %v746_v37 = vadd.f32 %v6546_v38, %v724_v44 }
 0x169   : > { %5275 = vmatmul.mubr.msk.f32.gmra.mrb[12].mxu0 %vm494_vm0, %v745_v60  ;;  %v725_v21 = vmul.f32 %v6540_v30, %v703_v61 }
 0x16a   : > { %5277 = vmatprep.mubr.msk.f32.mxu0 %vm494_vm0, %v746_v37 }
 0x16b   : > { %v747_v47 = vadd.f32 %v6546_v38, %v725_v21 }
 0x16d   : > { %5278 = vmatmul.mubr.msk.f32.gmra.mrb[14].mxu0 %vm494_vm0, %v747_v47 }
 0x224   : > { %v5258_v63 = vpop.f32.mrb[0].mxu0 }
 0x225   : > { %v6617_v3 = vadd.f32 %v5258_v63, %v4790_v25  ;;  %v873_v4 = vpop.f32.mrb[1].mxu0 }
 0x226   : > { %v6619_v30 = vadd.f32 %v4790_v25, %v873_v4 }
 0x228   : > { %v5261_v5 = vpop.f32.mrb[2].mxu0  ;;  %v5758_v38 = vpack.i.bf16 %v6617_v3, %v6619_v30  ;;  %v1016_v6 = vmul.f32 %v984_v2, %v6619_v30 }
 0x229   : > { %v6624_v7 = vadd.f32 %v5261_v5, %v4790_v25  ;;  %v883_v45 = vpop.f32.mrb[3].mxu0 }
 0x22a   : > { %v6626_v8 = vadd.f32 %v4790_v25, %v883_v45  ;;  %5759 = vrot.lane.b32.xlu0 %v5758_v38, %s6278_s24  ;;  %5296 = vmatprep.mubr.msk.f32.mxu1 %vm494_vm0, %v1016_v6 }
 0x22c   : > { %v5264_v9 = vpop.f32.mrb[4].mxu0  ;;  %v5763_v12 = vpack.i.bf16 %v6624_v7, %v6626_v8 }
 0x22d   : > { %v6632_v13 = vadd.f32 %v5264_v9, %v4790_v25  ;;  %v893_v14 = vpop.f32.mrb[5].mxu0 }
 0x22e   : > { %v6634_v15 = vadd.f32 %v4790_v25, %v893_v14  ;;  %5764 = vrot.lane.b32.xlu1 %v5763_v12, %s6278_s24 }
 0x230   : > { %v5267_v54 = vpop.f32.mrb[6].mxu0  ;;  %v5768_v18 = vpack.i.bf16 %v6632_v13, %v6634_v15 }
 0x231   : > { %v6639_v19 = vadd.f32 %v5267_v54, %v4790_v25  ;;  %v903_v22 = vpop.f32.mrb[7].mxu0  ;;  %v954_v54 = vld [vmem:[%s8666_s1 + $0x10] sm:$0xff] }
 0x232   : > { %v6641_v16 = vadd.f32 %v4790_v25, %v903_v22  ;;  %5769 = vrot.lane.b32.xlu1 %v5768_v18, %s6278_s24 }
 0x234   : > { %v5270_v26 = vpop.f32.mrb[8].mxu0  ;;  %v5778_v27 = vpack.i.bf16 %v6639_v19, %v6641_v16 }
 0x235   : > { %v6646_v55 = vadd.f32 %v5270_v26, %v4790_v25  ;;  %v913_v31 = vpop.f32.mrb[9].mxu0 }
 0x236   : > { %v6648_v0 = vadd.f32 %v4790_v25, %v913_v31  ;;  %5779 = vrot.lane.b32.xlu0 %v5778_v27, %s6278_s24  ;;  %v955_v31 = vld [vmem:[%s8666_s1 + $0x18] sm:$0xff] }
 0x238   : > { %v5273_v32 = vpop.f32.mrb[10].mxu0  ;;  %v5773_v33 = vpack.i.bf16 %v6646_v55, %v6648_v0  ;;  %v1048_v34 = vmul.f32 %v984_v2, %v6648_v0 }
 0x239   : > { %v6654_v20 = vadd.f32 %v5273_v32, %v4790_v25  ;;  %v923_v39 = vpop.f32.mrb[11].mxu0 }
 0x23a   : > { %v6656_v40 = vadd.f32 %v4790_v25, %v923_v39  ;;  %5774 = vrot.lane.b32.xlu1 %v5773_v33, %s6278_s24  ;;  %5360 = vmatprep.mubr.msk.f32.mxu0 %vm494_vm0, %v1048_v34 }
 0x23c   : > { %v5276_v41 = vpop.f32.mrb[12].mxu0  ;;  %v5783_v42 = vpack.i.bf16 %v6654_v20, %v6656_v40 }
 0x23d   : > { %v6662_v1 = vadd.f32 %v5276_v41, %v4790_v25  ;;  %v933_v43 = vpop.f32.mrb[13].mxu0  ;;  %v956_v41 = vld [vmem:[%s8666_s1 + $0x20] sm:$0xff] }
 0x23e   : > { %v6664_v46 = vadd.f32 %v4790_v25, %v933_v43  ;;  %5784 = vrot.lane.b32.xlu1 %v5783_v42, %s6278_s24 }
 0x240   : > { %v5279_v10 = vpop.f32.mrb[14].mxu0  ;;  %v5788_v24 = vpack.i.bf16 %v6662_v1, %v6664_v46 }
 0x241   : > { %v6669_v48 = vadd.f32 %v5279_v10, %v4790_v25  ;;  %v943_v36 = vpop.f32.mrb[15].mxu0 }
 0x242   : > { %v6671_v49 = vadd.f32 %v4790_v25, %v943_v36  ;;  %5789 = vrot.lane.b32.xlu0 %v5788_v24, %s6278_s24  ;;  %v6727_v36 = vmul.f32 0.35355338, %v955_v31 }
 0x244   : > { %v5793_v50 = vpack.i.bf16 %v6669_v48, %v6671_v49 }
 0x246   : > { %5804 = vrot.lane.b32.xlu0 %v5763_v12, %s6279_s25  ;;  %5794 = vrot.lane.b32.xlu1 %v5793_v50, %s6278_s24  ;;  %v953_v12 = vld [vmem:[%s8666_s1 + $0x8] sm:$0xff] }
 0x247   : > { %v6715_v22 = vmul.f32 0.35355338, %v953_v12 }
 0x249   : > { %v1017_v10 = vmul.f32 %v6715_v22, %v6617_v3 }
 0x24a   : > { %5814 = vrot.lane.b32.xlu0 %v5778_v27, %s6279_s25  ;;  %5799 = vrot.lane.b32.xlu1 %v5758_v38, %s6279_s25  ;;  %v6717_v27 = vmul.f32 0.35355338, %v954_v54 }
 0x24e   : > { %5824 = vrot.lane.b32.xlu0 %v5783_v42, %s6279_s25  ;;  %5809 = vrot.lane.b32.xlu1 %v5768_v18, %s6279_s25 }
 0x252   : > { %5834 = vrot.lane.b32.xlu0 %v5793_v50, %s6279_s25  ;;  %5819 = vrot.lane.b32.xlu1 %v5773_v33, %s6279_s25 }
 0x256   : > { %5829 = vrot.lane.b32.xlu1 %v5788_v24, %s6279_s25 }
 0x29c   : > { %v5760_v51 = vpop.permute.xlu0 %5759 }
 0x29d   : > { %v5762_v11 = vunpack.i.h.bf16 %v5760_v51  ;;  %v5761_v52 = vunpack.i.l.bf16 %v5760_v51  ;;  %v1018_v51 = vmul.f32 %v6717_v27, %v6626_v8 }
 0x29f   : > { %v5640_v28 = vpack.c.bf16 %v5762_v11, %v5761_v52  ;;  %v6731_v11 = vmul.f32 0.35355338, %v956_v41  ;;  %v957_v52 = vld [vmem:[%s8666_s1 + $0x28] sm:$0xff] }
 0x2a0   : > { %v5765_v29 = vpop.permute.xlu1 %5764 }
 0x2a1   : > { %v5767_v53 = vunpack.i.h.bf16 %v5765_v29  ;;  %v5766_v56 = vunpack.i.l.bf16 %v5765_v29  ;;  %5642 = vmatprep.subr.msk.bf16.mxu1 %vm6679_vm1, %v5640_v28  ;;  %v958_v29 = vld [vmem:[%s8666_s1 + $0x30] sm:$0xff] }
 0x2a2   : > { %5645 = vmatpush3.bf16.xpose.msk.msra.mxu1 %vm6679_vm1, %v5640_v28 }
 0x2a3   : > { %v5646_v57 = vpack.c.bf16 %v5767_v53, %v5766_v56 }
 0x2a4   : > { %v5770_v17 = vpop.permute.xlu1 %5769 }
 0x2a5   : > { %v5772_v58 = vunpack.i.h.bf16 %v5770_v17  ;;  %v5771_v35 = vunpack.i.l.bf16 %v5770_v17  ;;  %5648 = vmatprep.subr.msk.bf16.mxu1 %vm6679_vm1, %v5646_v57 }
 0x2a7   : > { %v5652_v59 = vpack.c.bf16 %v5772_v58, %v5771_v35  ;;  %v1019_v58 = vmul.f32 %v6727_v36, %v6624_v7  ;;  %v6747_v35 = vmul.f32 0.35355338, %v957_v52 }
 0x2a8   : > { %v5780_v44 = vpop.permute.xlu0 %5779 }
 0x2a9   : > { %v5782_v61 = vunpack.i.h.bf16 %v5780_v44  ;;  %v5781_v37 = vunpack.i.l.bf16 %v5780_v44  ;;  %v1020_v44 = vmul.f32 %v6731_v11, %v6634_v15 }
 0x2aa   : > { %5651 = vmatpush3.bf16.xpose.msk.msra.mxu1 %vm6679_vm1, %v5646_v57 }
 0x2ab   : > { %5654 = vmatprep.subr.msk.bf16.mxu1 %vm6679_vm1, %v5652_v59  ;;  %v5658_v63 = vpack.c.bf16 %v5782_v61, %v5781_v37  ;;  %v959_v61 = vld [vmem:[%s8666_s1 + $0x38] sm:$0xff] }
 0x2ac   : > { %v5775_v60 = vpop.permute.xlu1 %5774 }
 0x2ad   : > { %v5777_v21 = vunpack.i.h.bf16 %v5775_v60  ;;  %v5776_v47 = vunpack.i.l.bf16 %v5775_v60  ;;  %v6751_v60 = vmul.f32 0.35355338, %v958_v29 }
 0x2af   : > { %v5664_v62 = vpack.c.bf16 %v5777_v21, %v5776_v47  ;;  %v960_v47 = vld [vmem:[%s8666_s1 + $0x40] sm:$0xff] }
 0x2b0   : > { %v5785_v25 = vpop.permute.xlu1 %5784 }
 0x2b1   : > { %v5787_v2 = vunpack.i.h.bf16 %v5785_v25  ;;  %v5786_v4 = vunpack.i.l.bf16 %v5785_v25  ;;  %5666 = vmatprep.subr.msk.bf16.mxu0 %vm6679_vm1, %v5664_v62 }
 0x2b2   : > { %5657 = vmatpush3.bf16.xpose.msk.msra.mxu1 %vm6679_vm1, %v5652_v59  ;;  %5669 = vmatpush3.bf16.xpose.msk.msra.mxu0 %vm6679_vm1, %v5664_v62 }
 0x2b3   : > { %v5670_v5 = vpack.c.bf16 %v5787_v2, %v5786_v4  ;;  %5660 = vmatprep.subr.msk.bf16.mxu1 %vm6679_vm1, %v5658_v63  ;;  %v1021_v2 = vmul.f32 %v6747_v35, %v6632_v13  ;;  %v6763_v4 = vmul.f32 0.35355338, %v959_v61 }
 0x2b4   : > { %v5790_v38 = vpop.permute.xlu0 %5789 }
 0x2b5   : > { %v5792_v6 = vunpack.i.h.bf16 %v5790_v38  ;;  %v5791_v45 = vunpack.i.l.bf16 %v5790_v38  ;;  %5672 = vmatprep.subr.msk.bf16.mxu0 %vm6679_vm1, %v5670_v5  ;;  %v6767_v38 = vmul.f32 0.35355338, %v960_v47  ;;  %v1023_v54 = vmul.f32 %v6763_v4, %v6639_v19 }
 0x2b6   : > { %v1053_v47 = vmul.f32 %v6747_v35, %v6662_v1  ;;  %v970_v35 = vld [vmem:[%s8666_s1 + $0x90] sm:$0xff] }
 0x2b7   : > { %v5676_v14 = vpack.c.bf16 %v5792_v6, %v5791_v45  ;;  %v961_v6 = vld [vmem:[%s8666_s1 + $0x48] sm:$0xff] }
 0x2b8   : > { %v5795_v9 = vpop.permute.xlu1 %5794  ;;  %v5805_v18 = vpop.permute.xlu0 %5804 }
 0x2b9   : > { %v5797_v32 = vunpack.i.h.bf16 %v5795_v9  ;;  %v5796_v33 = vunpack.i.l.bf16 %v5795_v9  ;;  %v5807_v42 = vunpack.i.h.bf16 %v5805_v18  ;;  %v5806_v43 = vunpack.i.l.bf16 %v5805_v18  ;;  %v962_v9 = vld [vmem:[%s8666_s1 + $0x50] sm:$0xff] }
 0x2ba   : > { %5663 = vmatpush3.bf16.xpose.msk.msra.mxu1 %vm6679_vm1, %v5658_v63  ;;  %5675 = vmatpush3.bf16.xpose.msk.msra.mxu0 %vm6679_vm1, %v5670_v5  ;;  %v1022_v5 = vmul.f32 %v6751_v60, %v6641_v16  ;;  %v6781_v18 = vmul.f32 0.35355338, %v961_v6  ;;  %v6785_v31 = vmul.f32 0.35355338, %v962_v9 }
 0x2bb   : > { %5678 = vmatprep.subr.msk.bf16.mxu0 %vm6679_vm1, %v5676_v14  ;;  %v5682_v28 = vpack.c.bf16 %v5797_v32, %v5796_v33  ;;  %v5692_v57 = vpack.c.bf16 %v5807_v42, %v5806_v43  ;;  %v964_v32 = vld [vmem:[%s8666_s1 + $0x60] sm:$0xff]  ;;  %v6799_v43 = vmul.f32 0.35355338, %v963_v23 }
 0x2bc   : > { %v5800_v26 = vpop.permute.xlu1 %5799  ;;  %v5815_v17 = vpop.permute.xlu0 %5814  ;;  %v1025_v42 = vmul.f32 %v6781_v18, %v6617_v3  ;;  %v1057_v23 = vmul.f32 %v6781_v18, %v6646_v55 }
 0x2bd   : > { %v5802_v34 = vunpack.i.h.bf16 %v5800_v26  ;;  %v5801_v39 = vunpack.i.l.bf16 %v5800_v26  ;;  %v5817_v62 = vunpack.i.h.bf16 %v5815_v17  ;;  %v5816_v25 = vunpack.i.l.bf16 %v5815_v17 }
 0x2be   : > { %v1024_v26 = vmul.f32 %v6767_v38, %v6619_v30 }
 0x2bf   : > { %v5688_v24 = vpack.c.bf16 %v5802_v34, %v5801_v39  ;;  %v5700_v12 = vpack.c.bf16 %v5817_v62, %v5816_v25  ;;  %v1049_v39 = vmul.f32 %v6715_v22, %v6646_v55  ;;  %v966_v22 = vld [vmem:[%s8666_s1 + $0x70] sm:$0xff] }
 0x2c0   : > { %v5810_v50 = vpop.permute.xlu1 %5809 }
 0x2c1   : > { %5297 = vmatmul.mubr.msk.f32.vlgmr.msra.gmra.mrb[0].mxu1 %vm494_vm0, %v1017_v10  ;;  %5689 = vmatprep.subr.bf16.mxu1 %v5688_v24  ;;  %v5812_v53 = vunpack.i.h.bf16 %v5810_v50  ;;  %v5811_v56 = vunpack.i.l.bf16 %v5810_v50  ;;  %v1026_v10 = vmul.f32 %v6785_v31, %v6626_v8  ;;  %v6805_v50 = vmul.f32 0.35355338, %v964_v32 }
 0x2c2   : > { %5299 = vmatprep.mubr.msk.f32.mxu1 %vm494_vm0, %v1018_v51  ;;  %5681 = vmatpush3.bf16.xpose.msk.msra.mxu0 %vm6679_vm1, %v5676_v14  ;;  %v5825_v14 = vpop.permute.xlu0 %5824  ;;  %v965_v51 = vld [vmem:[%s8666_s1 + $0x68] sm:$0xff] }
 0x2c3   : > { %5691 = vmatpush3.bf16.msra.mxu1 %v5688_v24  ;;  %5684 = vmatprep.subr.msk.bf16.mxu0 %vm6679_vm1, %v5682_v28  ;;  %v5696_v63 = vpack.c.bf16 %v5812_v53, %v5811_v56  ;;  %v5827_v33 = vunpack.i.h.bf16 %v5825_v14  ;;  %v5826_v34 = vunpack.i.l.bf16 %v5825_v14  ;;  %v1050_v24 = vmul.f32 %v6717_v27, %v6656_v40 }
 0x2c4   : > { %5693 = vmatprep.subr.bf16.mxu1 %v5692_v57  ;;  %v5820_v59 = vpop.permute.xlu1 %5819  ;;  %v1027_v53 = vmul.f32 %v6799_v43, %v6624_v7  ;;  %v1051_v56 = vmul.f32 %v6727_v36, %v6654_v20  ;;  %v1028_v17 = vmul.f32 %v6805_v50, %v6634_v15  ;;  %v968_v36 = vld [vmem:[%s8666_s1 + $0x80] sm:$0xff]  ;;  %v1056_v14 = vmul.f32 %v6767_v38, %v6648_v0 }
 0x2c5   : > { %v5822_v37 = vunpack.i.h.bf16 %v5820_v59  ;;  %v5821_v21 = vunpack.i.l.bf16 %v5820_v59  ;;  %5300 = vmatmul.mubr.msk.f32.gmra.mrb[2].mxu1 %vm494_vm0, %v1019_v58  ;;  %v5708_v27 = vpack.c.bf16 %v5827_v33, %v5826_v34  ;;  %v1052_v58 = vmul.f32 %v6731_v11, %v6664_v46 }
 0x2c6   : > { %5302 = vmatprep.mubr.msk.f32.mxu1 %vm494_vm0, %v1020_v44  ;;  %v5835_v29 = vpop.permute.xlu0 %5834  ;;  %v6827_v59 = vmul.f32 0.35355338, %v966_v22  ;;  %v967_v44 = vld [vmem:[%s8666_s1 + $0x78] sm:$0xff]  ;;  %v1058_v34 = vmul.f32 %v6785_v31, %v6656_v40  ;;  %v1059_v31 = vmul.f32 %v6799_v43, %v6654_v20 }
 0x2c7   : > { %5695 = vmatpush3.bf16.msra.mxu1 %v5692_v57  ;;  %v5704_v45 = vpack.c.bf16 %v5822_v37, %v5821_v21  ;;  %v6821_v57 = vmul.f32 0.35355338, %v965_v51  ;;  %v5837_v61 = vunpack.i.h.bf16 %v5835_v29  ;;  %v5836_v37 = vunpack.i.l.bf16 %v5835_v29 }
 0x2c8   : > { %5697 = vmatprep.subr.bf16.mxu1 %v5696_v63  ;;  %v5830_v41 = vpop.permute.xlu1 %5829  ;;  %v6843_v62 = vmul.f32 0.35355338, %v967_v44  ;;  %v1030_v25 = vmul.f32 %v6827_v59, %v6641_v16  ;;  %v1060_v51 = vmul.f32 %v6805_v50, %v6664_v46 }
 0x2c9   : > { %5303 = vmatmul.mubr.msk.f32.gmra.mrb[4].mxu1 %vm494_vm0, %v1021_v2  ;;  %v5832_v52 = vunpack.i.h.bf16 %v5830_v41  ;;  %v1029_v21 = vmul.f32 %v6821_v57, %v6632_v13  ;;  %v6849_v2 = vmul.f32 0.35355338, %v968_v36  ;;  %v5716_v6 = vpack.c.bf16 %v5837_v61, %v5836_v37 }
 0x2ca   : > { %5305 = vmatprep.mubr.msk.f32.mxu1 %vm494_vm0, %v1022_v5  ;;  %5687 = vmatpush3.bf16.xpose.msk.msra.mxu0 %vm6679_vm1, %v5682_v28  ;;  %v5831_v28 = vunpack.i.l.bf16 %v5830_v41  ;;  %v969_v5 = vld [vmem:[%s8666_s1 + $0x88] sm:$0xff]  ;;  %v1061_v50 = vmul.f32 %v6821_v57, %v6662_v1 }
 0x2cb   : > { %5699 = vmatpush3.bf16.msra.mxu1 %v5696_v63  ;;  %5705 = vmatprep.subr.bf16.mxu0 %v5704_v45  ;;  %v1054_v63 = vmul.f32 %v6751_v60, %v6671_v49  ;;  %v1031_v60 = vmul.f32 %v6843_v62, %v6639_v19  ;;  %v1001_v9 = vmul.f32 0.35355338, %v969_v5  ;;  %v973_v41 = vld [vmem:[%s8666_s1 + $0xa8] sm:$0xff]  ;;  %v1064_v61 = vmul.f32 %v6849_v2, %v6648_v0 }
 0x2cc   : > { %5701 = vmatprep.subr.bf16.mxu1 %v5700_v12  ;;  %v5712_v11 = vpack.c.bf16 %v5832_v52, %v5831_v28  ;;  %v975_v52 = vld [vmem:[%s8666_s1 + $0xb8] sm:$0xff]  ;;  %v976_v28 = vld [vmem:[%s8666_s1 + $0xc0] sm:$0xff]  ;;  %v981_v5 = vld [vmem:[%s8666_s1 + $0xe8] sm:$0xff] }
 0x2cd   : > { %5306 = vmatmul.mubr.msk.f32.gmra.mrb[6].mxu1 %vm494_vm0, %v1023_v54  ;;  %v1002_v54 = vmul.f32 0.35355338, %v970_v35  ;;  %v1033_v38 = vmul.f32 %v1001_v9, %v6617_v3 }
 0x2ce   : > { %5308 = vmatprep.mubr.msk.f32.mxu1 %vm494_vm0, %v1024_v26  ;;  %v971_v26 = vld [vmem:[%s8666_s1 + $0x98] sm:$0xff] }
 0x2cf   : > { %5703 = vmatpush3.bf16.msra.mxu1 %v5700_v12  ;;  %v1032_v12 = vmul.f32 %v6849_v2, %v6619_v30  ;;  %v1003_v32 = vmul.f32 0.35355338, %v971_v26  ;;  %v1034_v33 = vmul.f32 %v1002_v54, %v6626_v8 }
 0x2d1   : > { %5309 = vmatmul.mubr.msk.f32.gmra.mrb[8].mxu1 %vm494_vm0, %v1025_v42  ;;  %5361 = vmatmul.mubr.msk.f32.vlgmr.msra.gmra.mrb[16].mxu0 %vm494_vm0, %v1049_v39  ;;  %v974_v42 = vld [vmem:[%s8666_s1 + $0xb0] sm:$0xff]  ;;  %v1035_v18 = vmul.f32 %v1003_v32, %v6624_v7  ;;  %v1067_v35 = vmul.f32 %v1003_v32, %v6654_v20 }
 0x2d2   : > { %5311 = vmatprep.mubr.msk.f32.mxu1 %vm494_vm0, %v1026_v10  ;;  %5363 = vmatprep.mubr.msk.f32.mxu0 %vm494_vm0, %v1050_v24  ;;  %v1005_v10 = vmul.f32 0.35355338, %v973_v41  ;;  %v1006_v22 = vmul.f32 0.35355338, %v974_v42 }
 0x2d3   : > { %5707 = vmatpush3.bf16.msra.mxu0 %v5704_v45  ;;  %v1055_v45 = vmul.f32 %v6763_v4, %v6669_v48  ;;  %v972_v4 = vld [vmem:[%s8666_s1 + $0xa0] sm:$0xff] }
 0x2d4   : > { %5709 = vmatprep.subr.bf16.mxu0 %v5708_v27  ;;  %v1004_v39 = vmul.f32 0.35355338, %v972_v4  ;;  %v1037_v43 = vmul.f32 %v1005_v10, %v6632_v13  ;;  %v1038_v29 = vmul.f32 %v1006_v22, %v6641_v16  ;;  %v1070_v26 = vmul.f32 %v1006_v22, %v6671_v49 }
 0x2d5   : > { %5312 = vmatmul.mubr.msk.f32.gmra.mrb[10].mxu1 %vm494_vm0, %v1027_v53  ;;  %5364 = vmatmul.mubr.msk.f32.gmra.mrb[18].mxu0 %vm494_vm0, %v1051_v56  ;;  %v1062_v53 = vmul.f32 %v6827_v59, %v6671_v49  ;;  %v1008_v56 = vmul.f32 0.35355338, %v976_v28  ;;  %v1063_v59 = vmul.f32 %v6843_v62, %v6669_v48 }
 0x2d6   : > { %5314 = vmatprep.mubr.msk.f32.mxu1 %vm494_vm0, %v1028_v17  ;;  %5366 = vmatprep.mubr.msk.f32.mxu0 %vm494_vm0, %v1052_v58  ;;  %v1036_v24 = vmul.f32 %v1004_v39, %v6634_v15  ;;  %v977_v17 = vld [vmem:[%s8666_s1 + $0xc8] sm:$0xff]  ;;  %v978_v58 = vld [vmem:[%s8666_s1 + $0xd0] sm:$0xff] }
 0x2d7   : > { %5711 = vmatpush3.bf16.msra.mxu0 %v5708_v27  ;;  %v1007_v27 = vmul.f32 0.35355338, %v975_v52  ;;  %v1009_v44 = vmul.f32 0.35355338, %v977_v17  ;;  %v1040_v36 = vmul.f32 %v1008_v56, %v6619_v30  ;;  %v1010_v37 = vmul.f32 0.35355338, %v978_v58 }
 0x2d8   : > { %5713 = vmatprep.subr.bf16.mxu0 %v5712_v11 }
 0x2d9   : > { %5315 = vmatmul.mubr.msk.f32.gmra.mrb[12].mxu1 %vm494_vm0, %v1029_v21  ;;  %5367 = vmatmul.mubr.msk.f32.gmra.mrb[20].mxu0 %vm494_vm0, %v1053_v47  ;;  %v1039_v57 = vmul.f32 %v1007_v27, %v6639_v19  ;;  %v980_v21 = vld [vmem:[%s8666_s1 + $0xe0] sm:$0xff]  ;;  %v1041_v30 = vmul.f32 %v1009_v44, %v6617_v3  ;;  %v1065_v47 = vmul.f32 %v1001_v9, %v6646_v55  ;;  %v982_v3 = vld [vmem:[%s8666_s1 + $0xf0] sm:$0xff] }
 0x2da   : > { %5317 = vmatprep.mubr.msk.f32.mxu1 %vm494_vm0, %v1030_v25  ;;  %5369 = vmatprep.mubr.msk.f32.mxu0 %vm494_vm0, %v1054_v63  ;;  %v1042_v25 = vmul.f32 %v1010_v37, %v6626_v8  ;;  %v1066_v63 = vmul.f32 %v1002_v54, %v6656_v40  ;;  %v1012_v2 = vmul.f32 0.35355338, %v980_v21  ;;  %v1014_v9 = vmul.f32 0.35355338, %v982_v3 }
 0x2db   : > { %5715 = vmatpush3.bf16.msra.mxu0 %v5712_v11  ;;  %v979_v11 = vld [vmem:[%s8666_s1 + $0xd8] sm:$0xff] }
 0x2dc   : > { %5717 = vmatprep.subr.bf16.mxu0 %v5716_v6  ;;  %v1011_v62 = vmul.f32 0.35355338, %v979_v11  ;;  %v1046_v54 = vmul.f32 %v1014_v9, %v6641_v16  ;;  %v1073_v16 = vmul.f32 %v1009_v44, %v6646_v55  ;;  %v1076_v32 = vmul.f32 %v1012_v2, %v6664_v46 }
 0x2dd   : > { %5318 = vmatmul.mubr.msk.f32.gmra.mrb[14].mxu1 %vm494_vm0, %v1031_v60  ;;  %5370 = vmatmul.mubr.msk.f32.gmra.mrb[22].mxu0 %vm494_vm0, %v1055_v45  ;;  %v1044_v60 = vmul.f32 %v1012_v2, %v6634_v15  ;;  %v1068_v45 = vmul.f32 %v1004_v39, %v6664_v46 }
 0x2de   : > { %5320 = vmatprep.mubr.msk.f32.mxu1 %vm494_vm0, %v1032_v12  ;;  %5372 = vmatprep.mubr.msk.f32.mxu0 %vm494_vm0, %v1056_v14  ;;  %v1043_v8 = vmul.f32 %v1011_v62, %v6624_v7  ;;  %v983_v12 = vld [vmem:[%s8666_s1 + $0xf8] sm:$0xff]  ;;  %v1069_v14 = vmul.f32 %v1005_v10, %v6662_v1 }
 0x2df   : > { %5719 = vmatpush3.bf16.msra.mxu0 %v5716_v6  ;;  %v1013_v6 = vmul.f32 0.35355338, %v981_v5  ;;  %v1015_v15 = vmul.f32 0.35355338, %v983_v12 }
 0x2e1   : > { %5321 = vmatmul.mubr.msk.f32.gmra.mrb[16].mxu1 %vm494_vm0, %v1033_v38  ;;  %5373 = vmatmul.mubr.msk.f32.gmra.mrb[24].mxu0 %vm494_vm0, %v1057_v23  ;;  %v1045_v7 = vmul.f32 %v1013_v6, %v6632_v13  ;;  %v1047_v4 = vmul.f32 %v1015_v15, %v6639_v19  ;;  %v1071_v38 = vmul.f32 %v1007_v27, %v6669_v48 }
 0x2e2   : > { %5323 = vmatprep.mubr.msk.f32.mxu1 %vm494_vm0, %v1034_v33  ;;  %5375 = vmatprep.mubr.msk.f32.mxu0 %vm494_vm0, %v1058_v34  ;;  %v1072_v13 = vmul.f32 %v1008_v56, %v6648_v0  ;;  %v1074_v23 = vmul.f32 %v1010_v37, %v6656_v40  ;;  %v1075_v19 = vmul.f32 %v1011_v62, %v6654_v20 }
 0x2e3   : > { %v1077_v0 = vmul.f32 %v1013_v6, %v6662_v1  ;;  %v1078_v33 = vmul.f32 %v1014_v9, %v6671_v49  ;;  %v1079_v55 = vmul.f32 %v1015_v15, %v6669_v48 }
 0x2e5   : > { %5324 = vmatmul.mubr.msk.f32.gmra.mrb[18].mxu1 %vm494_vm0, %v1035_v18  ;;  %5376 = vmatmul.mubr.msk.f32.gmra.mrb[26].mxu0 %vm494_vm0, %v1059_v31 }
 0x2e6   : > { %5326 = vmatprep.mubr.msk.f32.mxu1 %vm494_vm0, %v1036_v24  ;;  %5378 = vmatprep.mubr.msk.f32.mxu0 %vm494_vm0, %v1060_v51 }
 0x2e9   : > { %5327 = vmatmul.mubr.msk.f32.gmra.mrb[20].mxu1 %vm494_vm0, %v1037_v43  ;;  %5379 = vmatmul.mubr.msk.f32.gmra.mrb[28].mxu0 %vm494_vm0, %v1061_v50 }
 0x2ea   : > { %5329 = vmatprep.mubr.msk.f32.mxu1 %vm494_vm0, %v1038_v29  ;;  %5381 = vmatprep.mubr.msk.f32.mxu0 %vm494_vm0, %v1062_v53 }
 0x2ed   : > { %5330 = vmatmul.mubr.msk.f32.gmra.mrb[22].mxu1 %vm494_vm0, %v1039_v57  ;;  %5382 = vmatmul.mubr.msk.f32.gmra.mrb[30].mxu0 %vm494_vm0, %v1063_v59 }
 0x2ee   : > { %5332 = vmatprep.mubr.msk.f32.mxu1 %vm494_vm0, %v1040_v36  ;;  %5384 = vmatprep.mubr.msk.f32.mxu0 %vm494_vm0, %v1064_v61 }
 0x2f1   : > { %5333 = vmatmul.mubr.msk.f32.gmra.mrb[24].mxu1 %vm494_vm0, %v1041_v30  ;;  %5385 = vmatmul.mubr.msk.f32.gmra.mrb[32].mxu0 %vm494_vm0, %v1065_v47 }
 0x2f2   : > { %5335 = vmatprep.mubr.msk.f32.mxu1 %vm494_vm0, %v1042_v25  ;;  %5387 = vmatprep.mubr.msk.f32.mxu0 %vm494_vm0, %v1066_v63 }
 0x2f5   : > { %5336 = vmatmul.mubr.msk.f32.gmra.mrb[26].mxu1 %vm494_vm0, %v1043_v8  ;;  %5388 = vmatmul.mubr.msk.f32.gmra.mrb[34].mxu0 %vm494_vm0, %v1067_v35 }
 0x2f6   : > { %5338 = vmatprep.mubr.msk.f32.mxu1 %vm494_vm0, %v1044_v60  ;;  %5390 = vmatprep.mubr.msk.f32.mxu0 %vm494_vm0, %v1068_v45 }
 0x2f9   : > { %5339 = vmatmul.mubr.msk.f32.gmra.mrb[28].mxu1 %vm494_vm0, %v1045_v7  ;;  %5391 = vmatmul.mubr.msk.f32.gmra.mrb[36].mxu0 %vm494_vm0, %v1069_v14 }
 0x2fa   : > { %5341 = vmatprep.mubr.msk.f32.mxu1 %vm494_vm0, %v1046_v54  ;;  %5393 = vmatprep.mubr.msk.f32.mxu0 %vm494_vm0, %v1070_v26 }
 0x2fd   : > { %5342 = vmatmul.mubr.msk.f32.gmra.mrb[30].mxu1 %vm494_vm0, %v1047_v4  ;;  %5394 = vmatmul.mubr.msk.f32.gmra.mrb[38].mxu0 %vm494_vm0, %v1071_v38 }
 0x2fe   : > { %5396 = vmatprep.mubr.msk.f32.mxu0 %vm494_vm0, %v1072_v13 }
 0x301   : > { %5397 = vmatmul.mubr.msk.f32.gmra.mrb[40].mxu0 %vm494_vm0, %v1073_v16 }
 0x302   : > { %5399 = vmatprep.mubr.msk.f32.mxu0 %vm494_vm0, %v1074_v23 }
 0x305   : > { %5400 = vmatmul.mubr.msk.f32.gmra.mrb[42].mxu0 %vm494_vm0, %v1075_v19 }
 0x306   : > { %5402 = vmatprep.mubr.msk.f32.mxu0 %vm494_vm0, %v1076_v32 }
 0x309   : > { %5403 = vmatmul.mubr.msk.f32.gmra.mrb[44].mxu0 %vm494_vm0, %v1077_v0 }
 0x30a   : > { %5405 = vmatprep.mubr.msk.f32.mxu0 %vm494_vm0, %v1078_v33 }
 0x30d   : > { %5406 = vmatmul.mubr.msk.f32.gmra.mrb[46].mxu0 %vm494_vm0, %v1079_v55 }
 0x394   : > { %v6996_v20 = vpop.f32.mrb[0].mxu1 }
 0x395   : > { %v6998_v40 = vpop.f32.mrb[1].mxu1  ;;  %v1806_v46 = vsel %vm1802_vm2, %v6996_v20, -inf }
 0x396   : > { %1807 = vmax.xlane.f32.xlu1 %v1806_v46  ;;  %v1803_v1 = vsel %vm1802_vm2, %v6998_v40, -inf }
 0x397   : > { %1804 = vmax.xlane.f32.xlu0 %v1803_v1 }
 0x398   : > { %v7004_v49 = vpop.f32.mrb[2].mxu1 }
 0x399   : > { %v7006_v34 = vpop.f32.mrb[3].mxu1  ;;  %v1812_v48 = vsel %vm1802_vm2, %v7004_v49, -inf }
 0x39a   : > { %v1809_v18 = vsel %vm1802_vm2, %v7006_v34, -inf }
 0x39b   : > { %1813 = vmax.xlane.f32.xlu0 %v1812_v48 }
 0x39c   : > { %v7010_v39 = vpop.f32.mrb[4].mxu1 }
 0x39d   : > { %v7012_v41 = vpop.f32.mrb[5].mxu1  ;;  %v1818_v42 = vsel %vm1802_vm2, %v7010_v39, -inf }
 0x39e   : > { %1819 = vmax.xlane.f32.xlu1 %v1818_v42  ;;  %v1815_v24 = vsel %vm1802_vm2, %v7012_v41, -inf }
 0x39f   : > { %1810 = vmax.xlane.f32.xlu0 %v1809_v18 }
 0x3a0   : > { %v7018_v31 = vpop.f32.mrb[6].mxu1 }
 0x3a1   : > { %v7020_v10 = vpop.f32.mrb[7].mxu1  ;;  %v1824_v50 = vsel %vm1802_vm2, %v7018_v31, -inf }
 0x3a2   : > { %v1821_v17 = vsel %vm1802_vm2, %v7020_v10, -inf }
 0x3a3   : > { %1816 = vmax.xlane.f32.xlu0 %v1815_v24 }
 0x3a4   : > { %v7024_v51 = vpop.f32.mrb[8].mxu1  ;;  %v7026_v22 = vpop.f32.mrb[16].mxu0 }
 0x3a5   : > { %v7028_v52 = vpop.f32.mrb[9].mxu1  ;;  %v7030_v28 = vpop.f32.mrb[17].mxu0  ;;  %v1830_v43 = vsel %vm1802_vm2, %v7024_v51, -inf  ;;  %v1902_v61 = vsel %vm1802_vm2, %v7026_v22, -inf }
 0x3a6   : > { %1831 = vmax.xlane.f32.xlu1 %v1830_v43  ;;  %v1827_v62 = vsel %vm1802_vm2, %v7028_v52, -inf  ;;  %v1899_v8 = vsel %vm1802_vm2, %v7030_v28, -inf }
 0x3a7   : > { %1825 = vmax.xlane.f32.xlu0 %v1824_v50 }
 0x3a8   : > { %v7036_v27 = vpop.f32.mrb[10].mxu1  ;;  %v7038_v29 = vpop.f32.mrb[18].mxu0 }
 0x3a9   : > { %v7040_v53 = vpop.f32.mrb[11].mxu1  ;;  %v7042_v56 = vpop.f32.mrb[19].mxu0  ;;  %v1836_v12 = vsel %vm1802_vm2, %v7036_v27, -inf  ;;  %v1908_v4 = vsel %vm1802_vm2, %v7038_v29, -inf }
 0x3aa   : > { %v1833_v58 = vsel %vm1802_vm2, %v7040_v53, -inf  ;;  %v1905_v37 = vsel %vm1802_vm2, %v7042_v56, -inf }
 0x3ab   : > { %1822 = vmax.xlane.f32.xlu0 %v1821_v17  ;;  %1834 = vmax.xlane.f32.xlu1 %v1833_v58 }
 0x3ac   : > { %v7048_v57 = vpop.f32.mrb[12].mxu1  ;;  %v7050_v59 = vpop.f32.mrb[20].mxu0 }
 0x3ad   : > { %v7052_v44 = vpop.f32.mrb[13].mxu1  ;;  %v7054_v36 = vpop.f32.mrb[21].mxu0  ;;  %v1914_v25 = vsel %vm1802_vm2, %v7050_v59, -inf  ;;  %v1842_v32 = vsel %vm1802_vm2, %v7048_v57, -inf }
 0x3ae   : > { %v1911_v35 = vsel %vm1802_vm2, %v7054_v36, -inf  ;;  %v1839_v48 = vsel %vm1802_vm2, %v7052_v44, -inf }
 0x3af   : > { %1903 = vmax.xlane.f32.xlu0 %v1902_v61  ;;  %1906 = vmax.xlane.f32.xlu1 %v1905_v37 }
 0x3b0   : > { %v7060_v11 = vpop.f32.mrb[14].mxu1  ;;  %v7062_v21 = vpop.f32.mrb[22].mxu0 }
 0x3b1   : > { %v7064_v30 = vpop.f32.mrb[15].mxu1  ;;  %v7066_v47 = vpop.f32.mrb[23].mxu0  ;;  %v1848_v17 = vsel %vm1802_vm2, %v7060_v11, -inf }
 0x3b2   : > { %v1845_v7 = vsel %vm1802_vm2, %v7064_v30, -inf  ;;  %v1917_v38 = vsel %vm1802_vm2, %v7066_v47, -inf }
 0x3b3   : > { %1828 = vmax.xlane.f32.xlu0 %v1827_v62  ;;  %1915 = vmax.xlane.f32.xlu1 %v1914_v25 }
 0x3b4   : > { %v7072_v63 = vpop.f32.mrb[16].mxu1  ;;  %v7074_v2 = vpop.f32.mrb[24].mxu0 }
 0x3b5   : > { %v7076_v5 = vpop.f32.mrb[17].mxu1  ;;  %v7078_v3 = vpop.f32.mrb[25].mxu0  ;;  %v1926_v0 = vsel %vm1802_vm2, %v7074_v2, -inf }
 0x3b6   : > { %8701 = vst [vmem:[#allocation2_spill] sm:$0xff] %v7076_v5  ;;  %v1923_v42 = vsel %vm1802_vm2, %v7078_v3, -inf }
 0x3b7   : > { %1900 = vmax.xlane.f32.xlu0 %v1899_v8  ;;  %1912 = vmax.xlane.f32.xlu1 %v1911_v35  ;;  %v1920_v8 = vsel %vm1802_vm2, %v7062_v21, -inf }
 0x3b8   : > { %v7084_v6 = vpop.f32.mrb[18].mxu1  ;;  %v7086_v60 = vpop.f32.mrb[26].mxu0 }
 0x3b9   : > { %8702 = vst [vmem:[#allocation3_spill] sm:$0xff] %v7084_v6  ;;  %v7088_v45 = vpop.f32.mrb[19].mxu1  ;;  %v7090_v9 = vpop.f32.mrb[27].mxu0 }
 0x3ba   : > { %v1857_v58 = vsel %vm1802_vm2, %v7088_v45, -inf  ;;  %v1929_v35 = vsel %vm1802_vm2, %v7090_v9, -inf }
 0x3bb   : > { %1837 = vmax.xlane.f32.xlu0 %v1836_v12  ;;  %1846 = vmax.xlane.f32.xlu1 %v1845_v7 }
 0x3bc   : > { %v7096_v14 = vpop.f32.mrb[20].mxu1  ;;  %v7098_v15 = vpop.f32.mrb[28].mxu0 }
 0x3bd   : > { %8703 = vst [vmem:[#allocation4_spill] sm:$0xff] %v7098_v15  ;;  %v7100_v54 = vpop.f32.mrb[21].mxu1  ;;  %v7102_v26 = vpop.f32.mrb[29].mxu0 }
 0x3be   : > { %8704 = vst [vmem:[#allocation5_spill] sm:$0xff] %v7102_v26 }
 0x3bf   : > { %1909 = vmax.xlane.f32.xlu0 %v1908_v4  ;;  %1918 = vmax.xlane.f32.xlu1 %v1917_v38 }
 0x3c0   : > { %v7108_v13 = vpop.f32.mrb[22].mxu1  ;;  %v7110_v16 = vpop.f32.mrb[30].mxu0 }
 0x3c1   : > { %8705 = vst [vmem:[#allocation6_spill] sm:$0xff] %v7108_v13  ;;  %8706 = vst [vmem:[#allocation7_spill] sm:$0xff] %v7110_v16  ;;  %v7112_v23 = vpop.f32.mrb[23].mxu1  ;;  %v7114_v19 = vpop.f32.mrb[31].mxu0 }
 0x3c3   : > { %1843 = vmax.xlane.f32.xlu0 %v1842_v32  ;;  %1927 = vmax.xlane.f32.xlu1 %v1926_v0  ;;  %v1854_v32 = vsel %vm1802_vm2, %v7072_v63, -inf  ;;  %v1938_v0 = vsel %vm1802_vm2, %v7098_v15, -inf }
 0x3c4   : > { %v7120_v33 = vpop.f32.mrb[24].mxu1  ;;  %v7122_v55 = vpop.f32.mrb[32].mxu0 }
 0x3c5   : > { %v7124_v46 = vpop.f32.mrb[25].mxu1  ;;  %v7126_v1 = vpop.f32.mrb[33].mxu0 }
 0x3c7   : > { %1840 = vmax.xlane.f32.xlu0 %v1839_v48  ;;  %1924 = vmax.xlane.f32.xlu1 %v1923_v42 }
 0x3c8   : > { %v7132_v18 = vpop.f32.mrb[26].mxu1  ;;  %v7134_v24 = vpop.f32.mrb[34].mxu0 }
 0x3c9   : > { %v7136_v43 = vpop.f32.mrb[27].mxu1  ;;  %v7138_v50 = vpop.f32.mrb[35].mxu0 }
 0x3cb   : > { %1849 = vmax.xlane.f32.xlu0 %v1848_v17  ;;  %1858 = vmax.xlane.f32.xlu1 %v1857_v58  ;;  %v1851_v17 = vsel %vm1802_vm2, %v7076_v5, -inf  ;;  %v1935_v58 = vsel %vm1802_vm2, %v7102_v26, -inf }
 0x3cc   : > { %v7144_v61 = vpop.f32.mrb[28].mxu1  ;;  %v7146_v37 = vpop.f32.mrb[36].mxu0 }
 0x3cd   : > { %v7148_v62 = vpop.f32.mrb[29].mxu1  ;;  %v7150_v25 = vpop.f32.mrb[37].mxu0 }
 0x3cf   : > { %1921 = vmax.xlane.f32.xlu0 %v1920_v8  ;;  %1930 = vmax.xlane.f32.xlu1 %v1929_v35 }
 0x3d0   : > { %v7156_v12 = vpop.f32.mrb[30].mxu1  ;;  %v7158_v7 = vpop.f32.mrb[38].mxu0 }
 0x3d1   : > { %v7160_v4 = vpop.f32.mrb[31].mxu1  ;;  %v7162_v38 = vpop.f32.mrb[39].mxu0 }
 0x3d3   : > { %1855 = vmax.xlane.f32.xlu0 %v1854_v32  ;;  %1939 = vmax.xlane.f32.xlu1 %v1938_v0  ;;  %v1860_v32 = vsel %vm1802_vm2, %v7084_v6, -inf  ;;  %v1872_v0 = vsel %vm1802_vm2, %v7108_v13, -inf  ;;  %v1863_v13 = vsel %vm1802_vm2, %v7100_v54, -inf }
 0x3d4   : > { %v7168_v48 = vpop.f32.mrb[40].mxu0 }
 0x3d5   : > { %8707 = vst [vmem:[#allocation8_spill] sm:$0xff] %v7168_v48  ;;  %v7170_v42 = vpop.f32.mrb[41].mxu0 }
 0x3d6   : > { %8708 = vst [vmem:[#allocation9_spill] sm:$0xff] %v7170_v42 }
 0x3d7   : > { %1852 = vmax.xlane.f32.xlu0 %v1851_v17  ;;  %1936 = vmax.xlane.f32.xlu1 %v1935_v58  ;;  %v1932_v17 = vsel %vm1802_vm2, %v7086_v60, -inf  ;;  %v1944_v58 = vsel %vm1802_vm2, %v7110_v16, -inf  ;;  %v1941_v16 = vsel %vm1802_vm2, %v7114_v19, -inf }
 0x3d8   : > { %v7176_v8 = vpop.f32.mrb[42].mxu0 }
 0x3d9   : > { %8709 = vst [vmem:[#allocation10_spill] sm:$0xff] %v7176_v8  ;;  %v7178_v35 = vpop.f32.mrb[43].mxu0 }
 0x3da   : > { %8710 = vst [vmem:[#allocation11_spill] sm:$0xff] %v7178_v35 }
 0x3db   : > { %1861 = vmax.xlane.f32.xlu0 %v1860_v32  ;;  %1873 = vmax.xlane.f32.xlu1 %v1872_v0  ;;  %v1866_v32 = vsel %vm1802_vm2, %v7096_v14, -inf  ;;  %v1869_v0 = vsel %vm1802_vm2, %v7112_v23, -inf }
 0x3dc   : > { %v7184_v15 = vpop.f32.mrb[44].mxu0 }
 0x3dd   : > { %8711 = vst [vmem:[#allocation12_spill] sm:$0xff] %v7184_v15  ;;  %v7186_v5 = vpop.f32.mrb[45].mxu0 }
 0x3de   : > { %8712 = vst [vmem:[#allocation13_spill] sm:$0xff] %v7186_v5 }
 0x3df   : > { %1933 = vmax.xlane.f32.xlu0 %v1932_v17  ;;  %1945 = vmax.xlane.f32.xlu1 %v1944_v58  ;;  %v1950_v17 = vsel %vm1802_vm2, %v7122_v55, -inf  ;;  %v1878_v58 = vsel %vm1802_vm2, %v7120_v33, -inf }
 0x3e0   : > { %v7192_v26 = vpop.f32.mrb[46].mxu0 }
 0x3e1   : > { %8713 = vst [vmem:[#allocation14_spill] sm:$0xff] %v7192_v26  ;;  %v7194_v6 = vpop.f32.mrb[47].mxu0 }
 0x3e2   : > { %8714 = vst [vmem:[#allocation15_spill] sm:$0xff] %v7194_v6 }
 0x3e3   : > { %1867 = vmax.xlane.f32.xlu0 %v1866_v32  ;;  %1870 = vmax.xlane.f32.xlu1 %v1869_v0  ;;  %v1947_v32 = vsel %vm1802_vm2, %v7126_v1, -inf  ;;  %v1875_v0 = vsel %vm1802_vm2, %v7124_v46, -inf }
 0x3e7   : > { %1864 = vmax.xlane.f32.xlu0 %v1863_v13  ;;  %1942 = vmax.xlane.f32.xlu1 %v1941_v16  ;;  %v1956_v13 = vsel %vm1802_vm2, %v7134_v24, -inf  ;;  %v1884_v16 = vsel %vm1802_vm2, %v7132_v18, -inf }
 0x3eb   : > { %1951 = vmax.xlane.f32.xlu1 %v1950_v17  ;;  %1879 = vmax.xlane.f32.xlu0 %v1878_v58  ;;  %v1953_v17 = vsel %vm1802_vm2, %v7138_v50, -inf  ;;  %v1881_v58 = vsel %vm1802_vm2, %v7136_v43, -inf }
 0x3ef   : > { %1948 = vmax.xlane.f32.xlu1 %v1947_v32  ;;  %1876 = vmax.xlane.f32.xlu0 %v1875_v0  ;;  %v1962_v32 = vsel %vm1802_vm2, %v7146_v37, -inf  ;;  %v1890_v0 = vsel %vm1802_vm2, %v7144_v61, -inf }
 0x3f3   : > { %1957 = vmax.xlane.f32.xlu1 %v1956_v13  ;;  %1885 = vmax.xlane.f32.xlu0 %v1884_v16  ;;  %v1959_v13 = vsel %vm1802_vm2, %v7150_v25, -inf  ;;  %v1887_v16 = vsel %vm1802_vm2, %v7148_v62, -inf }
 0x3f7   : > { %1954 = vmax.xlane.f32.xlu1 %v1953_v17  ;;  %1882 = vmax.xlane.f32.xlu0 %v1881_v58  ;;  %v1965_v17 = vsel %vm1802_vm2, %v7162_v38, -inf  ;;  %v1896_v58 = vsel %vm1802_vm2, %v7156_v12, -inf }
 0x3fb   : > { %1963 = vmax.xlane.f32.xlu1 %v1962_v32  ;;  %1891 = vmax.xlane.f32.xlu0 %v1890_v0  ;;  %v1968_v32 = vsel %vm1802_vm2, %v7158_v7, -inf  ;;  %v1893_v0 = vsel %vm1802_vm2, %v7160_v4, -inf }
 0x3ff   : > { %1960 = vmax.xlane.f32.xlu1 %v1959_v13  ;;  %1888 = vmax.xlane.f32.xlu0 %v1887_v16  ;;  %v1974_v13 = vsel %vm1802_vm2, %v7168_v48, -inf  ;;  %v1971_v16 = vsel %vm1802_vm2, %v7170_v42, -inf }
 0x403   : > { %1966 = vmax.xlane.f32.xlu1 %v1965_v17  ;;  %1897 = vmax.xlane.f32.xlu0 %v1896_v58  ;;  %v1980_v17 = vsel %vm1802_vm2, %v7176_v8, -inf  ;;  %v1977_v58 = vsel %vm1802_vm2, %v7178_v35, -inf }
 0x407   : > { %1969 = vmax.xlane.f32.xlu1 %v1968_v32  ;;  %1894 = vmax.xlane.f32.xlu0 %v1893_v0  ;;  %v1986_v32 = vsel %vm1802_vm2, %v7184_v15, -inf  ;;  %v1983_v0 = vsel %vm1802_vm2, %v7186_v5, -inf }
 0x40b   : > { %1975 = vmax.xlane.f32.xlu1 %v1974_v13  ;;  %1972 = vmax.xlane.f32.xlu0 %v1971_v16  ;;  %v1992_v13 = vsel %vm1802_vm2, %v7192_v26, -inf  ;;  %v1989_v16 = vsel %vm1802_vm2, %v7194_v6, -inf }
 0x40f   : > { %1981 = vmax.xlane.f32.xlu1 %v1980_v17  ;;  %1978 = vmax.xlane.f32.xlu0 %v1977_v58 }
 0x413   : > { %1987 = vmax.xlane.f32.xlu1 %v1986_v32  ;;  %1984 = vmax.xlane.f32.xlu0 %v1983_v0 }
 0x417   : > { %1993 = vmax.xlane.f32.xlu1 %v1992_v13  ;;  %1990 = vmax.xlane.f32.xlu0 %v1989_v16 }
 0x423   : > { %v1808_v8 = vpop.xlane.xlu1 %1807 }
 0x424   : > { %v1996_v17 = vsub.f32 %v6996_v20, %v1808_v8  ;;  %v1805_v58 = vpop.xlane.xlu0 %1804 }
 0x425   : > { %v1995_v35 = vsub.f32 %v6998_v40, %v1805_v58 }
 0x426   : > { %v2061_v15 = vmul.f32 1.442695, %v1996_v17 }
 0x427   : > { %v2059_v42 = vmul.f32 1.442695, %v1995_v35 }
 0x428   : > { %5870 = vpow2.f32 %v2061_v15  ;;  %v1814_v5 = vpop.xlane.xlu0 %1813 }
 0x429   : > { %5872 = vpow2.f32 %v2059_v42  ;;  %v1998_v32 = vsub.f32 %v7004_v49, %v1814_v5 }
 0x42b   : > { %v2065_v0 = vmul.f32 1.442695, %v1998_v32  ;;  %v1820_v26 = vpop.xlane.xlu1 %1819 }
 0x42c   : > { %v2000_v48 = vsub.f32 %v7010_v39, %v1820_v26  ;;  %v1811_v6 = vpop.xlane.xlu0 %1810 }
 0x42d   : > { %5874 = vpow2.f32 %v2065_v0  ;;  %v1997_v13 = vsub.f32 %v7006_v34, %v1811_v6 }
 0x42e   : > { %v2069_v16 = vmul.f32 1.442695, %v2000_v48 }
 0x42f   : > { %v2063_v20 = vmul.f32 1.442695, %v1997_v13 }
 0x430   : > { %5876 = vpow2.f32 %v2069_v16  ;;  %v1817_v8 = vpop.xlane.xlu0 %1816 }
 0x431   : > { %5878 = vpow2.f32 %v2063_v20  ;;  %v1999_v40 = vsub.f32 %v7012_v41, %v1817_v8 }
 0x432   : > { %v5871_v15 = vpop.eup %5870 }
 0x433   : > { %v5873_v35 = vpop.eup %5872  ;;  %v2067_v42 = vmul.f32 1.442695, %v1999_v40  ;;  %v1832_v17 = vpop.xlane.xlu1 %1831  ;;  %v2190_v49 = vsel %vm1802_vm2, %v5871_v15, 0.0 }
 0x434   : > { %v2004_v5 = vsub.f32 %v7024_v51, %v1832_v17  ;;  %5424 = vmatprep.mubr.msk.f32.mxu1 %vm1802_vm2, %v5873_v35  ;;  %v1826_v39 = vpop.xlane.xlu0 %1825  ;;  %2191 = vadd.xlane.f32.xlu0 %v2190_v49  ;;  %v2187_v48 = vsel %vm1802_vm2, %v5873_v35, 0.0 }
 0x435   : > { %5880 = vpow2.f32 %v2067_v42  ;;  %v2002_v34 = vsub.f32 %v7018_v31, %v1826_v39  ;;  %5425 = vmatmul.mubr.msk.f32.vlgmr.msra.gmra.mrb[32].mxu1 %vm1802_vm2, %v5871_v15 }
 0x436   : > { %v2077_v26 = vmul.f32 1.442695, %v2004_v5 }
 0x437   : > { %v5875_v6 = vpop.eup %5874  ;;  %v2073_v41 = vmul.f32 1.442695, %v2002_v34 }
 0x438   : > { %v1823_v58 = vpop.xlane.xlu0 %1822  ;;  %v1835_v32 = vpop.xlane.xlu1 %1834  ;;  %2188 = vadd.xlane.f32.xlu0 %v2187_v48  ;;  %v2196_v0 = vsel %vm1802_vm2, %v5875_v6, 0.0 }
 0x439   : > { %5882 = vpow2.f32 %v2073_v41  ;;  %v2001_v51 = vsub.f32 %v7020_v10, %v1823_v58  ;;  %2197 = vadd.xlane.f32.xlu1 %v2196_v0  ;;  %v2005_v42 = vsub.f32 %v7040_v53, %v1835_v32 }
 0x43a   : > { %v5877_v13 = vpop.eup %5876  ;;  %5884 = vpow2.f32 %v2077_v26 }
 0x43b   : > { %v5879_v16 = vpop.eup %5878  ;;  %v2071_v31 = vmul.f32 1.442695, %v2001_v51  ;;  %v2202_v20 = vsel %vm1802_vm2, %v5877_v13, 0.0 }
 0x43c   : > { %5427 = vmatprep.mubr.msk.f32.mxu1 %vm1802_vm2, %v5879_v16  ;;  %v1904_v8 = vpop.xlane.xlu0 %1903  ;;  %v1907_v40 = vpop.xlane.xlu1 %1906  ;;  %v2193_v15 = vsel %vm1802_vm2, %v5879_v16, 0.0 }
 0x43d   : > { %5886 = vpow2.f32 %v2071_v31  ;;  %v2028_v35 = vsub.f32 %v7026_v22, %v1904_v8  ;;  %5428 = vmatmul.mubr.msk.f32.gmra.mrb[34].mxu1 %vm1802_vm2, %v5875_v6  ;;  %2203 = vadd.xlane.f32.xlu1 %v2202_v20  ;;  %v2079_v6 = vmul.f32 1.442695, %v2005_v42  ;;  %v2029_v26 = vsub.f32 %v7042_v56, %v1907_v40 }
 0x43e   : > { %2194 = vadd.xlane.f32.xlu0 %v2193_v15 }
 0x43f   : > { %v5881_v10 = vpop.eup %5880  ;;  %v2125_v17 = vmul.f32 1.442695, %v2028_v35 }
 0x440   : > { %5430 = vmatprep.mubr.msk.f32.mxu1 %vm1802_vm2, %v5881_v10  ;;  %v1829_v49 = vpop.xlane.xlu0 %1828  ;;  %v1916_v5 = vpop.xlane.xlu1 %1915  ;;  %v2199_v39 = vsel %vm1802_vm2, %v5881_v10, 0.0 }
 0x441   : > { %5888 = vpow2.f32 %v2125_v17  ;;  %v2003_v34 = vsub.f32 %v7028_v52, %v1829_v49  ;;  %5431 = vmatmul.mubr.msk.f32.gmra.mrb[36].mxu1 %vm1802_vm2, %v5877_v13  ;;  %v2127_v52 = vmul.f32 1.442695, %v2029_v26  ;;  %v2032_v35 = vsub.f32 %v7050_v59, %v1916_v5 }
 0x442   : > { %2200 = vadd.xlane.f32.xlu0 %v2199_v39 }
 0x443   : > { %v5883_v22 = vpop.eup %5882  ;;  %v2075_v41 = vmul.f32 1.442695, %v2003_v34 }
 0x444   : > { %v1901_v48 = vpop.xlane.xlu0 %1900  ;;  %v1913_v53 = vpop.xlane.xlu1 %1912  ;;  %v2208_v58 = vsel %vm1802_vm2, %v5883_v22, 0.0 }
 0x445   : > { %v5885_v32 = vpop.eup %5884  ;;  %5890 = vpow2.f32 %v2075_v41  ;;  %v2027_v0 = vsub.f32 %v7030_v28, %v1901_v48  ;;  %2209 = vadd.xlane.f32.xlu1 %v2208_v58  ;;  %v2031_v28 = vsub.f32 %v7054_v36, %v1913_v53  ;;  %v2133_v36 = vmul.f32 1.442695, %v2032_v35 }
 0x446   : > { %5892 = vpow2.f32 %v2079_v6  ;;  %v2214_v56 = vsel %vm1802_vm2, %v5885_v32, 0.0 }
 0x447   : > { %v5887_v51 = vpop.eup %5886  ;;  %v2123_v16 = vmul.f32 1.442695, %v2027_v0  ;;  %v2131_v39 = vmul.f32 1.442695, %v2031_v28 }
 0x448   : > { %5433 = vmatprep.mubr.msk.f32.mxu1 %vm1802_vm2, %v5887_v51  ;;  %v1838_v13 = vpop.xlane.xlu0 %1837  ;;  %v1847_v31 = vpop.xlane.xlu1 %1846  ;;  %v2205_v20 = vsel %vm1802_vm2, %v5887_v51, 0.0 }
 0x449   : > { %5894 = vpow2.f32 %v2123_v16  ;;  %v2006_v8 = vsub.f32 %v7036_v27, %v1838_v13  ;;  %5434 = vmatmul.mubr.msk.f32.gmra.mrb[38].mxu1 %vm1802_vm2, %v5883_v22  ;;  %2215 = vadd.xlane.f32.xlu1 %v2214_v56  ;;  %v2009_v48 = vsub.f32 %v7064_v30, %v1847_v31 }
 0x44a   : > { %2206 = vadd.xlane.f32.xlu0 %v2205_v20  ;;  %5896 = vpow2.f32 %v2127_v52 }
 0x44b   : > { %v5889_v40 = vpop.eup %5888  ;;  %v2081_v15 = vmul.f32 1.442695, %v2006_v8  ;;  %v2087_v30 = vmul.f32 1.442695, %v2009_v48 }
 0x44c   : > { %v1910_v10 = vpop.xlane.xlu0 %1909  ;;  %v1919_v42 = vpop.xlane.xlu1 %1918  ;;  %v2286_v17 = vsel %vm1802_vm2, %v5889_v40, 0.0 }
 0x44d   : > { %5898 = vpow2.f32 %v2081_v15  ;;  %v2030_v49 = vsub.f32 %v7038_v29, %v1910_v10  ;;  %v2033_v27 = vsub.f32 %v7066_v47, %v1919_v42 }
 0x44e   : > { %2287 = vadd.xlane.f32.xlu0 %v2286_v17 }
 0x44f   : > { %v5891_v34 = vpop.eup %5890  ;;  %v2129_v22 = vmul.f32 1.442695, %v2030_v49  ;;  %v2135_v29 = vmul.f32 1.442695, %v2033_v27 }
 0x450   : > { %5436 = vmatprep.mubr.msk.f32.mxu1 %vm1802_vm2, %v5891_v34  ;;  %v1844_v6 = vpop.xlane.xlu0 %1843  ;;  %v1928_v26 = vpop.xlane.xlu1 %1927  ;;  %v2211_v59 = vsel %vm1802_vm2, %v5891_v34, 0.0 }
 0x451   : > { %v5893_v5 = vpop.eup %5892  ;;  %5900 = vpow2.f32 %v2129_v22  ;;  %v2008_v41 = vsub.f32 %v7048_v57, %v1844_v6  ;;  %5437 = vmatmul.mubr.msk.f32.gmra.mrb[40].mxu1 %vm1802_vm2, %v5885_v32  ;;  %2212 = vadd.xlane.f32.xlu1 %v2211_v59  ;;  %v2036_v42 = vsub.f32 %v7074_v2, %v1928_v26 }
 0x452   : > { %5902 = vpow2.f32 %v2131_v39  ;;  %5439 = vmatprep.mubr.msk.f32.mxu1 %vm1802_vm2, %v5893_v5 }
 0x453   : > { %v5895_v47 = vpop.eup %5894  ;;  %v2085_v53 = vmul.f32 1.442695, %v2008_v41  ;;  %5904 = vpow2.f32 %v2133_v36  ;;  %v2141_v26 = vmul.f32 1.442695, %v2036_v42  ;;  %v8718_v42 = vld [vmem:[#allocation4_spill] sm:$0xff] }
 0x454   : > { %5488 = vmatprep.mubr.msk.f32.mxu0 %vm1802_vm2, %v5895_v47  ;;  %v1841_v58 = vpop.xlane.xlu0 %1840  ;;  %v1925_v0 = vpop.xlane.xlu1 %1924  ;;  %v2283_v51 = vsel %vm1802_vm2, %v5895_v47, 0.0 }
 0x455   : > { %v5897_v52 = vpop.eup %5896  ;;  %5906 = vpow2.f32 %v2085_v53  ;;  %v2007_v57 = vsub.f32 %v7052_v44, %v1841_v58  ;;  %5489 = vmatmul.mubr.msk.f32.vlgmr.msra.gmra.mrb[48].mxu0 %vm1802_vm2, %v5889_v40  ;;  %2284 = vadd.xlane.f32.xlu1 %v2283_v51  ;;  %v2035_v44 = vsub.f32 %v7078_v3, %v1925_v0  ;;  %v8715_v0 = vld [vmem:[#allocation2_spill] sm:$0xff] }
 0x456   : > { %5908 = vpow2.f32 %v2135_v29  ;;  %5491 = vmatprep.mubr.msk.f32.mxu0 %vm1802_vm2, %v5897_v52 }
 0x457   : > { %v5899_v32 = vpop.eup %5898  ;;  %v2083_v16 = vmul.f32 1.442695, %v2007_v57  ;;  %v2139_v49 = vmul.f32 1.442695, %v2035_v44 }
 0x458   : > { %5440 = vmatmul.mubr.msk.f32.gmra.mrb[42].mxu1 %vm1802_vm2, %v5899_v32  ;;  %v1850_v13 = vpop.xlane.xlu0 %1849  ;;  %v1859_v31 = vpop.xlane.xlu1 %1858  ;;  %v2220_v56 = vsel %vm1802_vm2, %v5899_v32, 0.0 }
 0x459   : > { %5910 = vpow2.f32 %v2083_v16  ;;  %v2010_v20 = vsub.f32 %v7060_v11, %v1850_v13  ;;  %2221 = vadd.xlane.f32.xlu0 %v2220_v56  ;;  %v2289_v11 = vsel %vm1802_vm2, %v5897_v52, 0.0  ;;  %v2013_v29 = vsub.f32 %v7088_v45, %v1859_v31  ;;  %v8716_v31 = vld [vmem:[#allocation3_spill] sm:$0xff] }
 0x45a   : > { %5912 = vpow2.f32 %v2087_v30 }
 0x45b   : > { %v5901_v8 = vpop.eup %5900  ;;  %v2089_v28 = vmul.f32 1.442695, %v2010_v20  ;;  %v2095_v52 = vmul.f32 1.442695, %v2013_v29  ;;  %v8717_v20 = vld [vmem:[#allocation5_spill] sm:$0xff] }
 0x45c   : > { %v5903_v40 = vpop.eup %5902  ;;  %5492 = vmatmul.mubr.msk.f32.gmra.mrb[50].mxu0 %vm1802_vm2, %v5901_v8  ;;  %v1922_v15 = vpop.xlane.xlu0 %1921  ;;  %v2292_v10 = vsel %vm1802_vm2, %v5901_v8, 0.0 }
 0x45d   : > { %v1931_v35 = vpop.xlane.xlu1 %1930  ;;  %5914 = vpow2.f32 %v2089_v28  ;;  %v2034_v17 = vsub.f32 %v7062_v21, %v1922_v15  ;;  %5494 = vmatprep.mubr.msk.f32.mxu0 %vm1802_vm2, %v5903_v40  ;;  %2293 = vadd.xlane.f32.xlu1 %v2292_v10  ;;  %v5905_v3 = vpop.eup %5904  ;;  %v2217_v21 = vsel %vm1802_vm2, %v5893_v5, 0.0  ;;  %v2295_v51 = vsel %vm1802_vm2, %v5903_v40, 0.0 }
 0x45e   : > { %v2037_v39 = vsub.f32 %v7090_v9, %v1931_v35  ;;  %2290 = vadd.xlane.f32.xlu0 %v2289_v11  ;;  %v2298_v53 = vsel %vm1802_vm2, %v5905_v3, 0.0 }
 0x45f   : > { %v5907_v27 = vpop.eup %5906  ;;  %v2137_v34 = vmul.f32 1.442695, %v2034_v17 }
 0x460   : > { %v5909_v22 = vpop.eup %5908  ;;  %5495 = vmatmul.mubr.msk.f32.gmra.mrb[52].mxu0 %vm1802_vm2, %v5905_v3  ;;  %v1856_v36 = vpop.xlane.xlu0 %1855  ;;  %v2226_v6 = vsel %vm1802_vm2, %v5907_v27, 0.0  ;;  %v2143_v9 = vmul.f32 1.442695, %v2037_v39 }
 0x461   : > { %v7312_v2 = vpop.xlane.xlu1 %1939  ;;  %5916 = vpow2.f32 %v2137_v34  ;;  %v2012_v59 = vsub.f32 %v7072_v63, %v1856_v36  ;;  %5497 = vmatprep.mubr.msk.f32.mxu0 %vm1802_vm2, %v5909_v22  ;;  %2218 = vadd.xlane.f32.xlu1 %v2217_v21  ;;  %v2301_v3 = vsel %vm1802_vm2, %v5909_v22, 0.0 }
 0x462   : > { %5918 = vpow2.f32 %v2139_v49  ;;  %2227 = vadd.xlane.f32.xlu0 %v2226_v6  ;;  %v2040_v17 = vsub.f32 %v8718_v42, %v7312_v2 }
 0x463   : > { %v5911_v41 = vpop.eup %5910  ;;  %v2093_v47 = vmul.f32 1.442695, %v2012_v59  ;;  %5920 = vpow2.f32 %v2141_v26  ;;  %v8719_v59 = vld [vmem:[#allocation7_spill] sm:$0xff] }
 0x464   : > { %5442 = vmatprep.mubr.msk.f32.mxu1 %vm1802_vm2, %v5911_v41  ;;  %v1853_v48 = vpop.xlane.xlu0 %1852  ;;  %v5913_v58 = vpop.eup %5912  ;;  %5922 = vpow2.f32 %v2143_v9  ;;  %v2223_v16 = vsel %vm1802_vm2, %v5911_v41, 0.0  ;;  %v2149_v26 = vmul.f32 1.442695, %v2040_v17 }
 0x465   : > { %v1937_v5 = vpop.xlane.xlu1 %1936  ;;  %v2011_v63 = vsub.f32 %v8715_v0, %v1853_v48  ;;  %5443 = vmatmul.mubr.msk.f32.gmra.mrb[44].mxu1 %vm1802_vm2, %v5907_v27  ;;  %2299 = vadd.xlane.f32.xlu1 %v2298_v53  ;;  %5924 = vpow2.f32 %v2093_v47  ;;  %v2229_v2 = vsel %vm1802_vm2, %v5913_v58, 0.0 }
 0x466   : > { %2296 = vadd.xlane.f32.xlu0 %v2295_v51  ;;  %5445 = vmatprep.mubr.msk.f32.mxu1 %vm1802_vm2, %v5913_v58  ;;  %v2039_v44 = vsub.f32 %v8717_v20, %v1937_v5 }
 0x467   : > { %v5915_v45 = vpop.eup %5914  ;;  %v2091_v57 = vmul.f32 1.442695, %v2011_v63  ;;  %v8720_v63 = vld [vmem:[#allocation6_spill] sm:$0xff] }
 0x468   : > { %v1862_v32 = vpop.xlane.xlu0 %1861  ;;  %v2232_v13 = vsel %vm1802_vm2, %v5915_v45, 0.0  ;;  %v2147_v49 = vmul.f32 1.442695, %v2039_v44 }
 0x469   : > { %v7325_v30 = vpop.xlane.xlu1 %1873  ;;  %5926 = vpow2.f32 %v2091_v57  ;;  %v2014_v56 = vsub.f32 %v8716_v31, %v1862_v32  ;;  %5446 = vmatmul.mubr.msk.f32.gmra.mrb[46].mxu1 %vm1802_vm2, %v5915_v45  ;;  %2224 = vadd.xlane.f32.xlu1 %v2223_v16 }
 0x46a   : > { %2233 = vadd.xlane.f32.xlu0 %v2232_v13  ;;  %5928 = vpow2.f32 %v2095_v52 }
 0x46b   : > { %v5917_v8 = vpop.eup %5916  ;;  %v2097_v28 = vmul.f32 1.442695, %v2014_v56 }
 0x46c   : > { %v5919_v40 = vpop.eup %5918  ;;  %5498 = vmatmul.mubr.msk.f32.gmra.mrb[54].mxu0 %vm1802_vm2, %v5917_v8  ;;  %v1934_v15 = vpop.xlane.xlu0 %1933  ;;  %v2304_v10 = vsel %vm1802_vm2, %v5917_v8, 0.0 }
 0x46d   : > { %v1946_v35 = vpop.xlane.xlu1 %1945  ;;  %5930 = vpow2.f32 %v2097_v28  ;;  %v2038_v11 = vsub.f32 %v7086_v60, %v1934_v15  ;;  %5500 = vmatprep.mubr.msk.f32.mxu0 %vm1802_vm2, %v5919_v40  ;;  %2305 = vadd.xlane.f32.xlu1 %v2304_v10  ;;  %v5921_v39 = vpop.eup %5920 }
 0x46e   : > { %2302 = vadd.xlane.f32.xlu0 %v2301_v3  ;;  %v7339_v34 = vpop.eup %5922  ;;  %v2042_v9 = vsub.f32 %v8719_v59, %v1946_v35 }
 0x46f   : > { %v2145_v27 = vmul.f32 1.442695, %v2038_v11  ;;  %v5925_v6 = vpop.eup %5924 }
 0x470   : > { %5501 = vmatmul.mubr.msk.f32.gmra.mrb[56].mxu0 %vm1802_vm2, %v5921_v39  ;;  %v1868_v36 = vpop.xlane.xlu0 %1867  ;;  %v2238_v5 = vsel %vm1802_vm2, %v5925_v6, 0.0  ;;  %v2153_v45 = vmul.f32 1.442695, %v2042_v9 }
 0x471   : > { %v1871_v21 = vpop.xlane.xlu1 %1870  ;;  %5932 = vpow2.f32 %v2145_v27  ;;  %v2016_v60 = vsub.f32 %v7096_v14, %v1868_v36  ;;  %5503 = vmatprep.mubr.msk.f32.mxu0 %vm1802_vm2, %v7339_v34  ;;  %2230 = vadd.xlane.f32.xlu1 %v2229_v2 }
 0x472   : > { %5934 = vpow2.f32 %v2147_v49  ;;  %v2017_v29 = vsub.f32 %v7112_v23, %v1871_v21  ;;  %v2018_v23 = vsub.f32 %v8720_v63, %v7325_v30  ;;  %v2307_v30 = vsel %vm1802_vm2, %v5919_v40, 0.0 }
 0x473   : > { %v5927_v22 = vpop.eup %5926  ;;  %v2101_v41 = vmul.f32 1.442695, %v2016_v60  ;;  %5936 = vpow2.f32 %v2149_v26 }
 0x474   : > { %5448 = vmatprep.mubr.msk.f32.mxu1 %vm1802_vm2, %v5927_v22  ;;  %v1865_v47 = vpop.xlane.xlu0 %1864  ;;  %v2235_v53 = vsel %vm1802_vm2, %v5927_v22, 0.0  ;;  %v5929_v14 = vpop.eup %5928  ;;  %v2103_v32 = vmul.f32 1.442695, %v2017_v29  ;;  %v2105_v31 = vmul.f32 1.442695, %v2018_v23 }
 0x475   : > { %v1943_v48 = vpop.xlane.xlu1 %1942  ;;  %v2015_v58 = vsub.f32 %v7100_v54, %v1865_v47  ;;  %5449 = vmatmul.mubr.msk.f32.gmra.mrb[48].mxu1 %vm1802_vm2, %v5925_v6  ;;  %2239 = vadd.xlane.f32.xlu1 %v2238_v5  ;;  %5938 = vpow2.f32 %v2101_v41  ;;  %v2310_v54 = vsel %vm1802_vm2, %v5921_v39, 0.0  ;;  %v2313_v39 = vsel %vm1802_vm2, %v7339_v34, 0.0 }
 0x476   : > { %v2041_v0 = vsub.f32 %v7114_v19, %v1943_v48  ;;  %2236 = vadd.xlane.f32.xlu0 %v2235_v53  ;;  %5451 = vmatprep.mubr.msk.f32.mxu1 %vm1802_vm2, %v5929_v14 }
 0x477   : > { %v5931_v51 = vpop.eup %5930  ;;  %v2099_v52 = vmul.f32 1.442695, %v2015_v58 }
 0x478   : > { %v2151_v57 = vmul.f32 1.442695, %v2041_v0  ;;  %v1880_v13 = vpop.xlane.xlu0 %1879 }
 0x479   : > { %v1952_v16 = vpop.xlane.xlu1 %1951  ;;  %5940 = vpow2.f32 %v2099_v52  ;;  %5452 = vmatmul.mubr.msk.f32.gmra.mrb[50].mxu1 %vm1802_vm2, %v5931_v51  ;;  %2311 = vadd.xlane.f32.xlu1 %v2310_v54  ;;  %v2020_v20 = vsub.f32 %v7120_v33, %v1880_v13 }
 0x47a   : > { %v2044_v19 = vsub.f32 %v7122_v55, %v1952_v16  ;;  %5942 = vpow2.f32 %v2151_v57  ;;  %2308 = vadd.xlane.f32.xlu0 %v2307_v30  ;;  %v2244_v55 = vsel %vm1802_vm2, %v5931_v51, 0.0 }
 0x47b   : > { %v5933_v56 = vpop.eup %5932  ;;  %5944 = vpow2.f32 %v2153_v45  ;;  %v2109_v42 = vmul.f32 1.442695, %v2020_v20 }
 0x47c   : > { %v5935_v44 = vpop.eup %5934  ;;  %5946 = vpow2.f32 %v2103_v32  ;;  %v2157_v8 = vmul.f32 1.442695, %v2044_v19  ;;  %5504 = vmatmul.mubr.msk.f32.gmra.mrb[58].mxu0 %vm1802_vm2, %v5933_v56  ;;  %v1877_v15 = vpop.xlane.xlu0 %1876  ;;  %v2316_v35 = vsel %vm1802_vm2, %v5933_v56, 0.0 }
 0x47d   : > { %v1949_v28 = vpop.xlane.xlu1 %1948  ;;  %v2019_v10 = vsub.f32 %v7124_v46, %v1877_v15  ;;  %5506 = vmatprep.mubr.msk.f32.mxu0 %vm1802_vm2, %v5935_v44  ;;  %2245 = vadd.xlane.f32.xlu1 %v2244_v55  ;;  %5948 = vpow2.f32 %v2105_v31  ;;  %v5937_v33 = vpop.eup %5936  ;;  %v2319_v53 = vsel %vm1802_vm2, %v5935_v44, 0.0 }
 0x47e   : > { %v2043_v40 = vsub.f32 %v7126_v1, %v1949_v28  ;;  %2317 = vadd.xlane.f32.xlu0 %v2316_v35  ;;  %5950 = vpow2.f32 %v2157_v8  ;;  %v2241_v1 = vsel %vm1802_vm2, %v5929_v14, 0.0 }
 0x47f   : > { %v2107_v11 = vmul.f32 1.442695, %v2019_v10  ;;  %v5939_v27 = vpop.eup %5938 }
 0x480   : > { %v2155_v17 = vmul.f32 1.442695, %v2043_v40  ;;  %5507 = vmatmul.mubr.msk.f32.gmra.mrb[60].mxu0 %vm1802_vm2, %v5937_v33  ;;  %v1886_v49 = vpop.xlane.xlu0 %1885  ;;  %v2250_v59 = vsel %vm1802_vm2, %v5939_v27, 0.0 }
 0x481   : > { %v1958_v3 = vpop.xlane.xlu1 %1957  ;;  %2314 = vadd.xlane.f32.xlu1 %v2313_v39  ;;  %v2022_v21 = vsub.f32 %v7132_v18, %v1886_v49  ;;  %v2322_v18 = vsel %vm1802_vm2, %v5937_v33, 0.0  ;;  %v8721_v49 = vld [vmem:[#allocation8_spill] sm:$0xff] }
 0x482   : > { %5952 = vpow2.f32 %v2155_v17  ;;  %v2046_v46 = vsub.f32 %v7134_v24, %v1958_v3  ;;  %2242 = vadd.xlane.f32.xlu0 %v2241_v1 }
 0x483   : > { %5954 = vpow2.f32 %v2107_v11  ;;  %v5941_v36 = vpop.eup %5940  ;;  %v2113_v41 = vmul.f32 1.442695, %v2022_v21 }
 0x484   : > { %5956 = vpow2.f32 %v2109_v42  ;;  %v5943_v2 = vpop.eup %5942  ;;  %v2161_v6 = vmul.f32 1.442695, %v2046_v46  ;;  %5454 = vmatprep.mubr.msk.f32.mxu1 %vm1802_vm2, %v5941_v36  ;;  %v1883_v60 = vpop.xlane.xlu0 %1882  ;;  %v2247_v58 = vsel %vm1802_vm2, %v5941_v36, 0.0 }
 0x485   : > { %v1955_v26 = vpop.xlane.xlu1 %1954  ;;  %v5945_v34 = vpop.eup %5944  ;;  %5509 = vmatprep.mubr.msk.f32.mxu0 %vm1802_vm2, %v5943_v2  ;;  %v2021_v22 = vsub.f32 %v7136_v43, %v1883_v60  ;;  %5455 = vmatmul.mubr.msk.f32.gmra.mrb[52].mxu1 %vm1802_vm2, %v5939_v27  ;;  %v2325_v31 = vsel %vm1802_vm2, %v5943_v2, 0.0 }
 0x486   : > { %v2045_v24 = vsub.f32 %v7138_v50, %v1955_v26  ;;  %v5947_v9 = vpop.eup %5946  ;;  %2251 = vadd.xlane.f32.xlu1 %v2250_v59  ;;  %5510 = vmatmul.mubr.msk.f32.gmra.mrb[62].mxu0 %vm1802_vm2, %v5945_v34  ;;  %5958 = vpow2.f32 %v2161_v6 }
 0x487   : > { %v2111_v47 = vmul.f32 1.442695, %v2021_v22  ;;  %2323 = vadd.xlane.f32.xlu0 %v2322_v18  ;;  %5457 = vmatprep.mubr.msk.f32.mxu1 %vm1802_vm2, %v5947_v9  ;;  %v5949_v48 = vpop.eup %5948  ;;  %v2253_v20 = vsel %vm1802_vm2, %v5947_v9, 0.0  ;;  %v8723_v22 = vld [vmem:[#allocation10_spill] sm:$0xff]  ;;  %v8724_v9 = vld [vmem:[#allocation11_spill] sm:$0xff] }
 0x488   : > { %v2159_v29 = vmul.f32 1.442695, %v2045_v24  ;;  %v1892_v43 = vpop.xlane.xlu0 %1891  ;;  %v7386_v14 = vpop.eup %5950  ;;  %v2256_v16 = vsel %vm1802_vm2, %v5949_v48, 0.0 }
 0x489   : > { %v1964_v50 = vpop.xlane.xlu1 %1963  ;;  %5458 = vmatmul.mubr.msk.f32.gmra.mrb[54].mxu1 %vm1802_vm2, %v5949_v48  ;;  %v2024_v63 = vsub.f32 %v7144_v61, %v1892_v43  ;;  %v2328_v61 = vsel %vm1802_vm2, %v5945_v34, 0.0  ;;  %v2334_v1 = vsel %vm1802_vm2, %v7386_v14, 0.0 }
 0x48a   : > { %5960 = vpow2.f32 %v2159_v29  ;;  %v2048_v5 = vsub.f32 %v7146_v37, %v1964_v50  ;;  %2320 = vadd.xlane.f32.xlu1 %v2319_v53  ;;  %v8725_v53 = vld [vmem:[#allocation12_spill] sm:$0xff] }
 0x48b   : > { %5962 = vpow2.f32 %v2111_v47  ;;  %2248 = vadd.xlane.f32.xlu0 %v2247_v58  ;;  %v2117_v13 = vmul.f32 1.442695, %v2024_v63  ;;  %v8726_v58 = vld [vmem:[#allocation13_spill] sm:$0xff] }
 0x48c   : > { %v7389_v0 = vpop.eup %5952  ;;  %5964 = vpow2.f32 %v2113_v41  ;;  %v2165_v51 = vmul.f32 1.442695, %v2048_v5  ;;  %v1889_v45 = vpop.xlane.xlu0 %1888 }
 0x48d   : > { %v5955_v23 = vpop.eup %5954  ;;  %5512 = vmatprep.mubr.msk.f32.mxu0 %vm1802_vm2, %v7389_v0  ;;  %v1961_v37 = vpop.xlane.xlu1 %1960  ;;  %v2023_v32 = vsub.f32 %v7148_v62, %v1889_v45  ;;  %v2331_v36 = vsel %vm1802_vm2, %v7389_v0, 0.0 }
 0x48e   : > { %v5957_v52 = vpop.eup %5956  ;;  %v2047_v57 = vsub.f32 %v7150_v25, %v1961_v37  ;;  %5460 = vmatprep.mubr.msk.f32.mxu1 %vm1802_vm2, %v5955_v23  ;;  %5513 = vmatmul.mubr.msk.f32.gmra.mrb[64].mxu0 %vm1802_vm2, %v7386_v14  ;;  %5966 = vpow2.f32 %v2165_v51  ;;  %v2259_v33 = vsel %vm1802_vm2, %v5955_v23, 0.0 }
 0x48f   : > { %2257 = vadd.xlane.f32.xlu1 %v2256_v16  ;;  %5461 = vmatmul.mubr.msk.f32.gmra.mrb[56].mxu1 %vm1802_vm2, %v5957_v52  ;;  %v2115_v19 = vmul.f32 1.442695, %v2023_v32 }
 0x490   : > { %v2163_v54 = vmul.f32 1.442695, %v2047_v57  ;;  %2329 = vadd.xlane.f32.xlu0 %v2328_v61  ;;  %v1898_v30 = vpop.xlane.xlu0 %1897  ;;  %v7404_v56 = vpop.eup %5958  ;;  %v8727_v61 = vld [vmem:[#allocation14_spill] sm:$0xff] }
 0x491   : > { %v1967_v25 = vpop.xlane.xlu1 %1966  ;;  %v2026_v28 = vsub.f32 %v7156_v12, %v1898_v30  ;;  %v2262_v12 = vsel %vm1802_vm2, %v5957_v52, 0.0  ;;  %v2340_v63 = vsel %vm1802_vm2, %v7404_v56, 0.0 }
 0x492   : > { %5968 = vpow2.f32 %v2163_v54  ;;  %v2049_v62 = vsub.f32 %v7162_v38, %v1967_v25  ;;  %v8728_v54 = vld [vmem:[#allocation15_spill] sm:$0xff] }
 0x493   : > { %5970 = vpow2.f32 %v2115_v19  ;;  %2326 = vadd.xlane.f32.xlu1 %v2325_v31  ;;  %v2121_v42 = vmul.f32 1.442695, %v2026_v28 }
 0x494   : > { %v7407_v44 = vpop.eup %5960  ;;  %5972 = vpow2.f32 %v2117_v13  ;;  %v2167_v8 = vmul.f32 1.442695, %v2049_v62  ;;  %2254 = vadd.xlane.f32.xlu0 %v2253_v20  ;;  %v1895_v55 = vpop.xlane.xlu0 %1894 }
 0x495   : > { %v5963_v15 = vpop.eup %5962  ;;  %5515 = vmatprep.mubr.msk.f32.mxu0 %vm1802_vm2, %v7407_v44  ;;  %v1970_v38 = vpop.xlane.xlu1 %1969  ;;  %v2025_v10 = vsub.f32 %v7160_v4, %v1895_v55  ;;  %v8722_v4 = vld [vmem:[#allocation9_spill] sm:$0xff]  ;;  %v2337_v23 = vsel %vm1802_vm2, %v7407_v44, 0.0 }
 0x496   : > { %v5965_v35 = vpop.eup %5964  ;;  %5974 = vpow2.f32 %v2167_v8  ;;  %v2050_v40 = vsub.f32 %v7158_v7, %v1970_v38  ;;  %5463 = vmatprep.mubr.msk.f32.mxu1 %vm1802_vm2, %v5963_v15  ;;  %5516 = vmatmul.mubr.msk.f32.gmra.mrb[66].mxu0 %vm1802_vm2, %v7404_v56  ;;  %v2265_v29 = vsel %vm1802_vm2, %v5963_v15, 0.0 }
 0x497   : > { %2263 = vadd.xlane.f32.xlu1 %v2262_v12  ;;  %5464 = vmatmul.mubr.msk.f32.gmra.mrb[58].mxu1 %vm1802_vm2, %v5965_v35  ;;  %v2119_v11 = vmul.f32 1.442695, %v2025_v10  ;;  %v2268_v41 = vsel %vm1802_vm2, %v5965_v35, 0.0  ;;  %v3373_v12 = vld [vmem:[%s8668_s3] sm:$0xff] }
 0x498   : > { %v2169_v17 = vmul.f32 1.442695, %v2050_v40  ;;  %2260 = vadd.xlane.f32.xlu0 %v2259_v33  ;;  %v1973_v7 = vpop.xlane.xlu0 %1972  ;;  %v7424_v27 = vpop.eup %5966  ;;  %v3374_v33 = vld [vmem:[%s8668_s3 + $0x8] sm:$0xff] }
 0x499   : > { %v1976_v3 = vpop.xlane.xlu1 %1975  ;;  %v2051_v46 = vsub.f32 %v8722_v4, %v1973_v7  ;;  %v2346_v44 = vsel %vm1802_vm2, %v7424_v27, 0.0 }
 0x49a   : > { %5976 = vpow2.f32 %v2169_v17  ;;  %v2052_v39 = vsub.f32 %v8721_v49, %v1976_v3  ;;  %v5720_v17 = vpack.c.bf16 %v3374_v33, %v3373_v12 }
 0x49b   : > { %5978 = vpow2.f32 %v2119_v11  ;;  %2335 = vadd.xlane.f32.xlu1 %v2334_v1  ;;  %v2171_v6 = vmul.f32 1.442695, %v2051_v46 }
 0x49c   : > { %v5969_v21 = vpop.eup %5968  ;;  %5980 = vpow2.f32 %v2121_v42  ;;  %v2173_v2 = vmul.f32 1.442695, %v2052_v39  ;;  %2332 = vadd.xlane.f32.xlu0 %v2331_v36  ;;  %v1979_v34 = vpop.xlane.xlu0 %1978  ;;  %5721 = vmatprep.subr.bf16.mxu0 %v5720_v17 }
 0x49d   : > { %v5971_v26 = vpop.eup %5970  ;;  %5518 = vmatprep.mubr.msk.f32.mxu0 %vm1802_vm2, %v5969_v21  ;;  %v1982_v60 = vpop.xlane.xlu1 %1981  ;;  %v2053_v18 = vsub.f32 %v8724_v9, %v1979_v34  ;;  %v2343_v8 = vsel %vm1802_vm2, %v5969_v21, 0.0  ;;  %5744 = vmatprep.subr.bf16.mxu1 %v5720_v17  ;;  %v3375_v34 = vld [vmem:[%s8668_s3 + $0x10] sm:$0xff] }
 0x49e   : > { %v5973_v24 = vpop.eup %5972  ;;  %5982 = vpow2.f32 %v2173_v2  ;;  %v2054_v59 = vsub.f32 %v8723_v22, %v1982_v60  ;;  %5466 = vmatprep.mubr.msk.f32.mxu1 %vm1802_vm2, %v5971_v26  ;;  %5519 = vmatmul.mubr.msk.f32.gmra.mrb[68].mxu0 %vm1802_vm2, %v7424_v27  ;;  %v2271_v30 = vsel %vm1802_vm2, %v5971_v26, 0.0 }
 0x49f   : > { %5984 = vpow2.f32 %v2171_v6  ;;  %2269 = vadd.xlane.f32.xlu1 %v2268_v41  ;;  %5467 = vmatmul.mubr.msk.f32.gmra.mrb[60].mxu1 %vm1802_vm2, %v5973_v24  ;;  %v2175_v50 = vmul.f32 1.442695, %v2053_v18  ;;  %v2274_v25 = vsel %vm1802_vm2, %v5973_v24, 0.0  ;;  %v3376_v24 = vld [vmem:[%s8668_s3 + $0x18] sm:$0xff] }
 0x4a0   : > { %v5975_v47 = vpop.eup %5974  ;;  %v2177_v48 = vmul.f32 1.442695, %v2054_v59  ;;  %2266 = vadd.xlane.f32.xlu0 %v2265_v29  ;;  %v1985_v5 = vpop.xlane.xlu0 %1984  ;;  %5723 = vmatpush3.bf16.msra.mxu0 %v5720_v17  ;;  %v5724_v22 = vpack.c.bf16 %v3376_v24, %v3375_v34 }
 0x4a1   : > { %5521 = vmatprep.mubr.msk.f32.mxu0 %vm1802_vm2, %v5975_v47  ;;  %v1988_v43 = vpop.xlane.xlu1 %1987  ;;  %v2055_v0 = vsub.f32 %v8726_v58, %v1985_v5  ;;  %v2349_v42 = vsel %vm1802_vm2, %v5975_v47, 0.0  ;;  %5746 = vmatpush3.bf16.msra.mxu1 %v5720_v17 }
 0x4a2   : > { %5986 = vpow2.f32 %v2177_v48  ;;  %v2056_v14 = vsub.f32 %v8725_v53, %v1988_v43  ;;  %5725 = vmatprep.subr.bf16.mxu0 %v5724_v22  ;;  %5745 = vmatprep.subr.bf16.mxu1 %v5724_v22 }
 0x4a3   : > { %5988 = vpow2.f32 %v2175_v50  ;;  %2341 = vadd.xlane.f32.xlu1 %v2340_v63  ;;  %v2179_v45 = vmul.f32 1.442695, %v2055_v0 }
 0x4a4   : > { %v5977_v51 = vpop.eup %5976  ;;  %v2181_v37 = vmul.f32 1.442695, %v2056_v14  ;;  %2338 = vadd.xlane.f32.xlu0 %v2337_v23  ;;  %v1991_v32 = vpop.xlane.xlu0 %1990  ;;  %5727 = vmatpush3.bf16.msra.mxu0 %v5724_v22 }
 0x4a5   : > { %v5979_v52 = vpop.eup %5978  ;;  %5522 = vmatmul.mubr.msk.f32.gmra.mrb[70].mxu0 %vm1802_vm2, %v5977_v51  ;;  %v1994_v57 = vpop.xlane.xlu1 %1993  ;;  %v2057_v19 = vsub.f32 %v8728_v54, %v1991_v32  ;;  %v2352_v10 = vsel %vm1802_vm2, %v5977_v51, 0.0  ;;  %5747 = vmatpush3.bf16.msra.mxu1 %v5724_v22  ;;  %v7591_v22 = vld [vmem:[%s8666_s1 + $0x30] sm:$0xff] }
 0x4a6   : > { %v5981_v16 = vpop.eup %5980  ;;  %5990 = vpow2.f32 %v2181_v37  ;;  %v2058_v13 = vsub.f32 %v8727_v61, %v1994_v57  ;;  %5469 = vmatprep.mubr.msk.f32.mxu1 %vm1802_vm2, %v5979_v52  ;;  %v2277_v55 = vsel %vm1802_vm2, %v5979_v52, 0.0  ;;  %v7521_v61 = vld [vmem:[%s8666_s1 + $0x8] sm:$0xff] }
 0x4a7   : > { %5992 = vpow2.f32 %v2179_v45  ;;  %2275 = vadd.xlane.f32.xlu1 %v2274_v25  ;;  %5470 = vmatmul.mubr.msk.f32.gmra.mrb[62].mxu1 %vm1802_vm2, %v5981_v16  ;;  %v2183_v56 = vmul.f32 1.442695, %v2057_v19  ;;  %v2280_v38 = vsel %vm1802_vm2, %v5981_v16, 0.0  ;;  %v7527_v19 = vld [vmem:[%s8666_s1] sm:$0xff] }
 0x4a8   : > { %v5983_v62 = vpop.eup %5982  ;;  %v2185_v31 = vmul.f32 1.442695, %v2058_v13  ;;  %2272 = vadd.xlane.f32.xlu0 %v2271_v30 }
 0x4a9   : > { %v5985_v20 = vpop.eup %5984  ;;  %v2358_v7 = vsel %vm1802_vm2, %v5983_v62, 0.0 }
 0x4aa   : > { %5994 = vpow2.f32 %v2185_v31  ;;  %5524 = vmatprep.mubr.msk.f32.mxu0 %vm1802_vm2, %v5985_v20  ;;  %v2355_v49 = vsel %vm1802_vm2, %v5985_v20, 0.0 }
 0x4ab   : > { %5996 = vpow2.f32 %v2183_v56  ;;  %2347 = vadd.xlane.f32.xlu1 %v2346_v44  ;;  %5525 = vmatmul.mubr.msk.f32.gmra.mrb[72].mxu0 %vm1802_vm2, %v5983_v62 }
 0x4ac   : > { %v5987_v28 = vpop.eup %5986  ;;  %2344 = vadd.xlane.f32.xlu0 %v2343_v8 }
 0x4ad   : > { %v5989_v15 = vpop.eup %5988  ;;  %v2364_v39 = vsel %vm1802_vm2, %v5987_v28, 0.0 }
 0x4ae   : > { %5527 = vmatprep.mubr.msk.f32.mxu0 %vm1802_vm2, %v5989_v15  ;;  %v2361_v4 = vsel %vm1802_vm2, %v5989_v15, 0.0 }
 0x4af   : > { %2281 = vadd.xlane.f32.xlu1 %v2280_v38  ;;  %5528 = vmatmul.mubr.msk.f32.gmra.mrb[74].mxu0 %vm1802_vm2, %v5987_v28  ;;  %v7541_v28 = vld [vmem:[%s8666_s1 + $0x18] sm:$0xff] }
 0x4b0   : > { %v5991_v35 = vpop.eup %5990  ;;  %2278 = vadd.xlane.f32.xlu0 %v2277_v55 }
 0x4b1   : > { %v5993_v40 = vpop.eup %5992  ;;  %v2370_v46 = vsel %vm1802_vm2, %v5991_v35, 0.0 }
 0x4b2   : > { %5530 = vmatprep.mubr.msk.f32.mxu0 %vm1802_vm2, %v5993_v40  ;;  %v2367_v1 = vsel %vm1802_vm2, %v5993_v40, 0.0  ;;  %v7549_v40 = vld [vmem:[%s8666_s1 + $0x10] sm:$0xff] }
 0x4b3   : > { %2353 = vadd.xlane.f32.xlu1 %v2352_v10  ;;  %5531 = vmatmul.mubr.msk.f32.gmra.mrb[76].mxu0 %vm1802_vm2, %v5991_v35 }
 0x4b4   : > { %v5995_v11 = vpop.eup %5994  ;;  %2350 = vadd.xlane.f32.xlu0 %v2349_v42 }
 0x4b5   : > { %v5997_v3 = vpop.eup %5996  ;;  %v2376_v27 = vsel %vm1802_vm2, %v5995_v11, 0.0 }
 0x4b6   : > { %5533 = vmatprep.mubr.msk.f32.mxu0 %vm1802_vm2, %v5997_v3  ;;  %v2373_v36 = vsel %vm1802_vm2, %v5997_v3, 0.0  ;;  %v7561_v3 = vld [vmem:[%s8666_s1 + $0x28] sm:$0xff] }
 0x4b7   : > { %2359 = vadd.xlane.f32.xlu1 %v2358_v7  ;;  %5534 = vmatmul.mubr.msk.f32.gmra.mrb[78].mxu0 %vm1802_vm2, %v5995_v11 }
 0x4b8   : > { %2356 = vadd.xlane.f32.xlu0 %v2355_v49 }
 0x4bb   : > { %2365 = vadd.xlane.f32.xlu1 %v2364_v39  ;;  %v7567_v39 = vld [vmem:[%s8666_s1 + $0x20] sm:$0xff] }
 0x4bc   : > { %2362 = vadd.xlane.f32.xlu0 %v2361_v4 }
 0x4bf   : > { %2371 = vadd.xlane.f32.xlu1 %v2370_v46 }
 0x4c0   : > { %2368 = vadd.xlane.f32.xlu0 %v2367_v1 }
 0x4c1   : > { %v2192_v21 = vpop.xlane.xlu0 %2191 }
 0x4c2   : > { %5998 = vrcp.f32 %v2192_v21 }
 0x4c3   : > { %2377 = vadd.xlane.f32.xlu1 %v2376_v27 }
 0x4c4   : > { %2374 = vadd.xlane.f32.xlu0 %v2373_v36 }
 0x4c5   : > { %v2189_v2 = vpop.xlane.xlu0 %2188 }
 0x4c6   : > { %v2198_v6 = vpop.xlane.xlu1 %2197  ;;  %6000 = vrcp.f32 %v2189_v2 }
 0x4c7   : > { %6002 = vrcp.f32 %v2198_v6 }
 0x4ca   : > { %v2204_v26 = vpop.xlane.xlu1 %2203 }
 0x4cb   : > { %v2195_v60 = vpop.xlane.xlu0 %2194 }
 0x4cc   : > { %6004 = vrcp.f32 %v2195_v60  ;;  %v5999_v52 = vpop.eup %5998 }
 0x4cd   : > { %6006 = vrcp.f32 %v2204_v26  ;;  %v3198_v13 = vmul.f32 %v7521_v61, %v5999_v52  ;;  %v7583_v26 = vld [vmem:[%s8666_s1 + $0x38] sm:$0xff] }
 0x4cf   : > { %v2201_v9 = vpop.xlane.xlu0 %2200 }
 0x4d0   : > { %v6001_v32 = vpop.eup %6000  ;;  %6008 = vrcp.f32 %v2201_v9 }
 0x4d1   : > { %v3197_v25 = vmul.f32 %v7527_v19, %v6001_v32  ;;  %v6003_v20 = vpop.eup %6002 }
 0x4d2   : > { %v2210_v59 = vpop.xlane.xlu1 %2209  ;;  %v3200_v15 = vmul.f32 %v7541_v28, %v6003_v20 }
 0x4d3   : > { %6010 = vrcp.f32 %v2210_v59 }
 0x4d6   : > { %v2216_v18 = vpop.xlane.xlu1 %2215  ;;  %v6005_v8 = vpop.eup %6004 }
 0x4d7   : > { %v2207_v41 = vpop.xlane.xlu0 %2206  ;;  %v6007_v38 = vpop.eup %6006  ;;  %v3199_v10 = vmul.f32 %v7549_v40, %v6005_v8 }
 0x4d8   : > { %6012 = vrcp.f32 %v2207_v41  ;;  %v3202_v7 = vmul.f32 %v7561_v3, %v6007_v38 }
 0x4d9   : > { %6014 = vrcp.f32 %v2216_v18 }
 0x4da   : > { %v6009_v12 = vpop.eup %6008 }
 0x4db   : > { %v7486_v47 = vpop.xlane.xlu0 %2287  ;;  %v3201_v4 = vmul.f32 %v7567_v39, %v6009_v12 }
 0x4dd   : > { %v6011_v21 = vpop.eup %6010 }
 0x4de   : > { %v2213_v29 = vpop.xlane.xlu1 %2212  ;;  %v3204_v60 = vmul.f32 %v7583_v26, %v6011_v21  ;;  %v7649_v21 = vld [vmem:[%s8666_s1 + $0x50] sm:$0xff] }
 0x4df   : > { %6016 = vrcp.f32 %v2213_v29 }
 0x4e0   : > { %6018 = vrcp.f32 %v7486_v47 }
 0x4e2   : > { %v7488_v48 = vpop.xlane.xlu1 %2284  ;;  %v6013_v6 = vpop.eup %6012 }
 0x4e3   : > { %6020 = vrcp.f32 %v7488_v48  ;;  %v3203_v59 = vmul.f32 %v7591_v22, %v6013_v6  ;;  %v6015_v47 = vpop.eup %6014 }
 0x4e6   : > { %v7490_v50 = vpop.xlane.xlu0 %2221 }
 0x4e7   : > { %6022 = vrcp.f32 %v7490_v50  ;;  %v7609_v50 = vld [vmem:[%s8666_s1 + $0x48] sm:$0xff] }
 0x4e8   : > { %v3206_v32 = vmul.f32 %v7609_v50, %v6015_v47 }
 0x4e9   : > { %v6017_v48 = vpop.eup %6016 }
 0x4ea   : > { %v7492_v43 = vpop.xlane.xlu1 %2293 }
 0x4eb   : > { %v7494_v5 = vpop.xlane.xlu0 %2290 }
 0x4ee   : > { %v7496_v53 = vpop.xlane.xlu1 %2218 }
 0x4ef   : > { %v7498_v14 = vpop.xlane.xlu0 %2227  ;;  %6024 = vrcp.f32 %v7496_v53  ;;  %v6019_v53 = vpop.eup %6018 }
 0x4f0   : > { %6026 = vrcp.f32 %v7492_v43 }
 0x4f1   : > { %6028 = vrcp.f32 %v7494_v5  ;;  %v6021_v5 = vpop.eup %6020 }
 0x4f2   : > { %v7500_v58 = vpop.xlane.xlu1 %2299 }
 0x4f3   : > { %v7502_v0 = vpop.xlane.xlu0 %2296  ;;  %6030 = vrcp.f32 %v7500_v58  ;;  %v3229_v58 = vmul.f32 %v7527_v19, %v6021_v5 }
 0x4f4   : > { %6032 = vrcp.f32 %v7502_v0 }
 0x4f5   : > { %6034 = vrcp.f32 %v7498_v14 }
 0x4f6   : > { %v7504_v63 = vpop.xlane.xlu1 %2224 }
 0x4f7   : > { %v7508_v51 = vpop.xlane.xlu0 %2233  ;;  %6036 = vrcp.f32 %v7504_v63 }
 0x4f8   : > { %6038 = vrcp.f32 %v7508_v51 }
 0x4fa   : > { %v7506_v23 = vpop.xlane.xlu1 %2305 }
 0x4fb   : > { %v7512_v45 = vpop.xlane.xlu0 %2302 }
 0x4fe   : > { %v7510_v37 = vpop.xlane.xlu1 %2230 }
 0x4ff   : > { %6040 = vrcp.f32 %v7510_v37 }
 0x500   : > { %6042 = vrcp.f32 %v7506_v23 }
 0x501   : > { %6044 = vrcp.f32 %v7512_v45  ;;  %v7687_v45 = vld [vmem:[%s8666_s1 + $0x68] sm:$0xff] }
 0x502   : > { %v7514_v57 = vpop.xlane.xlu1 %2239 }
 0x503   : > { %v7516_v16 = vpop.xlane.xlu0 %2236 }
 0x506   : > { %v7532_v31 = vpop.xlane.xlu1 %2311 }
 0x507   : > { %v7536_v44 = vpop.xlane.xlu0 %2308  ;;  %6046 = vrcp.f32 %v7532_v31 }
 0x508   : > { %v5426_v54 = vpop.f32.mrb[32].mxu1  ;;  %6048 = vrcp.f32 %v7536_v44 }
 0x509   : > { %v7530_v30 = vmul.f32 %v5426_v54, %v3198_v13  ;;  %v2693_v62 = vpop.f32.mrb[33].mxu1  ;;  %6050 = vrcp.f32 %v7514_v57 }
 0x50a   : > { %v7534_v56 = vmul.f32 %v3197_v25, %v2693_v62  ;;  %v7544_v55 = vpop.xlane.xlu1 %2245  ;;  %v7617_v25 = vld [vmem:[%s8666_s1 + $0x40] sm:$0xff]  ;;  %6052 = vrcp.f32 %v7516_v16  ;;  %v7717_v16 = vld [vmem:[%s8666_s1 + $0x70] sm:$0xff] }
 0x50b   : > { %v7554_v17 = vpop.xlane.xlu0 %2317  ;;  %v3205_v43 = vmul.f32 %v7617_v25, %v6017_v48 }
 0x50e   : > { %v7572_v27 = vpop.xlane.xlu1 %2314 }
 0x50f   : > { %v7576_v2 = vpop.xlane.xlu0 %2242 }
 0x510   : > { %v5429_v35 = vpop.f32.mrb[34].mxu1 }
 0x511   : > { %v7552_v33 = vmul.f32 %v5429_v35, %v3200_v15  ;;  %v2703_v42 = vpop.f32.mrb[35].mxu1  ;;  %v6023_v15 = vpop.eup %6022  ;;  %v3230_v35 = vmul.f32 %v7521_v61, %v6019_v53  ;;  %v7642_v61 = vld [vmem:[%s8666_s1 + $0x58] sm:$0xff]  ;;  %6054 = vrcp.f32 %v7544_v55 }
 0x512   : > { %v7556_v11 = vmul.f32 %v3199_v10, %v2703_v42  ;;  %v6025_v10 = vpop.eup %6024  ;;  %6056 = vrcp.f32 %v7576_v2 }
 0x513   : > { %v7586_v34 = vpop.xlane.xlu1 %2251  ;;  %v3207_v14 = vmul.f32 %v7649_v21, %v6025_v10 }
 0x514   : > { %v5432_v49 = vpop.f32.mrb[36].mxu1  ;;  %v7598_v41 = vpop.xlane.xlu0 %2323 }
 0x515   : > { %v7570_v46 = vmul.f32 %v5432_v49, %v3202_v7  ;;  %v2713_v1 = vpop.f32.mrb[37].mxu1 }
 0x516   : > { %v7574_v36 = vmul.f32 %v3201_v4, %v2713_v1  ;;  %v6027_v1 = vpop.eup %6026  ;;  %6058 = vrcp.f32 %v7554_v17 }
 0x517   : > { %v7604_v52 = vpop.xlane.xlu1 %2320  ;;  %v6029_v6 = vpop.eup %6028  ;;  %v3232_v63 = vmul.f32 %v7541_v28, %v6027_v1  ;;  %6060 = vrcp.f32 %v7572_v27 }
 0x518   : > { %v7612_v13 = vpop.xlane.xlu0 %2248  ;;  %v6031_v48 = vpop.eup %6030  ;;  %6062 = vrcp.f32 %v7598_v41 }
 0x519   : > { %v3234_v37 = vmul.f32 %v7561_v3, %v6031_v48 }
 0x51c   : > { %v5435_v24 = vpop.f32.mrb[38].mxu1  ;;  %v7626_v12 = vpop.xlane.xlu1 %2257 }
 0x51d   : > { %v7595_v9 = vmul.f32 %v5435_v24, %v3204_v60  ;;  %v2723_v18 = vpop.f32.mrb[39].mxu1  ;;  %v7635_v0 = vpop.xlane.xlu0 %2329 }
 0x51e   : > { %v7600_v29 = vmul.f32 %v3203_v59, %v2723_v18 }
 0x520   : > { %v7653_v18 = vpop.xlane.xlu1 %2326 }
 0x521   : > { %v7664_v5 = vpop.xlane.xlu0 %2254 }
 0x524   : > { %v5438_v54 = vpop.f32.mrb[40].mxu1 }
 0x525   : > { %v3270_v62 = vmul.f32 %v5438_v54, %v3206_v32  ;;  %v2733_v20 = vpop.f32.mrb[41].mxu1  ;;  %v3231_v54 = vmul.f32 %v7549_v40, %v6029_v6  ;;  %v7682_v23 = vpop.xlane.xlu0 %2260 }
 0x526   : > { %v3269_v8 = vmul.f32 %v3205_v43, %v2733_v20  ;;  %v6033_v43 = vpop.eup %6032  ;;  %6064 = vrcp.f32 %v7604_v52  ;;  %v7763_v52 = vld [vmem:[%s8666_s1 + $0x80] sm:$0xff] }
 0x527   : > { %v7623_v38 = vadd.f32 %v3270_v62, %v7530_v30  ;;  %v6035_v20 = vpop.eup %6034  ;;  %6066 = vrcp.f32 %v7586_v34 }
 0x528   : > { %v7629_v42 = vadd.f32 %v3269_v8, %v7534_v56  ;;  %v5490_v7 = vpop.f32.mrb[48].mxu0  ;;  %v3208_v56 = vmul.f32 %v7642_v61, %v6023_v15  ;;  %v7674_v8 = vpop.xlane.xlu1 %2263  ;;  %v3210_v3 = vmul.f32 %v7687_v45, %v6035_v20 }
 0x529   : > { %v7632_v49 = vmul.f32 %v5490_v7, %v3230_v35  ;;  %v3038_v4 = vpop.f32.mrb[49].mxu0  ;;  %v6037_v35 = vpop.eup %6036  ;;  %6068 = vrcp.f32 %v7612_v13 }
 0x52a   : > { %v7637_v30 = vmul.f32 %v3229_v58, %v3038_v4  ;;  %v7693_v58 = vld [vmem:[%s8666_s1 + $0x60] sm:$0xff] }
 0x52b   : > { %v5441_v19 = vpop.f32.mrb[42].mxu1  ;;  %v3209_v31 = vmul.f32 %v7693_v58, %v6037_v35 }
 0x52c   : > { %v3272_v60 = vmul.f32 %v5441_v19, %v3208_v56  ;;  %v2743_v24 = vpop.f32.mrb[43].mxu1  ;;  %v7697_v1 = vpop.xlane.xlu1 %2335 }
 0x52d   : > { %v3271_v59 = vmul.f32 %v3207_v14, %v2743_v24 }
 0x52e   : > { %v7656_v47 = vadd.f32 %v3272_v60, %v7552_v33  ;;  %v7706_v60 = vld [vmem:[%s8666_s1 + $0x78] sm:$0xff] }
 0x52f   : > { %v7661_v32 = vadd.f32 %v3271_v59, %v7556_v11  ;;  %v5493_v53 = vpop.f32.mrb[50].mxu0  ;;  %v3233_v11 = vmul.f32 %v7567_v39, %v6033_v43  ;;  %v6039_v39 = vpop.eup %6038  ;;  %6070 = vrcp.f32 %v7635_v0 }
 0x530   : > { %v7666_v51 = vmul.f32 %v5493_v53, %v3232_v63  ;;  %v3048_v62 = vpop.f32.mrb[51].mxu0  ;;  %v6041_v4 = vpop.eup %6040  ;;  %v3212_v24 = vmul.f32 %v7706_v60, %v6039_v39  ;;  %6072 = vrcp.f32 %v7653_v18 }
 0x531   : > { %v7669_v33 = vmul.f32 %v3231_v54, %v3048_v62  ;;  %v6043_v14 = vpop.eup %6042  ;;  %v7709_v63 = vpop.xlane.xlu0 %2332  ;;  %6074 = vrcp.f32 %v7626_v12 }
 0x532   : > { %v6045_v59 = vpop.eup %6044  ;;  %v3236_v62 = vmul.f32 %v7583_v26, %v6043_v14  ;;  %6076 = vrcp.f32 %v7664_v5 }
 0x533   : > { %v5496_v28 = vpop.f32.mrb[52].mxu0 }
 0x534   : > { %v7676_v40 = vmul.f32 %v5496_v28, %v3234_v37  ;;  %v3058_v15 = vpop.f32.mrb[53].mxu0  ;;  %v6047_v37 = vpop.eup %6046  ;;  %6078 = vrcp.f32 %v7674_v8 }
 0x535   : > { %v7679_v10 = vmul.f32 %v3233_v11, %v3058_v15  ;;  %v3235_v11 = vmul.f32 %v7591_v22, %v6045_v59  ;;  %v6049_v20 = vpop.eup %6048  ;;  %v7727_v15 = vpop.xlane.xlu1 %2269  ;;  %6080 = vrcp.f32 %v7697_v1 }
 0x536   : > { %v7738_v2 = vpop.xlane.xlu0 %2266  ;;  %v3237_v39 = vmul.f32 %v7617_v25, %v6049_v20 }
 0x538   : > { %v5444_v7 = vpop.f32.mrb[44].mxu1 }
 0x539   : > { %v3274_v44 = vmul.f32 %v5444_v7, %v3210_v3  ;;  %v2753_v56 = vpop.f32.mrb[45].mxu1  ;;  %v6051_v7 = vpop.eup %6050  ;;  %6082 = vrcp.f32 %v7709_v63 }
 0x53a   : > { %v3273_v19 = vmul.f32 %v3209_v31, %v2753_v56  ;;  %v7744_v17 = vpop.xlane.xlu1 %2341  ;;  %v7758_v41 = vpop.xlane.xlu0 %2338 }
 0x53b   : > { %v7701_v6 = vadd.f32 %v3274_v44, %v7570_v46  ;;  %v3211_v46 = vmul.f32 %v7717_v16, %v6041_v4  ;;  %v6053_v4 = vpop.eup %6052  ;;  %6084 = vrcp.f32 %v7682_v23 }
 0x53c   : > { %v7712_v57 = vadd.f32 %v3273_v19, %v7574_v36  ;;  %v5447_v48 = vpop.f32.mrb[46].mxu1  ;;  %v6055_v19 = vpop.eup %6054  ;;  %6086 = vrcp.f32 %v7727_v15  ;;  %v7851_v15 = vld [vmem:[%s8666_s1 + $0xb8] sm:$0xff] }
 0x53d   : > { %v3276_v53 = vmul.f32 %v5447_v48, %v3212_v24  ;;  %v2763_v54 = vpop.f32.mrb[47].mxu1 }
 0x53e   : > { %v3275_v43 = vmul.f32 %v3211_v46, %v2763_v54  ;;  %v7775_v54 = vld [vmem:[%s8666_s1 + $0x98] sm:$0xff]  ;;  %v7779_v34 = vpop.xlane.xlu1 %2275  ;;  %v7791_v20 = vpop.xlane.xlu0 %2272 }
 0x53f   : > { %v7724_v36 = vadd.f32 %v3276_v53, %v7595_v9  ;;  %v5499_v28 = vpop.f32.mrb[54].mxu0  ;;  %v3238_v9 = vmul.f32 %v7609_v50, %v6047_v37  ;;  %v7755_v50 = vld [vmem:[%s8666_s1 + $0x88] sm:$0xff] }
 0x540   : > { %v7730_v35 = vadd.f32 %v3275_v43, %v7600_v29  ;;  %v7732_v3 = vmul.f32 %v5499_v28, %v3236_v62  ;;  %v3068_v55 = vpop.f32.mrb[55].mxu0  ;;  %v3214_v25 = vmul.f32 %v7755_v50, %v6051_v7  ;;  %v3216_v43 = vmul.f32 %v7775_v54, %v6055_v19 }
 0x541   : > { %v7735_v26 = vmul.f32 %v3235_v11, %v3068_v55 }
 0x542   : > { %v7816_v1 = vpop.xlane.xlu0 %2344 }
 0x543   : > { %v5502_v22 = vpop.f32.mrb[56].mxu0 }
 0x544   : > { %v3302_v31 = vmul.f32 %v5502_v22, %v3238_v9  ;;  %v3078_v29 = vpop.f32.mrb[57].mxu0 }
 0x545   : > { %v3301_v44 = vmul.f32 %v3237_v39, %v3078_v29 }
 0x546   : > { %v7747_v27 = vadd.f32 %v3302_v31, %v7632_v49  ;;  %v3213_v49 = vmul.f32 %v7763_v52, %v6053_v4 }
 0x547   : > { %v7750_v56 = vadd.f32 %v3301_v44, %v7637_v30  ;;  %v6057_v30 = vpop.eup %6056  ;;  %6088 = vrcp.f32 %v7744_v17 }
 0x548   : > { %v5450_v14 = vpop.f32.mrb[48].mxu1  ;;  %v6059_v46 = vpop.eup %6058  ;;  %6090 = vrcp.f32 %v7758_v41 }
 0x549   : > { %v3278_v24 = vmul.f32 %v5450_v14, %v3214_v25  ;;  %v2773_v59 = vpop.f32.mrb[49].mxu1  ;;  %v6061_v62 = vpop.eup %6060  ;;  %v3240_v55 = vmul.f32 %v7642_v61, %v6059_v46  ;;  %6092 = vrcp.f32 %v7738_v2 }
 0x54a   : > { %v3277_v48 = vmul.f32 %v3213_v49, %v2773_v59  ;;  %v6063_v9 = vpop.eup %6062  ;;  %v3239_v39 = vmul.f32 %v7649_v21, %v6061_v62  ;;  %v7804_v61 = vpop.xlane.xlu1 %2347  ;;  %6094 = vrcp.f32 %v7779_v34 }
 0x54b   : > { %v7770_v53 = vadd.f32 %v7623_v38, %v3278_v24  ;;  %v7787_v38 = vld [vmem:[%s8666_s1 + $0x90] sm:$0xff]  ;;  %v6065_v7 = vpop.eup %6064  ;;  %6096 = vrcp.f32 %v7804_v61 }
 0x54c   : > { %v7782_v13 = vadd.f32 %v7629_v42, %v3277_v48  ;;  %v5453_v37 = vpop.f32.mrb[50].mxu1  ;;  %v3215_v0 = vmul.f32 %v7787_v38, %v6057_v30  ;;  %v6067_v44 = vpop.eup %6066  ;;  %v3241_v25 = vmul.f32 %v7693_v58, %v6065_v7  ;;  %6098 = vrcp.f32 %v7816_v1 }
 0x54d   : > { %v3280_v28 = vmul.f32 %v5453_v37, %v3216_v43  ;;  %v2783_v11 = vpop.f32.mrb[51].mxu1  ;;  %v6069_v8 = vpop.eup %6068  ;;  %6100 = vrcp.f32 %v7791_v20  ;;  %v7908_v20 = vld [vmem:[%s8666_s1 + $0xd8] sm:$0xff] }
 0x54e   : > { %v3279_v18 = vmul.f32 %v3215_v0, %v2783_v11  ;;  %v7830_v24 = vpop.xlane.xlu1 %2281 }
 0x54f   : > { %v7796_v42 = vadd.f32 %v7656_v47, %v3280_v28  ;;  %v5505_v22 = vpop.f32.mrb[58].mxu0  ;;  %v3242_v47 = vmul.f32 %v7687_v45, %v6063_v9  ;;  %v7842_v28 = vpop.xlane.xlu0 %2278 }
 0x550   : > { %v7800_v31 = vadd.f32 %v7661_v32, %v3279_v18  ;;  %v3304_v29 = vmul.f32 %v5505_v22, %v3240_v55  ;;  %v3088_v12 = vpop.f32.mrb[59].mxu0 }
 0x551   : > { %v3303_v4 = vmul.f32 %v3239_v39, %v3088_v12 }
 0x552   : > { %v7807_v5 = vadd.f32 %v3304_v29, %v7666_v51  ;;  %v6071_v51 = vpop.eup %6070 }
 0x553   : > { %v7812_v21 = vadd.f32 %v3303_v4, %v7669_v33  ;;  %v5508_v32 = vpop.f32.mrb[60].mxu0  ;;  %v6073_v30 = vpop.eup %6072  ;;  %v7827_v33 = vld [vmem:[%s8666_s1 + $0xa8] sm:$0xff]  ;;  %v3244_v48 = vmul.f32 %v7706_v60, %v6071_v51 }
 0x554   : > { %v3306_v19 = vmul.f32 %v5508_v32, %v3242_v47  ;;  %v3098_v14 = vpop.f32.mrb[61].mxu0  ;;  %v3218_v23 = vmul.f32 %v7827_v33, %v6067_v44  ;;  %v6075_v58 = vpop.eup %6074  ;;  %v3243_v0 = vmul.f32 %v7717_v16, %v6073_v30 }
 0x555   : > { %v3305_v49 = vmul.f32 %v3241_v25, %v3098_v14  ;;  %v6077_v46 = vpop.eup %6076  ;;  %v3220_v16 = vmul.f32 %v7851_v15, %v6075_v58  ;;  %v2354_v32 = vpop.xlane.xlu1 %2353  ;;  %v7880_v14 = vld [vmem:[%s8666_s1 + $0xc8] sm:$0xff] }
 0x556   : > { %v7819_v45 = vadd.f32 %v3306_v19, %v7676_v40  ;;  %v7836_v40 = vld [vmem:[%s8666_s1 + $0xa0] sm:$0xff]  ;;  %v6079_v55 = vpop.eup %6078  ;;  %6102 = vrcp.f32 %v2354_v32 }
 0x557   : > { %v7822_v63 = vadd.f32 %v3305_v49, %v7679_v10  ;;  %v3217_v10 = vmul.f32 %v7836_v40, %v6069_v8  ;;  %v6081_v17 = vpop.eup %6080  ;;  %v2351_v8 = vpop.xlane.xlu0 %2350 }
 0x558   : > { %v5456_v59 = vpop.f32.mrb[52].mxu1  ;;  %v6083_v12 = vpop.eup %6082  ;;  %v3246_v25 = vmul.f32 %v7755_v50, %v6081_v17  ;;  %v7888_v50 = vld [vmem:[%s8666_s1 + $0xc0] sm:$0xff]  ;;  %6104 = vrcp.f32 %v2351_v8 }
 0x559   : > { %v3282_v43 = vmul.f32 %v5456_v59, %v3218_v23  ;;  %v5511_v62 = vpop.f32.mrb[62].mxu0  ;;  %v2793_v37 = vpop.f32.mrb[53].mxu1  ;;  %v3245_v49 = vmul.f32 %v7763_v52, %v6083_v12  ;;  %6106 = vrcp.f32 %v7830_v24 }
 0x55a   : > { %v3308_v60 = vmul.f32 %v5511_v62, %v3244_v48  ;;  %v3281_v11 = vmul.f32 %v3217_v10, %v2793_v37  ;;  %v3108_v18 = vpop.f32.mrb[63].mxu0  ;;  %v6085_v44 = vpop.eup %6084  ;;  %6108 = vrcp.f32 %v7842_v28 }
 0x55b   : > { %v7846_v9 = vadd.f32 %v7701_v6, %v3282_v43  ;;  %v3307_v22 = vmul.f32 %v3243_v0, %v3108_v18  ;;  %v7864_v6 = vld [vmem:[%s8666_s1 + $0xb0] sm:$0xff]  ;;  %v6087_v10 = vpop.eup %6086 }
 0x55c   : > { %v7856_v39 = vadd.f32 %v3308_v60, %v7732_v3  ;;  %v7859_v7 = vadd.f32 %v7712_v57, %v3281_v11  ;;  %v5459_v41 = vpop.f32.mrb[54].mxu1  ;;  %v3219_v29 = vmul.f32 %v7864_v6, %v6077_v46  ;;  %v6089_v46 = vpop.eup %6088 }
 0x55d   : > { %v7868_v4 = vadd.f32 %v3307_v22, %v7735_v26  ;;  %v3284_v47 = vmul.f32 %v5459_v41, %v3220_v16  ;;  %v2803_v2 = vpop.f32.mrb[55].mxu1  ;;  %v3222_v26 = vmul.f32 %v7880_v14, %v6079_v55  ;;  %v6091_v37 = vpop.eup %6090  ;;  %v7915_v55 = vld [vmem:[%s8666_s1 + $0xd0] sm:$0xff] }
 0x55e   : > { %v3283_v3 = vmul.f32 %v3219_v29, %v2803_v2  ;;  %v6093_v0 = vpop.eup %6092  ;;  %v2360_v60 = vpop.xlane.xlu1 %2359  ;;  %v3247_v1 = vmul.f32 %v7787_v38, %v6091_v37 }
 0x55f   : > { %v7871_v57 = vadd.f32 %v7724_v36, %v3284_v47  ;;  %v2357_v11 = vpop.xlane.xlu0 %2356  ;;  %v6095_v29 = vpop.eup %6094  ;;  %6110 = vrcp.f32 %v2360_v60 }
 0x560   : > { %v7875_v19 = vadd.f32 %v7730_v35, %v3283_v3  ;;  %v3221_v35 = vmul.f32 %v7888_v50, %v6085_v44  ;;  %v6097_v47 = vpop.eup %6096  ;;  %6112 = vrcp.f32 %v2357_v11 }
 0x561   : > { %v5514_v51 = vpop.f32.mrb[64].mxu0  ;;  %v6099_v32 = vpop.eup %6098 }
 0x562   : > { %v5462_v36 = vpop.f32.mrb[56].mxu1  ;;  %v3310_v30 = vmul.f32 %v5514_v51, %v3246_v25  ;;  %v3118_v23 = vpop.f32.mrb[65].mxu0  ;;  %v3249_v28 = vmul.f32 %v7836_v40, %v6099_v32 }
 0x563   : > { %v3286_v58 = vmul.f32 %v5462_v36, %v3222_v26  ;;  %v2813_v59 = vpop.f32.mrb[57].mxu1  ;;  %v3309_v48 = vmul.f32 %v3245_v49, %v3118_v23  ;;  %v2366_v2 = vpop.xlane.xlu1 %2365  ;;  %v7941_v49 = vld [vmem:[%s8666_s1 + $0xe0] sm:$0xff] }
 0x564   : > { %v7894_v52 = vadd.f32 %v7747_v27, %v3310_v30  ;;  %v3285_v34 = vmul.f32 %v3221_v35, %v2813_v59  ;;  %v3248_v27 = vmul.f32 %v7775_v54, %v6089_v46  ;;  %v3223_v54 = vmul.f32 %v7915_v55, %v6093_v0  ;;  %v2363_v25 = vpop.xlane.xlu0 %2362  ;;  %v6101_v26 = vpop.eup %6100 }
 0x565   : > { %v3358_v43 = vadd.f32 %v7770_v53, %v3286_v58  ;;  %v7899_v62 = vadd.f32 %v7750_v56, %v3309_v48  ;;  %v3224_v56 = vmul.f32 %v7908_v20, %v6087_v10  ;;  %v6103_v59 = vpop.eup %6102  ;;  %6114 = vrcp.f32 %v2366_v2 }
 0x566   : > { %v3357_v61 = vadd.f32 %v7782_v13, %v3285_v34  ;;  %v6105_v34 = vpop.eup %6104  ;;  %6116 = vrcp.f32 %v2363_v25  ;;  %v3252_v60 = vmul.f32 %v7851_v15, %v6103_v59 }
 0x567   : > { %v2372_v30 = vpop.xlane.xlu1 %2371  ;;  %v6107_v37 = vpop.eup %6106 }
 0x568   : > { %5544 = vmatprep.mubr.msk.f32.mxu0 %vm494_vm0, %v3357_v61  ;;  %v2369_v48 = vpop.xlane.xlu0 %2368  ;;  %v6109_v0 = vpop.eup %6108  ;;  %6118 = vrcp.f32 %v2372_v30 }
 0x569   : > { %5545 = vmatmul.mubr.msk.f32.vlgmr.msra.gmra.mrb[80].mxu0 %vm494_vm0, %v3358_v43  ;;  %v5517_v53 = vpop.f32.mrb[66].mxu0  ;;  %6120 = vrcp.f32 %v2369_v48 }
 0x56a   : > { %v5465_v13 = vpop.f32.mrb[58].mxu1  ;;  %v3312_v18 = vmul.f32 %v5517_v53, %v3248_v27  ;;  %v3128_v22 = vpop.f32.mrb[67].mxu0 }
 0x56b   : > { %v3288_v16 = vmul.f32 %v5465_v13, %v3224_v56  ;;  %v2823_v17 = vpop.f32.mrb[59].mxu1  ;;  %v3311_v41 = vmul.f32 %v3247_v1, %v3128_v22  ;;  %v2378_v27 = vpop.xlane.xlu1 %2377 }
 0x56c   : > { %v7920_v38 = vadd.f32 %v7807_v5, %v3312_v18  ;;  %v3287_v12 = vmul.f32 %v3223_v54, %v2823_v17  ;;  %v3250_v5 = vmul.f32 %v7827_v33, %v6097_v47  ;;  %v3225_v33 = vmul.f32 %v7941_v49, %v6101_v26  ;;  %v6111_v53 = vpop.eup %6110  ;;  %v2375_v1 = vpop.xlane.xlu0 %2374  ;;  %v6253_v18 = vld [vmem:[%s8666_s1 + $0xf0] sm:$0xff] }
 0x56d   : > { %v3360_v44 = vadd.f32 %v7796_v42, %v3288_v16  ;;  %v7925_v3 = vadd.f32 %v7812_v21, %v3311_v41  ;;  %v7934_v42 = vld [vmem:[%s8666_s1 + $0xe8] sm:$0xff]  ;;  %v6113_v54 = vpop.eup %6112  ;;  %6122 = vrcp.f32 %v2378_v27  ;;  %v3254_v47 = vmul.f32 %v7880_v14, %v6111_v53  ;;  %v6255_v27 = vld [vmem:[%s6371_s19] sm:$0xff] }
 0x56e   : > { %v3359_v8 = vadd.f32 %v7800_v31, %v3287_v12  ;;  %v3226_v21 = vmul.f32 %v7934_v42, %v6095_v29  ;;  %6124 = vrcp.f32 %v2375_v1  ;;  %v3253_v25 = vmul.f32 %v7888_v50, %v6113_v54 }
 0x56f   : > { %v6115_v2 = vpop.eup %6114 }
 0x570   : > { %5547 = vmatprep.mubr.msk.f32.mxu0 %vm494_vm0, %v3359_v8  ;;  %v6117_v8 = vpop.eup %6116 }
 0x571   : > { %5548 = vmatmul.mubr.msk.f32.gmra.mrb[82].mxu0 %vm494_vm0, %v3360_v44  ;;  %v5520_v24 = vpop.f32.mrb[68].mxu0 }
 0x572   : > { %v5468_v31 = vpop.f32.mrb[60].mxu1  ;;  %v3314_v51 = vmul.f32 %v5520_v24, %v3250_v5  ;;  %v3138_v36 = vpop.f32.mrb[69].mxu0 }
 0x573   : > { %v3290_v35 = vmul.f32 %v5468_v31, %v3226_v21  ;;  %v2833_v23 = vpop.f32.mrb[61].mxu1  ;;  %v3313_v58 = vmul.f32 %v3249_v28, %v3138_v36  ;;  %v6119_v21 = vpop.eup %6118 }
 0x574   : > { %v7945_v10 = vadd.f32 %v7819_v45, %v3314_v51  ;;  %v3289_v40 = vmul.f32 %v3225_v33, %v2833_v23  ;;  %v3251_v45 = vmul.f32 %v7864_v6, %v6105_v34  ;;  %v3227_v6 = vmul.f32 %v6253_v18, %v6109_v0  ;;  %v6121_v28 = vpop.eup %6120 }
 0x575   : > { %v3362_v46 = vadd.f32 %v7846_v9, %v3290_v35  ;;  %v7949_v43 = vadd.f32 %v7822_v63, %v3313_v58  ;;  %v6252_v63 = vld [vmem:[%s8666_s1 + $0xf8] sm:$0xff] }
 0x576   : > { %v3361_v61 = vadd.f32 %v7859_v7, %v3289_v40  ;;  %v3228_v9 = vmul.f32 %v6252_v63, %v6107_v37 }
 0x577   : > { %v6123_v36 = vpop.eup %6122 }
 0x578   : > { %5550 = vmatprep.mubr.msk.f32.mxu0 %vm494_vm0, %v3361_v61  ;;  %v5523_v11 = vpop.f32.mrb[70].mxu0  ;;  %v6125_v35 = vpop.eup %6124 }
 0x579   : > { %v3316_v56 = vmul.f32 %v5523_v11, %v3252_v60  ;;  %5551 = vmatmul.mubr.msk.f32.gmra.mrb[84].mxu0 %vm494_vm0, %v3362_v46  ;;  %v3148_v7 = vpop.f32.mrb[71].mxu0  ;;  %v3259_v40 = vmul.f32 %v6253_v18, %v6125_v35  ;;  %v6254_v11 = vld [vmem:[%s6371_s19 + $0x8] sm:$0xff] }
 0x57a   : > { %v5471_v15 = vpop.f32.mrb[62].mxu1  ;;  %v3315_v13 = vmul.f32 %v3251_v45, %v3148_v7 }
 0x57b   : > { %v3356_v22 = vadd.f32 %v7856_v39, %v3316_v56  ;;  %v3292_v16 = vmul.f32 %v5471_v15, %v3228_v9  ;;  %v2843_v17 = vpop.f32.mrb[63].mxu1 }
 0x57c   : > { %v3355_v41 = vadd.f32 %v7868_v4, %v3315_v13  ;;  %v3291_v29 = vmul.f32 %v3227_v6, %v2843_v17  ;;  %v6256_v13 = vld [vmem:[%s6371_s19 + $0x18] sm:$0xff]  ;;  %v6257_v6 = vld [vmem:[%s6371_s19 + $0x10] sm:$0xff] }
 0x57d   : > { %v3364_v12 = vadd.f32 %v7871_v57, %v3292_v16  ;;  %v3256_v57 = vmul.f32 %v7908_v20, %v6115_v2 }
 0x57e   : > { %v3363_v44 = vadd.f32 %v7875_v19, %v3291_v29  ;;  %v5526_v32 = vpop.f32.mrb[72].mxu0  ;;  %v3255_v19 = vmul.f32 %v7915_v55, %v6117_v8 }
 0x57f   : > { %v3318_v26 = vmul.f32 %v5526_v32, %v3254_v47  ;;  %v3158_v39 = vpop.f32.mrb[73].mxu0  ;;  %v6258_v47 = vld [vmem:[%s6371_s19 + $0x28] sm:$0xff] }
 0x580   : > { %v3317_v5 = vmul.f32 %v3253_v25, %v3158_v39  ;;  %5553 = vmatprep.mubr.msk.f32.mxu1 %vm494_vm0, %v3363_v44  ;;  %v6259_v44 = vld [vmem:[%s6371_s19 + $0x20] sm:$0xff] }
 0x581   : > { %v3366_v4 = vadd.f32 %v7894_v52, %v3318_v26  ;;  %5554 = vmatmul.mubr.msk.f32.vlgmr.msra.gmra.mrb[64].mxu1 %vm494_vm0, %v3364_v12  ;;  %v3258_v52 = vmul.f32 %v7934_v42, %v6119_v21 }
 0x582   : > { %v3365_v14 = vadd.f32 %v7899_v62, %v3317_v5  ;;  %v5529_v24 = vpop.f32.mrb[74].mxu0  ;;  %v3257_v62 = vmul.f32 %v7941_v49, %v6121_v28 }
 0x583   : > { %v3320_v50 = vmul.f32 %v5529_v24, %v3256_v57  ;;  %v3168_v31 = vpop.f32.mrb[75].mxu0  ;;  %v6260_v57 = vld [vmem:[%s6371_s19 + $0x38] sm:$0xff] }
 0x584   : > { %v3319_v51 = vmul.f32 %v3255_v19, %v3168_v31  ;;  %5556 = vmatprep.mubr.msk.f32.mxu1 %vm494_vm0, %v3365_v14  ;;  %v6261_v14 = vld [vmem:[%s6371_s19 + $0x30] sm:$0xff] }
 0x585   : > { %v3368_v33 = vadd.f32 %v7920_v38, %v3320_v50  ;;  %5557 = vmatmul.mubr.msk.f32.gmra.mrb[66].mxu1 %vm494_vm0, %v3366_v4  ;;  %v3260_v38 = vmul.f32 %v6252_v63, %v6123_v36 }
 0x586   : > { %v3367_v20 = vadd.f32 %v7925_v3, %v3319_v51  ;;  %v5532_v30 = vpop.f32.mrb[76].mxu0 }
 0x587   : > { %v3322_v55 = vmul.f32 %v5532_v30, %v3258_v52  ;;  %v3178_v23 = vpop.f32.mrb[77].mxu0  ;;  %v6262_v52 = vld [vmem:[%s6371_s19 + $0x48] sm:$0xff] }
 0x588   : > { %v3321_v58 = vmul.f32 %v3257_v62, %v3178_v23  ;;  %5559 = vmatprep.mubr.msk.f32.mxu1 %vm494_vm0, %v3367_v20  ;;  %v6263_v20 = vld [vmem:[%s6371_s19 + $0x40] sm:$0xff] }
 0x589   : > { %v3370_v59 = vadd.f32 %v7945_v10, %v3322_v55  ;;  %5560 = vmatmul.mubr.msk.f32.gmra.mrb[68].mxu1 %vm494_vm0, %v3368_v33  ;;  %v7991_v10 = vld [vmem:[%s8674_s9] ss:$0 sm:$0xff] }
 0x58a   : > { %v3369_v48 = vadd.f32 %v7949_v43, %v3321_v58  ;;  %v5535_v42 = vpop.f32.mrb[78].mxu0 }
 0x58b   : > { %v3324_v3 = vmul.f32 %v5535_v42, %v3260_v38  ;;  %v3188_v34 = vpop.f32.mrb[79].mxu0  ;;  %v6264_v38 = vld [vmem:[%s6371_s19 + $0x58] sm:$0xff]  ;;  %v6265_v42 = vld [vmem:[%s6371_s19 + $0x50] sm:$0xff] }
 0x58c   : > { %v3323_v49 = vmul.f32 %v3259_v40, %v3188_v34  ;;  %5562 = vmatprep.mubr.msk.f32.mxu1 %vm494_vm0, %v3369_v48 }
 0x58d   : > { %v3372_v46 = vadd.f32 %v3356_v22, %v3324_v3  ;;  %5563 = vmatmul.mubr.msk.f32.gmra.mrb[70].mxu1 %vm494_vm0, %v3370_v59 }
 0x58e   : > { %v3371_v37 = vadd.f32 %v3355_v41, %v3323_v49 }
 0x590   : > { %5565 = vmatprep.mubr.msk.f32.mxu1 %vm494_vm0, %v3371_v37 }
 0x591   : > { %5566 = vmatmul.mubr.msk.f32.gmra.mrb[72].mxu1 %vm494_vm0, %v3372_v46 }
 0x63c   : > { %v5546_v43 = vpop.f32.mrb[80].mxu0 }
 0x63d   : > { %v3504_v61 = vadd.f32 %v5546_v43, %v7991_v10  ;;  %v3498_v0 = vpop.f32.mrb[81].mxu0 }
 0x63e   : > { %v3499_v60 = vadd.f32 %v7991_v10, %v3498_v0 }
 0x63f   : > { %v7996_v45 = vadd.f32 %v6254_v11, %v3504_v61  ;;  %v6266_v61 = vld [vmem:[%s6371_s19 + $0x68] sm:$0xff] }
 0x640   : > { %v7999_v56 = vadd.f32 %v6255_v27, %v3499_v60  ;;  %v6267_v60 = vld [vmem:[%s6371_s19 + $0x60] sm:$0xff] }
 0x641   : > { %v3598_v63 = vsel %vm494_vm0, %v7996_v45, 0.0 }
 0x642   : > { %3599 = vadd.xlane.f32.xlu1 %v3598_v63  ;;  %v3595_v9 = vsel %vm494_vm0, %v7999_v56, 0.0 }
 0x643   : > { %3596 = vadd.xlane.f32.xlu0 %v3595_v9 }
 0x644   : > { %v5549_v7 = vpop.f32.mrb[82].mxu0 }
 0x645   : > { %v3514_v53 = vadd.f32 %v5549_v7, %v7991_v10  ;;  %v3508_v1 = vpop.f32.mrb[83].mxu0 }
 0x646   : > { %v3509_v15 = vadd.f32 %v7991_v10, %v3508_v1 }
 0x647   : > { %v8008_v18 = vadd.f32 %v6256_v13, %v3514_v53 }
 0x648   : > { %v8011_v54 = vadd.f32 %v6257_v6, %v3509_v15  ;;  %v6268_v15 = vld [vmem:[%s6371_s19 + $0x78] sm:$0xff]  ;;  %v6269_v6 = vld [vmem:[%s6371_s19 + $0x70] sm:$0xff]  ;;  %s8612_s19 = scalar_lea.vmem %s8679_s14, %s5006_s16 }
 0x649   : > { %v3604_v22 = vsel %vm494_vm0, %v8008_v18, 0.0 }
 0x64a   : > { %3605 = vadd.xlane.f32.xlu1 %v3604_v22  ;;  %v3601_v16 = vsel %vm494_vm0, %v8011_v54, 0.0 }
 0x64b   : > { %3602 = vadd.xlane.f32.xlu0 %v3601_v16 }
 0x64c   : > { %v5552_v17 = vpop.f32.mrb[84].mxu0 }
 0x64d   : > { %v3524_v41 = vadd.f32 %v5552_v17, %v7991_v10  ;;  %v3518_v29 = vpop.f32.mrb[85].mxu0 }
 0x64e   : > { %v3519_v12 = vadd.f32 %v7991_v10, %v3518_v29 }
 0x64f   : > { %v8020_v2 = vadd.f32 %v6258_v47, %v3524_v41 }
 0x650   : > { %v8023_v32 = vadd.f32 %v6259_v44, %v3519_v12 }
 0x651   : > { %v3610_v25 = vsel %vm494_vm0, %v8020_v2, 0.0 }
 0x652   : > { %3611 = vadd.xlane.f32.xlu1 %v3610_v25  ;;  %v3607_v8 = vsel %vm494_vm0, %v8023_v32, 0.0 }
 0x653   : > { %3608 = vadd.xlane.f32.xlu0 %v3607_v8 }
 0x654   : > { %v5555_v26 = vpop.f32.mrb[64].mxu1 }
 0x655   : > { %v3534_v39 = vadd.f32 %v5555_v26, %v7991_v10  ;;  %v3528_v5 = vpop.f32.mrb[65].mxu1 }
 0x656   : > { %v3529_v4 = vadd.f32 %v7991_v10, %v3528_v5 }
 0x657   : > { %v8032_v21 = vadd.f32 %v6260_v57, %v3534_v39 }
 0x658   : > { %v8035_v24 = vadd.f32 %v6261_v14, %v3529_v4  ;;  %v5558_v19 = vpop.f32.mrb[66].mxu1 }
 0x659   : > { %v3544_v28 = vadd.f32 %v5558_v19, %v7991_v10  ;;  %v3538_v50 = vpop.f32.mrb[67].mxu1  ;;  %v3616_v31 = vsel %vm494_vm0, %v8032_v21, 0.0 }
 0x65a   : > { %v3539_v51 = vadd.f32 %v7991_v10, %v3538_v50  ;;  %3617 = vadd.xlane.f32.xlu1 %v3616_v31  ;;  %v3613_v33 = vsel %vm494_vm0, %v8035_v24, 0.0 }
 0x65b   : > { %v8044_v36 = vadd.f32 %v6262_v52, %v3544_v28  ;;  %3614 = vadd.xlane.f32.xlu0 %v3613_v33 }
 0x65c   : > { %v8047_v30 = vadd.f32 %v6263_v20, %v3539_v51  ;;  %v5561_v62 = vpop.f32.mrb[68].mxu1 }
 0x65d   : > { %v3554_v35 = vadd.f32 %v5561_v62, %v7991_v10  ;;  %v3548_v55 = vpop.f32.mrb[69].mxu1  ;;  %v3622_v23 = vsel %vm494_vm0, %v8044_v36, 0.0 }
 0x65e   : > { %v3549_v58 = vadd.f32 %v7991_v10, %v3548_v55  ;;  %3623 = vadd.xlane.f32.xlu1 %v3622_v23  ;;  %v3619_v59 = vsel %vm494_vm0, %v8047_v30, 0.0 }
 0x65f   : > { %v8056_v48 = vadd.f32 %v6264_v38, %v3554_v35  ;;  %3620 = vadd.xlane.f32.xlu0 %v3619_v59 }
 0x660   : > { %v8059_v40 = vadd.f32 %v6265_v42, %v3549_v58  ;;  %v5564_v3 = vpop.f32.mrb[70].mxu1 }
 0x661   : > { %v3564_v34 = vadd.f32 %v5564_v3, %v7991_v10  ;;  %v3558_v49 = vpop.f32.mrb[71].mxu1  ;;  %v3628_v46 = vsel %vm494_vm0, %v8056_v48, 0.0 }
 0x662   : > { %8729 = vst [vmem:[#allocation2_spill] sm:$0xff] %v8059_v40  ;;  %v3559_v37 = vadd.f32 %v7991_v10, %v3558_v49  ;;  %3629 = vadd.xlane.f32.xlu1 %v3628_v46  ;;  %v3625_v43 = vsel %vm494_vm0, %v8059_v40, 0.0 }
 0x663   : > { %v8068_v0 = vadd.f32 %v6266_v61, %v3564_v34  ;;  %3626 = vadd.xlane.f32.xlu0 %v3625_v43 }
 0x664   : > { %v8071_v11 = vadd.f32 %v6267_v60, %v3559_v37  ;;  %v5567_v27 = vpop.f32.mrb[72].mxu1 }
 0x665   : > { %8730 = vst [vmem:[#allocation3_spill] sm:$0xff] %v8068_v0  ;;  %v3574_v63 = vadd.f32 %v5567_v27, %v7991_v10  ;;  %v3568_v9 = vpop.f32.mrb[73].mxu1  ;;  %v3634_v7 = vsel %vm494_vm0, %v8068_v0, 0.0 }
 0x666   : > { %8731 = vst [vmem:[#allocation5_spill] sm:$0xff] %v8071_v11  ;;  %v3569_v53 = vadd.f32 %v7991_v10, %v3568_v9  ;;  %3635 = vadd.xlane.f32.xlu1 %v3634_v7  ;;  %v3631_v1 = vsel %vm494_vm0, %v8071_v11, 0.0 }
 0x667   : > { %v8080_v13 = vadd.f32 %v6268_v15, %v3574_v63  ;;  %3632 = vadd.xlane.f32.xlu0 %v3631_v1 }
 0x668   : > { %v8083_v22 = vadd.f32 %v6269_v6, %v3569_v53 }
 0x669   : > { %8732 = vst [vmem:[#allocation4_spill] sm:$0xff] %v8080_v13  ;;  %v3640_v16 = vsel %vm494_vm0, %v8080_v13, 0.0 }
 0x66a   : > { %8733 = vst [vmem:[#allocation7_spill] sm:$0xff] %v8083_v22  ;;  %3641 = vadd.xlane.f32.xlu1 %v3640_v16  ;;  %v3637_v17 = vsel %vm494_vm0, %v8083_v22, 0.0 }
 0x66b   : > { %3638 = vadd.xlane.f32.xlu0 %v3637_v17 }
 0x6cf   : > { %v3600_v10 = vpop.xlane.xlu1 %3599 }
 0x6d0   : > { %v3644_v41 = vmul.f32 0.03125, %v3600_v10  ;;  %v3597_v29 = vpop.xlane.xlu0 %3596 }
 0x6d1   : > { %v3643_v12 = vmul.f32 0.03125, %v3597_v29 }
 0x6d2   : > { %v8090_v47 = vsub.f32 %v7996_v45, %v3644_v41 }
 0x6d3   : > { %v8093_v44 = vsub.f32 %v7999_v56, %v3643_v12 }
 0x6d4   : > { %v3676_v25 = vmul.f32 %v8090_v47, %v8090_v47 }
 0x6d5   : > { %v3675_v8 = vmul.f32 %v8093_v44, %v8093_v44 }
 0x6d6   : > { %v3694_v26 = vsel %vm494_vm0, %v3676_v25, 0.0 }
 0x6d7   : > { %v3606_v39 = vpop.xlane.xlu1 %3605  ;;  %3695 = vadd.xlane.f32.xlu1 %v3694_v26  ;;  %v3691_v5 = vsel %vm494_vm0, %v3675_v8, 0.0  ;;  %v3847_v26 = vld [vmem:[%s8669_s4] sm:$0xff] }
 0x6d8   : > { %v3646_v4 = vmul.f32 0.03125, %v3606_v39  ;;  %3692 = vadd.xlane.f32.xlu0 %v3691_v5  ;;  %v3603_v57 = vpop.xlane.xlu0 %3602  ;;  %v3848_v39 = vld [vmem:[%s8669_s4 + $0x8] sm:$0xff] }
 0x6d9   : > { %v3645_v14 = vmul.f32 0.03125, %v3603_v57 }
 0x6da   : > { %v8102_v19 = vsub.f32 %v8008_v18, %v3646_v4 }
 0x6db   : > { %v8105_v28 = vsub.f32 %v8011_v54, %v3645_v14  ;;  %v5728_v14 = vpack.c.bf16 %v3848_v39, %v3847_v26 }
 0x6dc   : > { %v3678_v50 = vmul.f32 %v8102_v19, %v8102_v19 }
 0x6dd   : > { %v3677_v31 = vmul.f32 %v8105_v28, %v8105_v28  ;;  %5729 = vmatprep.subr.bf16.mxu0 %v5728_v14 }
 0x6de   : > { %v3700_v51 = vsel %vm494_vm0, %v3678_v50, 0.0  ;;  %5731 = vmatpush3.bf16.msra.mxu0 %v5728_v14 }
 0x6df   : > { %v3612_v33 = vpop.xlane.xlu1 %3611  ;;  %3701 = vadd.xlane.f32.xlu1 %v3700_v51  ;;  %v3697_v52 = vsel %vm494_vm0, %v3677_v31, 0.0 }
 0x6e0   : > { %v3648_v20 = vmul.f32 0.03125, %v3612_v33  ;;  %3698 = vadd.xlane.f32.xlu0 %v3697_v52  ;;  %v3609_v62 = vpop.xlane.xlu0 %3608 }
 0x6e1   : > { %v3647_v35 = vmul.f32 0.03125, %v3609_v62 }
 0x6e2   : > { %v8114_v55 = vsub.f32 %v8020_v2, %v3648_v20 }
 0x6e3   : > { %v8117_v23 = vsub.f32 %v8023_v32, %v3647_v35  ;;  %v3849_v35 = vld [vmem:[%s8669_s4 + $0x10] sm:$0xff] }
 0x6e4   : > { %v3680_v58 = vmul.f32 %v8114_v55, %v8114_v55 }
 0x6e5   : > { %v3679_v59 = vmul.f32 %v8117_v23, %v8117_v23 }
 0x6e6   : > { %v3706_v38 = vsel %vm494_vm0, %v3680_v58, 0.0  ;;  %v3850_v58 = vld [vmem:[%s8669_s4 + $0x18] sm:$0xff] }
 0x6e7   : > { %v3618_v42 = vpop.xlane.xlu1 %3617  ;;  %3707 = vadd.xlane.f32.xlu1 %v3706_v38  ;;  %v3703_v3 = vsel %vm494_vm0, %v3679_v59, 0.0 }
 0x6e8   : > { %v3650_v34 = vmul.f32 0.03125, %v3618_v42  ;;  %3704 = vadd.xlane.f32.xlu0 %v3703_v3  ;;  %v3615_v49 = vpop.xlane.xlu0 %3614  ;;  %v5732_v3 = vpack.c.bf16 %v3850_v58, %v3849_v35 }
 0x6e9   : > { %v3649_v46 = vmul.f32 0.03125, %v3615_v49 }
 0x6ea   : > { %v8126_v37 = vsub.f32 %v8032_v21, %v3650_v34  ;;  %5733 = vmatprep.subr.bf16.mxu0 %v5732_v3 }
 0x6eb   : > { %v8129_v43 = vsub.f32 %v8035_v24, %v3649_v46  ;;  %v3624_v61 = vpop.xlane.xlu1 %3623  ;;  %5735 = vmatpush3.bf16.msra.mxu0 %v5732_v3  ;;  %v8207_v3 = vld [vmem:[%s8676_s11] ss:$0 sm:$0xff] }
 0x6ec   : > { %v3652_v60 = vmul.f32 0.03125, %v3624_v61  ;;  %v3621_v27 = vpop.xlane.xlu0 %3620  ;;  %v3682_v63 = vmul.f32 %v8126_v37, %v8126_v37 }
 0x6ed   : > { %v3651_v9 = vmul.f32 0.03125, %v3621_v27  ;;  %v3681_v7 = vmul.f32 %v8129_v43, %v8129_v43 }
 0x6ee   : > { %v8136_v53 = vsub.f32 %v8044_v36, %v3652_v60  ;;  %v3712_v1 = vsel %vm494_vm0, %v3682_v63, 0.0 }
 0x6ef   : > { %v8140_v15 = vsub.f32 %v8047_v30, %v3651_v9  ;;  %v3630_v6 = vpop.xlane.xlu1 %3629  ;;  %3713 = vadd.xlane.f32.xlu1 %v3712_v1  ;;  %v3709_v16 = vsel %vm494_vm0, %v3681_v7, 0.0 }
 0x6f0   : > { %v3654_v17 = vmul.f32 0.03125, %v3630_v6  ;;  %3710 = vadd.xlane.f32.xlu0 %v3709_v16  ;;  %v3627_v10 = vpop.xlane.xlu0 %3626  ;;  %v3684_v41 = vmul.f32 %v8136_v53, %v8136_v53 }
 0x6f1   : > { %v3653_v29 = vmul.f32 0.03125, %v3627_v10  ;;  %v3683_v12 = vmul.f32 %v8140_v15, %v8140_v15 }
 0x6f2   : > { %v8148_v25 = vsub.f32 %v8056_v48, %v3654_v17  ;;  %v3718_v8 = vsel %vm494_vm0, %v3684_v41, 0.0 }
 0x6f3   : > { %v8158_v5 = vsub.f32 %v8059_v40, %v3653_v29  ;;  %v3636_v4 = vpop.xlane.xlu1 %3635  ;;  %3719 = vadd.xlane.f32.xlu1 %v3718_v8  ;;  %v3715_v57 = vsel %vm494_vm0, %v3683_v12, 0.0 }
 0x6f4   : > { %v3656_v50 = vmul.f32 0.03125, %v3636_v4  ;;  %3716 = vadd.xlane.f32.xlu0 %v3715_v57  ;;  %v3633_v31 = vpop.xlane.xlu0 %3632  ;;  %v3686_v51 = vmul.f32 %v8148_v25, %v8148_v25 }
 0x6f5   : > { %v3655_v33 = vmul.f32 0.03125, %v3633_v31  ;;  %v3685_v52 = vmul.f32 %v8158_v5, %v8158_v5 }
 0x6f6   : > { %v8166_v20 = vsub.f32 %v8068_v0, %v3656_v50  ;;  %v3724_v62 = vsel %vm494_vm0, %v3686_v51, 0.0 }
 0x6f7   : > { %v8176_v59 = vsub.f32 %v8071_v11, %v3655_v33  ;;  %3725 = vadd.xlane.f32.xlu1 %v3724_v62  ;;  %v3642_v38 = vpop.xlane.xlu1 %3641  ;;  %v3721_v42 = vsel %vm494_vm0, %v3685_v52, 0.0  ;;  %v8200_v33 = vld [vmem:[%s8675_s10] ss:$0 sm:$0xff] }
 0x6f8   : > { %v3658_v34 = vmul.f32 0.03125, %v3642_v38  ;;  %3722 = vadd.xlane.f32.xlu0 %v3721_v42  ;;  %v3639_v49 = vpop.xlane.xlu0 %3638  ;;  %v3688_v46 = vmul.f32 %v8166_v20, %v8166_v20 }
 0x6f9   : > { %v3657_v61 = vmul.f32 0.03125, %v3639_v49  ;;  %v3687_v60 = vmul.f32 %v8176_v59, %v8176_v59 }
 0x6fa   : > { %v8184_v27 = vsub.f32 %v8080_v13, %v3658_v34  ;;  %v3730_v63 = vsel %vm494_vm0, %v3688_v46, 0.0 }
 0x6fb   : > { %v8188_v9 = vsub.f32 %v8083_v22, %v3657_v61  ;;  %3731 = vadd.xlane.f32.xlu1 %v3730_v63  ;;  %v3727_v7 = vsel %vm494_vm0, %v3687_v60, 0.0 }
 0x6fc   : > { %3728 = vadd.xlane.f32.xlu0 %v3727_v7  ;;  %v3690_v1 = vmul.f32 %v8184_v27, %v8184_v27 }
 0x6fd   : > { %v3689_v6 = vmul.f32 %v8188_v9, %v8188_v9 }
 0x6fe   : > { %v3736_v16 = vsel %vm494_vm0, %v3690_v1, 0.0 }
 0x6ff   : > { %3737 = vadd.xlane.f32.xlu1 %v3736_v16  ;;  %v3733_v17 = vsel %vm494_vm0, %v3689_v6, 0.0 }
 0x700   : > { %3734 = vadd.xlane.f32.xlu0 %v3733_v17 }
 0x764   : > { %v3696_v10 = vpop.xlane.xlu1 %3695 }
 0x765   : > { %v3740_v41 = vmul.f32 0.03125, %v3696_v10  ;;  %v3693_v29 = vpop.xlane.xlu0 %3692 }
 0x766   : > { %v3739_v12 = vmul.f32 0.03125, %v3693_v29 }
 0x767   : > { %v3756_v8 = vadd.f32 1e-05, %v3740_v41 }
 0x768   : > { %v3755_v26 = vadd.f32 1e-05, %v3739_v12 }
 0x769   : > { %6126 = vrsqrt.f32 %v3756_v8 }
 0x76a   : > { %6128 = vrsqrt.f32 %v3755_v26 }
 0x76c   : > { %v3702_v39 = vpop.xlane.xlu1 %3701 }
 0x76d   : > { %v3742_v4 = vmul.f32 0.03125, %v3702_v39  ;;  %v3699_v57 = vpop.xlane.xlu0 %3698 }
 0x76e   : > { %v3741_v14 = vmul.f32 0.03125, %v3699_v57 }
 0x76f   : > { %v3758_v50 = vadd.f32 1e-05, %v3742_v4 }
 0x770   : > { %v3757_v31 = vadd.f32 1e-05, %v3741_v14 }
 0x771   : > { %6130 = vrsqrt.f32 %v3758_v50 }
 0x772   : > { %6132 = vrsqrt.f32 %v3757_v31 }
 0x773   : > { %v6127_v51 = vpop.eup %6126 }
 0x774   : > { %v6129_v52 = vpop.eup %6128  ;;  %v3788_v62 = vmul.f32 %v6127_v51, %v8090_v47  ;;  %v3708_v35 = vpop.xlane.xlu1 %3707 }
 0x775   : > { %v3744_v58 = vmul.f32 0.03125, %v3708_v35  ;;  %v3705_v38 = vpop.xlane.xlu0 %3704  ;;  %v3787_v42 = vmul.f32 %v6129_v52, %v8093_v44 }
 0x776   : > { %v3810_v34 = vmul.f32 %v8200_v33, %v3788_v62  ;;  %v3743_v49 = vmul.f32 0.03125, %v3705_v38 }
 0x777   : > { %v3760_v46 = vadd.f32 1e-05, %v3744_v58  ;;  %v3809_v61 = vmul.f32 %v8200_v33, %v3787_v42 }
 0x778   : > { %v3759_v60 = vadd.f32 1e-05, %v3743_v49  ;;  %v3832_v63 = vadd.f32 %v8207_v3, %v3810_v34 }
 0x779   : > { %6134 = vrsqrt.f32 %v3760_v46  ;;  %v3831_v47 = vadd.f32 %v8207_v3, %v3809_v61 }
 0x77a   : > { %6136 = vrsqrt.f32 %v3759_v60 }
 0x77b   : > { %v6131_v7 = vpop.eup %6130  ;;  %5576 = vmatprep.mubr.msk.f32.mxu0 %vm494_vm0, %v3831_v47 }
 0x77c   : > { %v6133_v44 = vpop.eup %6132  ;;  %v3714_v1 = vpop.xlane.xlu1 %3713  ;;  %5577 = vmatmul.mubr.msk.f32.vlgmr.msra.gmra.mrb[86].mxu0 %vm494_vm0, %v3832_v63  ;;  %v3790_v6 = vmul.f32 %v6131_v7, %v8102_v19 }
 0x77d   : > { %v3746_v16 = vmul.f32 0.03125, %v3714_v1  ;;  %v3711_v17 = vpop.xlane.xlu0 %3710  ;;  %v3789_v10 = vmul.f32 %v6133_v44, %v8105_v28 }
 0x77e   : > { %v3745_v41 = vmul.f32 0.03125, %v3711_v17  ;;  %v3812_v29 = vmul.f32 %v8200_v33, %v3790_v6 }
 0x77f   : > { %v3762_v12 = vadd.f32 1e-05, %v3746_v16  ;;  %v3811_v8 = vmul.f32 %v8200_v33, %v3789_v10 }
 0x780   : > { %v3761_v26 = vadd.f32 1e-05, %v3745_v41  ;;  %v3720_v39 = vpop.xlane.xlu1 %3719  ;;  %v3834_v19 = vadd.f32 %v8207_v3, %v3812_v29 }
 0x781   : > { %6138 = vrsqrt.f32 %v3762_v12  ;;  %v3748_v4 = vmul.f32 0.03125, %v3720_v39  ;;  %v3717_v57 = vpop.xlane.xlu0 %3716  ;;  %v3833_v14 = vadd.f32 %v8207_v3, %v3811_v8 }
 0x782   : > { %6140 = vrsqrt.f32 %v3761_v26  ;;  %v3747_v50 = vmul.f32 0.03125, %v3717_v57 }
 0x783   : > { %v6135_v31 = vpop.eup %6134  ;;  %v3764_v51 = vadd.f32 1e-05, %v3748_v4  ;;  %5579 = vmatprep.mubr.msk.f32.mxu0 %vm494_vm0, %v3833_v14 }
 0x784   : > { %v6137_v28 = vpop.eup %6136  ;;  %v3763_v52 = vadd.f32 1e-05, %v3747_v50  ;;  %v3726_v62 = vpop.xlane.xlu1 %3725  ;;  %5580 = vmatmul.mubr.msk.f32.gmra.mrb[88].mxu0 %vm494_vm0, %v3834_v19  ;;  %v3792_v35 = vmul.f32 %v6135_v31, %v8114_v55 }
 0x785   : > { %6142 = vrsqrt.f32 %v3764_v51  ;;  %v3750_v58 = vmul.f32 0.03125, %v3726_v62  ;;  %v3723_v38 = vpop.xlane.xlu0 %3722  ;;  %v3791_v42 = vmul.f32 %v6137_v28, %v8117_v23 }
 0x786   : > { %6144 = vrsqrt.f32 %v3763_v52  ;;  %v3749_v34 = vmul.f32 0.03125, %v3723_v38  ;;  %v3814_v49 = vmul.f32 %v8200_v33, %v3792_v35 }
 0x787   : > { %v3766_v46 = vadd.f32 1e-05, %v3750_v58  ;;  %v3813_v61 = vmul.f32 %v8200_v33, %v3791_v42 }
 0x788   : > { %v3765_v60 = vadd.f32 1e-05, %v3749_v34  ;;  %v3732_v47 = vpop.xlane.xlu1 %3731  ;;  %v3836_v1 = vadd.f32 %v8207_v3, %v3814_v49 }
 0x789   : > { %6146 = vrsqrt.f32 %v3766_v46  ;;  %v3752_v63 = vmul.f32 0.03125, %v3732_v47  ;;  %v3729_v7 = vpop.xlane.xlu0 %3728  ;;  %v3835_v44 = vadd.f32 %v8207_v3, %v3813_v61 }
 0x78a   : > { %6148 = vrsqrt.f32 %v3765_v60  ;;  %v3751_v55 = vmul.f32 0.03125, %v3729_v7 }
 0x78b   : > { %v6139_v6 = vpop.eup %6138  ;;  %v3768_v23 = vadd.f32 1e-05, %v3752_v63  ;;  %5582 = vmatprep.mubr.msk.f32.mxu0 %vm494_vm0, %v3835_v44 }
 0x78c   : > { %v6141_v16 = vpop.eup %6140  ;;  %v3767_v17 = vadd.f32 1e-05, %v3751_v55  ;;  %v3738_v10 = vpop.xlane.xlu1 %3737  ;;  %5583 = vmatmul.mubr.msk.f32.gmra.mrb[90].mxu0 %vm494_vm0, %v3836_v1  ;;  %v3794_v41 = vmul.f32 %v6139_v6, %v8126_v37 }
 0x78d   : > { %6150 = vrsqrt.f32 %v3768_v23  ;;  %v3754_v29 = vmul.f32 0.03125, %v3738_v10  ;;  %v3735_v12 = vpop.xlane.xlu0 %3734  ;;  %v3793_v8 = vmul.f32 %v6141_v16, %v8129_v43 }
 0x78e   : > { %6152 = vrsqrt.f32 %v3767_v17  ;;  %v3753_v26 = vmul.f32 0.03125, %v3735_v12  ;;  %v3816_v39 = vmul.f32 %v8200_v33, %v3794_v41 }
 0x78f   : > { %v6143_v4 = vpop.eup %6142  ;;  %v3770_v57 = vadd.f32 1e-05, %v3754_v29  ;;  %v3815_v14 = vmul.f32 %v8200_v33, %v3793_v8  ;;  %v8286_v29 = vld [vmem:[%s8677_s12] ss:$0 sm:$0xff] }
 0x790   : > { %v6145_v50 = vpop.eup %6144  ;;  %v3769_v19 = vadd.f32 1e-05, %v3753_v26  ;;  %v3796_v31 = vmul.f32 %v6143_v4, %v8136_v53  ;;  %v3838_v43 = vadd.f32 %v8207_v3, %v3816_v39 }
 0x791   : > { %6154 = vrsqrt.f32 %v3770_v57  ;;  %v3837_v37 = vadd.f32 %v8207_v3, %v3815_v14  ;;  %v3795_v51 = vmul.f32 %v6145_v50, %v8140_v15 }
 0x792   : > { %6156 = vrsqrt.f32 %v3769_v19  ;;  %v3818_v28 = vmul.f32 %v8200_v33, %v3796_v31 }
 0x793   : > { %v6147_v52 = vpop.eup %6146  ;;  %5585 = vmatprep.mubr.msk.f32.mxu0 %vm494_vm0, %v3837_v37  ;;  %v3817_v62 = vmul.f32 %v8200_v33, %v3795_v51 }
 0x794   : > { %v6149_v35 = vpop.eup %6148  ;;  %5586 = vmatmul.mubr.msk.f32.gmra.mrb[92].mxu0 %vm494_vm0, %v3838_v43  ;;  %v3798_v53 = vmul.f32 %v6147_v52, %v8148_v25  ;;  %v3840_v15 = vadd.f32 %v8207_v3, %v3818_v28 }
 0x795   : > { %v3839_v58 = vadd.f32 %v8207_v3, %v3817_v62  ;;  %v3797_v38 = vmul.f32 %v6149_v35, %v8158_v5 }
 0x796   : > { %v3820_v42 = vmul.f32 %v8200_v33, %v3798_v53 }
 0x797   : > { %v6151_v34 = vpop.eup %6150  ;;  %5588 = vmatprep.mubr.msk.f32.mxu0 %vm494_vm0, %v3839_v58  ;;  %v3819_v49 = vmul.f32 %v8200_v33, %v3797_v38 }
 0x798   : > { %v6153_v46 = vpop.eup %6152  ;;  %5589 = vmatmul.mubr.msk.f32.gmra.mrb[94].mxu0 %vm494_vm0, %v3840_v15  ;;  %v3800_v61 = vmul.f32 %v6151_v34, %v8166_v20  ;;  %v3842_v5 = vadd.f32 %v8207_v3, %v3820_v42 }
 0x799   : > { %v3841_v25 = vadd.f32 %v8207_v3, %v3819_v49  ;;  %v3799_v60 = vmul.f32 %v6153_v46, %v8176_v59 }
 0x79a   : > { %v3822_v47 = vmul.f32 %v8200_v33, %v3800_v61 }
 0x79b   : > { %v6155_v63 = vpop.eup %6154  ;;  %5591 = vmatprep.mubr.msk.f32.mxu0 %vm494_vm0, %v3841_v25  ;;  %v3821_v7 = vmul.f32 %v8200_v33, %v3799_v60 }
 0x79c   : > { %v6157_v44 = vpop.eup %6156  ;;  %5592 = vmatmul.mubr.msk.f32.gmra.mrb[96].mxu0 %vm494_vm0, %v3842_v5  ;;  %v3802_v55 = vmul.f32 %v6155_v63, %v8184_v27  ;;  %v3844_v59 = vadd.f32 %v8207_v3, %v3822_v47  ;;  %v4483_v27 = vld [vmem:[%s8670_s5] sm:$0xff] }
 0x79d   : > { %v3843_v20 = vadd.f32 %v8207_v3, %v3821_v7  ;;  %v3801_v1 = vmul.f32 %v6157_v44, %v8188_v9  ;;  %v4484_v9 = vld [vmem:[%s8670_s5 + $0x8] sm:$0xff] }
 0x79e   : > { %v3824_v6 = vmul.f32 %v8200_v33, %v3802_v55  ;;  %v5736_v10 = vpack.c.bf16 %v4484_v9, %v4483_v27 }
 0x79f   : > { %5594 = vmatprep.mubr.msk.f32.mxu0 %vm494_vm0, %v3843_v20  ;;  %v3823_v23 = vmul.f32 %v8200_v33, %v3801_v1  ;;  %v4485_v33 = vld [vmem:[%s8670_s5 + $0x10] sm:$0xff] }
 0x7a0   : > { %5595 = vmatmul.mubr.msk.f32.gmra.mrb[98].mxu0 %vm494_vm0, %v3844_v59  ;;  %v3846_v17 = vadd.f32 %v8207_v3, %v3824_v6  ;;  %5737 = vmatprep.subr.bf16.mxu1 %v5736_v10 }
 0x7a1   : > { %v3845_v16 = vadd.f32 %v8207_v3, %v3823_v23  ;;  %5739 = vmatpush3.bf16.msra.mxu1 %v5736_v10  ;;  %v4486_v3 = vld [vmem:[%s8670_s5 + $0x18] sm:$0xff] }
 0x7a2   : > { %v5740_v41 = vpack.c.bf16 %v4486_v3, %v4485_v33 }
 0x7a3   : > { %5597 = vmatprep.mubr.msk.f32.mxu0 %vm494_vm0, %v3845_v16 }
 0x7a4   : > { %5598 = vmatmul.mubr.msk.f32.gmra.mrb[100].mxu0 %vm494_vm0, %v3846_v17  ;;  %5741 = vmatprep.subr.bf16.mxu1 %v5740_v41 }
 0x7a5   : > { %5743 = vmatpush3.bf16.msra.mxu1 %v5740_v41 }
 0x84f   : > { %v5578_v12 = vpop.f32.mrb[86].mxu0 }
 0x850   : > { %v8289_v8 = vadd.f32 %v5578_v12, %v8286_v29  ;;  %v3972_v26 = vpop.f32.mrb[87].mxu0 }
 0x851   : > { %v8292_v39 = vadd.f32 %v8286_v29, %v3972_v26 }
 0x852   : > { %v8295_v4 = vmul.f32 0.70710677, %v8289_v8 }
 0x853   : > { %v8298_v57 = vmul.f32 0.70710677, %v8292_v39 }
 0x854   : > { %v4084_v14 = vand.u32 2147483647, %v8295_v4  ;;  %vm4404_vm3 = vcmp.lt.f32.partialorder %v8295_v4, 0.0 }
 0x855   : > { %v4083_v50 = vand.u32 2147483647, %v8298_v57  ;;  %vm4403_vm4 = vcmp.lt.f32.partialorder %v8298_v57, 0.0 }
 0x856   : > { %v4100_v19 = vmul.f32 0.3275911, %v4084_v14  ;;  %v4308_v35 = vmul.f32 %v4084_v14, %v4084_v14 }
 0x857   : > { %v4099_v31 = vmul.f32 0.3275911, %v4083_v50  ;;  %v5581_v37 = vpop.f32.mrb[88].mxu0  ;;  %v4307_v58 = vmul.f32 %v4083_v50, %v4083_v50 }
 0x858   : > { %v4116_v51 = vadd.f32 1.0, %v4100_v19  ;;  %v8303_v43 = vadd.f32 %v5581_v37, %v8286_v29  ;;  %v3982_v28 = vpop.f32.mrb[89].mxu0  ;;  %v4324_v34 = vsub.f32 0.0, %v4308_v35 }
 0x859   : > { %v4115_v52 = vadd.f32 1.0, %v4099_v31  ;;  %v8306_v62 = vadd.f32 %v8286_v29, %v3982_v28  ;;  %v4323_v61 = vsub.f32 0.0, %v4307_v58 }
 0x85a   : > { %6158 = vrcp.f32 %v4116_v51  ;;  %v8309_v53 = vmul.f32 0.70710677, %v8303_v43  ;;  %v4341_v1 = vmul.f32 1.442695, %v4324_v34 }
 0x85b   : > { %6160 = vrcp.f32 %v4115_v52  ;;  %v8312_v38 = vmul.f32 0.70710677, %v8306_v62  ;;  %v4339_v23 = vmul.f32 1.442695, %v4323_v61 }
 0x85c   : > { %v4086_v15 = vand.u32 2147483647, %v8309_v53  ;;  %vm4406_vm5 = vcmp.lt.f32.partialorder %v8309_v53, 0.0 }
 0x85d   : > { %v4085_v42 = vand.u32 2147483647, %v8312_v38  ;;  %vm4405_vm6 = vcmp.lt.f32.partialorder %v8312_v38, 0.0 }
 0x85e   : > { %v4102_v49 = vmul.f32 0.3275911, %v4086_v15  ;;  %v4310_v46 = vmul.f32 %v4086_v15, %v4086_v15 }
 0x85f   : > { %v4101_v25 = vmul.f32 0.3275911, %v4085_v42  ;;  %v4309_v60 = vmul.f32 %v4085_v42, %v4085_v42  ;;  %v5584_v5 = vpop.f32.mrb[90].mxu0 }
 0x860   : > { %v4118_v47 = vadd.f32 1.0, %v4102_v49  ;;  %v4326_v63 = vsub.f32 0.0, %v4310_v46  ;;  %v8317_v7 = vadd.f32 %v5584_v5, %v8286_v29  ;;  %v3992_v44 = vpop.f32.mrb[91].mxu0  ;;  %v8345_v49 = vmul.f32 0.5, %v8289_v8 }
 0x861   : > { %v4117_v55 = vadd.f32 1.0, %v4101_v25  ;;  %v8320_v20 = vadd.f32 %v8286_v29, %v3992_v44  ;;  %v4325_v59 = vsub.f32 0.0, %v4309_v60  ;;  %v8353_v60 = vmul.f32 0.5, %v8292_v39 }
 0x862   : > { %6162 = vrcp.f32 %v4118_v47  ;;  %v8323_v6 = vmul.f32 0.70710677, %v8317_v7  ;;  %v4345_v27 = vmul.f32 1.442695, %v4326_v63 }
 0x863   : > { %6164 = vrcp.f32 %v4117_v55  ;;  %v8326_v16 = vmul.f32 0.70710677, %v8320_v20  ;;  %v4343_v12 = vmul.f32 1.442695, %v4325_v59 }
 0x864   : > { %v8328_v17 = vpop.eup %6158  ;;  %v4088_v9 = vand.u32 2147483647, %v8323_v6  ;;  %6166 = vpow2.f32 %v4341_v1  ;;  %vm4408_vm7 = vcmp.lt.f32.partialorder %v8323_v6, 0.0 }
 0x865   : > { %v8331_v10 = vpop.eup %6160  ;;  %v4164_v33 = vmul.f32 1.0614054, %v8328_v17  ;;  %v4087_v3 = vand.u32 2147483647, %v8326_v16  ;;  %6168 = vpow2.f32 %v4339_v23  ;;  %vm4407_vm8 = vcmp.lt.f32.partialorder %v8326_v16, 0.0 }
 0x866   : > { %v4163_v41 = vmul.f32 1.0614054, %v8331_v10  ;;  %v4104_v26 = vmul.f32 0.3275911, %v4088_v9  ;;  %6170 = vpow2.f32 %v4345_v27  ;;  %v4312_v35 = vmul.f32 %v4088_v9, %v4088_v9 }
 0x867   : > { %v4180_v14 = vadd.f32 -1.4531521, %v4164_v33  ;;  %v4103_v50 = vmul.f32 0.3275911, %v4087_v3  ;;  %v5587_v19 = vpop.f32.mrb[92].mxu0  ;;  %v4311_v34 = vmul.f32 %v4087_v3, %v4087_v3 }
 0x868   : > { %v4179_v31 = vadd.f32 -1.4531521, %v4163_v41  ;;  %v4120_v37 = vadd.f32 1.0, %v4104_v26  ;;  %v8337_v51 = vadd.f32 %v5587_v19, %v8286_v29  ;;  %v4002_v28 = vpop.f32.mrb[93].mxu0  ;;  %v4328_v1 = vsub.f32 0.0, %v4312_v35 }
 0x869   : > { %v4196_v52 = vmul.f32 %v8328_v17, %v4180_v14  ;;  %v4119_v58 = vadd.f32 1.0, %v4103_v50  ;;  %v8341_v15 = vadd.f32 %v8286_v29, %v4002_v28  ;;  %v4327_v9 = vsub.f32 0.0, %v4311_v34 }
 0x86a   : > { %v4195_v42 = vmul.f32 %v8331_v10, %v4179_v31  ;;  %6172 = vrcp.f32 %v4120_v37  ;;  %v8348_v61 = vmul.f32 0.70710677, %v8337_v51  ;;  %v4349_v22 = vmul.f32 1.442695, %v4328_v1 }
 0x86b   : > { %v4212_v46 = vadd.f32 1.4214138, %v4196_v52  ;;  %6174 = vrcp.f32 %v4119_v58  ;;  %v8356_v47 = vmul.f32 0.70710677, %v8341_v15  ;;  %v8358_v63 = vpop.f32.mrb[94].mxu0 }
 0x86c   : > { %v8350_v25 = vpop.eup %6162  ;;  %v4211_v5 = vadd.f32 1.4214138, %v4195_v42  ;;  %6176 = vpow2.f32 %v4343_v12  ;;  %v4090_v59 = vand.u32 2147483647, %v8348_v61  ;;  %v8365_v23 = vpop.f32.mrb[95].mxu0  ;;  %vm4410_vm9 = vcmp.lt.f32.partialorder %v8348_v61, 0.0 }
 0x86d   : > { %v8360_v44 = vpop.eup %6164  ;;  %v4228_v8 = vmul.f32 %v8328_v17, %v4212_v46  ;;  %v4166_v55 = vmul.f32 1.0614054, %v8350_v25  ;;  %v4089_v33 = vand.u32 2147483647, %v8356_v47  ;;  %vm4409_vm10 = vcmp.lt.f32.partialorder %v8356_v47, 0.0 }
 0x86e   : > { %v4227_v39 = vmul.f32 %v8331_v10, %v4211_v5  ;;  %v4165_v27 = vmul.f32 1.0614054, %v8360_v44  ;;  %v4106_v12 = vmul.f32 0.3275911, %v4090_v59  ;;  %v4314_v26 = vmul.f32 %v4090_v59, %v4090_v59  ;;  %v6167_v14 = vpop.eup %6166 }
 0x86f   : > { %v4244_v3 = vadd.f32 -0.28449672, %v4228_v8  ;;  %v4182_v41 = vadd.f32 -1.4531521, %v4166_v55  ;;  %v4105_v31 = vmul.f32 0.3275911, %v4089_v33  ;;  %v4313_v37 = vmul.f32 %v4089_v33, %v4089_v33  ;;  %v6169_v28 = vpop.eup %6168 }
 0x870   : > { %v4243_v50 = vadd.f32 -0.28449672, %v4227_v39  ;;  %v4181_v19 = vadd.f32 -1.4531521, %v4165_v27  ;;  %v4122_v58 = vadd.f32 1.0, %v4106_v12  ;;  %v4330_v42 = vsub.f32 0.0, %v4314_v26  ;;  %v8374_v34 = vpop.eup %6170 }
 0x871   : > { %v4260_v52 = vmul.f32 %v8328_v17, %v4244_v3  ;;  %v4198_v35 = vmul.f32 %v8350_v25, %v4182_v41  ;;  %v8372_v46 = vpop.f32.mrb[96].mxu0  ;;  %v4121_v55 = vadd.f32 1.0, %v4105_v31  ;;  %v4329_v59 = vsub.f32 0.0, %v4313_v37 }
 0x872   : > { %v4259_v5 = vmul.f32 %v8331_v10, %v4243_v50  ;;  %v4197_v8 = vmul.f32 %v8360_v44, %v4181_v19  ;;  %v8378_v39 = vpop.f32.mrb[97].mxu0  ;;  %6178 = vrcp.f32 %v4122_v58  ;;  %v4347_v26 = vmul.f32 1.442695, %v4327_v9 }
 0x873   : > { %v4276_v27 = vadd.f32 0.2548296, %v4260_v52  ;;  %v4214_v33 = vadd.f32 1.4214138, %v4198_v35  ;;  %6180 = vrcp.f32 %v4121_v55  ;;  %v4353_v1 = vmul.f32 1.442695, %v4330_v42 }
 0x874   : > { %v8380_v3 = vpop.eup %6172  ;;  %v4275_v41 = vadd.f32 0.2548296, %v4259_v5  ;;  %v4213_v12 = vadd.f32 1.4214138, %v4197_v8  ;;  %v8389_v37 = vpop.f32.mrb[98].mxu0  ;;  %6182 = vpow2.f32 %v4349_v22 }
 0x875   : > { %v8383_v13 = vpop.eup %6174  ;;  %v4292_v50 = vmul.f32 %v8328_v17, %v4276_v27  ;;  %v4230_v19 = vmul.f32 %v8350_v25, %v4214_v33  ;;  %v4168_v31 = vmul.f32 1.0614054, %v8380_v3  ;;  %v4351_v5 = vmul.f32 1.442695, %v4329_v59  ;;  %v8394_v8 = vpop.f32.mrb[99].mxu0 }
 0x876   : > { %v6177_v52 = vpop.eup %6176  ;;  %v4291_v35 = vmul.f32 %v8331_v10, %v4275_v41  ;;  %v4229_v58 = vmul.f32 %v8360_v44, %v4213_v12  ;;  %v4167_v9 = vmul.f32 1.0614054, %v8383_v13  ;;  %v8397_v27 = vmul.f32 0.5, %v8306_v62 }
 0x877   : > { %v4372_v17 = vmul.f32 %v6167_v14, %v4292_v50  ;;  %v4246_v55 = vadd.f32 -0.28449672, %v4230_v19  ;;  %v4184_v33 = vadd.f32 -1.4531521, %v4168_v31  ;;  %v8399_v11 = vpop.f32.mrb[100].mxu0  ;;  %v8407_v14 = vadd.f32 %v8358_v63, %v8286_v29 }
 0x878   : > { %v4371_v42 = vmul.f32 %v6169_v28, %v4291_v35  ;;  %v4245_v0 = vadd.f32 -0.28449672, %v4229_v58  ;;  %v4183_v40 = vadd.f32 -1.4531521, %v4167_v9  ;;  %v8401_v10 = vpop.f32.mrb[101].mxu0  ;;  %6184 = vpow2.f32 %v4347_v26 }
 0x879   : > { %v4388_v41 = vsub.f32 1.0, %v4372_v17  ;;  %v4262_v12 = vmul.f32 %v8350_v25, %v4246_v55  ;;  %v4200_v59 = vmul.f32 %v8380_v3, %v4184_v33  ;;  %6186 = vpow2.f32 %v4353_v1 }
 0x87a   : > { %v4387_v62 = vsub.f32 1.0, %v4371_v42  ;;  %v4261_v50 = vmul.f32 %v8360_v44, %v4245_v0  ;;  %v4199_v19 = vmul.f32 %v8383_v13, %v4183_v40  ;;  %6188 = vpow2.f32 %v4351_v5 }
 0x87b   : > { %v4420_v28 = vsub.f32 0.0, %v4388_v41  ;;  %v4278_v22 = vadd.f32 0.2548296, %v4262_v12  ;;  %v4216_v31 = vadd.f32 1.4214138, %v4200_v59 }
 0x87c   : > { %v4419_v35 = vsub.f32 0.0, %v4387_v62  ;;  %v4277_v58 = vadd.f32 0.2548296, %v4261_v50  ;;  %v4215_v9 = vadd.f32 1.4214138, %v4199_v19  ;;  %v8412_v17 = vpop.eup %6178 }
 0x87d   : > { %v4436_v63 = vsel %vm4404_vm3, %v4420_v28, %v4388_v41  ;;  %v4294_v0 = vmul.f32 %v8350_v25, %v4278_v22  ;;  %v4232_v40 = vmul.f32 %v8380_v3, %v4216_v31  ;;  %v8420_v26 = vmul.f32 0.70710677, %v8407_v14  ;;  %v8422_v1 = vpop.eup %6180 }
 0x87e   : > { %v4452_v55 = vadd.f32 1.0, %v4436_v63  ;;  %v4435_v5 = vsel %vm4403_vm4, %v4419_v35, %v4387_v62  ;;  %v4293_v33 = vmul.f32 %v8360_v44, %v4277_v58  ;;  %v4231_v4 = vmul.f32 %v8383_v13, %v4215_v9  ;;  %v6183_v31 = vpop.eup %6182 }
 0x87f   : > { %v4451_v42 = vadd.f32 1.0, %v4435_v5  ;;  %v4374_v25 = vmul.f32 %v8374_v34, %v4294_v0  ;;  %v4248_v41 = vadd.f32 -0.28449672, %v4232_v40  ;;  %v4170_v12 = vmul.f32 1.0614054, %v8412_v17 }
 0x880   : > { %v4468_v59 = vmul.f32 %v4452_v55, %v8345_v49  ;;  %v4373_v50 = vmul.f32 %v6177_v52, %v4293_v33  ;;  %v4247_v19 = vadd.f32 -0.28449672, %v4231_v4  ;;  %v4169_v28 = vmul.f32 1.0614054, %v8422_v1 }
 0x881   : > { %v4467_v22 = vmul.f32 %v4451_v42, %v8353_v60  ;;  %v4390_v57 = vsub.f32 1.0, %v4374_v25  ;;  %v4264_v62 = vmul.f32 %v8380_v3, %v4248_v41  ;;  %v4186_v44 = vadd.f32 -1.4531521, %v4170_v12 }
 0x882   : > { %v4389_v35 = vsub.f32 1.0, %v4373_v50  ;;  %v4263_v58 = vmul.f32 %v8383_v13, %v4247_v19  ;;  %v4185_v34 = vadd.f32 -1.4531521, %v4169_v28  ;;  %v4092_v9 = vand.u32 2147483647, %v8420_v26  ;;  %v6185_v60 = vpop.eup %6184 }
 0x883   : > { %v4422_v63 = vsub.f32 0.0, %v4390_v57  ;;  %v4280_v0 = vadd.f32 0.2548296, %v4264_v62  ;;  %v4202_v49 = vmul.f32 %v8412_v17, %v4186_v44  ;;  %v8439_v52 = vadd.f32 %v8286_v29, %v8365_v23  ;;  %5608 = vmatprep.mubr.msk.f32.mxu1 %vm494_vm0, %v4467_v22  ;;  %v6187_v4 = vpop.eup %6186 }
 0x884   : > { %v4421_v40 = vsub.f32 0.0, %v4389_v35  ;;  %v4279_v55 = vadd.f32 0.2548296, %v4263_v58  ;;  %v4201_v5 = vmul.f32 %v8422_v1, %v4185_v34  ;;  %v4108_v33 = vmul.f32 0.3275911, %v4092_v9  ;;  %5609 = vmatmul.mubr.msk.f32.vlgmr.msra.gmra.mrb[74].mxu1 %vm494_vm0, %v4468_v59  ;;  %v6189_v12 = vpop.eup %6188 }
 0x885   : > { %v4438_v42 = vsel %vm4406_vm5, %v4422_v63, %v4390_v57  ;;  %v4296_v25 = vmul.f32 %v8380_v3, %v4280_v0  ;;  %v4218_v41 = vadd.f32 1.4214138, %v4202_v49  ;;  %v8449_v23 = vadd.f32 %v8372_v46, %v8286_v29 }
 0x886   : > { %v4454_v50 = vadd.f32 1.0, %v4438_v42  ;;  %v4437_v19 = vsel %vm4405_vm6, %v4421_v40, %v4389_v35  ;;  %v4295_v28 = vmul.f32 %v8383_v13, %v4279_v55  ;;  %v4217_v22 = vadd.f32 1.4214138, %v4201_v5 }
 0x887   : > { %v4453_v59 = vadd.f32 1.0, %v4437_v19  ;;  %v4376_v62 = vmul.f32 %v6183_v31, %v4296_v25  ;;  %v4234_v53 = vmul.f32 %v8412_v17, %v4218_v41  ;;  %v4124_v57 = vadd.f32 1.0, %v4108_v33 }
 0x888   : > { %v4054_v3 = vmul.f32 0.5, %v8303_v43  ;;  %v4375_v44 = vmul.f32 %v6185_v60, %v4295_v28  ;;  %v4233_v58 = vmul.f32 %v8422_v1, %v4217_v22  ;;  %v8460_v31 = vmul.f32 0.70710677, %v8439_v52 }
 0x889   : > { %v4469_v46 = vmul.f32 %v4453_v59, %v8397_v27  ;;  %v4392_v34 = vsub.f32 1.0, %v4376_v62  ;;  %v4250_v63 = vadd.f32 -0.28449672, %v4234_v53  ;;  %6190 = vrcp.f32 %v4124_v57 }
 0x88a   : > { %v4470_v38 = vmul.f32 %v4454_v50, %v4054_v3  ;;  %v4391_v35 = vsub.f32 1.0, %v4375_v44  ;;  %v4249_v0 = vadd.f32 -0.28449672, %v4233_v58  ;;  %v8463_v40 = vmul.f32 0.70710677, %v8449_v23 }
 0x88b   : > { %v4424_v13 = vsub.f32 0.0, %v4392_v34  ;;  %v4266_v49 = vmul.f32 %v8412_v17, %v4250_v63  ;;  %5611 = vmatprep.mubr.msk.f32.mxu1 %vm494_vm0, %v4469_v46  ;;  %v4055_v43 = vmul.f32 0.5, %v8320_v20  ;;  %v4091_v33 = vand.u32 2147483647, %v8460_v31 }
 0x88c   : > { %v4423_v27 = vsub.f32 0.0, %v4391_v35  ;;  %v4265_v60 = vmul.f32 %v8422_v1, %v4249_v0  ;;  %5612 = vmatmul.mubr.msk.f32.gmra.mrb[76].mxu1 %vm494_vm0, %v4470_v38  ;;  %v4094_v50 = vand.u32 2147483647, %v8463_v40  ;;  %v4316_v20 = vmul.f32 %v4092_v9, %v4092_v9 }
 0x88d   : > { %v4440_v55 = vsel %vm4408_vm7, %v4424_v13, %v4392_v34  ;;  %v4282_v5 = vadd.f32 0.2548296, %v4266_v49  ;;  %v4107_v28 = vmul.f32 0.3275911, %v4091_v33  ;;  %v4056_v22 = vmul.f32 0.5, %v8317_v7 }
 0x88e   : > { %v4456_v42 = vadd.f32 1.0, %v4440_v55  ;;  %v4439_v25 = vsel %vm4407_vm8, %v4423_v27, %v4391_v35  ;;  %v4281_v41 = vadd.f32 0.2548296, %v4265_v60  ;;  %v4110_v62 = vmul.f32 0.3275911, %v4094_v50 }
 0x88f   : > { %v4455_v19 = vadd.f32 1.0, %v4439_v25  ;;  %v4298_v6 = vmul.f32 %v8412_v17, %v4282_v5  ;;  %v4123_v57 = vadd.f32 1.0, %v4107_v28  ;;  %v8478_v3 = vadd.f32 %v8286_v29, %v8378_v39 }
 0x890   : > { %v4297_v59 = vmul.f32 %v8422_v1, %v4281_v41  ;;  %v4472_v44 = vmul.f32 %v4456_v42, %v4056_v22  ;;  %v4126_v46 = vadd.f32 1.0, %v4110_v62  ;;  %v4332_v9 = vsub.f32 0.0, %v4316_v20 }
 0x891   : > { %v4471_v53 = vmul.f32 %v4455_v19, %v4055_v43  ;;  %v4378_v16 = vmul.f32 %v6187_v4, %v4298_v6  ;;  %6192 = vrcp.f32 %v4123_v57  ;;  %v4057_v39 = vmul.f32 0.5, %v8341_v15 }
 0x892   : > { %v4377_v58 = vmul.f32 %v6189_v12, %v4297_v59  ;;  %6194 = vrcp.f32 %v4126_v46  ;;  %v8487_v63 = vmul.f32 0.70710677, %v8478_v3  ;;  %v8491_v12 = vadd.f32 %v8389_v37, %v8286_v29 }
 0x893   : > { %v8480_v34 = vpop.eup %6190  ;;  %v4394_v17 = vsub.f32 1.0, %v4378_v16  ;;  %5614 = vmatprep.mubr.msk.f32.mxu1 %vm494_vm0, %v4471_v53  ;;  %v4357_v13 = vmul.f32 1.442695, %v4332_v9  ;;  %v8498_v15 = vadd.f32 %v8286_v29, %v8394_v8  ;;  %v4315_v55 = vmul.f32 %v4091_v33, %v4091_v33 }
 0x894   : > { %v4393_v7 = vsub.f32 1.0, %v4377_v58  ;;  %v4172_v1 = vmul.f32 1.0614054, %v8480_v34  ;;  %5615 = vmatmul.mubr.msk.f32.gmra.mrb[78].mxu1 %vm494_vm0, %v4472_v44  ;;  %v4093_v49 = vand.u32 2147483647, %v8487_v63  ;;  %v4318_v47 = vmul.f32 %v4094_v50, %v4094_v50 }
 0x895   : > { %v4426_v4 = vsub.f32 0.0, %v4394_v17  ;;  %v8502_v37 = vmul.f32 0.70710677, %v8491_v12  ;;  %v4058_v42 = vmul.f32 0.5, %v8337_v51  ;;  %v8507_v8 = vmul.f32 0.70710677, %v8498_v15 }
 0x896   : > { %v4425_v38 = vsub.f32 0.0, %v4393_v7  ;;  %v4188_v35 = vadd.f32 -1.4531521, %v4172_v1  ;;  %v4109_v5 = vmul.f32 0.3275911, %v4093_v49  ;;  %6196 = vpow2.f32 %v4357_v13 }
 0x897   : > { %v4442_v0 = vsel %vm4410_vm9, %v4426_v4, %v4394_v17  ;;  %v4096_v41 = vand.u32 2147483647, %v8502_v37  ;;  %v4331_v33 = vsub.f32 0.0, %v4315_v55  ;;  %v4334_v50 = vsub.f32 0.0, %v4318_v47 }
 0x898   : > { %v4458_v43 = vadd.f32 1.0, %v4442_v0  ;;  %v4441_v27 = vsel %vm4409_vm10, %v4425_v38, %v4393_v7  ;;  %v4204_v60 = vmul.f32 %v8480_v34, %v4188_v35  ;;  %v4125_v6 = vadd.f32 1.0, %v4109_v5 }
 0x899   : > { %v4457_v61 = vadd.f32 1.0, %v4441_v27  ;;  %v4112_v22 = vmul.f32 0.3275911, %v4096_v41  ;;  %v4095_v51 = vand.u32 2147483647, %v8507_v8  ;;  %v8519_v44 = vadd.f32 %v8399_v11, %v8286_v29 }
 0x89a   : > { %v4220_v25 = vadd.f32 1.4214138, %v4204_v60  ;;  %v4474_v20 = vmul.f32 %v4458_v43, %v4058_v42  ;;  %6198 = vrcp.f32 %v4125_v6  ;;  %v4355_v7 = vmul.f32 1.442695, %v4331_v33 }
 0x89b   : > { %v4473_v19 = vmul.f32 %v4457_v61, %v4057_v39  ;;  %v8510_v59 = vpop.eup %6192  ;;  %v4128_v57 = vadd.f32 1.0, %v4112_v22  ;;  %v4111_v46 = vmul.f32 0.3275911, %v4095_v51  ;;  %v4317_v4 = vmul.f32 %v4093_v49, %v4093_v49 }
 0x89c   : > { %v4236_v28 = vmul.f32 %v8480_v34, %v4220_v25  ;;  %v8514_v62 = vpop.eup %6194  ;;  %v4171_v16 = vmul.f32 1.0614054, %v8510_v59  ;;  %v4361_v0 = vmul.f32 1.442695, %v4334_v50  ;;  %v8526_v11 = vmul.f32 0.70710677, %v8519_v44 }
 0x89d   : > { %5617 = vmatprep.mubr.msk.f32.mxu1 %vm494_vm0, %v4473_v19  ;;  %v4174_v58 = vmul.f32 1.0614054, %v8514_v62  ;;  %6200 = vrcp.f32 %v4128_v57  ;;  %v4127_v39 = vadd.f32 1.0, %v4111_v46  ;;  %v8531_v43 = vadd.f32 %v8286_v29, %v8401_v10 }
 0x89e   : > { %v4252_v53 = vadd.f32 -0.28449672, %v4236_v28  ;;  %5618 = vmatmul.mubr.msk.f32.gmra.mrb[80].mxu1 %vm494_vm0, %v4474_v20  ;;  %v4187_v9 = vadd.f32 -1.4531521, %v4171_v16  ;;  %v4320_v61 = vmul.f32 %v4096_v41, %v4096_v41  ;;  %v4098_v49 = vand.u32 2147483647, %v8526_v11 }
 0x89f   : > { %v4190_v1 = vadd.f32 -1.4531521, %v4174_v58  ;;  %6202 = vrcp.f32 %v4127_v39  ;;  %v4333_v47 = vsub.f32 0.0, %v4317_v4  ;;  %v8536_v5 = vmul.f32 0.70710677, %v8531_v43 }
 0x8a0   : > { %v4268_v17 = vmul.f32 %v8480_v34, %v4252_v53  ;;  %v4203_v35 = vmul.f32 %v8510_v59, %v4187_v9  ;;  %6204 = vpow2.f32 %v4355_v7  ;;  %v6197_v42 = vpop.eup %6196  ;;  %v4114_v19 = vmul.f32 0.3275911, %v4098_v49 }
 0x8a1   : > { %v4206_v13 = vmul.f32 %v8514_v62, %v4190_v1  ;;  %6206 = vpow2.f32 %v4361_v0  ;;  %v4336_v28 = vsub.f32 0.0, %v4320_v61  ;;  %v4359_v50 = vmul.f32 1.442695, %v4333_v47 }
 0x8a2   : > { %v4284_v38 = vadd.f32 0.2548296, %v4268_v17  ;;  %v4219_v60 = vadd.f32 1.4214138, %v4203_v35  ;;  %v4130_v22 = vadd.f32 1.0, %v4114_v19  ;;  %v4319_v53 = vmul.f32 %v4095_v51, %v4095_v51 }
 0x8a3   : > { %v4222_v55 = vadd.f32 1.4214138, %v4206_v13  ;;  %v4060_v4 = vmul.f32 0.5, %v8407_v14  ;;  %v4365_v35 = vmul.f32 1.442695, %v4336_v28  ;;  %v4322_v19 = vmul.f32 %v4098_v49, %v4098_v49 }
 0x8a4   : > { %v4300_v27 = vmul.f32 %v8480_v34, %v4284_v38  ;;  %v4235_v25 = vmul.f32 %v8510_v59, %v4219_v60  ;;  %v8539_v6 = vpop.eup %6198  ;;  %v4097_v34 = vand.u32 2147483647, %v8536_v5  ;;  %6208 = vrcp.f32 %v4130_v22 }
 0x8a5   : > { %v4238_v10 = vmul.f32 %v8514_v62, %v4222_v55  ;;  %v4173_v20 = vmul.f32 1.0614054, %v8539_v6  ;;  %6210 = vpow2.f32 %v4359_v50  ;;  %vm4412_vm11 = vcmp.lt.f32.partialorder %v8420_v26, 0.0 }
 0x8a6   : > { %v4380_v29 = vmul.f32 %v6197_v42, %v4300_v27  ;;  %v4251_v41 = vadd.f32 -0.28449672, %v4235_v25  ;;  %v4113_v16 = vmul.f32 0.3275911, %v4097_v34  ;;  %v4335_v27 = vsub.f32 0.0, %v4319_v53 }
 0x8a7   : > { %v4254_v33 = vadd.f32 -0.28449672, %v4238_v10  ;;  %v8544_v57 = vpop.eup %6200  ;;  %v4189_v46 = vadd.f32 -1.4531521, %v4173_v20  ;;  %v4059_v10 = vmul.f32 0.5, %v8439_v52  ;;  %vm4411_vm12 = vcmp.lt.f32.partialorder %v8460_v31, 0.0 }
 0x8a8   : > { %v4267_v58 = vmul.f32 %v8510_v59, %v4251_v41  ;;  %v4396_v17 = vsub.f32 1.0, %v4380_v29  ;;  %v4176_v7 = vmul.f32 1.0614054, %v8544_v57  ;;  %v4129_v1 = vadd.f32 1.0, %v4113_v16 }
 0x8a9   : > { %v4270_v9 = vmul.f32 %v8514_v62, %v4254_v33  ;;  %v4205_v38 = vmul.f32 %v8539_v6, %v4189_v46  ;;  %v8551_v51 = vpop.eup %6202  ;;  %v4363_v33 = vmul.f32 1.442695, %v4335_v27  ;;  %v4321_v46 = vmul.f32 %v4097_v34, %v4097_v34 }
 0x8aa   : > { %v4283_v39 = vadd.f32 0.2548296, %v4267_v58  ;;  %v4192_v13 = vadd.f32 -1.4531521, %v4176_v7  ;;  %v4175_v55 = vmul.f32 1.0614054, %v8551_v51  ;;  %6212 = vrcp.f32 %v4129_v1  ;;  %v6205_v47 = vpop.eup %6204 }
 0x8ab   : > { %v4286_v0 = vadd.f32 0.2548296, %v4270_v9  ;;  %v4221_v61 = vadd.f32 1.4214138, %v4205_v38  ;;  %v4428_v42 = vsub.f32 0.0, %v4396_v17  ;;  %v6207_v29 = vpop.eup %6206  ;;  %6214 = vpow2.f32 %v4365_v35 }
 0x8ac   : > { %v4299_v60 = vmul.f32 %v8510_v59, %v4283_v39  ;;  %v4208_v25 = vmul.f32 %v8544_v57, %v4192_v13  ;;  %v4191_v28 = vadd.f32 -1.4531521, %v4175_v55  ;;  %v4338_v58 = vsub.f32 0.0, %v4322_v19 }
 0x8ad   : > { %v4302_v14 = vmul.f32 %v8514_v62, %v4286_v0  ;;  %v4237_v20 = vmul.f32 %v8539_v6, %v4221_v61  ;;  %v4444_v16 = vsel %vm4412_vm11, %v4428_v42, %v4396_v17  ;;  %6216 = vpow2.f32 %v4363_v33 }
 0x8ae   : > { %v4379_v41 = vmul.f32 %v6205_v47, %v4299_v60  ;;  %v4224_v22 = vadd.f32 1.4214138, %v4208_v25  ;;  %v4207_v62 = vmul.f32 %v8551_v51, %v4191_v28  ;;  %v8562_v52 = vpop.eup %6208  ;;  %v4460_v35 = vadd.f32 1.0, %v4444_v16 }
 0x8af   : > { %v4382_v59 = vmul.f32 %v6207_v29, %v4302_v14  ;;  %v4253_v53 = vadd.f32 -0.28449672, %v4237_v20  ;;  %v4178_v38 = vmul.f32 1.0614054, %v8562_v52  ;;  %v6211_v27 = vpop.eup %6210  ;;  %v4369_v55 = vmul.f32 1.442695, %v4338_v58 }
 0x8b0   : > { %v4395_v50 = vsub.f32 1.0, %v4379_v41  ;;  %v4240_v49 = vmul.f32 %v8544_v57, %v4224_v22  ;;  %v4223_v26 = vadd.f32 1.4214138, %v4207_v62  ;;  %v4337_v25 = vsub.f32 0.0, %v4321_v46 }
 0x8b1   : > { %v4398_v7 = vsub.f32 1.0, %v4382_v59  ;;  %v4269_v1 = vmul.f32 %v8539_v6, %v4253_v53  ;;  %v4194_v61 = vadd.f32 -1.4531521, %v4178_v38  ;;  %v4476_v28 = vmul.f32 %v4460_v35, %v4060_v4 }
 0x8b2   : > { %v4427_v9 = vsub.f32 0.0, %v4395_v50  ;;  %v4256_v39 = vadd.f32 -0.28449672, %v4240_v49  ;;  %v4239_v13 = vmul.f32 %v8551_v51, %v4223_v26  ;;  %vm4414_vm13 = vcmp.lt.f32.partialorder %v8463_v40, 0.0 }
 0x8b3   : > { %v4285_v17 = vadd.f32 0.2548296, %v4269_v1  ;;  %v4430_v42 = vsub.f32 0.0, %v4398_v7  ;;  %v4210_v41 = vmul.f32 %v8562_v52, %v4194_v61  ;;  %6218 = vpow2.f32 %v4369_v55 }
 0x8b4   : > { %v4443_v0 = vsel %vm4411_vm12, %v4427_v9, %v4395_v50  ;;  %v4272_v60 = vmul.f32 %v8544_v57, %v4256_v39  ;;  %v8569_v47 = vpop.eup %6212  ;;  %v4255_v14 = vadd.f32 -0.28449672, %v4239_v13  ;;  %v4367_v16 = vmul.f32 1.442695, %v4337_v25 }
 0x8b5   : > { %v4459_v34 = vadd.f32 1.0, %v4443_v0  ;;  %v4301_v31 = vmul.f32 %v8539_v6, %v4285_v17  ;;  %v4177_v20 = vmul.f32 1.0614054, %v8569_v47  ;;  %v4226_v50 = vadd.f32 1.4214138, %v4210_v41  ;;  %v6215_v6 = vpop.eup %6214 }
 0x8b6   : > { %v4288_v29 = vadd.f32 0.2548296, %v4272_v60  ;;  %v4271_v22 = vmul.f32 %v8551_v51, %v4255_v14  ;;  %v4446_v49 = vsel %vm4414_vm13, %v4430_v42, %v4398_v7  ;;  %v4061_v40 = vmul.f32 0.5, %v8478_v3 }
 0x8b7   : > { %v4475_v19 = vmul.f32 %v4459_v34, %v4059_v10  ;;  %v4381_v59 = vmul.f32 %v6211_v27, %v4301_v31  ;;  %v4193_v53 = vadd.f32 -1.4531521, %v4177_v20  ;;  %v4242_v58 = vmul.f32 %v8562_v52, %v4226_v50  ;;  %v6217_v1 = vpop.eup %6216 }
 0x8b8   : > { %v4304_v33 = vmul.f32 %v8544_v57, %v4288_v29  ;;  %v4287_v10 = vadd.f32 0.2548296, %v4271_v22  ;;  %vm4413_vm14 = vcmp.lt.f32.partialorder %v8487_v63, 0.0  ;;  %v4462_v35 = vadd.f32 1.0, %v4446_v49 }
 0x8b9   : > { %5620 = vmatprep.mubr.msk.f32.mxu1 %vm494_vm0, %v4475_v19  ;;  %v4397_v62 = vsub.f32 1.0, %v4381_v59  ;;  %v4209_v46 = vmul.f32 %v8569_v47, %v4193_v53  ;;  %v4258_v39 = vadd.f32 -0.28449672, %v4242_v58  ;;  %6220 = vpow2.f32 %v4367_v16 }
 0x8ba   : > { %5621 = vmatmul.mubr.msk.f32.gmra.mrb[82].mxu1 %vm494_vm0, %v4476_v28  ;;  %v4384_v4 = vmul.f32 %v6215_v6, %v4304_v33  ;;  %v4303_v9 = vmul.f32 %v8551_v51, %v4287_v10  ;;  %v4062_v3 = vmul.f32 0.5, %v8449_v23  ;;  %vm4416_vm15 = vcmp.lt.f32.partialorder %v8502_v37, 0.0 }
 0x8bb   : > { %v4429_v57 = vsub.f32 0.0, %v4397_v62  ;;  %v4225_v38 = vadd.f32 1.4214138, %v4209_v46  ;;  %v4274_v27 = vmul.f32 %v8562_v52, %v4258_v39  ;;  %vm4415_vm1 = vcmp.lt.f32.partialorder %v8507_v8, 0.0 }
 0x8bc   : > { %v4400_v26 = vsub.f32 1.0, %v4384_v4  ;;  %v4383_v17 = vmul.f32 %v6217_v1, %v4303_v9  ;;  %v4478_v42 = vmul.f32 %v4462_v35, %v4062_v3  ;;  %v4063_v37 = vmul.f32 0.5, %v8498_v15 }
 0x8bd   : > { %v4445_v0 = vsel %vm4413_vm14, %v4429_v57, %v4397_v62  ;;  %v4241_v34 = vmul.f32 %v8569_v47, %v4225_v38  ;;  %v4290_v61 = vadd.f32 0.2548296, %v4274_v27  ;;  %v6219_v19 = vpop.eup %6218  ;;  %v4064_v59 = vmul.f32 0.5, %v8491_v12 }
 0x8be   : > { %v4461_v7 = vadd.f32 1.0, %v4445_v0  ;;  %v4432_v13 = vsub.f32 0.0, %v4400_v26  ;;  %v4399_v51 = vsub.f32 1.0, %v4383_v17  ;;  %vm4418_vm2 = vcmp.lt.f32.partialorder %v8526_v11, 0.0  ;;  %v4987_v11 = vld [vmem:[%s8678_s13] ss:$0 sm:$0xff] }
 0x8bf   : > { %v4257_v55 = vadd.f32 -0.28449672, %v4241_v34  ;;  %v4306_v14 = vmul.f32 %v8562_v52, %v4290_v61  ;;  %vm4417_vm3 = vcmp.lt.f32.partialorder %v8536_v5, 0.0  ;;  %v4066_v4 = vmul.f32 0.5, %v8519_v44 }
 0x8c0   : > { %v4477_v60 = vmul.f32 %v4461_v7, %v4061_v40  ;;  %v4448_v63 = vsel %vm4416_vm15, %v4432_v13, %v4400_v26  ;;  %v4431_v31 = vsub.f32 0.0, %v4399_v51 }
 0x8c1   : > { %v4273_v25 = vmul.f32 %v8569_v47, %v4257_v55  ;;  %v4464_v29 = vadd.f32 1.0, %v4448_v63  ;;  %v4386_v20 = vmul.f32 %v6219_v19, %v4306_v14  ;;  %v8734_v19 = vld [vmem:[#allocation2_spill] sm:$0xff] }
 0x8c2   : > { %5623 = vmatprep.mubr.msk.f32.mxu1 %vm494_vm0, %v4477_v60  ;;  %v4447_v23 = vsel %vm4415_vm1, %v4431_v31, %v4399_v51 }
 0x8c3   : > { %5624 = vmatmul.mubr.msk.f32.gmra.mrb[84].mxu1 %vm494_vm0, %v4478_v42  ;;  %v4463_v41 = vadd.f32 1.0, %v4447_v23  ;;  %v4289_v28 = vadd.f32 0.2548296, %v4273_v25  ;;  %v4402_v8 = vsub.f32 1.0, %v4386_v20  ;;  %v6221_v33 = vpop.eup %6220  ;;  %v4480_v50 = vmul.f32 %v4464_v29, %v4064_v59 }
 0x8c5   : > { %v4479_v22 = vmul.f32 %v4463_v41, %v4063_v37  ;;  %v4305_v52 = vmul.f32 %v8569_v47, %v4289_v28  ;;  %v4434_v53 = vsub.f32 0.0, %v4402_v8  ;;  %v4065_v47 = vmul.f32 0.5, %v8531_v43  ;;  %v8735_v41 = vld [vmem:[#allocation3_spill] sm:$0xff]  ;;  %v8736_v28 = vld [vmem:[#allocation5_spill] sm:$0xff] }
 0x8c7   : > { %v4385_v6 = vmul.f32 %v6221_v33, %v4305_v52  ;;  %5626 = vmatprep.mubr.msk.f32.mxu1 %vm494_vm0, %v4479_v22  ;;  %v4450_v62 = vsel %vm4418_vm2, %v4434_v53, %v4402_v8  ;;  %v8737_v33 = vld [vmem:[#allocation4_spill] sm:$0xff]  ;;  %v8738_v53 = vld [vmem:[#allocation7_spill] sm:$0xff] }
 0x8c8   : > { %5627 = vmatmul.mubr.msk.f32.gmra.mrb[86].mxu1 %vm494_vm0, %v4480_v50  ;;  %v4466_v12 = vadd.f32 1.0, %v4450_v62 }
 0x8c9   : > { %v4401_v15 = vsub.f32 1.0, %v4385_v6 }
 0x8ca   : > { %v4482_v46 = vmul.f32 %v4466_v12, %v4066_v4 }
 0x8cb   : > { %v4433_v10 = vsub.f32 0.0, %v4401_v15 }
 0x8cd   : > { %v4449_v16 = vsel %vm4417_vm3, %v4433_v10, %v4401_v15 }
 0x8ce   : > { %v4465_v49 = vadd.f32 1.0, %v4449_v16 }
 0x8d0   : > { %v4481_v58 = vmul.f32 %v4465_v49, %v4065_v47 }
 0x8d2   : > { %5629 = vmatprep.mubr.msk.f32.mxu1 %vm494_vm0, %v4481_v58 }
 0x8d3   : > { %5630 = vmatmul.mubr.msk.f32.gmra.mrb[88].mxu1 %vm494_vm0, %v4482_v46 }
 0x957   : > { %v5610_v40 = vpop.f32.mrb[74].mxu1 }
 0x958   : > { %v4614_v57 = vadd.f32 %v5610_v40, %v4987_v11  ;;  %v4608_v5 = vpop.f32.mrb[75].mxu1 }
 0x959   : > { %v4609_v44 = vadd.f32 %v4987_v11, %v4608_v5 }
 0x95a   : > { %v4688_v43 = vadd.f32 %v4614_v57, %v7996_v45 }
 0x95b   : > { %v4687_v9 = vadd.f32 %v4609_v44, %v7999_v56 }
 0x95c   : > { %4704 = vst.msk [vmem:[%s8612_s19 + $0x8] sm:$0xff] %vm494_vm0, %v4688_v43 }
 0x95d   : > { %4703 = vst.msk [vmem:[%s8612_s19] sm:$0xff] %vm494_vm0, %v4687_v9 }
 0x95f   : > { %v5613_v1 = vpop.f32.mrb[76].mxu1 }
 0x960   : > { %v4624_v26 = vadd.f32 %v5613_v1, %v4987_v11  ;;  %v4618_v39 = vpop.f32.mrb[77].mxu1 }
 0x961   : > { %v4619_v38 = vadd.f32 %v4987_v11, %v4618_v39 }
 0x962   : > { %v4690_v35 = vadd.f32 %v4624_v26, %v8008_v18 }
 0x963   : > { %v4689_v0 = vadd.f32 %v4619_v38, %v8011_v54 }
 0x964   : > { %4706 = vst.msk [vmem:[%s8612_s19 + $0x18] sm:$0xff] %vm494_vm0, %v4690_v35 }
 0x965   : > { %4705 = vst.msk [vmem:[%s8612_s19 + $0x10] sm:$0xff] %vm494_vm0, %v4689_v0 }
 0x967   : > { %v5616_v45 = vpop.f32.mrb[78].mxu1 }
 0x968   : > { %v4634_v56 = vadd.f32 %v5616_v45, %v4987_v11  ;;  %v4628_v17 = vpop.f32.mrb[79].mxu1 }
 0x969   : > { %v4629_v7 = vadd.f32 %v4987_v11, %v4628_v17 }
 0x96a   : > { %v4692_v13 = vadd.f32 %v4634_v56, %v8020_v2 }
 0x96b   : > { %v4691_v27 = vadd.f32 %v4629_v7, %v8023_v32 }
 0x96c   : > { %4708 = vst.msk [vmem:[%s8612_s19 + $0x28] sm:$0xff] %vm494_vm0, %v4692_v13 }
 0x96d   : > { %4707 = vst.msk [vmem:[%s8612_s19 + $0x20] sm:$0xff] %vm494_vm0, %v4691_v27 }
 0x971   : > { %v5619_v18 = vpop.f32.mrb[80].mxu1 }
 0x972   : > { %v4644_v54 = vadd.f32 %v5619_v18, %v4987_v11  ;;  %v4638_v34 = vpop.f32.mrb[81].mxu1 }
 0x973   : > { %v4639_v3 = vadd.f32 %v4987_v11, %v4638_v34 }
 0x974   : > { %v4694_v51 = vadd.f32 %v4644_v54, %v8032_v21 }
 0x975   : > { %v4693_v60 = vadd.f32 %v4639_v3, %v8035_v24 }
 0x976   : > { %4710 = vst.msk [vmem:[%s8612_s19 + $0x38] sm:$0xff] %vm494_vm0, %v4694_v51 }
 0x977   : > { %4709 = vst.msk [vmem:[%s8612_s19 + $0x30] sm:$0xff] %vm494_vm0, %v4693_v60 }
 0x98d   : > { %v5622_v2 = vpop.f32.mrb[82].mxu1 }
 0x98e   : > { %v4654_v32 = vadd.f32 %v5622_v2, %v4987_v11  ;;  %v4648_v63 = vpop.f32.mrb[83].mxu1 }
 0x98f   : > { %v4649_v61 = vadd.f32 %v4987_v11, %v4648_v63 }
 0x990   : > { %v4696_v55 = vadd.f32 %v4654_v32, %v8044_v36 }
 0x991   : > { %v4695_v42 = vadd.f32 %v4649_v61, %v8047_v30 }
 0x992   : > { %4712 = vst.msk [vmem:[%s8612_s19 + $0x48] sm:$0xff] %vm494_vm0, %v4696_v55 }
 0x993   : > { %4711 = vst.msk [vmem:[%s8612_s19 + $0x40] sm:$0xff] %vm494_vm0, %v4695_v42 }
 0x996   : > { %v5625_v21 = vpop.f32.mrb[84].mxu1 }
 0x997   : > { %v4664_v24 = vadd.f32 %v5625_v21, %v4987_v11  ;;  %v4658_v31 = vpop.f32.mrb[85].mxu1 }
 0x998   : > { %v4659_v14 = vadd.f32 %v4987_v11, %v4658_v31 }
 0x999   : > { %v4698_v25 = vadd.f32 %v4664_v24, %v8056_v48 }
 0x99a   : > { %v4697_v29 = vadd.f32 %v4659_v14, %v8734_v19 }
 0x99b   : > { %4714 = vst.msk [vmem:[%s8612_s19 + $0x58] sm:$0xff] %vm494_vm0, %v4698_v25  ;;  %v5628_v36 = vpop.f32.mrb[86].mxu1 }
 0x99c   : > { %4713 = vst.msk [vmem:[%s8612_s19 + $0x50] sm:$0xff] %vm494_vm0, %v4697_v29  ;;  %v4674_v30 = vadd.f32 %v5628_v36, %v4987_v11  ;;  %v4668_v23 = vpop.f32.mrb[87].mxu1 }
 0x99d   : > { %v4669_v37 = vadd.f32 %v4987_v11, %v4668_v23 }
 0x99e   : > { %v4700_v20 = vadd.f32 %v4674_v30, %v8735_v41 }
 0x99f   : > { %v4699_v59 = vadd.f32 %v4669_v37, %v8736_v28 }
 0x9a0   : > { %4716 = vst.msk [vmem:[%s8612_s19 + $0x68] sm:$0xff] %vm494_vm0, %v4700_v20 }
 0x9a1   : > { %4715 = vst.msk [vmem:[%s8612_s19 + $0x60] sm:$0xff] %vm494_vm0, %v4699_v59 }
 0x9a6   : > { %v5631_v48 = vpop.f32.mrb[88].mxu1 }
 0x9a7   : > { %v4684_v22 = vadd.f32 %v5631_v48, %v4987_v11  ;;  %v4678_v8 = vpop.f32.mrb[89].mxu1 }
 0x9a8   : > { %v4679_v52 = vadd.f32 %v4987_v11, %v4678_v8 }
 0x9a9   : > { %v4702_v50 = vadd.f32 %v4684_v22, %v8737_v33 }
 0x9aa   : > { %v4701_v6 = vadd.f32 %v4679_v52, %v8738_v53 }
 0x9ab   : > { %4718 = vst.msk [vmem:[%s8612_s19 + $0x78] sm:$0xff] %vm494_vm0, %v4702_v50 }
 0x9ac   : > { %4717 = vst.msk [vmem:[%s8612_s19 + $0x70] sm:$0xff] %vm494_vm0, %v4701_v6 }
 0x9ad PF: > { %s24_s29 = sadd.s32 1, %s6276_s29  }
 0x9ae   : > { %p21_p4 = scmp.ge.s32.totalorder %s24_s29, 4  }
 0x9b0   :  { %23 = sbr.rel (!%p21_p4) target bundleno = 1 (0x1), region = 106 }

</bundles_post_ra>
